<compile_context>
chip_gen: v5e
topology: v5e:2x2
jax: 0.10.0
libtpu: 0.0.40
codegen_flags: <defaults>
</compile_context>

<pallas_src>
import functools

import jax
import jax.numpy as jnp
from jax.experimental import pallas as pl
from jax.experimental.pallas import tpu as pltpu


def _pool_linear_kernel(x_ref, w_ref, o_ref, acc_ref, *,
                        inv_s, s_total, s_tile, single_step, needs_mask):
    """Fused global-average-pool + classifier for one (sample, channel-half).

    Grid: (N, c_split, num_s_tiles) -- N and c_split 'parallel', S 'arbitrary'.

    x_ref:   (1, C_blk, s_tile)  feature tile, native dtype (C sublanes, S lanes)
    w_ref:   (C_blk, L_pad)      classifier weight slice, transposed (C, L), f32
    o_ref:   (1, 1, 8, L_pad)    logits row (replicated over 8 sublanes)
    acc_ref: (C_blk, 128)        f32 lane-dense running sums (multi-step only)
    """
    k = pl.program_id(2)

    def tile_lane_sums(masked):
        # Sum this tile's lanes into a lane-dense (C_blk, 128) partial using
        # plain VPU adds over 128-lane groups; load/upcast/(mask) one group at
        # a time so the full f32 tile is never materialized.
        out = None
        for j in range(s_tile // 128):
            chunk = x_ref[0, :, j * 128:(j + 1) * 128].astype(jnp.float32)
            if masked:
                lane = jax.lax.broadcasted_iota(jnp.int32, (1, 128), 1)
                chunk = jnp.where(k * s_tile + j * 128 + lane < s_total,
                                  chunk, 0.0)
            out = chunk if out is None else out + chunk
        return out

    def epilogue(pooled_col):
        # pooled_col: (C_blk, 1) f32, already scaled by 1/S.
        # logits[l] = sum_c pooled[c] * w_t[c, l], computed as a chunked VPU
        # broadcast-multiply + cross-sublane reduce -> lane-dense (1, L_pad)
        # row (no MXU broadcast hack, no lane-sparse (L_pad, 1) column store).
        c_blk, l_pad = w_ref.shape
        ch = 512 if c_blk % 512 == 0 else c_blk
        row = None
        for c0 in range(0, c_blk, ch):
            part = jnp.sum(w_ref[c0:c0 + ch, :] * pooled_col[c0:c0 + ch, :],
                           axis=0, keepdims=True)                 # (1, L_pad)
            row = part if row is None else row + part
        # Replicate over 8 sublanes -> one full, unmasked (8, 128) vreg store.
        o_ref[0, 0] = jnp.broadcast_to(row, (8, l_pad))

    if single_step:
        # Whole S in one tile (s_tile == S exactly): no scratch accumulator,
        # no tail mask, no pl.when phases.
        n_full = s_tile // 128
        rem = s_tile - n_full * 128
        pooled = None
        if n_full:
            pooled = jnp.sum(tile_lane_sums(False), axis=-1, keepdims=True)
        if rem:  # static: only when S % 128 != 0 (tiny XLU reduce, once/sample)
            tail = x_ref[0, :, n_full * 128:s_tile].astype(jnp.float32)
            t = jnp.sum(tail, axis=-1, keepdims=True)
            pooled = t if pooled is None else pooled + t
        epilogue(pooled * jnp.float32(inv_s))
    else:
        @pl.when(k == 0)
        def _init():
            acc_ref[...] = jnp.zeros_like(acc_ref)

        last = pl.num_programs(2) - 1
        if needs_mask:
            # Mask only the final (partial) tile; steady state stays unmasked.
            @pl.when(k < last)
            def _steady():
                acc_ref[...] += tile_lane_sums(False)

            @pl.when(k == last)
            def _final():
                acc_ref[...] += tile_lane_sums(True)
                pooled = jnp.sum(acc_ref[...], axis=-1, keepdims=True)
                epilogue(pooled * jnp.float32(inv_s))
        else:
            acc_ref[...] += tile_lane_sums(False)

            @pl.when(k == last)
            def _final():
                pooled = jnp.sum(acc_ref[...], axis=-1, keepdims=True)
                epilogue(pooled * jnp.float32(inv_s))


@jax.jit
def slowonly_head(feat, w, b):
    """feat: (N, 2048, T, H, W) backbone features (native layout & dtype).
    w: (label_num, 2048) torch-layout classifier weight.  b: (label_num,).
    Returns (N, label_num) == cls_head(adaptive_avg_pool3d(feat).view(-1, 2048)).
    """
    N, C, T, H, W = feat.shape
    S = T * H * W
    L = w.shape[0]
    L_pad = ((L + 127) // 128) * 128
    assert C % 8 == 0 and w.shape[1] == C

    # Free reshape (T, H, W contiguous): no HBM transpose, no dtype copy.
    x = feat.reshape(N, C, S)

    # v7x: with batch 1, split the channel axis into two 'parallel' halves so
    # both TensorCores are fed; partial logits are summed in the wrapper.
    c_split = 2 if (N == 1 and C % 16 == 0) else 1
    C_blk = C // c_split

    # Classifier weight transposed to (C, L_pad) (contract C on sublanes, emit a
    # lane-dense logits row).  Kept f32: the epilogue is VPU work, not MXU.
    w_t = jnp.zeros((C, L_pad), jnp.float32).at[:, :L].set(w.astype(jnp.float32).T)

    # Tile S: one full-S step per sample whenever an ~8 MiB tile covers it,
    # otherwise large 128-multiple tiles (tail masked on the last step only).
    itemsize = jnp.dtype(feat.dtype).itemsize
    tile_budget = 8 * 1024 * 1024
    s_cap = max(128, (tile_budget // (C_blk * itemsize)) // 128 * 128)
    if S <= s_cap:
        s_tile, num_s, single_step, needs_mask = S, 1, True, False
    else:
        s_tile = s_cap
        num_s = pl.cdiv(S, s_tile)
        single_step = False
        needs_mask = (S % s_tile) != 0

    kernel = functools.partial(
        _pool_linear_kernel, inv_s=1.0 / S, s_total=S, s_tile=s_tile,
        single_step=single_step, needs_mask=needs_mask)

    cost = pl.CostEstimate(
        flops=int(N * (C * S + 2 * C * L_pad)),
        transcendentals=0,
        bytes_accessed=int(N * C * S * itemsize + C * L_pad * 4
                           + N * c_split * 8 * L_pad * 4),
    )

    out = pl.pallas_call(
        kernel,
        out_shape=jax.ShapeDtypeStruct((N, c_split, 8, L_pad), jnp.float32),
        grid_spec=pltpu.PrefetchScalarGridSpec(
            num_scalar_prefetch=0,
            grid=(N, c_split, num_s),
            in_specs=[
                pl.BlockSpec((1, C_blk, s_tile), lambda n, h, k: (n, h, k)),
                pl.BlockSpec((C_blk, L_pad), lambda n, h, k: (h, 0)),   # resident
            ],
            out_specs=pl.BlockSpec((1, 1, 8, L_pad), lambda n, h, k: (n, h, 0, 0)),
            scratch_shapes=[pltpu.VMEM((C_blk, 128), jnp.float32)],
        ),
        compiler_params=pltpu.CompilerParams(
            dimension_semantics=("parallel", "parallel", "arbitrary"),
            vmem_limit_bytes=48 * 1024 * 1024,
        ),
        cost_estimate=cost,
    )(x, w_t)

    # Combine channel halves, drop sublane replication & label padding, add bias.
    return out[:, :, 0, :].sum(axis=1)[:, :L] + b.astype(jnp.float32)


def _reference(feat, w, b):
    pooled = jnp.mean(feat.astype(jnp.float32), axis=(2, 3, 4))
    return jnp.dot(pooled, w.astype(jnp.float32).T,
                   precision=jax.lax.Precision.HIGHEST) + b


def _check(key, n, t, h, w_sp, label_num):
    kf, kw, kb = jax.random.split(key, 3)
    C = 2048  # hard-coded by x.view(-1, 2048) / nn.Linear(2048, label_num)
    feat = jax.random.normal(kf, (n, C, t, h, w_sp), jnp.bfloat16)
    bound = 1.0 / (C ** 0.5)
    w = jax.random.uniform(kw, (label_num, C), jnp.float32, -bound, bound)
    b = jax.random.uniform(kb, (label_num,), jnp.float32, -bound, bound)
    out = jax.block_until_ready(slowonly_head(feat, w, b))
    ref = _reference(feat, w, b)
    assert out.shape == (n, label_num)
    err = float(jnp.max(jnp.abs(out - ref)))
    assert jnp.allclose(out, ref, atol=1e-3, rtol=1e-3), f"max abs err {err}"


if __name__ == "__main__":
    key = jax.random.PRNGKey(0)
    k1, k2, k3 = jax.random.split(key, 3)
    # Single-step path (S = 8*7*7 = 392 fits one tile), batch-parallel grid.
    _check(k1, n=2, t=8, h=7, w_sp=7, label_num=16)
    # Batch-1: channel-split 'parallel' axis (feeds both v7x TensorCores).
    _check(k2, n=1, t=8, h=7, w_sp=7, label_num=16)
    # Multi-step path with masked tail tile (S = 16*14*14 = 3136 > one tile).
    _check(k3, n=2, t=16, h=14, w_sp=14, label_num=16)
    print("KERNEL_OK")
</pallas_src>

<mosaic_0001>
module attributes {stable_mosaic.version = 11 : i64} {
  func.func @_pool_linear_kernel(%arg0: i32, %arg1: i32, %arg2: i32, %arg3: memref<1x2048x392xbf16, #tpu.memory_space<vmem>>, %arg4: memref<2048x128xf32, #tpu.memory_space<vmem>>, %arg5: memref<1x1x8x128xf32, #tpu.memory_space<vmem>>, %arg6: memref<2048x128xf32, #tpu.memory_space<vmem>>) attributes {dimension_semantics = [#tpu.dimension_semantics<parallel>, #tpu.dimension_semantics<parallel>, #tpu.dimension_semantics<arbitrary>], iteration_bounds = array<i64: 2, 1, 1>, scalar_prefetch = 0 : i64, scratch_operands = 1 : i64, tpu.core_type = #tpu.core_type<tc>, window_params = [{transform_indices = @transform_0, window_bounds = array<i64: 1, 2048, 392>}, {transform_indices = @transform_1, window_bounds = array<i64: 2048, 128>}, {transform_indices = @transform_2, window_bounds = array<i64: 1, 1, 8, 128>}]} {
    %c0 = arith.constant 0 : index
    %c0_0 = arith.constant 0 : index
    %c0_1 = arith.constant 0 : index
    %0 = vector.load %arg3[%c0, %c0_0, %c0_1] : memref<1x2048x392xbf16, #tpu.memory_space<vmem>>, vector<1x2048x128xbf16>
    %1 = vector.shape_cast %0 : vector<1x2048x128xbf16> to vector<2048x128xbf16>
    %2 = arith.extf %1 : vector<2048x128xbf16> to vector<2048x128xf32>
    %c0_2 = arith.constant 0 : index
    %c0_3 = arith.constant 0 : index
    %c128 = arith.constant 128 : index
    %3 = vector.load %arg3[%c0_2, %c0_3, %c128] : memref<1x2048x392xbf16, #tpu.memory_space<vmem>>, vector<1x2048x128xbf16>
    %4 = vector.shape_cast %3 : vector<1x2048x128xbf16> to vector<2048x128xbf16>
    %5 = arith.extf %4 : vector<2048x128xbf16> to vector<2048x128xf32>
    %6 = arith.addf %2, %5 : vector<2048x128xf32>
    %c0_4 = arith.constant 0 : index
    %c0_5 = arith.constant 0 : index
    %c256 = arith.constant 256 : index
    %7 = vector.load %arg3[%c0_4, %c0_5, %c256] : memref<1x2048x392xbf16, #tpu.memory_space<vmem>>, vector<1x2048x128xbf16>
    %8 = vector.shape_cast %7 : vector<1x2048x128xbf16> to vector<2048x128xbf16>
    %9 = arith.extf %8 : vector<2048x128xbf16> to vector<2048x128xf32>
    %10 = arith.addf %6, %9 : vector<2048x128xf32>
    %cst = arith.constant dense<0.000000e+00> : vector<2048xf32>
    %11 = vector.multi_reduction <add>, %10, %cst [1] : vector<2048x128xf32> to vector<2048xf32>
    %12 = vector.shape_cast %11 : vector<2048xf32> to vector<2048x1xf32>
    %c0_6 = arith.constant 0 : index
    %c0_7 = arith.constant 0 : index
    %c384 = arith.constant 384 : index
    %13 = vector.load %arg3[%c0_6, %c0_7, %c384] : memref<1x2048x392xbf16, #tpu.memory_space<vmem>>, vector<1x2048x8xbf16>
    %14 = vector.shape_cast %13 : vector<1x2048x8xbf16> to vector<2048x8xbf16>
    %15 = arith.extf %14 : vector<2048x8xbf16> to vector<2048x8xf32>
    %cst_8 = arith.constant dense<0.000000e+00> : vector<2048xf32>
    %16 = vector.multi_reduction <add>, %15, %cst_8 [1] : vector<2048x8xf32> to vector<2048xf32>
    %17 = vector.shape_cast %16 : vector<2048xf32> to vector<2048x1xf32>
    %18 = arith.addf %12, %17 : vector<2048x1xf32>
    %cst_9 = arith.constant 0.00255102036 : f32
    %19 = vector.broadcast %cst_9 : f32 to vector<2048x1xf32>
    %20 = arith.mulf %18, %19 : vector<2048x1xf32>
    %c0_10 = arith.constant 0 : index
    %c0_11 = arith.constant 0 : index
    %21 = vector.load %arg4[%c0_10, %c0_11] : memref<2048x128xf32, #tpu.memory_space<vmem>>, vector<512x128xf32>
    %22 = vector.extract_strided_slice %20 {offsets = [0, 0], sizes = [512, 1], strides = [1, 1]} : vector<2048x1xf32> to vector<512x1xf32>
    %23 = vector.broadcast %22 : vector<512x1xf32> to vector<512x128xf32>
    %24 = arith.mulf %21, %23 : vector<512x128xf32>
    %cst_12 = arith.constant dense<0.000000e+00> : vector<128xf32>
    %25 = vector.multi_reduction <add>, %24, %cst_12 [0] : vector<512x128xf32> to vector<128xf32>
    %26 = vector.shape_cast %25 : vector<128xf32> to vector<1x128xf32>
    %c512 = arith.constant 512 : index
    %c0_13 = arith.constant 0 : index
    %27 = vector.load %arg4[%c512, %c0_13] : memref<2048x128xf32, #tpu.memory_space<vmem>>, vector<512x128xf32>
    %28 = vector.extract_strided_slice %20 {offsets = [512, 0], sizes = [512, 1], strides = [1, 1]} : vector<2048x1xf32> to vector<512x1xf32>
    %29 = vector.broadcast %28 : vector<512x1xf32> to vector<512x128xf32>
    %30 = arith.mulf %27, %29 : vector<512x128xf32>
    %cst_14 = arith.constant dense<0.000000e+00> : vector<128xf32>
    %31 = vector.multi_reduction <add>, %30, %cst_14 [0] : vector<512x128xf32> to vector<128xf32>
    %32 = vector.shape_cast %31 : vector<128xf32> to vector<1x128xf32>
    %33 = arith.addf %26, %32 : vector<1x128xf32>
    %c1024 = arith.constant 1024 : index
    %c0_15 = arith.constant 0 : index
    %34 = vector.load %arg4[%c1024, %c0_15] : memref<2048x128xf32, #tpu.memory_space<vmem>>, vector<512x128xf32>
    %35 = vector.extract_strided_slice %20 {offsets = [1024, 0], sizes = [512, 1], strides = [1, 1]} : vector<2048x1xf32> to vector<512x1xf32>
    %36 = vector.broadcast %35 : vector<512x1xf32> to vector<512x128xf32>
    %37 = arith.mulf %34, %36 : vector<512x128xf32>
    %cst_16 = arith.constant dense<0.000000e+00> : vector<128xf32>
    %38 = vector.multi_reduction <add>, %37, %cst_16 [0] : vector<512x128xf32> to vector<128xf32>
    %39 = vector.shape_cast %38 : vector<128xf32> to vector<1x128xf32>
    %40 = arith.addf %33, %39 : vector<1x128xf32>
    %c1536 = arith.constant 1536 : index
    %c0_17 = arith.constant 0 : index
    %41 = vector.load %arg4[%c1536, %c0_17] : memref<2048x128xf32, #tpu.memory_space<vmem>>, vector<512x128xf32>
    %42 = vector.extract_strided_slice %20 {offsets = [1536, 0], sizes = [512, 1], strides = [1, 1]} : vector<2048x1xf32> to vector<512x1xf32>
    %43 = vector.broadcast %42 : vector<512x1xf32> to vector<512x128xf32>
    %44 = arith.mulf %41, %43 : vector<512x128xf32>
    %cst_18 = arith.constant dense<0.000000e+00> : vector<128xf32>
    %45 = vector.multi_reduction <add>, %44, %cst_18 [0] : vector<512x128xf32> to vector<128xf32>
    %46 = vector.shape_cast %45 : vector<128xf32> to vector<1x128xf32>
    %47 = arith.addf %40, %46 : vector<1x128xf32>
    %48 = vector.shape_cast %47 : vector<1x128xf32> to vector<1x128xf32>
    %49 = vector.broadcast %48 : vector<1x128xf32> to vector<8x128xf32>
    %c0_19 = arith.constant 0 : index
    %c0_20 = arith.constant 0 : index
    %c0_21 = arith.constant 0 : index
    %c0_22 = arith.constant 0 : index
    %50 = vector.load %arg5[%c0_19, %c0_20, %c0_21, %c0_22] : memref<1x1x8x128xf32, #tpu.memory_space<vmem>>, vector<1x1x8x128xf32>
    %51 = vector.shape_cast %50 : vector<1x1x8x128xf32> to vector<8x128xf32>
    %52 = vector.shape_cast %49 : vector<8x128xf32> to vector<1x1x8x128xf32>
    tpu.vector_store %arg5[%c0_19, %c0_20, %c0_21, %c0_22], %52 {strides = array<i32>} : memref<1x1x8x128xf32, #tpu.memory_space<vmem>>, vector<1x1x8x128xf32>,
    return
  }
  func.func @transform_0(%arg0: i32, %arg1: i32, %arg2: i32) -> (i32, i32, i32) {
    %c0_i32 = arith.constant 0 : i32
    return %arg0, %arg1, %arg2 : i32, i32, i32
  }
  func.func @transform_1(%arg0: i32, %arg1: i32, %arg2: i32) -> (i32, i32) {
    %c0_i32 = arith.constant 0 : i32
    %c0_i32_0 = arith.constant 0 : i32
    return %arg1, %c0_i32 : i32, i32
  }
  func.func @transform_2(%arg0: i32, %arg1: i32, %arg2: i32) -> (i32, i32, i32, i32) {
    %c0_i32 = arith.constant 0 : i32
    %c0_i32_0 = arith.constant 0 : i32
    %c0_i32_1 = arith.constant 0 : i32
    return %arg0, %arg1, %c0_i32, %c0_i32_0 : i32, i32, i32, i32
  }
}

</mosaic_0001>

<bundles_post_ra>
// kernel: slowonly_head.1
= control target key start
LH: loop header
LB: loop body
LE: loop exit
PB: predicated region body
PF: predicated region fallthrough
CT: control target
= control target key end

     0   :  { %s5548_s9 = smov 0   ;;  %s5550_s10 = smov 0   ;;  %s8346_s0 = inlined_call_operand.vmem [shape: bf16[2,2048,392], index: 0, kind: input, shape index: {}]   ;;  %s8347_s1 = inlined_call_operand.vmem [shape: f32[2048,128], index: 1, kind: input, shape index: {}]   ;;  %s8348_s2 = inlined_call_operand.vmem [shape: f32[2,1,8,128], index: 2, kind: output, shape index: {}]  }
   0x1   :  { %s5552_s11 = smov 0  }
   0x2 LB: > { %s31_s12 = sadd.s32 1, %s5527_s10  ;;  %p5478_p0 = scmp.ge.s32.totalorder %s5531_s11, 1  ;;  %s5531_s11 = sphi %s5552_s11, %s12_s11   ;;  %s5527_s10 = sphi %s5550_s10, %s8902_s10   ;;  %s5523_s9 = sphi %s5548_s9, %s8901_s9  }
   0x3   : > { %p33_p1 = scmp.ge.s32.totalorder %s31_s12, 2  ;;  %p159_p2 = scmp.lt.s32.totalorder %s5531_s11, 3 }
   0x5   : > { %s8904_s12 = smov (%p33_p1, %s31_s12), 0  ;;  %p160_p3 = pnand %p5478_p0, %p159_p2 }
   0x7   : > { %163 = sbr.rel (%p160_p3) target bundleno = 1527 (0x5f7), region = 28 }
   0xc   : > { %p199_p4 = scmp.lt.s32.totalorder %s5523_s9, 1  ;;  %vm3298_vm0 = vcmask 64512  }
   0xe   : > { %s8906_s9 = smov (!%p199_p4, %s5523_s9), 1 }
   0xf   : > { %s5484_s13 = sshll.u32 %s8906_s9, 12  ;;  %s5481_s19 = sshll.u32 %s8906_s9, 3 }
  0x10   : > { %s5572_s16 = scalar_lea.vmem %s8346_s0, %s5484_s13  ;;  %s225_s21 = scalar_lea.vmem %s8348_s2, %s5481_s19 }
  0x11   : > { %v230_v0 = vld [vmem:[%s5572_s16 + $0x40] sm:$0xff]   ;;  %v1510_v1 = vld [vmem:[%s5572_s16 + $0x48] sm:$0xf]  ;;  %v231_v14 = vld [vmem:[%s5572_s16 + $0x50] sm:$0xff]  }
  0x12   : > { %v228_v2 = vld [vmem:[%s5572_s16 + $0x20] sm:$0xff]   ;;  %v486_v3 = vunpack.c.l.bf16 %v230_v0  ;;  %v998_v4 = vunpack.c.h.bf16 %v230_v0  ;;  %v1766_v5 = vunpack.c.l.bf16 %v1510_v1  ;;  %v1508_v7 = vld [vmem:[%s5572_s16 + $0x28] sm:$0xf]  ;;  %v1511_v15 = vld [vmem:[%s5572_s16 + $0x58] sm:$0xf]  ;;  %v487_v19 = vunpack.c.l.bf16 %v231_v14 }
  0x13   : > { %v484_v6 = vunpack.c.l.bf16 %v228_v2  ;;  %v226_v8 = vld [vmem:[%s5572_s16] sm:$0xff]   ;;  %v1506_v9 = vld [vmem:[%s5572_s16 + $0x8] sm:$0xf]  ;;  %v996_v10 = vunpack.c.h.bf16 %v228_v2  ;;  %v1764_v11 = vunpack.c.l.bf16 %v1508_v7  ;;  %v229_v16 = vld [vmem:[%s5572_s16 + $0x30] sm:$0xff]   ;;  %v999_v20 = vunpack.c.h.bf16 %v231_v14 }
  0x14   : > { %v482_v12 = vunpack.c.l.bf16 %v226_v8  ;;  %v994_v13 = vunpack.c.h.bf16 %v226_v8  ;;  %v1254_v17 = vadd.f32 %v998_v4, %v486_v3  ;;  %v1762_v18 = vunpack.c.l.bf16 %v1506_v9  ;;  %v227_v21 = vld [vmem:[%s5572_s16 + $0x10] sm:$0xff]   ;;  %v1509_v25 = vld [vmem:[%s5572_s16 + $0x38] sm:$0xf]  ;;  %v234_v39 = vld [vmem:[%s5572_s16 + $0x80] sm:$0xff]  }
  0x15   : > { %v1252_v22 = vadd.f32 %v996_v10, %v484_v6  ;;  %v485_v24 = vunpack.c.l.bf16 %v229_v16  ;;  %v1255_v27 = vadd.f32 %v999_v20, %v487_v19  ;;  %v1767_v28 = vunpack.c.l.bf16 %v1511_v15  ;;  %v1507_v30 = vld [vmem:[%s5572_s16 + $0x18] sm:$0xf]  ;;  %v233_v40 = vld [vmem:[%s5572_s16 + $0x70] sm:$0xff]   ;;  %v232_v41 = vld [vmem:[%s5572_s16 + $0x60] sm:$0xff]  }
  0x16   : > { %v1250_v23 = vadd.f32 %v994_v13, %v482_v12  ;;  %v2022_v26 = vadd.f32 %v1766_v5, %v1254_v17  ;;  %v997_v29 = vunpack.c.h.bf16 %v229_v16  ;;  %v483_v33 = vunpack.c.l.bf16 %v227_v21  ;;  %v1514_v48 = vld [vmem:[%s5572_s16 + $0x88] sm:$0xf]  ;;  %v1513_v52 = vld [vmem:[%s5572_s16 + $0x78] sm:$0xf]  ;;  %v237_v56 = vld [vmem:[%s5572_s16 + $0xb0] sm:$0xff]  }
  0x17   : > { %v2020_v31 = vadd.f32 %v1764_v11, %v1252_v22  ;;  %v995_v34 = vunpack.c.h.bf16 %v227_v21  ;;  %v1765_v36 = vunpack.c.l.bf16 %v1509_v25  ;;  %v1763_v38 = vunpack.c.l.bf16 %v1507_v30  ;;  %v1512_v53 = vld [vmem:[%s5572_s16 + $0x68] sm:$0xf]  ;;  %v236_v61 = vld [vmem:[%s5572_s16 + $0xa0] sm:$0xff]   ;;  %v235_v62 = vld [vmem:[%s5572_s16 + $0x90] sm:$0xff]  }
  0x18   : > { %v2018_v32 = vadd.f32 %v1762_v18, %v1250_v23  ;;  %2282 = vadd.xlane.f32.xlu2 %v2022_v26  ;;  %v1253_v35 = vadd.f32 %v997_v29, %v485_v24  ;;  %v2023_v42 = vadd.f32 %v1767_v28, %v1255_v27  ;;  %v490_v44 = vunpack.c.l.bf16 %v234_v39  ;;  %v1517_v2 = vld [vmem:[%s5572_s16 + $0xb8] sm:$0xf]  ;;  %v1516_v7 = vld [vmem:[%s5572_s16 + $0xa8] sm:$0xf]  ;;  %v240_v17 = vld [vmem:[%s5572_s16 + $0xe0] sm:$0xff]  }
  0x19   : > { %2278 = vadd.xlane.f32.xlu1 %v2020_v31  ;;  %v1251_v37 = vadd.f32 %v995_v34, %v483_v33  ;;  %v1002_v45 = vunpack.c.h.bf16 %v234_v39  ;;  %v489_v46 = vunpack.c.l.bf16 %v233_v40  ;;  %v1001_v49 = vunpack.c.h.bf16 %v233_v40  ;;  %v1515_v10 = vld [vmem:[%s5572_s16 + $0x98] sm:$0xf]  ;;  %v239_v18 = vld [vmem:[%s5572_s16 + $0xd0] sm:$0xff]   ;;  %v238_v19 = vld [vmem:[%s5572_s16 + $0xc0] sm:$0xff]  }
  0x1a   : > { %2274 = vadd.xlane.f32.xlu0 %v2018_v32  ;;  %v2021_v43 = vadd.f32 %v1765_v36, %v1253_v35  ;;  %v488_v50 = vunpack.c.l.bf16 %v232_v41  ;;  %v1000_v51 = vunpack.c.h.bf16 %v232_v41  ;;  %v1770_v55 = vunpack.c.l.bf16 %v1514_v48  ;;  %v1520_v26 = vld [vmem:[%s5572_s16 + $0xe8] sm:$0xf]  ;;  %v1519_v30 = vld [vmem:[%s5572_s16 + $0xd8] sm:$0xf]  ;;  %v243_v34 = vld [vmem:[%s5572_s16 + $0x110] sm:$0xff]  }
  0x1b   : > { %v2019_v47 = vadd.f32 %v1763_v38, %v1251_v37  ;;  %v1258_v54 = vadd.f32 %v1002_v45, %v490_v44  ;;  %v1257_v57 = vadd.f32 %v1001_v49, %v489_v46  ;;  %v1769_v58 = vunpack.c.l.bf16 %v1513_v52  ;;  %v1518_v31 = vld [vmem:[%s5572_s16 + $0xc8] sm:$0xf]  ;;  %v242_v39 = vld [vmem:[%s5572_s16 + $0x100] sm:$0xff]   ;;  %v241_v40 = vld [vmem:[%s5572_s16 + $0xf0] sm:$0xff]  }
  0x1c   : > { %v1256_v59 = vadd.f32 %v1000_v51, %v488_v50  ;;  %v1768_v60 = vunpack.c.l.bf16 %v1512_v53  ;;  %v493_v63 = vunpack.c.l.bf16 %v237_v56  ;;  %v1005_v0 = vunpack.c.h.bf16 %v237_v56  ;;  %v1523_v48 = vld [vmem:[%s5572_s16 + $0x118] sm:$0xf]  ;;  %v1522_v49 = vld [vmem:[%s5572_s16 + $0x108] sm:$0xf] }
  0x1d   : > { %v2026_v1 = vadd.f32 %v1770_v55, %v1258_v54  ;;  %v492_v3 = vunpack.c.l.bf16 %v236_v61  ;;  %v1004_v4 = vunpack.c.h.bf16 %v236_v61  ;;  %v2025_v5 = vadd.f32 %v1769_v58, %v1257_v57  ;;  %v1521_v52 = vld [vmem:[%s5572_s16 + $0xf8] sm:$0xf]  ;;  %v246_v57 = vld [vmem:[%s5572_s16 + $0x140] sm:$0xff]  }
  0x1e   : > { %v2024_v6 = vadd.f32 %v1768_v60, %v1256_v59  ;;  %v491_v8 = vunpack.c.l.bf16 %v235_v62  ;;  %v1003_v9 = vunpack.c.h.bf16 %v235_v62  ;;  %v1261_v11 = vadd.f32 %v1005_v0, %v493_v63  ;;  %v245_v60 = vld [vmem:[%s5572_s16 + $0x130] sm:$0xff]   ;;  %v244_v61 = vld [vmem:[%s5572_s16 + $0x120] sm:$0xff]  }
  0x1f   : > { %v1773_v12 = vunpack.c.l.bf16 %v1517_v2  ;;  %v1260_v13 = vadd.f32 %v1004_v4, %v492_v3  ;;  %v1772_v14 = vunpack.c.l.bf16 %v1516_v7  ;;  %v1771_v16 = vunpack.c.l.bf16 %v1515_v10  ;;  %v1526_v2 = vld [vmem:[%s5572_s16 + $0x148] sm:$0xf] }
  0x20   : > { %2284 = vadd.xlane.f32.xlu2 %v2023_v42  ;;  %v1259_v15 = vadd.f32 %v1003_v9, %v491_v8  ;;  %v496_v22 = vunpack.c.l.bf16 %v240_v17  ;;  %v1008_v23 = vunpack.c.h.bf16 %v240_v17  ;;  %v495_v24 = vunpack.c.l.bf16 %v239_v18  ;;  %v1525_v8 = vld [vmem:[%s5572_s16 + $0x138] sm:$0xf]  ;;  %v1524_v9 = vld [vmem:[%s5572_s16 + $0x128] sm:$0xf]  ;;  %v248_v17 = vld [vmem:[%s5572_s16 + $0x160] sm:$0xff]  }
  0x21   : > { %2280 = vadd.xlane.f32.xlu1 %v2021_v43  ;;  %v2029_v20 = vadd.f32 %v1773_v12, %v1261_v11  ;;  %v2028_v21 = vadd.f32 %v1772_v14, %v1260_v13  ;;  %v1007_v27 = vunpack.c.h.bf16 %v239_v18  ;;  %v494_v28 = vunpack.c.l.bf16 %v238_v19  ;;  %v249_v12 = vld [vmem:[%s5572_s16 + $0x170] sm:$0xff]  }
  0x22   : > { %2276 = vadd.xlane.f32.xlu0 %v2019_v47  ;;  %v2027_v25 = vadd.f32 %v1771_v16, %v1259_v15  ;;  %v1006_v29 = vunpack.c.h.bf16 %v238_v19  ;;  %v1264_v32 = vadd.f32 %v1008_v23, %v496_v22  ;;  %v1776_v33 = vunpack.c.l.bf16 %v1520_v26  ;;  %v247_v18 = vld [vmem:[%s5572_s16 + $0x150] sm:$0xff]   ;;  %v1529_v22 = vld [vmem:[%s5572_s16 + $0x178] sm:$0xf] }
  0x23   : > { %v1263_v35 = vadd.f32 %v1007_v27, %v495_v24  ;;  %v1775_v36 = vunpack.c.l.bf16 %v1519_v30  ;;  %v1774_v38 = vunpack.c.l.bf16 %v1518_v31  ;;  %v499_v41 = vunpack.c.l.bf16 %v243_v34  ;;  %v1527_v30 = vld [vmem:[%s5572_s16 + $0x158] sm:$0xf] }
  0x24   : > { %v1262_v37 = vadd.f32 %v1006_v29, %v494_v28  ;;  %v2032_v42 = vadd.f32 %v1776_v33, %v1264_v32  ;;  %v1011_v43 = vunpack.c.h.bf16 %v243_v34  ;;  %v498_v44 = vunpack.c.l.bf16 %v242_v39  ;;  %v1528_v29 = vld [vmem:[%s5572_s16 + $0x168] sm:$0xf] }
  0x25   : > { %v1010_v45 = vunpack.c.h.bf16 %v242_v39  ;;  %v2031_v46 = vadd.f32 %v1775_v36, %v1263_v35  ;;  %v497_v50 = vunpack.c.l.bf16 %v241_v40  ;;  %v1009_v51 = vunpack.c.h.bf16 %v241_v40  ;;  %v250_v39 = vld [vmem:[%s5572_s16 + $0x180] sm:$0xff]  }
  0x26   : > { %v2030_v47 = vadd.f32 %v1774_v38, %v1262_v37  ;;  %v1267_v53 = vadd.f32 %v1011_v43, %v499_v41  ;;  %v1779_v54 = vunpack.c.l.bf16 %v1523_v48  ;;  %v1778_v56 = vunpack.c.l.bf16 %v1522_v49  ;;  %v252_v37 = vld [vmem:[%s5572_s16 + $0x1a0] sm:$0xff]   ;;  %v251_v38 = vld [vmem:[%s5572_s16 + $0x190] sm:$0xff]  }
  0x27   : > { %v1266_v55 = vadd.f32 %v1010_v45, %v498_v44  ;;  %v1265_v58 = vadd.f32 %v1009_v51, %v497_v50  ;;  %v1777_v59 = vunpack.c.l.bf16 %v1521_v52  ;;  %v502_v62 = vunpack.c.l.bf16 %v246_v57  ;;  %v1532_v45 = vld [vmem:[%s5572_s16 + $0x1a8] sm:$0xf]  ;;  %v1531_v50 = vld [vmem:[%s5572_s16 + $0x198] sm:$0xf] }
  0x28   : > { %2290 = vadd.xlane.f32.xlu2 %v2026_v1  ;;  %v1014_v63 = vunpack.c.h.bf16 %v246_v57  ;;  %v2035_v0 = vadd.f32 %v1779_v54, %v1267_v53  ;;  %v501_v3 = vunpack.c.l.bf16 %v245_v60  ;;  %v1012_v7 = vunpack.c.h.bf16 %v244_v61  ;;  %v1530_v51 = vld [vmem:[%s5572_s16 + $0x188] sm:$0xf]  ;;  %v255_v54 = vld [vmem:[%s5572_s16 + $0x1d0] sm:$0xff]  }
  0x29   : > { %2288 = vadd.xlane.f32.xlu1 %v2025_v5  ;;  %v2034_v1 = vadd.f32 %v1778_v56, %v1266_v55  ;;  %v2033_v4 = vadd.f32 %v1777_v59, %v1265_v58  ;;  %v1013_v5 = vunpack.c.h.bf16 %v245_v60  ;;  %v1782_v11 = vunpack.c.l.bf16 %v1526_v2  ;;  %v254_v59 = vld [vmem:[%s5572_s16 + $0x1c0] sm:$0xff]   ;;  %v253_v60 = vld [vmem:[%s5572_s16 + $0x1b0] sm:$0xff]  }
  0x2a   : > { %2286 = vadd.xlane.f32.xlu0 %v2024_v6  ;;  %v500_v6 = vunpack.c.l.bf16 %v244_v61  ;;  %v1270_v10 = vadd.f32 %v1014_v63, %v502_v62  ;;  %v1781_v14 = vunpack.c.l.bf16 %v1525_v8  ;;  %v1780_v16 = vunpack.c.l.bf16 %v1524_v9  ;;  %v1533_v8 = vld [vmem:[%s5572_s16 + $0x1b8] sm:$0xf] }
  0x2b   : > { %v1269_v13 = vadd.f32 %v1013_v5, %v501_v3  ;;  %v504_v23 = vunpack.c.l.bf16 %v248_v17  ;;  %v1016_v24 = vunpack.c.h.bf16 %v248_v17  ;;  %v1015_v26 = vunpack.c.h.bf16 %v247_v18  ;;  %v256_v17 = vld [vmem:[%s5572_s16 + $0x1e0] sm:$0xff]  }
  0x2c   : > { %v1268_v15 = vadd.f32 %v1012_v7, %v500_v6  ;;  %v2038_v19 = vadd.f32 %v1782_v11, %v1270_v10  ;;  %v1785_v32 = vunpack.c.l.bf16 %v1529_v22  ;;  %v1784_v34 = vunpack.c.l.bf16 %v1528_v29  ;;  %v1534_v7 = vld [vmem:[%s5572_s16 + $0x1c8] sm:$0xf] }
  0x2d   : > { %v2037_v27 = vadd.f32 %v1781_v14, %v1269_v13  ;;  %v1272_v33 = vadd.f32 %v1016_v24, %v504_v23  ;;  %v1783_v36 = vunpack.c.l.bf16 %v1527_v30  ;;  %v508_v40 = vunpack.c.l.bf16 %v252_v37  ;;  %v1538_v23 = vld [vmem:[%s5572_s16 + $0x208] sm:$0xf] }
  0x2e   : > { %v2036_v28 = vadd.f32 %v1780_v16, %v1268_v15  ;;  %v1020_v41 = vunpack.c.h.bf16 %v252_v37  ;;  %v506_v48 = vunpack.c.l.bf16 %v250_v39  ;;  %v1018_v49 = vunpack.c.h.bf16 %v250_v39  ;;  %v258_v15 = vld [vmem:[%s5572_s16 + $0x200] sm:$0xff]   ;;  %v257_v16 = vld [vmem:[%s5572_s16 + $0x1f0] sm:$0xff]   ;;  %v1536_v29 = vld [vmem:[%s5572_s16 + $0x1e8] sm:$0xf] }
  0x2f   : > { %v2040_v43 = vadd.f32 %v1784_v34, %v1272_v33  ;;  %v1788_v53 = vunpack.c.l.bf16 %v1532_v45  ;;  %v1787_v56 = vunpack.c.l.bf16 %v1531_v50  ;;  %v1786_v58 = vunpack.c.l.bf16 %v1530_v51  ;;  %v260_v37 = vld [vmem:[%s5572_s16 + $0x220] sm:$0xff]   ;;  %v1539_v50 = vld [vmem:[%s5572_s16 + $0x218] sm:$0xf] }
  0x30   : > { %2296 = vadd.xlane.f32.xlu2 %v2029_v20  ;;  %v505_v20 = vunpack.c.l.bf16 %v249_v12  ;;  %v1276_v52 = vadd.f32 %v1020_v41, %v508_v40  ;;  %v1274_v57 = vadd.f32 %v1018_v49, %v506_v48  ;;  %v511_v62 = vunpack.c.l.bf16 %v255_v54  ;;  %v1540_v49 = vld [vmem:[%s5572_s16 + $0x228] sm:$0xf] }
  0x31   : > { %2294 = vadd.xlane.f32.xlu1 %v2028_v21  ;;  %v1017_v21 = vunpack.c.h.bf16 %v249_v12  ;;  %v1023_v63 = vunpack.c.h.bf16 %v255_v54  ;;  %v1022_v2 = vunpack.c.h.bf16 %v254_v59  ;;  %v509_v3 = vunpack.c.l.bf16 %v253_v60 }
  0x32   : > { %2292 = vadd.xlane.f32.xlu0 %v2027_v25  ;;  %v503_v25 = vunpack.c.l.bf16 %v247_v18  ;;  %v2044_v61 = vadd.f32 %v1788_v53, %v1276_v52  ;;  %v2042_v6 = vadd.f32 %v1786_v58, %v1274_v57  ;;  %v1790_v12 = vunpack.c.l.bf16 %v1534_v7  ;;  %v264_v57 = vld [vmem:[%s5572_s16 + $0x260] sm:$0xff]   ;;  %v263_v58 = vld [vmem:[%s5572_s16 + $0x250] sm:$0xff]   ;;  %v1542_v7 = vld [vmem:[%s5572_s16 + $0x248] sm:$0xf] }
  0x33   : > { %v1273_v31 = vadd.f32 %v1017_v21, %v505_v20  ;;  %v1279_v9 = vadd.f32 %v1023_v63, %v511_v62  ;;  %v1789_v14 = vunpack.c.l.bf16 %v1533_v8  ;;  %v514_v18 = vunpack.c.l.bf16 %v258_v15 }
  0x34   : > { %v1271_v35 = vadd.f32 %v1015_v26, %v503_v25  ;;  %v513_v24 = vunpack.c.l.bf16 %v257_v16  ;;  %v1025_v25 = vunpack.c.h.bf16 %v257_v16  ;;  %v512_v26 = vunpack.c.l.bf16 %v256_v17  ;;  %v265_v16 = vld [vmem:[%s5572_s16 + $0x270] sm:$0xff]  }
  0x35   : > { %v1796_v54 = vunpack.c.l.bf16 %v1540_v49  ;;  %v1548_v49 = vld [vmem:[%s5572_s16 + $0x2a8] sm:$0xf] }
  0x36   : > { %v2039_v44 = vadd.f32 %v1783_v36, %v1271_v35  ;;  %v1281_v33 = vadd.f32 %v1025_v25, %v513_v24  ;;  %v1792_v36 = vunpack.c.l.bf16 %v1536_v29  ;;  %v1033_v24 = vunpack.c.h.bf16 %v265_v16 }
  0x38   : > { %2302 = vadd.xlane.f32.xlu2 %v2032_v42  ;;  %v2041_v42 = vadd.f32 %v1785_v32, %v1273_v31  ;;  %v1794_v31 = vunpack.c.l.bf16 %v1538_v23  ;;  %v261_v32 = vld [vmem:[%s5572_s16 + $0x230] sm:$0xff]   ;;  %v521_v23 = vunpack.c.l.bf16 %v265_v16 }
  0x39   : > { %2300 = vadd.xlane.f32.xlu1 %v2031_v46  ;;  %v507_v46 = vunpack.c.l.bf16 %v251_v38  ;;  %v517_v40 = vunpack.c.l.bf16 %v261_v32  ;;  %v1029_v41 = vunpack.c.h.bf16 %v261_v32 }
  0x3a   : > { %2298 = vadd.xlane.f32.xlu0 %v2030_v47  ;;  %v1019_v47 = vunpack.c.h.bf16 %v251_v38  ;;  %v259_v38 = vld [vmem:[%s5572_s16 + $0x210] sm:$0xff]  }
  0x3b   : > { %v515_v45 = vunpack.c.l.bf16 %v259_v38  ;;  %v1285_v51 = vadd.f32 %v1029_v41, %v517_v40 }
  0x3c   : > { %v1275_v55 = vadd.f32 %v1019_v47, %v507_v46  ;;  %v1027_v46 = vunpack.c.h.bf16 %v259_v38 }
  0x3e   : > { %v2043_v5 = vadd.f32 %v1787_v56, %v1275_v55  ;;  %v1283_v55 = vadd.f32 %v1027_v46, %v515_v45  ;;  %v1795_v56 = vunpack.c.l.bf16 %v1539_v50 }
  0x40   : > { %2308 = vadd.xlane.f32.xlu2 %v2035_v0  ;;  %v1535_v0 = vld [vmem:[%s5572_s16 + $0x1d8] sm:$0xf] }
  0x41   : > { %2306 = vadd.xlane.f32.xlu1 %v2034_v1  ;;  %v510_v1 = vunpack.c.l.bf16 %v254_v59  ;;  %v1791_v10 = vunpack.c.l.bf16 %v1535_v0  ;;  %v262_v59 = vld [vmem:[%s5572_s16 + $0x240] sm:$0xff]   ;;  %v2051_v0 = vadd.f32 %v1795_v56, %v1283_v55  ;;  %v1804_v56 = vunpack.c.l.bf16 %v1548_v49 }
  0x42   : > { %2304 = vadd.xlane.f32.xlu0 %v2033_v4  ;;  %v1021_v4 = vunpack.c.h.bf16 %v253_v60  ;;  %v520_v60 = vunpack.c.l.bf16 %v264_v57 }
  0x43   : > { %v1278_v11 = vadd.f32 %v1022_v2, %v510_v1  ;;  %v2047_v20 = vadd.f32 %v1791_v10, %v1279_v9  ;;  %v1544_v1 = vld [vmem:[%s5572_s16 + $0x268] sm:$0xf]  ;;  %v519_v2 = vunpack.c.l.bf16 %v263_v58  ;;  %v267_v10 = vld [vmem:[%s5572_s16 + $0x290] sm:$0xff]  }
  0x44   : > { %v1277_v13 = vadd.f32 %v1021_v4, %v509_v3  ;;  %v1031_v3 = vunpack.c.h.bf16 %v263_v58  ;;  %v518_v4 = vunpack.c.l.bf16 %v262_v59  ;;  %v1800_v9 = vunpack.c.l.bf16 %v1544_v1  ;;  %v271_v58 = vld [vmem:[%s5572_s16 + $0x2d0] sm:$0xff]  }
  0x45   : > { %v2046_v21 = vadd.f32 %v1790_v12, %v1278_v11  ;;  %v527_v1 = vunpack.c.l.bf16 %v271_v58 }
  0x46   : > { %v2045_v22 = vadd.f32 %v1789_v14, %v1277_v13  ;;  %v1287_v11 = vadd.f32 %v1031_v3, %v519_v2  ;;  %v1798_v14 = vunpack.c.l.bf16 %v1542_v7  ;;  %v1039_v2 = vunpack.c.h.bf16 %v271_v58 }
  0x48   : > { %2314 = vadd.xlane.f32.xlu2 %v2038_v19  ;;  %v1026_v19 = vunpack.c.h.bf16 %v258_v15  ;;  %v266_v15 = vld [vmem:[%s5572_s16 + $0x280] sm:$0xff]  }
  0x49   : > { %2312 = vadd.xlane.f32.xlu1 %v2037_v27  ;;  %v1024_v27 = vunpack.c.h.bf16 %v256_v17 }
  0x4a   : > { %2310 = vadd.xlane.f32.xlu0 %v2036_v28  ;;  %v1537_v28 = vld [vmem:[%s5572_s16 + $0x1f8] sm:$0xf]  ;;  %v1282_v30 = vadd.f32 %v1026_v19, %v514_v18  ;;  %v523_v18 = vunpack.c.l.bf16 %v267_v10  ;;  %v1035_v19 = vunpack.c.h.bf16 %v267_v10 }
  0x4b   : > { %v1793_v34 = vunpack.c.l.bf16 %v1537_v28  ;;  %v1280_v35 = vadd.f32 %v1024_v27, %v512_v26  ;;  %v1546_v27 = vld [vmem:[%s5572_s16 + $0x288] sm:$0xf]  ;;  %v1545_v28 = vld [vmem:[%s5572_s16 + $0x278] sm:$0xf] }
  0x4c   : > { %v2050_v39 = vadd.f32 %v1794_v31, %v1282_v30  ;;  %v1291_v29 = vadd.f32 %v1035_v19, %v523_v18  ;;  %v1802_v32 = vunpack.c.l.bf16 %v1546_v27 }
  0x4d   : > { %v2049_v47 = vadd.f32 %v1793_v34, %v1281_v33  ;;  %v2048_v48 = vadd.f32 %v1792_v36, %v1280_v35  ;;  %v1289_v33 = vadd.f32 %v1033_v24, %v521_v23  ;;  %v1801_v34 = vunpack.c.l.bf16 %v1545_v28  ;;  %v270_v35 = vld [vmem:[%s5572_s16 + $0x2c0] sm:$0xff]   ;;  %v269_v36 = vld [vmem:[%s5572_s16 + $0x2b0] sm:$0xff]   ;;  %v1556_v24 = vld [vmem:[%s5572_s16 + $0x328] sm:$0xf] }
  0x4e   : > { %v526_v38 = vunpack.c.l.bf16 %v270_v35  ;;  %v1037_v45 = vunpack.c.h.bf16 %v269_v36 }
  0x50   : > { %2320 = vadd.xlane.f32.xlu2 %v2041_v42  ;;  %v1541_v42 = vld [vmem:[%s5572_s16 + $0x238] sm:$0xf] }
  0x51   : > { %2318 = vadd.xlane.f32.xlu1 %v2040_v43  ;;  %v516_v43 = vunpack.c.l.bf16 %v260_v37  ;;  %v1797_v52 = vunpack.c.l.bf16 %v1541_v42  ;;  %v2057_v42 = vadd.f32 %v1801_v34, %v1289_v33  ;;  %v279_v33 = vld [vmem:[%s5572_s16 + $0x350] sm:$0xff]  }
  0x52   : > { %2316 = vadd.xlane.f32.xlu0 %v2039_v44  ;;  %v1028_v44 = vunpack.c.h.bf16 %v260_v37  ;;  %v268_v37 = vld [vmem:[%s5572_s16 + $0x2a0] sm:$0xff]  }
  0x53   : > { %v2053_v62 = vadd.f32 %v1797_v52, %v1285_v51  ;;  %v524_v46 = vunpack.c.l.bf16 %v268_v37  ;;  %v273_v52 = vld [vmem:[%s5572_s16 + $0x2f0] sm:$0xff]  }
  0x54   : > { %v1284_v53 = vadd.f32 %v1028_v44, %v516_v43  ;;  %v1550_v43 = vld [vmem:[%s5572_s16 + $0x2c8] sm:$0xf]  ;;  %v525_v44 = vunpack.c.l.bf16 %v269_v36 }
  0x55   : > { %v1806_v51 = vunpack.c.l.bf16 %v1550_v43  ;;  %v1047_v43 = vunpack.c.h.bf16 %v279_v33 }
  0x56   : > { %v2052_v63 = vadd.f32 %v1796_v54, %v1284_v53  ;;  %v1293_v53 = vadd.f32 %v1037_v45, %v525_v44 }
  0x58   : > { %2326 = vadd.xlane.f32.xlu2 %v2044_v61  ;;  %v1032_v61 = vunpack.c.h.bf16 %v264_v57  ;;  %v272_v57 = vld [vmem:[%s5572_s16 + $0x2e0] sm:$0xff]  }
  0x59   : > { %2324 = vadd.xlane.f32.xlu1 %v2043_v5  ;;  %v1030_v5 = vunpack.c.h.bf16 %v262_v59 }
  0x5a   : > { %2322 = vadd.xlane.f32.xlu0 %v2042_v6  ;;  %v1543_v6 = vld [vmem:[%s5572_s16 + $0x258] sm:$0xf]  ;;  %v1288_v8 = vadd.f32 %v1032_v61, %v520_v60  ;;  %v529_v60 = vunpack.c.l.bf16 %v273_v52  ;;  %v1041_v61 = vunpack.c.h.bf16 %v273_v52 }
  0x5b   : > { %v1799_v12 = vunpack.c.l.bf16 %v1543_v6  ;;  %v1286_v13 = vadd.f32 %v1030_v5, %v518_v4  ;;  %v1552_v5 = vld [vmem:[%s5572_s16 + $0x2e8] sm:$0xf]  ;;  %v1551_v6 = vld [vmem:[%s5572_s16 + $0x2d8] sm:$0xf] }
  0x5c   : > { %v2056_v17 = vadd.f32 %v1800_v9, %v1288_v8  ;;  %v1297_v7 = vadd.f32 %v1041_v61, %v529_v60  ;;  %v1808_v10 = vunpack.c.l.bf16 %v1552_v5  ;;  %v282_v61 = vld [vmem:[%s5572_s16 + $0x380] sm:$0xff]  }
  0x5d   : > { %v2055_v25 = vadd.f32 %v1799_v12, %v1287_v11  ;;  %v2054_v26 = vadd.f32 %v1798_v14, %v1286_v13  ;;  %v1295_v11 = vadd.f32 %v1039_v2, %v527_v1  ;;  %v1807_v12 = vunpack.c.l.bf16 %v1551_v6  ;;  %v276_v13 = vld [vmem:[%s5572_s16 + $0x320] sm:$0xff]   ;;  %v275_v14 = vld [vmem:[%s5572_s16 + $0x310] sm:$0xff]  }
  0x5e   : > { %v1044_v18 = vunpack.c.h.bf16 %v276_v13  ;;  %v538_v1 = vunpack.c.l.bf16 %v282_v61  ;;  %v1050_v2 = vunpack.c.h.bf16 %v282_v61 }
  0x5f   : > { %v2063_v23 = vadd.f32 %v1807_v12, %v1295_v11 }
  0x60   : > { %2332 = vadd.xlane.f32.xlu2 %v2047_v20  ;;  %v1547_v20 = vld [vmem:[%s5572_s16 + $0x298] sm:$0xf] }
  0x61   : > { %2330 = vadd.xlane.f32.xlu1 %v2046_v21  ;;  %v522_v21 = vunpack.c.l.bf16 %v266_v15  ;;  %v1803_v30 = vunpack.c.l.bf16 %v1547_v20 }
  0x62   : > { %2328 = vadd.xlane.f32.xlu0 %v2045_v22  ;;  %v1034_v22 = vunpack.c.h.bf16 %v266_v15  ;;  %v274_v15 = vld [vmem:[%s5572_s16 + $0x300] sm:$0xff]  }
  0x63   : > { %v2059_v40 = vadd.f32 %v1803_v30, %v1291_v29  ;;  %v530_v27 = vunpack.c.l.bf16 %v274_v15  ;;  %v1042_v28 = vunpack.c.h.bf16 %v274_v15  ;;  %v1555_v29 = vld [vmem:[%s5572_s16 + $0x318] sm:$0xf]  ;;  %v1554_v30 = vld [vmem:[%s5572_s16 + $0x308] sm:$0xf]  ;;  %v1306_v15 = vadd.f32 %v1050_v2, %v538_v1 }
  0x64   : > { %v1290_v31 = vadd.f32 %v1034_v22, %v522_v21 }
  0x65   : > { %v1298_v36 = vadd.f32 %v1042_v28, %v530_v27 }
  0x66   : > { %v2058_v41 = vadd.f32 %v1802_v32, %v1290_v31  ;;  %v1812_v32 = vunpack.c.l.bf16 %v1556_v24 }
  0x68   : > { %2338 = vadd.xlane.f32.xlu2 %v2050_v39  ;;  %v1038_v39 = vunpack.c.h.bf16 %v270_v35  ;;  %v1811_v35 = vunpack.c.l.bf16 %v1555_v29 }
  0x69   : > { %2336 = vadd.xlane.f32.xlu1 %v2049_v47  ;;  %v1036_v47 = vunpack.c.h.bf16 %v268_v37  ;;  %v1810_v37 = vunpack.c.l.bf16 %v1554_v30 }
  0x6a   : > { %2334 = vadd.xlane.f32.xlu0 %v2048_v48  ;;  %v1549_v48 = vld [vmem:[%s5572_s16 + $0x2b8] sm:$0xf]  ;;  %v1294_v50 = vadd.f32 %v1038_v39, %v526_v38  ;;  %v278_v38 = vld [vmem:[%s5572_s16 + $0x340] sm:$0xff]   ;;  %v277_v39 = vld [vmem:[%s5572_s16 + $0x330] sm:$0xff]  }
  0x6b   : > { %v1805_v54 = vunpack.c.l.bf16 %v1549_v48  ;;  %v1292_v55 = vadd.f32 %v1036_v47, %v524_v46  ;;  %v1559_v46 = vld [vmem:[%s5572_s16 + $0x358] sm:$0xf]  ;;  %v534_v47 = vunpack.c.l.bf16 %v278_v38  ;;  %v1046_v48 = vunpack.c.h.bf16 %v278_v38 }
  0x6c   : > { %v2062_v59 = vadd.f32 %v1806_v51, %v1294_v50  ;;  %v533_v49 = vunpack.c.l.bf16 %v277_v39  ;;  %v1045_v50 = vunpack.c.h.bf16 %v277_v39  ;;  %v2066_v52 = vadd.f32 %v1810_v37, %v1298_v36 }
  0x6d   : > { %v2061_v3 = vadd.f32 %v1805_v54, %v1293_v53  ;;  %v2060_v4 = vadd.f32 %v1804_v56, %v1292_v55  ;;  %v1558_v53 = vld [vmem:[%s5572_s16 + $0x348] sm:$0xf]  ;;  %v1557_v54 = vld [vmem:[%s5572_s16 + $0x338] sm:$0xf]  ;;  %v1815_v56 = vunpack.c.l.bf16 %v1559_v46 }
  0x6e   : > { %v1814_v58 = vunpack.c.l.bf16 %v1558_v53  ;;  %v1813_v60 = vunpack.c.l.bf16 %v1557_v54  ;;  %v286_v53 = vld [vmem:[%s5572_s16 + $0x3c0] sm:$0xff]  }
  0x6f   : > { %v542_v2 = vunpack.c.l.bf16 %v286_v53 }
  0x70   : > { %2344 = vadd.xlane.f32.xlu2 %v2053_v62  ;;  %v1553_v62 = vld [vmem:[%s5572_s16 + $0x2f8] sm:$0xf] }
  0x71   : > { %2342 = vadd.xlane.f32.xlu1 %v2052_v63  ;;  %v528_v63 = vunpack.c.l.bf16 %v272_v57  ;;  %v1809_v8 = vunpack.c.l.bf16 %v1553_v62  ;;  %v281_v62 = vld [vmem:[%s5572_s16 + $0x370] sm:$0xff]  }
  0x72   : > { %2340 = vadd.xlane.f32.xlu0 %v2051_v0  ;;  %v1040_v0 = vunpack.c.h.bf16 %v272_v57  ;;  %v1302_v57 = vadd.f32 %v1046_v48, %v534_v47 }
  0x73   : > { %v2065_v21 = vadd.f32 %v1809_v8, %v1297_v7  ;;  %v1562_v8 = vld [vmem:[%s5572_s16 + $0x388] sm:$0xf] }
  0x74   : > { %v1296_v9 = vadd.f32 %v1040_v0, %v528_v63  ;;  %v280_v63 = vld [vmem:[%s5572_s16 + $0x360] sm:$0xff]   ;;  %v2070_v6 = vadd.f32 %v1814_v58, %v1302_v57 }
  0x75   : > { %v536_v11 = vunpack.c.l.bf16 %v280_v63  ;;  %v1048_v12 = vunpack.c.h.bf16 %v280_v63 }
  0x76   : > { %v2064_v22 = vadd.f32 %v1808_v10, %v1296_v9  ;;  %v537_v9 = vunpack.c.l.bf16 %v281_v62  ;;  %v1049_v10 = vunpack.c.h.bf16 %v281_v62  ;;  %v1568_v62 = vld [vmem:[%s5572_s16 + $0x3e8] sm:$0xf] }
  0x78   : > { %2350 = vadd.xlane.f32.xlu2 %v2056_v17  ;;  %v532_v17 = vunpack.c.l.bf16 %v276_v13  ;;  %v1561_v13 = vld [vmem:[%s5572_s16 + $0x378] sm:$0xf] }
  0x79   : > { %2348 = vadd.xlane.f32.xlu1 %v2055_v25  ;;  %v531_v25 = vunpack.c.l.bf16 %v275_v14 }
  0x7a   : > { %2346 = vadd.xlane.f32.xlu0 %v2054_v26  ;;  %v1043_v26 = vunpack.c.h.bf16 %v275_v14  ;;  %v1300_v31 = vadd.f32 %v1044_v18, %v532_v17  ;;  %v1560_v14 = vld [vmem:[%s5572_s16 + $0x368] sm:$0xf]  ;;  %v1818_v17 = vunpack.c.l.bf16 %v1562_v8  ;;  %v285_v18 = vld [vmem:[%s5572_s16 + $0x3b0] sm:$0xff]  }
  0x7b   : > { %v1816_v24 = vunpack.c.l.bf16 %v1560_v14  ;;  %v541_v29 = vunpack.c.l.bf16 %v285_v18  ;;  %v1053_v30 = vunpack.c.h.bf16 %v285_v18 }
  0x7c   : > { %v1299_v34 = vadd.f32 %v1043_v26, %v531_v25  ;;  %v284_v25 = vld [vmem:[%s5572_s16 + $0x3a0] sm:$0xff]   ;;  %v283_v26 = vld [vmem:[%s5572_s16 + $0x390] sm:$0xff]   ;;  %v2074_v28 = vadd.f32 %v1818_v17, %v1306_v15 }
  0x7d   : > { %v539_v36 = vunpack.c.l.bf16 %v283_v26  ;;  %v1051_v37 = vunpack.c.h.bf16 %v283_v26  ;;  %v290_v15 = vld [vmem:[%s5572_s16 + $0x400] sm:$0xff]   ;;  %v289_v17 = vld [vmem:[%s5572_s16 + $0x3f0] sm:$0xff]   ;;  %v1571_v26 = vld [vmem:[%s5572_s16 + $0x418] sm:$0xf] }
  0x7e   : > { %v2067_v51 = vadd.f32 %v1811_v35, %v1299_v34  ;;  %v540_v34 = vunpack.c.l.bf16 %v284_v25  ;;  %v1052_v35 = vunpack.c.h.bf16 %v284_v25 }
  0x80   : > { %2356 = vadd.xlane.f32.xlu2 %v2059_v40  ;;  %v1308_v47 = vadd.f32 %v1052_v35, %v540_v34 }
  0x81   : > { %2354 = vadd.xlane.f32.xlu1 %v2058_v41  ;;  %v2068_v41 = vadd.f32 %v1812_v32, %v1300_v31 }
  0x82   : > { %2352 = vadd.xlane.f32.xlu0 %v2057_v42  ;;  %v535_v42 = vunpack.c.l.bf16 %v279_v33  ;;  %v1565_v33 = vld [vmem:[%s5572_s16 + $0x3b8] sm:$0xf] }
  0x83   : > { %v1821_v46 = vunpack.c.l.bf16 %v1565_v33  ;;  %v1057_v33 = vunpack.c.h.bf16 %v289_v17 }
  0x84   : > { %v1303_v55 = vadd.f32 %v1047_v43, %v535_v42  ;;  %v1563_v42 = vld [vmem:[%s5572_s16 + $0x398] sm:$0xf]  ;;  %v1309_v43 = vadd.f32 %v1053_v30, %v541_v29  ;;  %v1058_v29 = vunpack.c.h.bf16 %v290_v15  ;;  %v545_v30 = vunpack.c.l.bf16 %v289_v17 }
  0x86   : > { %v2071_v5 = vadd.f32 %v1815_v56, %v1303_v55 }
  0x88   : > { %2362 = vadd.xlane.f32.xlu2 %v2062_v59  ;;  %v1301_v59 = vadd.f32 %v1045_v50, %v533_v49  ;;  %v1307_v49 = vadd.f32 %v1051_v37, %v539_v36  ;;  %v1819_v50 = vunpack.c.l.bf16 %v1563_v42  ;;  %v1570_v36 = vld [vmem:[%s5572_s16 + $0x408] sm:$0xf]  ;;  %v1569_v37 = vld [vmem:[%s5572_s16 + $0x3f8] sm:$0xf] }
  0x89   : > { %2360 = vadd.xlane.f32.xlu1 %v2061_v3  ;;  %v1826_v42 = vunpack.c.l.bf16 %v1570_v36 }
  0x8a   : > { %2358 = vadd.xlane.f32.xlu0 %v2060_v4  ;;  %v2069_v7 = vadd.f32 %v1813_v60, %v1301_v59  ;;  %v2077_v59 = vadd.f32 %v1821_v46, %v1309_v43  ;;  %v2075_v61 = vadd.f32 %v1819_v50, %v1307_v49  ;;  %v1313_v43 = vadd.f32 %v1057_v33, %v545_v30  ;;  %v292_v49 = vld [vmem:[%s5572_s16 + $0x420] sm:$0xff]  }
  0x8b   : > { %v5673_v16 = vpop.xlane.xlu2 %2282  ;;  %v1825_v46 = vunpack.c.l.bf16 %v1569_v37 }
  0x8c   : > { %8349 = vst [vmem:[#allocation3_spill] sm:$0xff] %v5673_v16  ;;  %v5675_v19 = vpop.xlane.xlu1 %2278 }
  0x8d   : > { %8350 = vst [vmem:[#allocation4_spill] sm:$0xff] %v5675_v19  ;;  %v5677_v20 = vpop.xlane.xlu0 %2274 }
  0x8e   : > { %8351 = vst [vmem:[#allocation5_spill] sm:$0xff] %v5677_v20  ;;  %v378_v20 = vld [vmem:[%s5572_s16 + $0x980] sm:$0xff]  }
  0x90   : > { %2368 = vadd.xlane.f32.xlu2 %v2065_v21  ;;  %v1305_v21 = vadd.f32 %v1049_v10, %v537_v9  ;;  %v1824_v9 = vunpack.c.l.bf16 %v1568_v62  ;;  %v291_v10 = vld [vmem:[%s5572_s16 + $0x410] sm:$0xff]  }
  0x91   : > { %2366 = vadd.xlane.f32.xlu1 %v2064_v22  ;;  %v1817_v22 = vunpack.c.l.bf16 %v1561_v13 }
  0x92   : > { %2364 = vadd.xlane.f32.xlu0 %v2063_v23  ;;  %v1304_v23 = vadd.f32 %v1048_v12, %v536_v11 }
  0x93   : > { %v5685_v40 = vpop.xlane.xlu2 %2284  ;;  %v2073_v38 = vadd.f32 %v1817_v22, %v1305_v21  ;;  %v547_v22 = vunpack.c.l.bf16 %v291_v10 }
  0x94   : > { %8352 = vst [vmem:[#allocation6_spill] sm:$0xff] %v5685_v40  ;;  %v5687_v44 = vpop.xlane.xlu1 %2280  ;;  %v2072_v39 = vadd.f32 %v1816_v24, %v1304_v23  ;;  %v1059_v23 = vunpack.c.h.bf16 %v291_v10 }
  0x95   : > { %8353 = vst [vmem:[#allocation7_spill] sm:$0xff] %v5687_v44  ;;  %v5689_v45 = vpop.xlane.xlu0 %2276 }
  0x96   : > { %8354 = vst [vmem:[#allocation8_spill] sm:$0xff] %v5689_v45 }
  0x98   : > { %2374 = vadd.xlane.f32.xlu2 %v2068_v41  ;;  %v1564_v41 = vld [vmem:[%s5572_s16 + $0x3a8] sm:$0xf] }
  0x99   : > { %2372 = vadd.xlane.f32.xlu1 %v2067_v51  ;;  %v1820_v48 = vunpack.c.l.bf16 %v1564_v41  ;;  %v288_v51 = vld [vmem:[%s5572_s16 + $0x3e0] sm:$0xff]  }
  0x9a   : > { %2370 = vadd.xlane.f32.xlu0 %v2066_v52  ;;  %v287_v52 = vld [vmem:[%s5572_s16 + $0x3d0] sm:$0xff]   ;;  %v544_v55 = vunpack.c.l.bf16 %v288_v51  ;;  %v1056_v56 = vunpack.c.h.bf16 %v288_v51 }
  0x9b   : > { %v5697_v0 = vpop.xlane.xlu2 %2290  ;;  %v2076_v60 = vadd.f32 %v1820_v48, %v1308_v47  ;;  %v543_v63 = vunpack.c.l.bf16 %v287_v52  ;;  %v1055_v1 = vunpack.c.h.bf16 %v287_v52  ;;  %v294_v47 = vld [vmem:[%s5572_s16 + $0x440] sm:$0xff]   ;;  %v293_v48 = vld [vmem:[%s5572_s16 + $0x430] sm:$0xff]  }
  0x9c   : > { %8355 = vst [vmem:[#allocation9_spill] sm:$0xff] %v5697_v0  ;;  %v5699_v3 = vpop.xlane.xlu1 %2288  ;;  %v1312_v8 = vadd.f32 %v1056_v56, %v544_v55  ;;  %v550_v51 = vunpack.c.l.bf16 %v294_v47  ;;  %v1062_v52 = vunpack.c.h.bf16 %v294_v47  ;;  %v549_v62 = vunpack.c.l.bf16 %v293_v48 }
  0x9d   : > { %8356 = vst [vmem:[#allocation10_spill] sm:$0xff] %v5699_v3  ;;  %v5701_v4 = vpop.xlane.xlu0 %2286  ;;  %v1311_v11 = vadd.f32 %v1055_v1, %v543_v63  ;;  %v1061_v63 = vunpack.c.h.bf16 %v293_v48  ;;  %v548_v1 = vunpack.c.l.bf16 %v292_v49  ;;  %v372_v3 = vld [vmem:[%s5572_s16 + $0x920] sm:$0xff]  }
  0x9e   : > { %8357 = vst [vmem:[#allocation11_spill] sm:$0xff] %v5701_v4  ;;  %v2080_v21 = vadd.f32 %v1824_v9, %v1312_v8  ;;  %v297_v9 = vld [vmem:[%s5572_s16 + $0x470] sm:$0xff]  }
  0x9f   : > { %v1317_v10 = vadd.f32 %v1061_v63, %v549_v62 }
  0xa0   : > { %2380 = vadd.xlane.f32.xlu2 %v2071_v5  ;;  %v1054_v5 = vunpack.c.h.bf16 %v286_v53 }
  0xa1   : > { %2378 = vadd.xlane.f32.xlu1 %v2070_v6  ;;  %v1567_v6 = vld [vmem:[%s5572_s16 + $0x3d8] sm:$0xf] }
  0xa2   : > { %2376 = vadd.xlane.f32.xlu0 %v2069_v7  ;;  %v1566_v7 = vld [vmem:[%s5572_s16 + $0x3c8] sm:$0xf]  ;;  %v1823_v12 = vunpack.c.l.bf16 %v1567_v6  ;;  %v1310_v13 = vadd.f32 %v1054_v5, %v542_v2  ;;  %v1060_v2 = vunpack.c.h.bf16 %v292_v49  ;;  %v1573_v5 = vld [vmem:[%s5572_s16 + $0x438] sm:$0xf]  ;;  %v300_v49 = vld [vmem:[%s5572_s16 + $0x4a0] sm:$0xff]  }
  0xa3   : > { %v5709_v27 = vpop.xlane.xlu2 %2296  ;;  %v1822_v14 = vunpack.c.l.bf16 %v1566_v7  ;;  %v1572_v6 = vld [vmem:[%s5572_s16 + $0x428] sm:$0xf]  ;;  %v1318_v7 = vadd.f32 %v1062_v52, %v550_v51  ;;  %v299_v51 = vld [vmem:[%s5572_s16 + $0x490] sm:$0xff]   ;;  %v298_v52 = vld [vmem:[%s5572_s16 + $0x480] sm:$0xff]  }
  0xa4   : > { %8358 = vst [vmem:[#allocation12_spill] sm:$0xff] %v5709_v27  ;;  %v5711_v31 = vpop.xlane.xlu1 %2294  ;;  %v2079_v34 = vadd.f32 %v1823_v12, %v1311_v11  ;;  %v1829_v11 = vunpack.c.l.bf16 %v1573_v5  ;;  %v1316_v12 = vadd.f32 %v1060_v2, %v548_v1  ;;  %v1580_v5 = vld [vmem:[%s5572_s16 + $0x4a8] sm:$0xf] }
  0xa5   : > { %8359 = vst [vmem:[#allocation13_spill] sm:$0xff] %v5711_v31  ;;  %v5713_v32 = vpop.xlane.xlu0 %2292  ;;  %v2078_v35 = vadd.f32 %v1822_v14, %v1310_v13  ;;  %v1828_v13 = vunpack.c.l.bf16 %v1572_v6  ;;  %v296_v14 = vld [vmem:[%s5572_s16 + $0x460] sm:$0xff]   ;;  %v555_v6 = vunpack.c.l.bf16 %v299_v51 }
  0xa6   : > { %8360 = vst [vmem:[#allocation14_spill] sm:$0xff] %v5713_v32  ;;  %v552_v30 = vunpack.c.l.bf16 %v296_v14  ;;  %v1064_v33 = vunpack.c.h.bf16 %v296_v14  ;;  %v2085_v36 = vadd.f32 %v1829_v11, %v1317_v10  ;;  %v1579_v10 = vld [vmem:[%s5572_s16 + $0x498] sm:$0xf]  ;;  %v1578_v11 = vld [vmem:[%s5572_s16 + $0x488] sm:$0xf]  ;;  %v303_v14 = vld [vmem:[%s5572_s16 + $0x4d0] sm:$0xff]  }
  0xa7   : > { %v2084_v37 = vadd.f32 %v1828_v13, %v1316_v12  ;;  %v1836_v13 = vunpack.c.l.bf16 %v1580_v5  ;;  %v306_v5 = vld [vmem:[%s5572_s16 + $0x500] sm:$0xff]  }
  0xa8   : > { %2386 = vadd.xlane.f32.xlu2 %v2074_v28  ;;  %v546_v28 = vunpack.c.l.bf16 %v290_v15  ;;  %v295_v15 = vld [vmem:[%s5572_s16 + $0x450] sm:$0xff]  }
  0xa9   : > { %2384 = vadd.xlane.f32.xlu1 %v2073_v38  ;;  %v1315_v38 = vadd.f32 %v1059_v23, %v547_v22  ;;  %v553_v22 = vunpack.c.l.bf16 %v297_v9  ;;  %v1065_v23 = vunpack.c.h.bf16 %v297_v9  ;;  %v1066_v9 = vunpack.c.h.bf16 %v298_v52 }
  0xaa   : > { %2382 = vadd.xlane.f32.xlu0 %v2072_v39  ;;  %v1827_v39 = vunpack.c.l.bf16 %v1571_v26  ;;  %v1314_v41 = vadd.f32 %v1058_v29, %v546_v28  ;;  %v1577_v29 = vld [vmem:[%s5572_s16 + $0x478] sm:$0xf] }
  0xab   : > { %v5721_v54 = vpop.xlane.xlu2 %2302 }
  0xac   : > { %8361 = vst [vmem:[#allocation15_spill] sm:$0xff] %v5721_v54  ;;  %v5723_v57 = vpop.xlane.xlu1 %2300  ;;  %v2083_v56 = vadd.f32 %v1827_v39, %v1315_v38  ;;  %v1576_v38 = vld [vmem:[%s5572_s16 + $0x468] sm:$0xf]  ;;  %v1575_v39 = vld [vmem:[%s5572_s16 + $0x458] sm:$0xf] }
  0xad   : > { %8362 = vst [vmem:[#allocation16_spill] sm:$0xff] %v5723_v57  ;;  %v5725_v58 = vpop.xlane.xlu0 %2298  ;;  %v1831_v48 = vunpack.c.l.bf16 %v1575_v39  ;;  %v1583_v39 = vld [vmem:[%s5572_s16 + $0x4d8] sm:$0xf] }
  0xae   : > { %8363 = vst [vmem:[#allocation17_spill] sm:$0xff] %v5725_v58  ;;  %v366_v58 = vld [vmem:[%s5572_s16 + $0x8c0] sm:$0xff]  }
  0xb0   : > { %2392 = vadd.xlane.f32.xlu2 %v2077_v59  ;;  %v2082_v59 = vadd.f32 %v1826_v42, %v1314_v41  ;;  %v1321_v41 = vadd.f32 %v1065_v23, %v553_v22  ;;  %v1833_v42 = vunpack.c.l.bf16 %v1577_v29  ;;  %v1834_v23 = vunpack.c.l.bf16 %v1578_v11  ;;  %v302_v29 = vld [vmem:[%s5572_s16 + $0x4c0] sm:$0xff]  }
  0xb1   : > { %2390 = vadd.xlane.f32.xlu1 %v2076_v60  ;;  %v2081_v60 = vadd.f32 %v1825_v46, %v1313_v43  ;;  %v1320_v43 = vadd.f32 %v1064_v33, %v552_v30  ;;  %v1832_v46 = vunpack.c.l.bf16 %v1576_v38  ;;  %v301_v30 = vld [vmem:[%s5572_s16 + $0x4b0] sm:$0xff]  }
  0xb2   : > { %2388 = vadd.xlane.f32.xlu0 %v2075_v61  ;;  %v1574_v61 = vld [vmem:[%s5572_s16 + $0x448] sm:$0xf]  ;;  %v2089_v63 = vadd.f32 %v1833_v42, %v1321_v41  ;;  %v558_v41 = vunpack.c.l.bf16 %v302_v29  ;;  %v1070_v42 = vunpack.c.h.bf16 %v302_v29 }
  0xb3   : > { %v5733_v18 = vpop.xlane.xlu2 %2308  ;;  %v1830_v8 = vunpack.c.l.bf16 %v1574_v61  ;;  %v2088_v1 = vadd.f32 %v1832_v46, %v1320_v43  ;;  %v557_v43 = vunpack.c.l.bf16 %v301_v30  ;;  %v1069_v46 = vunpack.c.h.bf16 %v301_v30 }
  0xb4   : > { %8364 = vst [vmem:[#allocation18_spill] sm:$0xff] %v5733_v18  ;;  %v5735_v24 = vpop.xlane.xlu1 %2306 }
  0xb5   : > { %8365 = vst [vmem:[#allocation19_spill] sm:$0xff] %v5735_v24  ;;  %v5737_v25 = vpop.xlane.xlu0 %2304 }
  0xb6   : > { %8366 = vst [vmem:[#allocation20_spill] sm:$0xff] %v5737_v25 }
  0xb8   : > { %2398 = vadd.xlane.f32.xlu2 %v2080_v21  ;;  %v2086_v21 = vadd.f32 %v1830_v8, %v1318_v7  ;;  %v1067_v7 = vunpack.c.h.bf16 %v299_v51  ;;  %v554_v8 = vunpack.c.l.bf16 %v298_v52  ;;  %v1581_v51 = vld [vmem:[%s5572_s16 + $0x4b8] sm:$0xf] }
  0xb9   : > { %2396 = vadd.xlane.f32.xlu1 %v2079_v34  ;;  %v551_v34 = vunpack.c.l.bf16 %v295_v15 }
  0xba   : > { %2394 = vadd.xlane.f32.xlu0 %v2078_v35  ;;  %v1063_v35 = vunpack.c.h.bf16 %v295_v15  ;;  %v1323_v15 = vadd.f32 %v1067_v7, %v555_v6  ;;  %v1322_v22 = vadd.f32 %v1066_v9, %v554_v8  ;;  %v305_v6 = vld [vmem:[%s5572_s16 + $0x4f0] sm:$0xff]   ;;  %v304_v7 = vld [vmem:[%s5572_s16 + $0x4e0] sm:$0xff]   ;;  %v562_v9 = vunpack.c.l.bf16 %v306_v5 }
  0xbb   : > { %v5745_v50 = vpop.xlane.xlu2 %2314  ;;  %v560_v29 = vunpack.c.l.bf16 %v304_v7  ;;  %v1072_v30 = vunpack.c.h.bf16 %v304_v7 }
  0xbc   : > { %8367 = vst [vmem:[#allocation21_spill] sm:$0xff] %v5745_v50  ;;  %v5747_v53 = vpop.xlane.xlu1 %2312  ;;  %v1319_v47 = vadd.f32 %v1063_v35, %v551_v34  ;;  %v559_v35 = vunpack.c.l.bf16 %v303_v14 }
  0xbd   : > { %8368 = vst [vmem:[#allocation22_spill] sm:$0xff] %v5747_v53  ;;  %v5749_v55 = vpop.xlane.xlu0 %2310 }
  0xbe   : > { %8369 = vst [vmem:[#allocation23_spill] sm:$0xff] %v5749_v55  ;;  %v2087_v2 = vadd.f32 %v1831_v48, %v1319_v47  ;;  %v2090_v48 = vadd.f32 %v1834_v23, %v1322_v22  ;;  %v561_v22 = vunpack.c.l.bf16 %v305_v6  ;;  %v1073_v23 = vunpack.c.h.bf16 %v305_v6  ;;  %v360_v55 = vld [vmem:[%s5572_s16 + $0x860] sm:$0xff]  }
  0xc0   : > { %2404 = vadd.xlane.f32.xlu2 %v2083_v56 }
  0xc1   : > { %2402 = vadd.xlane.f32.xlu1 %v2082_v59  ;;  %v556_v59 = vunpack.c.l.bf16 %v300_v49 }
  0xc2   : > { %2400 = vadd.xlane.f32.xlu0 %v2081_v60  ;;  %v1068_v60 = vunpack.c.h.bf16 %v300_v49  ;;  %v1582_v49 = vld [vmem:[%s5572_s16 + $0x4c8] sm:$0xf] }
  0xc3   : > { %v5757_v17 = vpop.xlane.xlu2 %2320 }
  0xc4   : > { %8370 = vst [vmem:[#allocation24_spill] sm:$0xff] %v5757_v17  ;;  %v5759_v26 = vpop.xlane.xlu1 %2318  ;;  %v1324_v12 = vadd.f32 %v1068_v60, %v556_v59  ;;  %v1839_v59 = vunpack.c.l.bf16 %v1583_v39  ;;  %v1326_v60 = vadd.f32 %v1070_v42, %v558_v41  ;;  %v309_v41 = vld [vmem:[%s5572_s16 + $0x530] sm:$0xff]   ;;  %v1329_v42 = vadd.f32 %v1073_v23, %v561_v22 }
  0xc5   : > { %8371 = vst [vmem:[#allocation25_spill] sm:$0xff] %v5759_v26  ;;  %v5761_v28 = vpop.xlane.xlu0 %2316 }
  0xc6   : > { %8372 = vst [vmem:[#allocation26_spill] sm:$0xff] %v5761_v28  ;;  %v2092_v34 = vadd.f32 %v1836_v13, %v1324_v12 }
  0xc8   : > { %2410 = vadd.xlane.f32.xlu2 %v2086_v21  ;;  %v1835_v21 = vunpack.c.l.bf16 %v1579_v10  ;;  %v1074_v10 = vunpack.c.h.bf16 %v306_v5 }
  0xc9   : > { %2408 = vadd.xlane.f32.xlu1 %v2085_v36  ;;  %v1071_v36 = vunpack.c.h.bf16 %v303_v14 }
  0xca   : > { %2406 = vadd.xlane.f32.xlu0 %v2084_v37  ;;  %v2091_v47 = vadd.f32 %v1835_v21, %v1323_v15  ;;  %v1586_v21 = vld [vmem:[%s5572_s16 + $0x508] sm:$0xf] }
  0xcb   : > { %v5769_v56 = vpop.xlane.xlu2 %2326  ;;  %v1327_v52 = vadd.f32 %v1071_v36, %v559_v35  ;;  %v1584_v35 = vld [vmem:[%s5572_s16 + $0x4e8] sm:$0xf]  ;;  %v1330_v36 = vadd.f32 %v1074_v10, %v562_v9  ;;  %v1842_v39 = vunpack.c.l.bf16 %v1586_v21 }
  0xcc   : > { %8373 = vst [vmem:[#allocation27_spill] sm:$0xff] %v5769_v56  ;;  %v5771_v61 = vpop.xlane.xlu1 %2324 }
  0xcd   : > { %8374 = vst [vmem:[#allocation28_spill] sm:$0xff] %v5771_v61  ;;  %v5773_v62 = vpop.xlane.xlu0 %2322  ;;  %v2095_v13 = vadd.f32 %v1839_v59, %v1327_v52  ;;  %v2098_v52 = vadd.f32 %v1842_v39, %v1330_v36  ;;  %v565_v59 = vunpack.c.l.bf16 %v309_v41  ;;  %v311_v36 = vld [vmem:[%s5572_s16 + $0x550] sm:$0xff]   ;;  %v310_v39 = vld [vmem:[%s5572_s16 + $0x540] sm:$0xff]  }
  0xce   : > { %8375 = vst [vmem:[#allocation29_spill] sm:$0xff] %v5773_v62  ;;  %v354_v62 = vld [vmem:[%s5572_s16 + $0x800] sm:$0xff]  }
  0xd0   : > { %2416 = vadd.xlane.f32.xlu2 %v2089_v63  ;;  %v1838_v63 = vunpack.c.l.bf16 %v1582_v49  ;;  %v307_v49 = vld [vmem:[%s5572_s16 + $0x510] sm:$0xff]  }
  0xd1   : > { %2414 = vadd.xlane.f32.xlu1 %v2088_v1  ;;  %v1325_v1 = vadd.f32 %v1069_v46, %v557_v43  ;;  %v1328_v46 = vadd.f32 %v1072_v30, %v560_v29  ;;  %v563_v7 = vunpack.c.l.bf16 %v307_v49  ;;  %v1075_v9 = vunpack.c.h.bf16 %v307_v49 }
  0xd2   : > { %2412 = vadd.xlane.f32.xlu0 %v2087_v2  ;;  %v1837_v2 = vunpack.c.l.bf16 %v1581_v51  ;;  %v2094_v14 = vadd.f32 %v1838_v63, %v1326_v60  ;;  %v1077_v60 = vunpack.c.h.bf16 %v309_v41 }
  0xd3   : > { %v5781_v33 = vpop.xlane.xlu2 %2332  ;;  %v1331_v30 = vadd.f32 %v1075_v9, %v563_v7  ;;  %v1591_v7 = vld [vmem:[%s5572_s16 + $0x558] sm:$0xf]  ;;  %v1590_v9 = vld [vmem:[%s5572_s16 + $0x548] sm:$0xf] }
  0xd4   : > { %8376 = vst [vmem:[#allocation30_spill] sm:$0xff] %v5781_v33  ;;  %v5783_v37 = vpop.xlane.xlu1 %2330  ;;  %v2093_v15 = vadd.f32 %v1837_v2, %v1325_v1  ;;  %v1589_v2 = vld [vmem:[%s5572_s16 + $0x538] sm:$0xf]  ;;  %v1333_v21 = vadd.f32 %v1077_v60, %v565_v59  ;;  %v1592_v59 = vld [vmem:[%s5572_s16 + $0x568] sm:$0xf]  ;;  %v567_v60 = vunpack.c.l.bf16 %v311_v36 }
  0xd5   : > { %8377 = vst [vmem:[#allocation31_spill] sm:$0xff] %v5783_v37  ;;  %v5785_v38 = vpop.xlane.xlu0 %2328  ;;  %v1845_v22 = vunpack.c.l.bf16 %v1589_v2  ;;  %v1079_v2 = vunpack.c.h.bf16 %v311_v36 }
  0xd6   : > { %8378 = vst [vmem:[#allocation32_spill] sm:$0xff] %v5785_v38 }
  0xd8   : > { %2422 = vadd.xlane.f32.xlu2 %v2092_v34  ;;  %v1585_v34 = vld [vmem:[%s5572_s16 + $0x4f8] sm:$0xf] }
  0xd9   : > { %2420 = vadd.xlane.f32.xlu1 %v2091_v47  ;;  %v1841_v43 = vunpack.c.l.bf16 %v1585_v34  ;;  %v1840_v47 = vunpack.c.l.bf16 %v1584_v35  ;;  %v312_v35 = vld [vmem:[%s5572_s16 + $0x560] sm:$0xff]  }
  0xda   : > { %2418 = vadd.xlane.f32.xlu0 %v2090_v48  ;;  %v308_v48 = vld [vmem:[%s5572_s16 + $0x520] sm:$0xff]  }
  0xdb   : > { %v5793_v8 = vpop.xlane.xlu2 %2338  ;;  %v564_v5 = vunpack.c.l.bf16 %v308_v48  ;;  %v1076_v6 = vunpack.c.h.bf16 %v308_v48  ;;  %v2097_v10 = vadd.f32 %v1841_v43, %v1329_v42  ;;  %v568_v42 = vunpack.c.l.bf16 %v312_v35 }
  0xdc   : > { %8379 = vst [vmem:[#allocation33_spill] sm:$0xff] %v5793_v8  ;;  %v5795_v11 = vpop.xlane.xlu1 %2336  ;;  %v1080_v43 = vunpack.c.h.bf16 %v312_v35  ;;  %v2101_v48 = vadd.f32 %v1845_v22, %v1333_v21  ;;  %v1847_v21 = vunpack.c.l.bf16 %v1591_v7  ;;  %v1593_v7 = vld [vmem:[%s5572_s16 + $0x578] sm:$0xf] }
  0xdd   : > { %8380 = vst [vmem:[#allocation34_spill] sm:$0xff] %v5795_v11  ;;  %v5797_v12 = vpop.xlane.xlu0 %2334  ;;  %v1332_v23 = vadd.f32 %v1076_v6, %v564_v5  ;;  %v566_v5 = vunpack.c.l.bf16 %v310_v39  ;;  %v1078_v6 = vunpack.c.h.bf16 %v310_v39  ;;  %v348_v11 = vld [vmem:[%s5572_s16 + $0x7a0] sm:$0xff]  }
  0xde   : > { %8381 = vst [vmem:[#allocation35_spill] sm:$0xff] %v5797_v12 }
  0xdf   : > { %v1334_v22 = vadd.f32 %v1078_v6, %v566_v5  ;;  %v1594_v6 = vld [vmem:[%s5572_s16 + $0x588] sm:$0xf] }
  0xe0   : > { %2428 = vadd.xlane.f32.xlu2 %v2095_v13  ;;  %v2096_v13 = vadd.f32 %v1840_v47, %v1328_v46 }
  0xe1   : > { %2426 = vadd.xlane.f32.xlu1 %v2094_v14  ;;  %v1588_v14 = vld [vmem:[%s5572_s16 + $0x528] sm:$0xf] }
  0xe2   : > { %2424 = vadd.xlane.f32.xlu0 %v2093_v15  ;;  %v1587_v15 = vld [vmem:[%s5572_s16 + $0x518] sm:$0xf]  ;;  %v1844_v29 = vunpack.c.l.bf16 %v1588_v14  ;;  %v315_v14 = vld [vmem:[%s5572_s16 + $0x590] sm:$0xff]  }
  0xe3   : > { %v5805_v51 = vpop.xlane.xlu2 %2344  ;;  %v1843_v34 = vunpack.c.l.bf16 %v1587_v15  ;;  %v1335_v15 = vadd.f32 %v1079_v2, %v567_v60  ;;  %v571_v36 = vunpack.c.l.bf16 %v315_v14  ;;  %v1083_v39 = vunpack.c.h.bf16 %v315_v14 }
  0xe4   : > { %8382 = vst [vmem:[#allocation36_spill] sm:$0xff] %v5805_v51  ;;  %v5807_v63 = vpop.xlane.xlu1 %2342  ;;  %v2100_v49 = vadd.f32 %v1844_v29, %v1332_v23  ;;  %v1846_v23 = vunpack.c.l.bf16 %v1590_v9  ;;  %v314_v29 = vld [vmem:[%s5572_s16 + $0x580] sm:$0xff]   ;;  %v1850_v14 = vunpack.c.l.bf16 %v1594_v6 }
  0xe5   : > { %8383 = vst [vmem:[#allocation37_spill] sm:$0xff] %v5807_v63  ;;  %v5809_v1 = vpop.xlane.xlu0 %2340  ;;  %v2103_v2 = vadd.f32 %v1847_v21, %v1335_v15  ;;  %v1339_v9 = vadd.f32 %v1083_v39, %v571_v36 }
  0xe6   : > { %8384 = vst [vmem:[#allocation38_spill] sm:$0xff] %v5809_v1  ;;  %v2102_v5 = vadd.f32 %v1846_v23, %v1334_v22 }
  0xe8   : > { %2434 = vadd.xlane.f32.xlu2 %v2098_v52  ;;  %v2099_v52 = vadd.f32 %v1843_v34, %v1331_v30  ;;  %v313_v30 = vld [vmem:[%s5572_s16 + $0x570] sm:$0xff]  }
  0xe9   : > { %2432 = vadd.xlane.f32.xlu1 %v2097_v10  ;;  %v1336_v10 = vadd.f32 %v1080_v43, %v568_v42  ;;  %v1081_v60 = vunpack.c.h.bf16 %v313_v30 }
  0xea   : > { %2430 = vadd.xlane.f32.xlu0 %v2096_v13  ;;  %v1848_v13 = vunpack.c.l.bf16 %v1592_v59  ;;  %v569_v59 = vunpack.c.l.bf16 %v313_v30  ;;  %v316_v30 = vld [vmem:[%s5572_s16 + $0x5a0] sm:$0xff]  }
  0xeb   : > { %v5817_v41 = vpop.xlane.xlu2 %2350 }
  0xec   : > { %8385 = vst [vmem:[#allocation39_spill] sm:$0xff] %v5817_v41  ;;  %v5819_v46 = vpop.xlane.xlu1 %2348  ;;  %v2104_v35 = vadd.f32 %v1848_v13, %v1336_v10 }
  0xed   : > { %8386 = vst [vmem:[#allocation40_spill] sm:$0xff] %v5819_v46  ;;  %v5821_v47 = vpop.xlane.xlu0 %2346  ;;  %v342_v46 = vld [vmem:[%s5572_s16 + $0x740] sm:$0xff]  }
  0xee   : > { %8387 = vst [vmem:[#allocation41_spill] sm:$0xff] %v5821_v47 }
  0xf0   : > { %2440 = vadd.xlane.f32.xlu2 %v2101_v48  ;;  %v1595_v48 = vld [vmem:[%s5572_s16 + $0x598] sm:$0xf] }
  0xf1   : > { %2438 = vadd.xlane.f32.xlu1 %v2100_v49  ;;  %v570_v49 = vunpack.c.l.bf16 %v314_v29  ;;  %v1851_v10 = vunpack.c.l.bf16 %v1595_v48  ;;  %v1598_v48 = vld [vmem:[%s5572_s16 + $0x5c8] sm:$0xf] }
  0xf2   : > { %2436 = vadd.xlane.f32.xlu0 %v2099_v52  ;;  %v1082_v52 = vunpack.c.h.bf16 %v314_v29  ;;  %v317_v29 = vld [vmem:[%s5572_s16 + $0x5b0] sm:$0xff]  }
  0xf3   : > { %v5829_v34 = vpop.xlane.xlu2 %2356 }
  0xf4   : > { %8388 = vst [vmem:[#allocation42_spill] sm:$0xff] %v5829_v34  ;;  %v5831_v42 = vpop.xlane.xlu1 %2354  ;;  %v1338_v13 = vadd.f32 %v1082_v52, %v570_v49  ;;  %v1337_v34 = vadd.f32 %v1081_v60, %v569_v59  ;;  %v573_v49 = vunpack.c.l.bf16 %v317_v29  ;;  %v1085_v52 = vunpack.c.h.bf16 %v317_v29 }
  0xf5   : > { %8389 = vst [vmem:[#allocation43_spill] sm:$0xff] %v5831_v42  ;;  %v5833_v43 = vpop.xlane.xlu0 %2352  ;;  %v1849_v42 = vunpack.c.l.bf16 %v1593_v7  ;;  %v572_v59 = vunpack.c.l.bf16 %v316_v30  ;;  %v1084_v60 = vunpack.c.h.bf16 %v316_v30  ;;  %v1854_v7 = vunpack.c.l.bf16 %v1598_v48 }
  0xf6   : > { %8390 = vst [vmem:[#allocation44_spill] sm:$0xff] %v5833_v43  ;;  %v318_v43 = vld [vmem:[%s5572_s16 + $0x5c0] sm:$0xff]   ;;  %v2106_v36 = vadd.f32 %v1850_v14, %v1338_v13  ;;  %v319_v13 = vld [vmem:[%s5572_s16 + $0x5d0] sm:$0xff]  }
  0xf7   : > { %v574_v15 = vunpack.c.l.bf16 %v318_v43  ;;  %v1086_v21 = vunpack.c.h.bf16 %v318_v43  ;;  %v2105_v39 = vadd.f32 %v1849_v42, %v1337_v34  ;;  %v321_v43 = vld [vmem:[%s5572_s16 + $0x5f0] sm:$0xff]   ;;  %v320_v42 = vld [vmem:[%s5572_s16 + $0x5e0] sm:$0xff]   ;;  %v575_v48 = vunpack.c.l.bf16 %v319_v13 }
  0xf8   : > { %2446 = vadd.xlane.f32.xlu2 %v2104_v35  ;;  %v2107_v35 = vadd.f32 %v1851_v10, %v1339_v9  ;;  %v1340_v10 = vadd.f32 %v1084_v60, %v572_v59  ;;  %v577_v30 = vunpack.c.l.bf16 %v321_v43  ;;  %v1600_v60 = vld [vmem:[%s5572_s16 + $0x5e8] sm:$0xf] }
  0xf9   : > { %2444 = vadd.xlane.f32.xlu1 %v2103_v2  ;;  %v1597_v2 = vld [vmem:[%s5572_s16 + $0x5b8] sm:$0xf]  ;;  %v1342_v6 = vadd.f32 %v1086_v21, %v574_v15 }
  0xfa   : > { %2442 = vadd.xlane.f32.xlu0 %v2102_v5  ;;  %v1596_v5 = vld [vmem:[%s5572_s16 + $0x5a8] sm:$0xf]  ;;  %v1853_v9 = vunpack.c.l.bf16 %v1597_v2  ;;  %v1599_v2 = vld [vmem:[%s5572_s16 + $0x5d8] sm:$0xf] }
  0xfb   : > { %v5841_v41 = vpop.xlane.xlu2 %2362  ;;  %v1852_v34 = vunpack.c.l.bf16 %v1596_v5  ;;  %v2110_v29 = vadd.f32 %v1854_v7, %v1342_v6 }
  0xfc   : > { %8391 = vst [vmem:[#allocation45_spill] sm:$0xff] %v5841_v41  ;;  %v5843_v22 = vpop.xlane.xlu1 %2360  ;;  %v1341_v41 = vadd.f32 %v1085_v52, %v573_v49  ;;  %v1087_v49 = vunpack.c.h.bf16 %v319_v13  ;;  %v322_v13 = vld [vmem:[%s5572_s16 + $0x600] sm:$0xff]  }
  0xfd   : > { %8392 = vst [vmem:[#allocation46_spill] sm:$0xff] %v5843_v22  ;;  %v5845_v23 = vpop.xlane.xlu0 %2358  ;;  %v2108_v59 = vadd.f32 %v1852_v34, %v1340_v10 }
  0xfe   : > { %8393 = vst [vmem:[#allocation47_spill] sm:$0xff] %v5845_v23  ;;  %v1089_v23 = vunpack.c.h.bf16 %v321_v43  ;;  %v2109_v52 = vadd.f32 %v1853_v9, %v1341_v41  ;;  %v1856_v43 = vunpack.c.l.bf16 %v1600_v60 }
 0x100   : > { %2452 = vadd.xlane.f32.xlu2 %v2107_v35  ;;  %v1601_v35 = vld [vmem:[%s5572_s16 + $0x5f8] sm:$0xf]  ;;  %v1345_v5 = vadd.f32 %v1089_v23, %v577_v30 }
 0x101   : > { %2450 = vadd.xlane.f32.xlu1 %v2106_v36  ;;  %v576_v36 = vunpack.c.l.bf16 %v320_v42  ;;  %v1857_v6 = vunpack.c.l.bf16 %v1601_v35  ;;  %v1604_v35 = vld [vmem:[%s5572_s16 + $0x628] sm:$0xf] }
 0x102   : > { %2448 = vadd.xlane.f32.xlu0 %v2105_v39  ;;  %v1088_v39 = vunpack.c.h.bf16 %v320_v42  ;;  %v323_v42 = vld [vmem:[%s5572_s16 + $0x610] sm:$0xff]  }
 0x103   : > { %v5853_v14 = vpop.xlane.xlu2 %2368  ;;  %v2113_v34 = vadd.f32 %v1857_v6, %v1345_v5 }
 0x104   : > { %8394 = vst [vmem:[#allocation48_spill] sm:$0xff] %v5853_v14  ;;  %v5855_v15 = vpop.xlane.xlu1 %2366  ;;  %v1344_v7 = vadd.f32 %v1088_v39, %v576_v36  ;;  %v1343_v14 = vadd.f32 %v1087_v49, %v575_v48  ;;  %v579_v36 = vunpack.c.l.bf16 %v323_v42  ;;  %v1091_v39 = vunpack.c.h.bf16 %v323_v42 }
 0x105   : > { %8395 = vst [vmem:[#allocation49_spill] sm:$0xff] %v5855_v15  ;;  %v5857_v21 = vpop.xlane.xlu0 %2364  ;;  %v1855_v15 = vunpack.c.l.bf16 %v1599_v2  ;;  %v578_v48 = vunpack.c.l.bf16 %v322_v13  ;;  %v1090_v49 = vunpack.c.h.bf16 %v322_v13  ;;  %v1860_v2 = vunpack.c.l.bf16 %v1604_v35 }
 0x106   : > { %8396 = vst [vmem:[#allocation50_spill] sm:$0xff] %v5857_v21  ;;  %v324_v21 = vld [vmem:[%s5572_s16 + $0x620] sm:$0xff]  }
 0x107   : > { %v580_v41 = vunpack.c.l.bf16 %v324_v21  ;;  %v1092_v9 = vunpack.c.h.bf16 %v324_v21  ;;  %v2111_v30 = vadd.f32 %v1855_v15, %v1343_v14  ;;  %v327_v21 = vld [vmem:[%s5572_s16 + $0x650] sm:$0xff]   ;;  %v1346_v6 = vadd.f32 %v1090_v49, %v578_v48  ;;  %v326_v15 = vld [vmem:[%s5572_s16 + $0x640] sm:$0xff]   ;;  %v1606_v49 = vld [vmem:[%s5572_s16 + $0x648] sm:$0xf] }
 0x108   : > { %2458 = vadd.xlane.f32.xlu2 %v2110_v29  ;;  %v2112_v29 = vadd.f32 %v1856_v43, %v1344_v7  ;;  %v325_v7 = vld [vmem:[%s5572_s16 + $0x630] sm:$0xff]   ;;  %v583_v13 = vunpack.c.l.bf16 %v327_v21 }
 0x109   : > { %2456 = vadd.xlane.f32.xlu1 %v2109_v52  ;;  %v1603_v52 = vld [vmem:[%s5572_s16 + $0x618] sm:$0xf]  ;;  %v1348_v60 = vadd.f32 %v1092_v9, %v580_v41  ;;  %v581_v35 = vunpack.c.l.bf16 %v325_v7 }
 0x10a   : > { %2454 = vadd.xlane.f32.xlu0 %v2108_v59  ;;  %v1602_v59 = vld [vmem:[%s5572_s16 + $0x608] sm:$0xf]  ;;  %v1859_v5 = vunpack.c.l.bf16 %v1603_v52  ;;  %v1605_v52 = vld [vmem:[%s5572_s16 + $0x638] sm:$0xf] }
 0x10b   : > { %v5865_v22 = vpop.xlane.xlu2 %2374  ;;  %v1858_v14 = vunpack.c.l.bf16 %v1602_v59  ;;  %v2116_v42 = vadd.f32 %v1860_v2, %v1348_v60 }
 0x10c   : > { %8397 = vst [vmem:[#allocation51_spill] sm:$0xff] %v5865_v22  ;;  %v5867_v23 = vpop.xlane.xlu1 %2372  ;;  %v1347_v22 = vadd.f32 %v1091_v39, %v579_v36  ;;  %v1093_v36 = vunpack.c.h.bf16 %v325_v7  ;;  %v328_v7 = vld [vmem:[%s5572_s16 + $0x660] sm:$0xff]  }
 0x10d   : > { %8398 = vst [vmem:[#allocation52_spill] sm:$0xff] %v5867_v23  ;;  %v5869_v10 = vpop.xlane.xlu0 %2370  ;;  %v2114_v48 = vadd.f32 %v1858_v14, %v1346_v6 }
 0x10e   : > { %8399 = vst [vmem:[#allocation53_spill] sm:$0xff] %v5869_v10  ;;  %v1095_v10 = vunpack.c.h.bf16 %v327_v21  ;;  %v2115_v39 = vadd.f32 %v1859_v5, %v1347_v22  ;;  %v1862_v21 = vunpack.c.l.bf16 %v1606_v49 }
 0x110   : > { %2464 = vadd.xlane.f32.xlu2 %v2113_v34  ;;  %v1607_v34 = vld [vmem:[%s5572_s16 + $0x658] sm:$0xf]  ;;  %v1351_v59 = vadd.f32 %v1095_v10, %v583_v13 }
 0x111   : > { %2462 = vadd.xlane.f32.xlu1 %v2112_v29  ;;  %v582_v29 = vunpack.c.l.bf16 %v326_v15  ;;  %v1863_v60 = vunpack.c.l.bf16 %v1607_v34  ;;  %v1610_v34 = vld [vmem:[%s5572_s16 + $0x688] sm:$0xf] }
 0x112   : > { %2460 = vadd.xlane.f32.xlu0 %v2111_v30  ;;  %v1094_v30 = vunpack.c.h.bf16 %v326_v15  ;;  %v329_v15 = vld [vmem:[%s5572_s16 + $0x670] sm:$0xff]  }
 0x113   : > { %v5877_v43 = vpop.xlane.xlu2 %2380  ;;  %v2119_v14 = vadd.f32 %v1863_v60, %v1351_v59 }
 0x114   : > { %8400 = vst [vmem:[#allocation54_spill] sm:$0xff] %v5877_v43  ;;  %v5879_v41 = vpop.xlane.xlu1 %2378  ;;  %v1350_v2 = vadd.f32 %v1094_v30, %v582_v29  ;;  %v1349_v43 = vadd.f32 %v1093_v36, %v581_v35  ;;  %v585_v29 = vunpack.c.l.bf16 %v329_v15  ;;  %v1097_v30 = vunpack.c.h.bf16 %v329_v15 }
 0x115   : > { %8401 = vst [vmem:[#allocation55_spill] sm:$0xff] %v5879_v41  ;;  %v5881_v9 = vpop.xlane.xlu0 %2376  ;;  %v1861_v41 = vunpack.c.l.bf16 %v1605_v52  ;;  %v584_v35 = vunpack.c.l.bf16 %v328_v7  ;;  %v1096_v36 = vunpack.c.h.bf16 %v328_v7  ;;  %v1866_v52 = vunpack.c.l.bf16 %v1610_v34 }
 0x116   : > { %8402 = vst [vmem:[#allocation56_spill] sm:$0xff] %v5881_v9  ;;  %v330_v9 = vld [vmem:[%s5572_s16 + $0x680] sm:$0xff]  }
 0x117   : > { %v586_v22 = vunpack.c.l.bf16 %v330_v9  ;;  %v1098_v5 = vunpack.c.h.bf16 %v330_v9  ;;  %v2117_v13 = vadd.f32 %v1861_v41, %v1349_v43  ;;  %v333_v9 = vld [vmem:[%s5572_s16 + $0x6b0] sm:$0xff]   ;;  %v1352_v60 = vadd.f32 %v1096_v36, %v584_v35  ;;  %v332_v41 = vld [vmem:[%s5572_s16 + $0x6a0] sm:$0xff]   ;;  %v1612_v36 = vld [vmem:[%s5572_s16 + $0x6a8] sm:$0xf] }
 0x118   : > { %2470 = vadd.xlane.f32.xlu2 %v2116_v42  ;;  %v2118_v42 = vadd.f32 %v1862_v21, %v1350_v2  ;;  %v331_v2 = vld [vmem:[%s5572_s16 + $0x690] sm:$0xff]   ;;  %v589_v7 = vunpack.c.l.bf16 %v333_v9 }
 0x119   : > { %2468 = vadd.xlane.f32.xlu1 %v2115_v39  ;;  %v1609_v39 = vld [vmem:[%s5572_s16 + $0x678] sm:$0xf]  ;;  %v1354_v49 = vadd.f32 %v1098_v5, %v586_v22  ;;  %v587_v34 = vunpack.c.l.bf16 %v331_v2 }
 0x11a   : > { %2466 = vadd.xlane.f32.xlu0 %v2114_v48  ;;  %v1608_v48 = vld [vmem:[%s5572_s16 + $0x668] sm:$0xf]  ;;  %v1865_v59 = vunpack.c.l.bf16 %v1609_v39  ;;  %v1611_v39 = vld [vmem:[%s5572_s16 + $0x698] sm:$0xf] }
 0x11b   : > { %v5889_v23 = vpop.xlane.xlu2 %2386  ;;  %v1864_v43 = vunpack.c.l.bf16 %v1608_v48  ;;  %v2122_v15 = vadd.f32 %v1866_v52, %v1354_v49 }
 0x11c   : > { %8403 = vst [vmem:[#allocation57_spill] sm:$0xff] %v5889_v23  ;;  %v5891_v10 = vpop.xlane.xlu1 %2384  ;;  %v1353_v23 = vadd.f32 %v1097_v30, %v585_v29  ;;  %v1099_v29 = vunpack.c.h.bf16 %v331_v2  ;;  %v334_v2 = vld [vmem:[%s5572_s16 + $0x6c0] sm:$0xff]  }
 0x11d   : > { %8404 = vst [vmem:[#allocation58_spill] sm:$0xff] %v5891_v10  ;;  %v5893_v6 = vpop.xlane.xlu0 %2382  ;;  %v1101_v10 = vunpack.c.h.bf16 %v333_v9  ;;  %v2120_v35 = vadd.f32 %v1864_v43, %v1352_v60  ;;  %v1868_v9 = vunpack.c.l.bf16 %v1612_v36 }
 0x11e   : > { %8405 = vst [vmem:[#allocation59_spill] sm:$0xff] %v5893_v6  ;;  %v2121_v30 = vadd.f32 %v1865_v59, %v1353_v23 }
 0x11f   : > { %v1357_v48 = vadd.f32 %v1101_v10, %v589_v7 }
 0x120   : > { %2476 = vadd.xlane.f32.xlu2 %v2119_v14  ;;  %v1613_v14 = vld [vmem:[%s5572_s16 + $0x6b8] sm:$0xf] }
 0x121   : > { %2474 = vadd.xlane.f32.xlu1 %v2118_v42  ;;  %v588_v42 = vunpack.c.l.bf16 %v332_v41  ;;  %v1869_v49 = vunpack.c.l.bf16 %v1613_v14  ;;  %v1616_v14 = vld [vmem:[%s5572_s16 + $0x6e8] sm:$0xf] }
 0x122   : > { %2472 = vadd.xlane.f32.xlu0 %v2117_v13  ;;  %v1100_v13 = vunpack.c.h.bf16 %v332_v41  ;;  %v335_v41 = vld [vmem:[%s5572_s16 + $0x6d0] sm:$0xff]  }
 0x123   : > { %v5901_v21 = vpop.xlane.xlu2 %2392  ;;  %v2125_v43 = vadd.f32 %v1869_v49, %v1357_v48 }
 0x124   : > { %8406 = vst [vmem:[#allocation60_spill] sm:$0xff] %v5901_v21  ;;  %v5903_v22 = vpop.xlane.xlu1 %2390  ;;  %v1356_v52 = vadd.f32 %v1100_v13, %v588_v42  ;;  %v1355_v21 = vadd.f32 %v1099_v29, %v587_v34  ;;  %v591_v42 = vunpack.c.l.bf16 %v335_v41  ;;  %v1103_v13 = vunpack.c.h.bf16 %v335_v41 }
 0x125   : > { %8407 = vst [vmem:[#allocation61_spill] sm:$0xff] %v5903_v22  ;;  %v5905_v5 = vpop.xlane.xlu0 %2388  ;;  %v1867_v22 = vunpack.c.l.bf16 %v1611_v39  ;;  %v590_v34 = vunpack.c.l.bf16 %v334_v2  ;;  %v1102_v29 = vunpack.c.h.bf16 %v334_v2  ;;  %v1872_v39 = vunpack.c.l.bf16 %v1616_v14 }
 0x126   : > { %8408 = vst [vmem:[#allocation62_spill] sm:$0xff] %v5905_v5  ;;  %v336_v5 = vld [vmem:[%s5572_s16 + $0x6e0] sm:$0xff]  }
 0x127   : > { %v592_v23 = vunpack.c.l.bf16 %v336_v5  ;;  %v1104_v59 = vunpack.c.h.bf16 %v336_v5  ;;  %v2123_v7 = vadd.f32 %v1867_v22, %v1355_v21  ;;  %v339_v5 = vld [vmem:[%s5572_s16 + $0x710] sm:$0xff]   ;;  %v1358_v49 = vadd.f32 %v1102_v29, %v590_v34  ;;  %v338_v22 = vld [vmem:[%s5572_s16 + $0x700] sm:$0xff]   ;;  %v1618_v29 = vld [vmem:[%s5572_s16 + $0x708] sm:$0xf] }
 0x128   : > { %2482 = vadd.xlane.f32.xlu2 %v2122_v15  ;;  %v2124_v15 = vadd.f32 %v1868_v9, %v1356_v52  ;;  %v337_v52 = vld [vmem:[%s5572_s16 + $0x6f0] sm:$0xff]   ;;  %v595_v2 = vunpack.c.l.bf16 %v339_v5 }
 0x129   : > { %2480 = vadd.xlane.f32.xlu1 %v2121_v30  ;;  %v1615_v30 = vld [vmem:[%s5572_s16 + $0x6d8] sm:$0xf]  ;;  %v1360_v36 = vadd.f32 %v1104_v59, %v592_v23  ;;  %v593_v14 = vunpack.c.l.bf16 %v337_v52 }
 0x12a   : > { %2478 = vadd.xlane.f32.xlu0 %v2120_v35  ;;  %v1614_v35 = vld [vmem:[%s5572_s16 + $0x6c8] sm:$0xf]  ;;  %v1871_v48 = vunpack.c.l.bf16 %v1615_v30  ;;  %v1617_v30 = vld [vmem:[%s5572_s16 + $0x6f8] sm:$0xf] }
 0x12b   : > { %v5913_v6 = vpop.xlane.xlu2 %2398  ;;  %v1870_v21 = vunpack.c.l.bf16 %v1614_v35  ;;  %v2128_v41 = vadd.f32 %v1872_v39, %v1360_v36 }
 0x12c   : > { %8409 = vst [vmem:[#allocation63_spill] sm:$0xff] %v5913_v6  ;;  %v5915_v10 = vpop.xlane.xlu1 %2396  ;;  %v1359_v6 = vadd.f32 %v1103_v13, %v591_v42  ;;  %v1105_v42 = vunpack.c.h.bf16 %v337_v52  ;;  %v340_v52 = vld [vmem:[%s5572_s16 + $0x720] sm:$0xff]  }
 0x12d   : > { %8410 = vst [vmem:[#allocation64_spill] sm:$0xff] %v5915_v10  ;;  %v5917_v60 = vpop.xlane.xlu0 %2394  ;;  %v2126_v34 = vadd.f32 %v1870_v21, %v1358_v49 }
 0x12e   : > { %8411 = vst [vmem:[#allocation65_spill] sm:$0xff] %v5917_v60  ;;  %v1107_v60 = vunpack.c.h.bf16 %v339_v5  ;;  %v2127_v13 = vadd.f32 %v1871_v48, %v1359_v6  ;;  %v1874_v5 = vunpack.c.l.bf16 %v1618_v29  ;;  %v1361_v10 = vadd.f32 %v1105_v42, %v593_v14 }
 0x12f   : > { %v598_v6 = vunpack.c.l.bf16 %v342_v46  ;;  %v1110_v48 = vunpack.c.h.bf16 %v342_v46  ;;  %v596_v14 = vunpack.c.l.bf16 %v340_v52  ;;  %v1108_v42 = vunpack.c.h.bf16 %v340_v52  ;;  %v345_v46 = vld [vmem:[%s5572_s16 + $0x770] sm:$0xff]  }
 0x130   : > { %2488 = vadd.xlane.f32.xlu2 %v2125_v43  ;;  %v1619_v43 = vld [vmem:[%s5572_s16 + $0x718] sm:$0xf]  ;;  %v1363_v35 = vadd.f32 %v1107_v60, %v595_v2  ;;  %v601_v52 = vunpack.c.l.bf16 %v345_v46  ;;  %v1113_v1 = vunpack.c.h.bf16 %v345_v46 }
 0x131   : > { %2486 = vadd.xlane.f32.xlu1 %v2124_v15  ;;  %v594_v15 = vunpack.c.l.bf16 %v338_v22  ;;  %v1875_v36 = vunpack.c.l.bf16 %v1619_v43  ;;  %v1622_v43 = vld [vmem:[%s5572_s16 + $0x748] sm:$0xf]  ;;  %v1366_v29 = vadd.f32 %v1110_v48, %v598_v6 }
 0x132   : > { %2484 = vadd.xlane.f32.xlu0 %v2123_v7  ;;  %v1106_v7 = vunpack.c.h.bf16 %v338_v22  ;;  %v341_v22 = vld [vmem:[%s5572_s16 + $0x730] sm:$0xff]  }
 0x133   : > { %v5925_v9 = vpop.xlane.xlu2 %2404  ;;  %v2131_v21 = vadd.f32 %v1875_v36, %v1363_v35  ;;  %v1364_v36 = vadd.f32 %v1108_v42, %v596_v14  ;;  %v1624_v42 = vld [vmem:[%s5572_s16 + $0x768] sm:$0xf] }
 0x134   : > { %v5927_v23 = vpop.xlane.xlu1 %2402  ;;  %v1362_v39 = vadd.f32 %v1106_v7, %v594_v15  ;;  %v597_v15 = vunpack.c.l.bf16 %v341_v22  ;;  %v1109_v7 = vunpack.c.h.bf16 %v341_v22  ;;  %v1880_v46 = vunpack.c.l.bf16 %v1624_v42 }
 0x135   : > { %v5929_v59 = vpop.xlane.xlu0 %2400 }
 0x136   : > { %8412 = vst [vmem:[#allocation66_spill] sm:$0xff] %v5929_v59  ;;  %v1873_v59 = vunpack.c.l.bf16 %v1617_v30  ;;  %v1878_v30 = vunpack.c.l.bf16 %v1622_v43  ;;  %v1365_v51 = vadd.f32 %v1109_v7, %v597_v15 }
 0x138   : > { %2494 = vadd.xlane.f32.xlu2 %v2128_v41  ;;  %v2130_v41 = vadd.f32 %v1874_v5, %v1362_v39  ;;  %v2129_v2 = vadd.f32 %v1873_v59, %v1361_v10  ;;  %v344_v59 = vld [vmem:[%s5572_s16 + $0x760] sm:$0xff]   ;;  %v343_v39 = vld [vmem:[%s5572_s16 + $0x750] sm:$0xff]   ;;  %v2134_v22 = vadd.f32 %v1878_v30, %v1366_v29 }
 0x139   : > { %2492 = vadd.xlane.f32.xlu1 %v2127_v13  ;;  %v1621_v13 = vld [vmem:[%s5572_s16 + $0x738] sm:$0xf]  ;;  %v599_v43 = vunpack.c.l.bf16 %v343_v39  ;;  %v1111_v15 = vunpack.c.h.bf16 %v343_v39  ;;  %v346_v39 = vld [vmem:[%s5572_s16 + $0x780] sm:$0xff]  }
 0x13a   : > { %2490 = vadd.xlane.f32.xlu0 %v2126_v34  ;;  %v1620_v34 = vld [vmem:[%s5572_s16 + $0x728] sm:$0xf]  ;;  %v1877_v35 = vunpack.c.l.bf16 %v1621_v13  ;;  %v1623_v13 = vld [vmem:[%s5572_s16 + $0x758] sm:$0xf] }
 0x13b   : > { %v5937_v47 = vpop.xlane.xlu2 %2410  ;;  %v1876_v10 = vunpack.c.l.bf16 %v1620_v34  ;;  %v1369_v34 = vadd.f32 %v1113_v1, %v601_v52  ;;  %v1367_v63 = vadd.f32 %v1111_v15, %v599_v43  ;;  %v1879_v8 = vunpack.c.l.bf16 %v1623_v13 }
 0x13c   : > { %v5939_v60 = vpop.xlane.xlu1 %2408  ;;  %v2133_v7 = vadd.f32 %v1877_v35, %v1365_v51  ;;  %v604_v51 = vunpack.c.l.bf16 %v348_v11  ;;  %v1116_v35 = vunpack.c.h.bf16 %v348_v11  ;;  %v602_v43 = vunpack.c.l.bf16 %v346_v39  ;;  %v351_v11 = vld [vmem:[%s5572_s16 + $0x7d0] sm:$0xff]  }
 0x13d   : > { %v5941_v49 = vpop.xlane.xlu0 %2406  ;;  %v2132_v14 = vadd.f32 %v1876_v10, %v1364_v36  ;;  %v2135_v52 = vadd.f32 %v1879_v8, %v1367_v63  ;;  %v1114_v15 = vunpack.c.h.bf16 %v346_v39  ;;  %v350_v63 = vld [vmem:[%s5572_s16 + $0x7c0] sm:$0xff]   ;;  %v607_v39 = vunpack.c.l.bf16 %v351_v11 }
 0x13e   : > { %v1372_v42 = vadd.f32 %v1116_v35, %v604_v51  ;;  %v1119_v37 = vunpack.c.h.bf16 %v351_v11 }
 0x140   : > { %2500 = vadd.xlane.f32.xlu2 %v2131_v21  ;;  %v1625_v21 = vld [vmem:[%s5572_s16 + $0x778] sm:$0xf] }
 0x141   : > { %2498 = vadd.xlane.f32.xlu1 %v2130_v41  ;;  %v600_v41 = vunpack.c.l.bf16 %v344_v59  ;;  %v1881_v29 = vunpack.c.l.bf16 %v1625_v21  ;;  %v1628_v21 = vld [vmem:[%s5572_s16 + $0x7a8] sm:$0xf] }
 0x142   : > { %2496 = vadd.xlane.f32.xlu0 %v2129_v2  ;;  %v1112_v2 = vunpack.c.h.bf16 %v344_v59  ;;  %v347_v59 = vld [vmem:[%s5572_s16 + $0x790] sm:$0xff]   ;;  %v1884_v13 = vunpack.c.l.bf16 %v1628_v21 }
 0x143   : > { %v5949_v5 = vpop.xlane.xlu2 %2416  ;;  %v2137_v10 = vadd.f32 %v1881_v29, %v1369_v34  ;;  %v1370_v29 = vadd.f32 %v1114_v15, %v602_v43  ;;  %v1630_v15 = vld [vmem:[%s5572_s16 + $0x7c8] sm:$0xf] }
 0x144   : > { %v5951_v6 = vpop.xlane.xlu1 %2414  ;;  %v1368_v30 = vadd.f32 %v1112_v2, %v600_v41  ;;  %v603_v41 = vunpack.c.l.bf16 %v347_v59  ;;  %v1115_v2 = vunpack.c.h.bf16 %v347_v59  ;;  %v2140_v59 = vadd.f32 %v1884_v13, %v1372_v42 }
 0x145   : > { %v5953_v48 = vpop.xlane.xlu0 %2412  ;;  %v1886_v11 = vunpack.c.l.bf16 %v1630_v15 }
 0x146   : > { %v1371_v33 = vadd.f32 %v1115_v2, %v603_v41 }
 0x148   : > { %2506 = vadd.xlane.f32.xlu2 %v2134_v22  ;;  %v2136_v22 = vadd.f32 %v1880_v46, %v1368_v30  ;;  %v349_v30 = vld [vmem:[%s5572_s16 + $0x7b0] sm:$0xff]  }
 0x149   : > { %2504 = vadd.xlane.f32.xlu1 %v2133_v7  ;;  %v1627_v7 = vld [vmem:[%s5572_s16 + $0x798] sm:$0xf]  ;;  %v605_v21 = vunpack.c.l.bf16 %v349_v30  ;;  %v1117_v41 = vunpack.c.h.bf16 %v349_v30  ;;  %v352_v30 = vld [vmem:[%s5572_s16 + $0x7e0] sm:$0xff]  }
 0x14a   : > { %2502 = vadd.xlane.f32.xlu0 %v2132_v14  ;;  %v1626_v14 = vld [vmem:[%s5572_s16 + $0x788] sm:$0xf]  ;;  %v1883_v34 = vunpack.c.l.bf16 %v1627_v7  ;;  %v1629_v7 = vld [vmem:[%s5572_s16 + $0x7b8] sm:$0xf] }
 0x14b   : > { %v5961_v12 = vpop.xlane.xlu2 %2422  ;;  %v1882_v8 = vunpack.c.l.bf16 %v1626_v14  ;;  %v1375_v14 = vadd.f32 %v1119_v37, %v607_v39  ;;  %v1373_v38 = vadd.f32 %v1117_v41, %v605_v21  ;;  %v1885_v56 = vunpack.c.l.bf16 %v1629_v7 }
 0x14c   : > { %v5963_v1 = vpop.xlane.xlu1 %2420  ;;  %v2139_v2 = vadd.f32 %v1883_v34, %v1371_v33  ;;  %v610_v33 = vunpack.c.l.bf16 %v354_v62  ;;  %v1122_v34 = vunpack.c.h.bf16 %v354_v62  ;;  %v608_v21 = vunpack.c.l.bf16 %v352_v30  ;;  %v357_v62 = vld [vmem:[%s5572_s16 + $0x830] sm:$0xff]  }
 0x14d   : > { %v5965_v36 = vpop.xlane.xlu0 %2418  ;;  %v2138_v43 = vadd.f32 %v1882_v8, %v1370_v29  ;;  %v2141_v39 = vadd.f32 %v1885_v56, %v1373_v38  ;;  %v1120_v41 = vunpack.c.h.bf16 %v352_v30  ;;  %v356_v38 = vld [vmem:[%s5572_s16 + $0x820] sm:$0xff]   ;;  %v613_v30 = vunpack.c.l.bf16 %v357_v62 }
 0x14e   : > { %v1378_v15 = vadd.f32 %v1122_v34, %v610_v33  ;;  %v1125_v26 = vunpack.c.h.bf16 %v357_v62 }
 0x150   : > { %2512 = vadd.xlane.f32.xlu2 %v2137_v10  ;;  %v1631_v10 = vld [vmem:[%s5572_s16 + $0x7d8] sm:$0xf] }
 0x151   : > { %2510 = vadd.xlane.f32.xlu1 %v2136_v22  ;;  %v606_v22 = vunpack.c.l.bf16 %v350_v63  ;;  %v1887_v42 = vunpack.c.l.bf16 %v1631_v10  ;;  %v1634_v10 = vld [vmem:[%s5572_s16 + $0x808] sm:$0xf] }
 0x152   : > { %2508 = vadd.xlane.f32.xlu0 %v2135_v52  ;;  %v1118_v52 = vunpack.c.h.bf16 %v350_v63  ;;  %v353_v63 = vld [vmem:[%s5572_s16 + $0x7f0] sm:$0xff]   ;;  %v1890_v7 = vunpack.c.l.bf16 %v1634_v10 }
 0x153   : > { %v5973_v46 = vpop.xlane.xlu2 %2428  ;;  %v2143_v8 = vadd.f32 %v1887_v42, %v1375_v14  ;;  %v1376_v42 = vadd.f32 %v1120_v41, %v608_v21  ;;  %v1636_v41 = vld [vmem:[%s5572_s16 + $0x828] sm:$0xf] }
 0x154   : > { %v5975_v51 = vpop.xlane.xlu1 %2426  ;;  %v1374_v13 = vadd.f32 %v1118_v52, %v606_v22  ;;  %v609_v22 = vunpack.c.l.bf16 %v353_v63  ;;  %v1121_v52 = vunpack.c.h.bf16 %v353_v63  ;;  %v2146_v63 = vadd.f32 %v1890_v7, %v1378_v15 }
 0x155   : > { %v5977_v35 = vpop.xlane.xlu0 %2424  ;;  %v1892_v62 = vunpack.c.l.bf16 %v1636_v41 }
 0x156   : > { %v1377_v17 = vadd.f32 %v1121_v52, %v609_v22 }
 0x158   : > { %2518 = vadd.xlane.f32.xlu2 %v2140_v59  ;;  %v2142_v59 = vadd.f32 %v1886_v11, %v1374_v13  ;;  %v355_v13 = vld [vmem:[%s5572_s16 + $0x810] sm:$0xff]  }
 0x159   : > { %2516 = vadd.xlane.f32.xlu1 %v2139_v2  ;;  %v1633_v2 = vld [vmem:[%s5572_s16 + $0x7f8] sm:$0xf]  ;;  %v611_v10 = vunpack.c.l.bf16 %v355_v13  ;;  %v1123_v22 = vunpack.c.h.bf16 %v355_v13  ;;  %v358_v13 = vld [vmem:[%s5572_s16 + $0x840] sm:$0xff]  }
 0x15a   : > { %2514 = vadd.xlane.f32.xlu0 %v2138_v43  ;;  %v1632_v43 = vld [vmem:[%s5572_s16 + $0x7e8] sm:$0xf]  ;;  %v1889_v14 = vunpack.c.l.bf16 %v1633_v2  ;;  %v1635_v2 = vld [vmem:[%s5572_s16 + $0x818] sm:$0xf] }
 0x15b   : > { %v5985_v61 = vpop.xlane.xlu2 %2434  ;;  %v1888_v56 = vunpack.c.l.bf16 %v1632_v43  ;;  %v1381_v43 = vadd.f32 %v1125_v26, %v613_v30  ;;  %v1379_v28 = vadd.f32 %v1123_v22, %v611_v10  ;;  %v1891_v50 = vunpack.c.l.bf16 %v1635_v2 }
 0x15c   : > { %v5987_v37 = vpop.xlane.xlu1 %2432  ;;  %v2145_v52 = vadd.f32 %v1889_v14, %v1377_v17  ;;  %v616_v17 = vunpack.c.l.bf16 %v360_v55  ;;  %v1128_v14 = vunpack.c.h.bf16 %v360_v55  ;;  %v614_v10 = vunpack.c.l.bf16 %v358_v13  ;;  %v363_v55 = vld [vmem:[%s5572_s16 + $0x890] sm:$0xff]  }
 0x15d   : > { %v5989_v29 = vpop.xlane.xlu0 %2430  ;;  %v2144_v21 = vadd.f32 %v1888_v56, %v1376_v42  ;;  %v2147_v30 = vadd.f32 %v1891_v50, %v1379_v28  ;;  %v1126_v22 = vunpack.c.h.bf16 %v358_v13  ;;  %v362_v28 = vld [vmem:[%s5572_s16 + $0x880] sm:$0xff]   ;;  %v619_v13 = vunpack.c.l.bf16 %v363_v55 }
 0x15e   : > { %v1384_v41 = vadd.f32 %v1128_v14, %v616_v17  ;;  %v1131_v25 = vunpack.c.h.bf16 %v363_v55 }
 0x160   : > { %2524 = vadd.xlane.f32.xlu2 %v2143_v8  ;;  %v1637_v8 = vld [vmem:[%s5572_s16 + $0x838] sm:$0xf] }
 0x161   : > { %2522 = vadd.xlane.f32.xlu1 %v2142_v59  ;;  %v612_v59 = vunpack.c.l.bf16 %v356_v38  ;;  %v1893_v15 = vunpack.c.l.bf16 %v1637_v8  ;;  %v1640_v8 = vld [vmem:[%s5572_s16 + $0x868] sm:$0xf] }
 0x162   : > { %2520 = vadd.xlane.f32.xlu0 %v2141_v39  ;;  %v1124_v39 = vunpack.c.h.bf16 %v356_v38  ;;  %v359_v38 = vld [vmem:[%s5572_s16 + $0x850] sm:$0xff]   ;;  %v1896_v2 = vunpack.c.l.bf16 %v1640_v8 }
 0x163   : > { %v5997_v11 = vpop.xlane.xlu2 %2440  ;;  %v2149_v56 = vadd.f32 %v1893_v15, %v1381_v43  ;;  %v1382_v15 = vadd.f32 %v1126_v22, %v614_v10  ;;  %v1642_v22 = vld [vmem:[%s5572_s16 + $0x888] sm:$0xf] }
 0x164   : > { %v5999_v33 = vpop.xlane.xlu1 %2438  ;;  %v1380_v7 = vadd.f32 %v1124_v39, %v612_v59  ;;  %v615_v59 = vunpack.c.l.bf16 %v359_v38  ;;  %v1127_v39 = vunpack.c.h.bf16 %v359_v38  ;;  %v2152_v38 = vadd.f32 %v1896_v2, %v1384_v41 }
 0x165   : > { %v6001_v34 = vpop.xlane.xlu0 %2436  ;;  %v1898_v55 = vunpack.c.l.bf16 %v1642_v22 }
 0x166   : > { %v1383_v18 = vadd.f32 %v1127_v39, %v615_v59 }
 0x168   : > { %2530 = vadd.xlane.f32.xlu2 %v2146_v63  ;;  %v2148_v63 = vadd.f32 %v1892_v62, %v1380_v7  ;;  %v361_v7 = vld [vmem:[%s5572_s16 + $0x870] sm:$0xff]  }
 0x169   : > { %2528 = vadd.xlane.f32.xlu1 %v2145_v52  ;;  %v1639_v52 = vld [vmem:[%s5572_s16 + $0x858] sm:$0xf]  ;;  %v617_v8 = vunpack.c.l.bf16 %v361_v7  ;;  %v1129_v59 = vunpack.c.h.bf16 %v361_v7  ;;  %v364_v7 = vld [vmem:[%s5572_s16 + $0x8a0] sm:$0xff]  }
 0x16a   : > { %2526 = vadd.xlane.f32.xlu0 %v2144_v21  ;;  %v1638_v21 = vld [vmem:[%s5572_s16 + $0x848] sm:$0xf]  ;;  %v1895_v43 = vunpack.c.l.bf16 %v1639_v52  ;;  %v1641_v52 = vld [vmem:[%s5572_s16 + $0x878] sm:$0xf] }
 0x16b   : > { %v6009_v53 = vpop.xlane.xlu2 %2446  ;;  %v1894_v50 = vunpack.c.l.bf16 %v1638_v21  ;;  %v1387_v21 = vadd.f32 %v1131_v25, %v619_v13  ;;  %v1385_v24 = vadd.f32 %v1129_v59, %v617_v8  ;;  %v1897_v54 = vunpack.c.l.bf16 %v1641_v52 }
 0x16c   : > { %v6011_v26 = vpop.xlane.xlu1 %2444  ;;  %v2151_v39 = vadd.f32 %v1895_v43, %v1383_v18  ;;  %v622_v18 = vunpack.c.l.bf16 %v366_v58  ;;  %v1134_v43 = vunpack.c.h.bf16 %v366_v58  ;;  %v620_v8 = vunpack.c.l.bf16 %v364_v7  ;;  %v369_v58 = vld [vmem:[%s5572_s16 + $0x8f0] sm:$0xff]  }
 0x16d   : > { %v6013_v42 = vpop.xlane.xlu0 %2442  ;;  %v2150_v10 = vadd.f32 %v1894_v50, %v1382_v15  ;;  %v2153_v13 = vadd.f32 %v1897_v54, %v1385_v24  ;;  %v1132_v59 = vunpack.c.h.bf16 %v364_v7  ;;  %v368_v24 = vld [vmem:[%s5572_s16 + $0x8e0] sm:$0xff]   ;;  %v625_v7 = vunpack.c.l.bf16 %v369_v58 }
 0x16e   : > { %v1390_v22 = vadd.f32 %v1134_v43, %v622_v18  ;;  %v1137_v31 = vunpack.c.h.bf16 %v369_v58 }
 0x170   : > { %2536 = vadd.xlane.f32.xlu2 %v2149_v56  ;;  %v1643_v56 = vld [vmem:[%s5572_s16 + $0x898] sm:$0xf] }
 0x171   : > { %2534 = vadd.xlane.f32.xlu1 %v2148_v63  ;;  %v618_v63 = vunpack.c.l.bf16 %v362_v28  ;;  %v1899_v41 = vunpack.c.l.bf16 %v1643_v56  ;;  %v1646_v56 = vld [vmem:[%s5572_s16 + $0x8c8] sm:$0xf] }
 0x172   : > { %2532 = vadd.xlane.f32.xlu0 %v2147_v30  ;;  %v1130_v30 = vunpack.c.h.bf16 %v362_v28  ;;  %v365_v28 = vld [vmem:[%s5572_s16 + $0x8b0] sm:$0xff]   ;;  %v1902_v52 = vunpack.c.l.bf16 %v1646_v56 }
 0x173   : > { %v6021_v62 = vpop.xlane.xlu2 %2452  ;;  %v2155_v50 = vadd.f32 %v1899_v41, %v1387_v21  ;;  %v1388_v41 = vadd.f32 %v1132_v59, %v620_v8  ;;  %v1648_v59 = vld [vmem:[%s5572_s16 + $0x8e8] sm:$0xf] }
 0x174   : > { %v6023_v17 = vpop.xlane.xlu1 %2450  ;;  %v1386_v2 = vadd.f32 %v1130_v30, %v618_v63  ;;  %v621_v63 = vunpack.c.l.bf16 %v365_v28  ;;  %v1133_v30 = vunpack.c.h.bf16 %v365_v28  ;;  %v2158_v28 = vadd.f32 %v1902_v52, %v1390_v22 }
 0x175   : > { %v6025_v14 = vpop.xlane.xlu0 %2448  ;;  %v1904_v58 = vunpack.c.l.bf16 %v1648_v59 }
 0x176   : > { %v1389_v27 = vadd.f32 %v1133_v30, %v621_v63 }
 0x178   : > { %2542 = vadd.xlane.f32.xlu2 %v2152_v38  ;;  %v2154_v38 = vadd.f32 %v1898_v55, %v1386_v2  ;;  %v367_v2 = vld [vmem:[%s5572_s16 + $0x8d0] sm:$0xff]  }
 0x179   : > { %2540 = vadd.xlane.f32.xlu1 %v2151_v39  ;;  %v1645_v39 = vld [vmem:[%s5572_s16 + $0x8b8] sm:$0xf]  ;;  %v623_v56 = vunpack.c.l.bf16 %v367_v2  ;;  %v1135_v63 = vunpack.c.h.bf16 %v367_v2  ;;  %v370_v2 = vld [vmem:[%s5572_s16 + $0x900] sm:$0xff]  }
 0x17a   : > { %2538 = vadd.xlane.f32.xlu0 %v2150_v10  ;;  %v1644_v10 = vld [vmem:[%s5572_s16 + $0x8a8] sm:$0xf]  ;;  %v1901_v21 = vunpack.c.l.bf16 %v1645_v39  ;;  %v1647_v39 = vld [vmem:[%s5572_s16 + $0x8d8] sm:$0xf] }
 0x17b   : > { %v6033_v57 = vpop.xlane.xlu2 %2458  ;;  %v1900_v54 = vunpack.c.l.bf16 %v1644_v10  ;;  %v1393_v10 = vadd.f32 %v1137_v31, %v625_v7  ;;  %v1391_v32 = vadd.f32 %v1135_v63, %v623_v56  ;;  %v1903_v0 = vunpack.c.l.bf16 %v1647_v39 }
 0x17c   : > { %v6035_v25 = vpop.xlane.xlu1 %2456  ;;  %v2157_v30 = vadd.f32 %v1901_v21, %v1389_v27  ;;  %v628_v27 = vunpack.c.l.bf16 %v372_v3  ;;  %v1140_v21 = vunpack.c.h.bf16 %v372_v3  ;;  %v626_v56 = vunpack.c.l.bf16 %v370_v2  ;;  %v375_v3 = vld [vmem:[%s5572_s16 + $0x950] sm:$0xff]  }
 0x17d   : > { %v6037_v15 = vpop.xlane.xlu0 %2454  ;;  %v2156_v8 = vadd.f32 %v1900_v54, %v1388_v41  ;;  %v2159_v7 = vadd.f32 %v1903_v0, %v1391_v32  ;;  %v1138_v63 = vunpack.c.h.bf16 %v370_v2  ;;  %v374_v32 = vld [vmem:[%s5572_s16 + $0x940] sm:$0xff]   ;;  %v631_v2 = vunpack.c.l.bf16 %v375_v3 }
 0x17e   : > { %v1396_v59 = vadd.f32 %v1140_v21, %v628_v27  ;;  %v1143_v16 = vunpack.c.h.bf16 %v375_v3 }
 0x180   : > { %2548 = vadd.xlane.f32.xlu2 %v2155_v50  ;;  %v1649_v50 = vld [vmem:[%s5572_s16 + $0x8f8] sm:$0xf] }
 0x181   : > { %2546 = vadd.xlane.f32.xlu1 %v2154_v38  ;;  %v624_v38 = vunpack.c.l.bf16 %v368_v24  ;;  %v1905_v22 = vunpack.c.l.bf16 %v1649_v50  ;;  %v1652_v50 = vld [vmem:[%s5572_s16 + $0x928] sm:$0xf] }
 0x182   : > { %2544 = vadd.xlane.f32.xlu0 %v2153_v13  ;;  %v1136_v13 = vunpack.c.h.bf16 %v368_v24  ;;  %v371_v24 = vld [vmem:[%s5572_s16 + $0x910] sm:$0xff]   ;;  %v1908_v39 = vunpack.c.l.bf16 %v1652_v50 }
 0x183   : > { %v6045_v55 = vpop.xlane.xlu2 %2464  ;;  %v2161_v54 = vadd.f32 %v1905_v22, %v1393_v10  ;;  %v1394_v22 = vadd.f32 %v1138_v63, %v626_v56  ;;  %v1654_v63 = vld [vmem:[%s5572_s16 + $0x948] sm:$0xf] }
 0x184   : > { %v6047_v18 = vpop.xlane.xlu1 %2462  ;;  %v1392_v52 = vadd.f32 %v1136_v13, %v624_v38  ;;  %v627_v38 = vunpack.c.l.bf16 %v371_v24  ;;  %v1139_v13 = vunpack.c.h.bf16 %v371_v24  ;;  %v2164_v24 = vadd.f32 %v1908_v39, %v1396_v59 }
 0x185   : > { %v6049_v43 = vpop.xlane.xlu0 %2460  ;;  %v1910_v3 = vunpack.c.l.bf16 %v1654_v63 }
 0x186   : > { %v1395_v40 = vadd.f32 %v1139_v13, %v627_v38 }
 0x188   : > { %2554 = vadd.xlane.f32.xlu2 %v2158_v28  ;;  %v2160_v28 = vadd.f32 %v1904_v58, %v1392_v52  ;;  %v373_v52 = vld [vmem:[%s5572_s16 + $0x930] sm:$0xff]  }
 0x189   : > { %2552 = vadd.xlane.f32.xlu1 %v2157_v30  ;;  %v1651_v30 = vld [vmem:[%s5572_s16 + $0x918] sm:$0xf]  ;;  %v629_v50 = vunpack.c.l.bf16 %v373_v52  ;;  %v1141_v38 = vunpack.c.h.bf16 %v373_v52  ;;  %v376_v52 = vld [vmem:[%s5572_s16 + $0x960] sm:$0xff]  }
 0x18a   : > { %2550 = vadd.xlane.f32.xlu0 %v2156_v8  ;;  %v1650_v8 = vld [vmem:[%s5572_s16 + $0x908] sm:$0xf]  ;;  %v1907_v10 = vunpack.c.l.bf16 %v1651_v30  ;;  %v1653_v30 = vld [vmem:[%s5572_s16 + $0x938] sm:$0xf] }
 0x18b   : > { %v6057_v4 = vpop.xlane.xlu2 %2470  ;;  %v1906_v0 = vunpack.c.l.bf16 %v1650_v8  ;;  %v1399_v8 = vadd.f32 %v1143_v16, %v631_v2  ;;  %v1397_v44 = vadd.f32 %v1141_v38, %v629_v50  ;;  %v1909_v19 = vunpack.c.l.bf16 %v1653_v30 }
 0x18c   : > { %v6059_v31 = vpop.xlane.xlu1 %2468  ;;  %v2163_v13 = vadd.f32 %v1907_v10, %v1395_v40  ;;  %v634_v40 = vunpack.c.l.bf16 %v378_v20  ;;  %v1146_v10 = vunpack.c.h.bf16 %v378_v20  ;;  %v632_v50 = vunpack.c.l.bf16 %v376_v52  ;;  %v381_v20 = vld [vmem:[%s5572_s16 + $0x9b0] sm:$0xff]  }
 0x18d   : > { %v6061_v41 = vpop.xlane.xlu0 %2466  ;;  %v2162_v56 = vadd.f32 %v1906_v0, %v1394_v22  ;;  %v2165_v2 = vadd.f32 %v1909_v19, %v1397_v44  ;;  %v1144_v38 = vunpack.c.h.bf16 %v376_v52  ;;  %v380_v44 = vld [vmem:[%s5572_s16 + $0x9a0] sm:$0xff]   ;;  %v637_v52 = vunpack.c.l.bf16 %v381_v20 }
 0x18e   : > { %v1402_v63 = vadd.f32 %v1146_v10, %v634_v40 }
 0x190   : > { %2560 = vadd.xlane.f32.xlu2 %v2161_v54  ;;  %v1655_v54 = vld [vmem:[%s5572_s16 + $0x958] sm:$0xf] }
 0x191   : > { %2558 = vadd.xlane.f32.xlu1 %v2160_v28  ;;  %v630_v28 = vunpack.c.l.bf16 %v374_v32  ;;  %v1911_v59 = vunpack.c.l.bf16 %v1655_v54  ;;  %v1658_v54 = vld [vmem:[%s5572_s16 + $0x988] sm:$0xf] }
 0x192   : > { %2556 = vadd.xlane.f32.xlu0 %v2159_v7  ;;  %v1142_v7 = vunpack.c.h.bf16 %v374_v32  ;;  %v377_v32 = vld [vmem:[%s5572_s16 + $0x970] sm:$0xff]   ;;  %v1914_v30 = vunpack.c.l.bf16 %v1658_v54 }
 0x193   : > { %v6069_v58 = vpop.xlane.xlu2 %2476  ;;  %v2167_v0 = vadd.f32 %v1911_v59, %v1399_v8  ;;  %v1400_v59 = vadd.f32 %v1144_v38, %v632_v50  ;;  %v1660_v38 = vld [vmem:[%s5572_s16 + $0x9a8] sm:$0xf] }
 0x194   : > { %8413 = vst [vmem:[#allocation67_spill] sm:$0xff] %v6069_v58  ;;  %v6071_v27 = vpop.xlane.xlu1 %2474  ;;  %v1398_v39 = vadd.f32 %v1142_v7, %v630_v28  ;;  %v633_v28 = vunpack.c.l.bf16 %v377_v32  ;;  %v1145_v7 = vunpack.c.h.bf16 %v377_v32  ;;  %v2170_v32 = vadd.f32 %v1914_v30, %v1402_v63 }
 0x195   : > { %v6073_v21 = vpop.xlane.xlu0 %2472 }
 0x198   : > { %2566 = vadd.xlane.f32.xlu2 %v2164_v24  ;;  %v2166_v24 = vadd.f32 %v1910_v3, %v1398_v39  ;;  %v379_v39 = vld [vmem:[%s5572_s16 + $0x990] sm:$0xff]  }
 0x199   : > { %2564 = vadd.xlane.f32.xlu1 %v2163_v13  ;;  %v1657_v13 = vld [vmem:[%s5572_s16 + $0x978] sm:$0xf]  ;;  %v635_v54 = vunpack.c.l.bf16 %v379_v39 }
 0x19a   : > { %2562 = vadd.xlane.f32.xlu0 %v2162_v56  ;;  %v1656_v56 = vld [vmem:[%s5572_s16 + $0x968] sm:$0xf]  ;;  %v1913_v8 = vunpack.c.l.bf16 %v1657_v13  ;;  %v1659_v13 = vld [vmem:[%s5572_s16 + $0x998] sm:$0xf] }
 0x19b   : > { %v6081_v45 = vpop.xlane.xlu2 %2482  ;;  %v1912_v19 = vunpack.c.l.bf16 %v1656_v56 }
 0x19c   : > { %8414 = vst [vmem:[#allocation68_spill] sm:$0xff] %v6081_v45  ;;  %v6083_v16 = vpop.xlane.xlu1 %2480  ;;  %v1401_v45 = vadd.f32 %v1145_v7, %v633_v28  ;;  %v1147_v28 = vunpack.c.h.bf16 %v379_v39  ;;  %v382_v39 = vld [vmem:[%s5572_s16 + $0x9c0] sm:$0xff]  }
 0x19d   : > { %8415 = vst [vmem:[#allocation69_spill] sm:$0xff] %v6083_v16  ;;  %v6085_v22 = vpop.xlane.xlu0 %2478  ;;  %v1149_v16 = vunpack.c.h.bf16 %v381_v20  ;;  %v2168_v50 = vadd.f32 %v1912_v19, %v1400_v59  ;;  %v1916_v20 = vunpack.c.l.bf16 %v1660_v38 }
 0x19e   : > { %v2169_v7 = vadd.f32 %v1913_v8, %v1401_v45 }
 0x19f   : > { %v1405_v56 = vadd.f32 %v1149_v16, %v637_v52 }
 0x1a0   : > { %2572 = vadd.xlane.f32.xlu2 %v2167_v0  ;;  %v1661_v0 = vld [vmem:[%s5572_s16 + $0x9b8] sm:$0xf] }
 0x1a1   : > { %2570 = vadd.xlane.f32.xlu1 %v2166_v24  ;;  %v636_v24 = vunpack.c.l.bf16 %v380_v44  ;;  %v1917_v63 = vunpack.c.l.bf16 %v1661_v0  ;;  %v1664_v0 = vld [vmem:[%s5572_s16 + $0x9e8] sm:$0xf] }
 0x1a2   : > { %2568 = vadd.xlane.f32.xlu0 %v2165_v2  ;;  %v1148_v2 = vunpack.c.h.bf16 %v380_v44  ;;  %v383_v44 = vld [vmem:[%s5572_s16 + $0x9d0] sm:$0xff]  }
 0x1a3   : > { %v6093_v3 = vpop.xlane.xlu2 %2488  ;;  %v2173_v19 = vadd.f32 %v1917_v63, %v1405_v56 }
 0x1a4   : > { %8416 = vst [vmem:[#allocation70_spill] sm:$0xff] %v6093_v3  ;;  %v6095_v40 = vpop.xlane.xlu1 %2486  ;;  %v1404_v30 = vadd.f32 %v1148_v2, %v636_v24  ;;  %v1403_v3 = vadd.f32 %v1147_v28, %v635_v54  ;;  %v639_v24 = vunpack.c.l.bf16 %v383_v44  ;;  %v1151_v2 = vunpack.c.h.bf16 %v383_v44 }
 0x1a5   : > { %8417 = vst [vmem:[#allocation71_spill] sm:$0xff] %v6095_v40  ;;  %v6097_v10 = vpop.xlane.xlu0 %2484  ;;  %v1915_v40 = vunpack.c.l.bf16 %v1659_v13  ;;  %v638_v54 = vunpack.c.l.bf16 %v382_v39  ;;  %v1150_v28 = vunpack.c.h.bf16 %v382_v39  ;;  %v1920_v13 = vunpack.c.l.bf16 %v1664_v0 }
 0x1a6   : > { %8418 = vst [vmem:[#allocation72_spill] sm:$0xff] %v6097_v10  ;;  %v384_v10 = vld [vmem:[%s5572_s16 + $0x9e0] sm:$0xff]  }
 0x1a7   : > { %v640_v45 = vunpack.c.l.bf16 %v384_v10  ;;  %v1152_v8 = vunpack.c.h.bf16 %v384_v10  ;;  %v2171_v52 = vadd.f32 %v1915_v40, %v1403_v3  ;;  %v387_v10 = vld [vmem:[%s5572_s16 + $0xa10] sm:$0xff]   ;;  %v1406_v63 = vadd.f32 %v1150_v28, %v638_v54  ;;  %v386_v40 = vld [vmem:[%s5572_s16 + $0xa00] sm:$0xff]   ;;  %v1666_v28 = vld [vmem:[%s5572_s16 + $0xa08] sm:$0xf] }
 0x1a8   : > { %2578 = vadd.xlane.f32.xlu2 %v2170_v32  ;;  %v2172_v32 = vadd.f32 %v1916_v20, %v1404_v30  ;;  %v385_v30 = vld [vmem:[%s5572_s16 + $0x9f0] sm:$0xff]   ;;  %v643_v39 = vunpack.c.l.bf16 %v387_v10 }
 0x1a9   : > { %2576 = vadd.xlane.f32.xlu1 %v2169_v7  ;;  %v1663_v7 = vld [vmem:[%s5572_s16 + $0x9d8] sm:$0xf]  ;;  %v1408_v38 = vadd.f32 %v1152_v8, %v640_v45  ;;  %v641_v0 = vunpack.c.l.bf16 %v385_v30 }
 0x1aa   : > { %2574 = vadd.xlane.f32.xlu0 %v2168_v50  ;;  %v1662_v50 = vld [vmem:[%s5572_s16 + $0x9c8] sm:$0xf]  ;;  %v1919_v56 = vunpack.c.l.bf16 %v1663_v7  ;;  %v1665_v7 = vld [vmem:[%s5572_s16 + $0x9f8] sm:$0xf] }
 0x1ab   : > { %v6105_v58 = vpop.xlane.xlu2 %2494  ;;  %v1918_v3 = vunpack.c.l.bf16 %v1662_v50  ;;  %v2176_v44 = vadd.f32 %v1920_v13, %v1408_v38 }
 0x1ac   : > { %8419 = vst [vmem:[#allocation73_spill] sm:$0xff] %v6105_v58  ;;  %v6107_v16 = vpop.xlane.xlu1 %2492  ;;  %v1407_v58 = vadd.f32 %v1151_v2, %v639_v24  ;;  %v1153_v24 = vunpack.c.h.bf16 %v385_v30  ;;  %v388_v30 = vld [vmem:[%s5572_s16 + $0xa20] sm:$0xff]  }
 0x1ad   : > { %8420 = vst [vmem:[#allocation74_spill] sm:$0xff] %v6107_v16  ;;  %v6109_v59 = vpop.xlane.xlu0 %2490  ;;  %v1155_v16 = vunpack.c.h.bf16 %v387_v10  ;;  %v2174_v54 = vadd.f32 %v1918_v3, %v1406_v63  ;;  %v1922_v10 = vunpack.c.l.bf16 %v1666_v28 }
 0x1ae   : > { %8421 = vst [vmem:[#allocation75_spill] sm:$0xff] %v6109_v59  ;;  %v2175_v2 = vadd.f32 %v1919_v56, %v1407_v58 }
 0x1af   : > { %v1411_v50 = vadd.f32 %v1155_v16, %v643_v39 }
 0x1b0   : > { %2584 = vadd.xlane.f32.xlu2 %v2173_v19  ;;  %v1667_v19 = vld [vmem:[%s5572_s16 + $0xa18] sm:$0xf] }
 0x1b1   : > { %2582 = vadd.xlane.f32.xlu1 %v2172_v32  ;;  %v642_v32 = vunpack.c.l.bf16 %v386_v40  ;;  %v1923_v38 = vunpack.c.l.bf16 %v1667_v19  ;;  %v1670_v19 = vld [vmem:[%s5572_s16 + $0xa48] sm:$0xf] }
 0x1b2   : > { %2580 = vadd.xlane.f32.xlu0 %v2171_v52  ;;  %v1154_v52 = vunpack.c.h.bf16 %v386_v40  ;;  %v389_v40 = vld [vmem:[%s5572_s16 + $0xa30] sm:$0xff]  }
 0x1b3   : > { %v6117_v20 = vpop.xlane.xlu2 %2500  ;;  %v2179_v3 = vadd.f32 %v1923_v38, %v1411_v50 }
 0x1b4   : > { %8422 = vst [vmem:[#allocation76_spill] sm:$0xff] %v6117_v20  ;;  %v6119_v45 = vpop.xlane.xlu1 %2498  ;;  %v1410_v13 = vadd.f32 %v1154_v52, %v642_v32  ;;  %v1409_v20 = vadd.f32 %v1153_v24, %v641_v0  ;;  %v645_v32 = vunpack.c.l.bf16 %v389_v40  ;;  %v1157_v52 = vunpack.c.h.bf16 %v389_v40 }
 0x1b5   : > { %8423 = vst [vmem:[#allocation77_spill] sm:$0xff] %v6119_v45  ;;  %v6121_v8 = vpop.xlane.xlu0 %2496  ;;  %v390_v45 = vld [vmem:[%s5572_s16 + $0xa40] sm:$0xff]   ;;  %v644_v0 = vunpack.c.l.bf16 %v388_v30  ;;  %v1156_v24 = vunpack.c.h.bf16 %v388_v30 }
 0x1b6   : > { %8424 = vst [vmem:[#allocation78_spill] sm:$0xff] %v6121_v8  ;;  %v1921_v8 = vunpack.c.l.bf16 %v1665_v7  ;;  %v646_v58 = vunpack.c.l.bf16 %v390_v45  ;;  %v1158_v56 = vunpack.c.h.bf16 %v390_v45  ;;  %v1926_v7 = vunpack.c.l.bf16 %v1670_v19  ;;  %v393_v45 = vld [vmem:[%s5572_s16 + $0xa70] sm:$0xff]  }
 0x1b7   : > { %v1412_v38 = vadd.f32 %v1156_v24, %v644_v0  ;;  %v649_v30 = vunpack.c.l.bf16 %v393_v45  ;;  %v1672_v24 = vld [vmem:[%s5572_s16 + $0xa68] sm:$0xf] }
 0x1b8   : > { %2590 = vadd.xlane.f32.xlu2 %v2176_v44  ;;  %v2178_v44 = vadd.f32 %v1922_v10, %v1410_v13  ;;  %v2177_v39 = vadd.f32 %v1921_v8, %v1409_v20  ;;  %v1414_v28 = vadd.f32 %v1158_v56, %v646_v58  ;;  %v392_v8 = vld [vmem:[%s5572_s16 + $0xa60] sm:$0xff]   ;;  %v391_v13 = vld [vmem:[%s5572_s16 + $0xa50] sm:$0xff]  }
 0x1b9   : > { %2588 = vadd.xlane.f32.xlu1 %v2175_v2  ;;  %v1669_v2 = vld [vmem:[%s5572_s16 + $0xa38] sm:$0xf]  ;;  %v647_v19 = vunpack.c.l.bf16 %v391_v13 }
 0x1ba   : > { %2586 = vadd.xlane.f32.xlu0 %v2174_v54  ;;  %v1668_v54 = vld [vmem:[%s5572_s16 + $0xa28] sm:$0xf]  ;;  %v1925_v50 = vunpack.c.l.bf16 %v1669_v2  ;;  %v2182_v40 = vadd.f32 %v1926_v7, %v1414_v28  ;;  %v1671_v2 = vld [vmem:[%s5572_s16 + $0xa58] sm:$0xf] }
 0x1bb   : > { %v6129_v59 = vpop.xlane.xlu2 %2506  ;;  %v1924_v20 = vunpack.c.l.bf16 %v1668_v54 }
 0x1bc   : > { %8425 = vst [vmem:[#allocation79_spill] sm:$0xff] %v6129_v59  ;;  %v6131_v16 = vpop.xlane.xlu1 %2504  ;;  %v1413_v59 = vadd.f32 %v1157_v52, %v645_v32  ;;  %v1159_v32 = vunpack.c.h.bf16 %v391_v13  ;;  %v394_v13 = vld [vmem:[%s5572_s16 + $0xa80] sm:$0xff]  }
 0x1bd   : > { %8426 = vst [vmem:[#allocation80_spill] sm:$0xff] %v6131_v16  ;;  %v6133_v63 = vpop.xlane.xlu0 %2502  ;;  %v2180_v0 = vadd.f32 %v1924_v20, %v1412_v38 }
 0x1be   : > { %8427 = vst [vmem:[#allocation81_spill] sm:$0xff] %v6133_v63  ;;  %v1161_v63 = vunpack.c.h.bf16 %v393_v45  ;;  %v2181_v52 = vadd.f32 %v1925_v50, %v1413_v59  ;;  %v1928_v45 = vunpack.c.l.bf16 %v1672_v24 }
 0x1c0   : > { %2596 = vadd.xlane.f32.xlu2 %v2179_v3  ;;  %v1673_v3 = vld [vmem:[%s5572_s16 + $0xa78] sm:$0xf]  ;;  %v1417_v54 = vadd.f32 %v1161_v63, %v649_v30 }
 0x1c1   : > { %2594 = vadd.xlane.f32.xlu1 %v2178_v44  ;;  %v648_v44 = vunpack.c.l.bf16 %v392_v8  ;;  %v1929_v28 = vunpack.c.l.bf16 %v1673_v3  ;;  %v1676_v3 = vld [vmem:[%s5572_s16 + $0xaa8] sm:$0xf] }
 0x1c2   : > { %2592 = vadd.xlane.f32.xlu0 %v2177_v39  ;;  %v1160_v39 = vunpack.c.h.bf16 %v392_v8  ;;  %v395_v8 = vld [vmem:[%s5572_s16 + $0xa90] sm:$0xff]  }
 0x1c3   : > { %v6141_v10 = vpop.xlane.xlu2 %2512  ;;  %v2185_v20 = vadd.f32 %v1929_v28, %v1417_v54 }
 0x1c4   : > { %8428 = vst [vmem:[#allocation82_spill] sm:$0xff] %v6141_v10  ;;  %v6143_v58 = vpop.xlane.xlu1 %2510  ;;  %v1416_v7 = vadd.f32 %v1160_v39, %v648_v44  ;;  %v1415_v10 = vadd.f32 %v1159_v32, %v647_v19  ;;  %v651_v44 = vunpack.c.l.bf16 %v395_v8  ;;  %v1163_v39 = vunpack.c.h.bf16 %v395_v8 }
 0x1c5   : > { %8429 = vst [vmem:[#allocation83_spill] sm:$0xff] %v6143_v58  ;;  %v6145_v56 = vpop.xlane.xlu0 %2508  ;;  %v396_v58 = vld [vmem:[%s5572_s16 + $0xaa0] sm:$0xff]   ;;  %v650_v19 = vunpack.c.l.bf16 %v394_v13  ;;  %v1162_v32 = vunpack.c.h.bf16 %v394_v13 }
 0x1c6   : > { %8430 = vst [vmem:[#allocation84_spill] sm:$0xff] %v6145_v56  ;;  %v1927_v56 = vunpack.c.l.bf16 %v1671_v2  ;;  %v652_v59 = vunpack.c.l.bf16 %v396_v58  ;;  %v1164_v50 = vunpack.c.h.bf16 %v396_v58  ;;  %v1932_v2 = vunpack.c.l.bf16 %v1676_v3  ;;  %v399_v58 = vld [vmem:[%s5572_s16 + $0xad0] sm:$0xff]  }
 0x1c7   : > { %v1418_v28 = vadd.f32 %v1162_v32, %v650_v19  ;;  %v655_v13 = vunpack.c.l.bf16 %v399_v58  ;;  %v1678_v32 = vld [vmem:[%s5572_s16 + $0xac8] sm:$0xf] }
 0x1c8   : > { %2602 = vadd.xlane.f32.xlu2 %v2182_v40  ;;  %v2184_v40 = vadd.f32 %v1928_v45, %v1416_v7  ;;  %v2183_v30 = vadd.f32 %v1927_v56, %v1415_v10  ;;  %v1420_v24 = vadd.f32 %v1164_v50, %v652_v59  ;;  %v398_v56 = vld [vmem:[%s5572_s16 + $0xac0] sm:$0xff]   ;;  %v397_v7 = vld [vmem:[%s5572_s16 + $0xab0] sm:$0xff]  }
 0x1c9   : > { %2600 = vadd.xlane.f32.xlu1 %v2181_v52  ;;  %v1675_v52 = vld [vmem:[%s5572_s16 + $0xa98] sm:$0xf]  ;;  %v653_v3 = vunpack.c.l.bf16 %v397_v7 }
 0x1ca   : > { %2598 = vadd.xlane.f32.xlu0 %v2180_v0  ;;  %v1674_v0 = vld [vmem:[%s5572_s16 + $0xa88] sm:$0xf]  ;;  %v1931_v54 = vunpack.c.l.bf16 %v1675_v52  ;;  %v2188_v8 = vadd.f32 %v1932_v2, %v1420_v24  ;;  %v1677_v52 = vld [vmem:[%s5572_s16 + $0xab8] sm:$0xf] }
 0x1cb   : > { %v6153_v16 = vpop.xlane.xlu2 %2518  ;;  %v1930_v10 = vunpack.c.l.bf16 %v1674_v0 }
 0x1cc   : > { %8431 = vst [vmem:[#allocation85_spill] sm:$0xff] %v6153_v16  ;;  %v6155_v63 = vpop.xlane.xlu1 %2516  ;;  %v1419_v16 = vadd.f32 %v1163_v39, %v651_v44  ;;  %v1165_v44 = vunpack.c.h.bf16 %v397_v7  ;;  %v400_v7 = vld [vmem:[%s5572_s16 + $0xae0] sm:$0xff]  }
 0x1cd   : > { %8432 = vst [vmem:[#allocation86_spill] sm:$0xff] %v6155_v63  ;;  %v6157_v38 = vpop.xlane.xlu0 %2514  ;;  %v2186_v19 = vadd.f32 %v1930_v10, %v1418_v28 }
 0x1ce   : > { %8433 = vst [vmem:[#allocation87_spill] sm:$0xff] %v6157_v38  ;;  %v1167_v38 = vunpack.c.h.bf16 %v399_v58  ;;  %v2187_v39 = vadd.f32 %v1931_v54, %v1419_v16  ;;  %v1934_v58 = vunpack.c.l.bf16 %v1678_v32 }
 0x1d0   : > { %2608 = vadd.xlane.f32.xlu2 %v2185_v20  ;;  %v1679_v20 = vld [vmem:[%s5572_s16 + $0xad8] sm:$0xf]  ;;  %v1423_v0 = vadd.f32 %v1167_v38, %v655_v13 }
 0x1d1   : > { %2606 = vadd.xlane.f32.xlu1 %v2184_v40  ;;  %v654_v40 = vunpack.c.l.bf16 %v398_v56  ;;  %v1935_v24 = vunpack.c.l.bf16 %v1679_v20  ;;  %v1682_v20 = vld [vmem:[%s5572_s16 + $0xb08] sm:$0xf] }
 0x1d2   : > { %2604 = vadd.xlane.f32.xlu0 %v2183_v30  ;;  %v1166_v30 = vunpack.c.h.bf16 %v398_v56  ;;  %v401_v56 = vld [vmem:[%s5572_s16 + $0xaf0] sm:$0xff]  }
 0x1d3   : > { %v6165_v45 = vpop.xlane.xlu2 %2524  ;;  %v2191_v10 = vadd.f32 %v1935_v24, %v1423_v0 }
 0x1d4   : > { %8434 = vst [vmem:[#allocation88_spill] sm:$0xff] %v6165_v45  ;;  %v6167_v59 = vpop.xlane.xlu1 %2522  ;;  %v1422_v2 = vadd.f32 %v1166_v30, %v654_v40  ;;  %v1421_v45 = vadd.f32 %v1165_v44, %v653_v3  ;;  %v657_v40 = vunpack.c.l.bf16 %v401_v56  ;;  %v1169_v30 = vunpack.c.h.bf16 %v401_v56 }
 0x1d5   : > { %8435 = vst [vmem:[#allocation89_spill] sm:$0xff] %v6167_v59  ;;  %v6169_v50 = vpop.xlane.xlu0 %2520  ;;  %v402_v59 = vld [vmem:[%s5572_s16 + $0xb00] sm:$0xff]   ;;  %v656_v3 = vunpack.c.l.bf16 %v400_v7  ;;  %v1168_v44 = vunpack.c.h.bf16 %v400_v7 }
 0x1d6   : > { %8436 = vst [vmem:[#allocation90_spill] sm:$0xff] %v6169_v50  ;;  %v1933_v50 = vunpack.c.l.bf16 %v1677_v52  ;;  %v658_v16 = vunpack.c.l.bf16 %v402_v59  ;;  %v1170_v54 = vunpack.c.h.bf16 %v402_v59  ;;  %v1938_v52 = vunpack.c.l.bf16 %v1682_v20  ;;  %v405_v59 = vld [vmem:[%s5572_s16 + $0xb30] sm:$0xff]  }
 0x1d7   : > { %v1424_v24 = vadd.f32 %v1168_v44, %v656_v3  ;;  %v661_v7 = vunpack.c.l.bf16 %v405_v59  ;;  %v1684_v44 = vld [vmem:[%s5572_s16 + $0xb28] sm:$0xf] }
 0x1d8   : > { %2614 = vadd.xlane.f32.xlu2 %v2188_v8  ;;  %v2190_v8 = vadd.f32 %v1934_v58, %v1422_v2  ;;  %v2189_v13 = vadd.f32 %v1933_v50, %v1421_v45  ;;  %v1426_v32 = vadd.f32 %v1170_v54, %v658_v16  ;;  %v404_v50 = vld [vmem:[%s5572_s16 + $0xb20] sm:$0xff]   ;;  %v403_v2 = vld [vmem:[%s5572_s16 + $0xb10] sm:$0xff]  }
 0x1d9   : > { %2612 = vadd.xlane.f32.xlu1 %v2187_v39  ;;  %v1681_v39 = vld [vmem:[%s5572_s16 + $0xaf8] sm:$0xf]  ;;  %v659_v20 = vunpack.c.l.bf16 %v403_v2 }
 0x1da   : > { %2610 = vadd.xlane.f32.xlu0 %v2186_v19  ;;  %v1680_v19 = vld [vmem:[%s5572_s16 + $0xae8] sm:$0xf]  ;;  %v1937_v0 = vunpack.c.l.bf16 %v1681_v39  ;;  %v2194_v56 = vadd.f32 %v1938_v52, %v1426_v32  ;;  %v1683_v39 = vld [vmem:[%s5572_s16 + $0xb18] sm:$0xf] }
 0x1db   : > { %v6177_v63 = vpop.xlane.xlu2 %2530  ;;  %v1936_v45 = vunpack.c.l.bf16 %v1680_v19 }
 0x1dc   : > { %8437 = vst [vmem:[#allocation91_spill] sm:$0xff] %v6177_v63  ;;  %v6179_v38 = vpop.xlane.xlu1 %2528  ;;  %v1425_v63 = vadd.f32 %v1169_v30, %v657_v40  ;;  %v1171_v40 = vunpack.c.h.bf16 %v403_v2  ;;  %v406_v2 = vld [vmem:[%s5572_s16 + $0xb40] sm:$0xff]  }
 0x1dd   : > { %8438 = vst [vmem:[#allocation92_spill] sm:$0xff] %v6179_v38  ;;  %v6181_v28 = vpop.xlane.xlu0 %2526  ;;  %v2192_v3 = vadd.f32 %v1936_v45, %v1424_v24 }
 0x1de   : > { %8439 = vst [vmem:[#allocation93_spill] sm:$0xff] %v6181_v28  ;;  %v1173_v28 = vunpack.c.h.bf16 %v405_v59  ;;  %v2193_v30 = vadd.f32 %v1937_v0, %v1425_v63  ;;  %v1940_v59 = vunpack.c.l.bf16 %v1684_v44 }
 0x1e0   : > { %2620 = vadd.xlane.f32.xlu2 %v2191_v10  ;;  %v1685_v10 = vld [vmem:[%s5572_s16 + $0xb38] sm:$0xf]  ;;  %v1429_v19 = vadd.f32 %v1173_v28, %v661_v7 }
 0x1e1   : > { %2618 = vadd.xlane.f32.xlu1 %v2190_v8  ;;  %v660_v8 = vunpack.c.l.bf16 %v404_v50  ;;  %v1941_v32 = vunpack.c.l.bf16 %v1685_v10  ;;  %v1688_v10 = vld [vmem:[%s5572_s16 + $0xb68] sm:$0xf] }
 0x1e2   : > { %2616 = vadd.xlane.f32.xlu0 %v2189_v13  ;;  %v1172_v13 = vunpack.c.h.bf16 %v404_v50  ;;  %v407_v50 = vld [vmem:[%s5572_s16 + $0xb50] sm:$0xff]  }
 0x1e3   : > { %v6189_v58 = vpop.xlane.xlu2 %2536  ;;  %v2197_v45 = vadd.f32 %v1941_v32, %v1429_v19 }
 0x1e4   : > { %8440 = vst [vmem:[#allocation94_spill] sm:$0xff] %v6189_v58  ;;  %v6191_v16 = vpop.xlane.xlu1 %2534  ;;  %v1428_v52 = vadd.f32 %v1172_v13, %v660_v8  ;;  %v1427_v58 = vadd.f32 %v1171_v40, %v659_v20  ;;  %v663_v8 = vunpack.c.l.bf16 %v407_v50  ;;  %v1175_v13 = vunpack.c.h.bf16 %v407_v50 }
 0x1e5   : > { %8441 = vst [vmem:[#allocation95_spill] sm:$0xff] %v6191_v16  ;;  %v6193_v54 = vpop.xlane.xlu0 %2532  ;;  %v408_v16 = vld [vmem:[%s5572_s16 + $0xb60] sm:$0xff]   ;;  %v662_v20 = vunpack.c.l.bf16 %v406_v2  ;;  %v1174_v40 = vunpack.c.h.bf16 %v406_v2 }
 0x1e6   : > { %8442 = vst [vmem:[#allocation96_spill] sm:$0xff] %v6193_v54  ;;  %v1939_v54 = vunpack.c.l.bf16 %v1683_v39  ;;  %v664_v63 = vunpack.c.l.bf16 %v408_v16  ;;  %v1176_v0 = vunpack.c.h.bf16 %v408_v16  ;;  %v1944_v39 = vunpack.c.l.bf16 %v1688_v10  ;;  %v411_v16 = vld [vmem:[%s5572_s16 + $0xb90] sm:$0xff]  }
 0x1e7   : > { %v1430_v32 = vadd.f32 %v1174_v40, %v662_v20  ;;  %v667_v2 = vunpack.c.l.bf16 %v411_v16  ;;  %v1690_v40 = vld [vmem:[%s5572_s16 + $0xb88] sm:$0xf] }
 0x1e8   : > { %2626 = vadd.xlane.f32.xlu2 %v2194_v56  ;;  %v2196_v56 = vadd.f32 %v1940_v59, %v1428_v52  ;;  %v2195_v7 = vadd.f32 %v1939_v54, %v1427_v58  ;;  %v1432_v44 = vadd.f32 %v1176_v0, %v664_v63  ;;  %v410_v54 = vld [vmem:[%s5572_s16 + $0xb80] sm:$0xff]   ;;  %v409_v52 = vld [vmem:[%s5572_s16 + $0xb70] sm:$0xff]  }
 0x1e9   : > { %2624 = vadd.xlane.f32.xlu1 %v2193_v30  ;;  %v1687_v30 = vld [vmem:[%s5572_s16 + $0xb58] sm:$0xf]  ;;  %v665_v10 = vunpack.c.l.bf16 %v409_v52 }
 0x1ea   : > { %2622 = vadd.xlane.f32.xlu0 %v2192_v3  ;;  %v1686_v3 = vld [vmem:[%s5572_s16 + $0xb48] sm:$0xf]  ;;  %v1943_v19 = vunpack.c.l.bf16 %v1687_v30  ;;  %v2200_v50 = vadd.f32 %v1944_v39, %v1432_v44  ;;  %v1689_v30 = vld [vmem:[%s5572_s16 + $0xb78] sm:$0xf] }
 0x1eb   : > { %v6201_v38 = vpop.xlane.xlu2 %2542  ;;  %v1942_v58 = vunpack.c.l.bf16 %v1686_v3 }
 0x1ec   : > { %8443 = vst [vmem:[#allocation97_spill] sm:$0xff] %v6201_v38  ;;  %v6203_v28 = vpop.xlane.xlu1 %2540  ;;  %v1431_v38 = vadd.f32 %v1175_v13, %v663_v8  ;;  %v1177_v8 = vunpack.c.h.bf16 %v409_v52  ;;  %v412_v52 = vld [vmem:[%s5572_s16 + $0xba0] sm:$0xff]  }
 0x1ed   : > { %8444 = vst [vmem:[#allocation98_spill] sm:$0xff] %v6203_v28  ;;  %v6205_v24 = vpop.xlane.xlu0 %2538  ;;  %v2198_v20 = vadd.f32 %v1942_v58, %v1430_v32 }
 0x1ee   : > { %8445 = vst [vmem:[#allocation99_spill] sm:$0xff] %v6205_v24  ;;  %v1179_v24 = vunpack.c.h.bf16 %v411_v16  ;;  %v2199_v13 = vadd.f32 %v1943_v19, %v1431_v38  ;;  %v1946_v16 = vunpack.c.l.bf16 %v1690_v40 }
 0x1f0   : > { %2632 = vadd.xlane.f32.xlu2 %v2197_v45  ;;  %v1691_v45 = vld [vmem:[%s5572_s16 + $0xb98] sm:$0xf]  ;;  %v1435_v3 = vadd.f32 %v1179_v24, %v667_v2 }
 0x1f1   : > { %2630 = vadd.xlane.f32.xlu1 %v2196_v56  ;;  %v666_v56 = vunpack.c.l.bf16 %v410_v54  ;;  %v1947_v44 = vunpack.c.l.bf16 %v1691_v45  ;;  %v1694_v45 = vld [vmem:[%s5572_s16 + $0xbc8] sm:$0xf] }
 0x1f2   : > { %2628 = vadd.xlane.f32.xlu0 %v2195_v7  ;;  %v1178_v7 = vunpack.c.h.bf16 %v410_v54  ;;  %v413_v54 = vld [vmem:[%s5572_s16 + $0xbb0] sm:$0xff]  }
 0x1f3   : > { %v6213_v59 = vpop.xlane.xlu2 %2548  ;;  %v2203_v58 = vadd.f32 %v1947_v44, %v1435_v3 }
 0x1f4   : > { %8446 = vst [vmem:[#allocation100_spill] sm:$0xff] %v6213_v59  ;;  %v6215_v63 = vpop.xlane.xlu1 %2546  ;;  %v1434_v39 = vadd.f32 %v1178_v7, %v666_v56  ;;  %v1433_v59 = vadd.f32 %v1177_v8, %v665_v10  ;;  %v669_v56 = vunpack.c.l.bf16 %v413_v54  ;;  %v1181_v7 = vunpack.c.h.bf16 %v413_v54 }
 0x1f5   : > { %8447 = vst [vmem:[#allocation101_spill] sm:$0xff] %v6215_v63  ;;  %v6217_v0 = vpop.xlane.xlu0 %2544  ;;  %v414_v63 = vld [vmem:[%s5572_s16 + $0xbc0] sm:$0xff]   ;;  %v668_v10 = vunpack.c.l.bf16 %v412_v52  ;;  %v1180_v8 = vunpack.c.h.bf16 %v412_v52 }
 0x1f6   : > { %8448 = vst [vmem:[#allocation102_spill] sm:$0xff] %v6217_v0  ;;  %v1945_v0 = vunpack.c.l.bf16 %v1689_v30  ;;  %v670_v38 = vunpack.c.l.bf16 %v414_v63  ;;  %v1182_v19 = vunpack.c.h.bf16 %v414_v63  ;;  %v1950_v30 = vunpack.c.l.bf16 %v1694_v45  ;;  %v417_v63 = vld [vmem:[%s5572_s16 + $0xbf0] sm:$0xff]  }
 0x1f7   : > { %v1436_v44 = vadd.f32 %v1180_v8, %v668_v10  ;;  %v673_v52 = vunpack.c.l.bf16 %v417_v63  ;;  %v1696_v8 = vld [vmem:[%s5572_s16 + $0xbe8] sm:$0xf] }
 0x1f8   : > { %2638 = vadd.xlane.f32.xlu2 %v2200_v50  ;;  %v2202_v50 = vadd.f32 %v1946_v16, %v1434_v39  ;;  %v2201_v2 = vadd.f32 %v1945_v0, %v1433_v59  ;;  %v1438_v40 = vadd.f32 %v1182_v19, %v670_v38  ;;  %v416_v0 = vld [vmem:[%s5572_s16 + $0xbe0] sm:$0xff]   ;;  %v415_v39 = vld [vmem:[%s5572_s16 + $0xbd0] sm:$0xff]  }
 0x1f9   : > { %2636 = vadd.xlane.f32.xlu1 %v2199_v13  ;;  %v1693_v13 = vld [vmem:[%s5572_s16 + $0xbb8] sm:$0xf]  ;;  %v671_v45 = vunpack.c.l.bf16 %v415_v39 }
 0x1fa   : > { %2634 = vadd.xlane.f32.xlu0 %v2198_v20  ;;  %v1692_v20 = vld [vmem:[%s5572_s16 + $0xba8] sm:$0xf]  ;;  %v1949_v3 = vunpack.c.l.bf16 %v1693_v13  ;;  %v2206_v54 = vadd.f32 %v1950_v30, %v1438_v40  ;;  %v1695_v13 = vld [vmem:[%s5572_s16 + $0xbd8] sm:$0xf] }
 0x1fb   : > { %v6225_v28 = vpop.xlane.xlu2 %2554  ;;  %v1948_v59 = vunpack.c.l.bf16 %v1692_v20 }
 0x1fc   : > { %8449 = vst [vmem:[#allocation103_spill] sm:$0xff] %v6225_v28  ;;  %v6227_v24 = vpop.xlane.xlu1 %2552  ;;  %v1437_v28 = vadd.f32 %v1181_v7, %v669_v56  ;;  %v1183_v56 = vunpack.c.h.bf16 %v415_v39  ;;  %v418_v39 = vld [vmem:[%s5572_s16 + $0xc00] sm:$0xff]  }
 0x1fd   : > { %8450 = vst [vmem:[#allocation104_spill] sm:$0xff] %v6227_v24  ;;  %v6229_v32 = vpop.xlane.xlu0 %2550  ;;  %v2204_v10 = vadd.f32 %v1948_v59, %v1436_v44 }
 0x1fe   : > { %8451 = vst [vmem:[#allocation105_spill] sm:$0xff] %v6229_v32  ;;  %v1185_v32 = vunpack.c.h.bf16 %v417_v63  ;;  %v2205_v7 = vadd.f32 %v1949_v3, %v1437_v28  ;;  %v1952_v63 = vunpack.c.l.bf16 %v1696_v8 }
 0x200   : > { %2644 = vadd.xlane.f32.xlu2 %v2203_v58  ;;  %v1697_v58 = vld [vmem:[%s5572_s16 + $0xbf8] sm:$0xf]  ;;  %v1441_v20 = vadd.f32 %v1185_v32, %v673_v52 }
 0x201   : > { %2642 = vadd.xlane.f32.xlu1 %v2202_v50  ;;  %v672_v50 = vunpack.c.l.bf16 %v416_v0  ;;  %v1953_v40 = vunpack.c.l.bf16 %v1697_v58  ;;  %v1700_v58 = vld [vmem:[%s5572_s16 + $0xc28] sm:$0xf] }
 0x202   : > { %2640 = vadd.xlane.f32.xlu0 %v2201_v2  ;;  %v1184_v2 = vunpack.c.h.bf16 %v416_v0  ;;  %v419_v0 = vld [vmem:[%s5572_s16 + $0xc10] sm:$0xff]  }
 0x203   : > { %v6237_v16 = vpop.xlane.xlu2 %2560  ;;  %v2209_v59 = vadd.f32 %v1953_v40, %v1441_v20 }
 0x204   : > { %8452 = vst [vmem:[#allocation106_spill] sm:$0xff] %v6237_v16  ;;  %v6239_v38 = vpop.xlane.xlu1 %2558  ;;  %v1440_v30 = vadd.f32 %v1184_v2, %v672_v50  ;;  %v1439_v16 = vadd.f32 %v1183_v56, %v671_v45  ;;  %v675_v50 = vunpack.c.l.bf16 %v419_v0  ;;  %v1187_v2 = vunpack.c.h.bf16 %v419_v0 }
 0x205   : > { %8453 = vst [vmem:[#allocation107_spill] sm:$0xff] %v6239_v38  ;;  %v6241_v19 = vpop.xlane.xlu0 %2556  ;;  %v420_v38 = vld [vmem:[%s5572_s16 + $0xc20] sm:$0xff]   ;;  %v674_v45 = vunpack.c.l.bf16 %v418_v39  ;;  %v1186_v56 = vunpack.c.h.bf16 %v418_v39 }
 0x206   : > { %8454 = vst [vmem:[#allocation108_spill] sm:$0xff] %v6241_v19  ;;  %v1951_v19 = vunpack.c.l.bf16 %v1695_v13  ;;  %v676_v28 = vunpack.c.l.bf16 %v420_v38  ;;  %v1188_v3 = vunpack.c.h.bf16 %v420_v38  ;;  %v1956_v13 = vunpack.c.l.bf16 %v1700_v58  ;;  %v423_v38 = vld [vmem:[%s5572_s16 + $0xc50] sm:$0xff]  }
 0x207   : > { %v1442_v40 = vadd.f32 %v1186_v56, %v674_v45  ;;  %v679_v39 = vunpack.c.l.bf16 %v423_v38  ;;  %v1702_v56 = vld [vmem:[%s5572_s16 + $0xc48] sm:$0xf] }
 0x208   : > { %2650 = vadd.xlane.f32.xlu2 %v2206_v54  ;;  %v2208_v54 = vadd.f32 %v1952_v63, %v1440_v30  ;;  %v2207_v52 = vadd.f32 %v1951_v19, %v1439_v16  ;;  %v1444_v8 = vadd.f32 %v1188_v3, %v676_v28  ;;  %v422_v19 = vld [vmem:[%s5572_s16 + $0xc40] sm:$0xff]   ;;  %v421_v30 = vld [vmem:[%s5572_s16 + $0xc30] sm:$0xff]  }
 0x209   : > { %2648 = vadd.xlane.f32.xlu1 %v2205_v7  ;;  %v1699_v7 = vld [vmem:[%s5572_s16 + $0xc18] sm:$0xf]  ;;  %v677_v58 = vunpack.c.l.bf16 %v421_v30 }
 0x20a   : > { %2646 = vadd.xlane.f32.xlu0 %v2204_v10  ;;  %v1698_v10 = vld [vmem:[%s5572_s16 + $0xc08] sm:$0xf]  ;;  %v1955_v20 = vunpack.c.l.bf16 %v1699_v7  ;;  %v2212_v0 = vadd.f32 %v1956_v13, %v1444_v8  ;;  %v1701_v7 = vld [vmem:[%s5572_s16 + $0xc38] sm:$0xf] }
 0x20b   : > { %v6249_v24 = vpop.xlane.xlu2 %2566  ;;  %v1954_v16 = vunpack.c.l.bf16 %v1698_v10 }
 0x20c   : > { %8455 = vst [vmem:[#allocation109_spill] sm:$0xff] %v6249_v24  ;;  %v6251_v32 = vpop.xlane.xlu1 %2564  ;;  %v1443_v24 = vadd.f32 %v1187_v2, %v675_v50  ;;  %v1189_v50 = vunpack.c.h.bf16 %v421_v30  ;;  %v424_v30 = vld [vmem:[%s5572_s16 + $0xc60] sm:$0xff]  }
 0x20d   : > { %8456 = vst [vmem:[#allocation110_spill] sm:$0xff] %v6251_v32  ;;  %v6253_v44 = vpop.xlane.xlu0 %2562  ;;  %v2210_v45 = vadd.f32 %v1954_v16, %v1442_v40 }
 0x20e   : > { %8457 = vst [vmem:[#allocation111_spill] sm:$0xff] %v6253_v44  ;;  %v1191_v44 = vunpack.c.h.bf16 %v423_v38  ;;  %v2211_v2 = vadd.f32 %v1955_v20, %v1443_v24  ;;  %v1958_v38 = vunpack.c.l.bf16 %v1702_v56 }
 0x210   : > { %2656 = vadd.xlane.f32.xlu2 %v2209_v59  ;;  %v1703_v59 = vld [vmem:[%s5572_s16 + $0xc58] sm:$0xf]  ;;  %v1447_v10 = vadd.f32 %v1191_v44, %v679_v39 }
 0x211   : > { %2654 = vadd.xlane.f32.xlu1 %v2208_v54  ;;  %v678_v54 = vunpack.c.l.bf16 %v422_v19  ;;  %v1959_v8 = vunpack.c.l.bf16 %v1703_v59  ;;  %v1706_v59 = vld [vmem:[%s5572_s16 + $0xc88] sm:$0xf] }
 0x212   : > { %2652 = vadd.xlane.f32.xlu0 %v2207_v52  ;;  %v1190_v52 = vunpack.c.h.bf16 %v422_v19  ;;  %v425_v19 = vld [vmem:[%s5572_s16 + $0xc70] sm:$0xff]  }
 0x213   : > { %v6261_v63 = vpop.xlane.xlu2 %2572  ;;  %v2215_v16 = vadd.f32 %v1959_v8, %v1447_v10 }
 0x214   : > { %8458 = vst [vmem:[#allocation112_spill] sm:$0xff] %v6261_v63  ;;  %v6263_v28 = vpop.xlane.xlu1 %2570  ;;  %v1446_v13 = vadd.f32 %v1190_v52, %v678_v54  ;;  %v1445_v63 = vadd.f32 %v1189_v50, %v677_v58  ;;  %v681_v54 = vunpack.c.l.bf16 %v425_v19  ;;  %v1193_v52 = vunpack.c.h.bf16 %v425_v19 }
 0x215   : > { %8459 = vst [vmem:[#allocation113_spill] sm:$0xff] %v6263_v28  ;;  %v6265_v3 = vpop.xlane.xlu0 %2568  ;;  %v426_v28 = vld [vmem:[%s5572_s16 + $0xc80] sm:$0xff]   ;;  %v680_v58 = vunpack.c.l.bf16 %v424_v30  ;;  %v1192_v50 = vunpack.c.h.bf16 %v424_v30 }
 0x216   : > { %8460 = vst [vmem:[#allocation114_spill] sm:$0xff] %v6265_v3  ;;  %v1957_v3 = vunpack.c.l.bf16 %v1701_v7  ;;  %v682_v24 = vunpack.c.l.bf16 %v426_v28  ;;  %v1194_v20 = vunpack.c.h.bf16 %v426_v28  ;;  %v1962_v7 = vunpack.c.l.bf16 %v1706_v59  ;;  %v429_v28 = vld [vmem:[%s5572_s16 + $0xcb0] sm:$0xff]  }
 0x217   : > { %v1448_v8 = vadd.f32 %v1192_v50, %v680_v58  ;;  %v685_v30 = vunpack.c.l.bf16 %v429_v28  ;;  %v1708_v50 = vld [vmem:[%s5572_s16 + $0xca8] sm:$0xf] }
 0x218   : > { %2662 = vadd.xlane.f32.xlu2 %v2212_v0  ;;  %v2214_v0 = vadd.f32 %v1958_v38, %v1446_v13  ;;  %v2213_v39 = vadd.f32 %v1957_v3, %v1445_v63  ;;  %v1450_v56 = vadd.f32 %v1194_v20, %v682_v24  ;;  %v428_v3 = vld [vmem:[%s5572_s16 + $0xca0] sm:$0xff]   ;;  %v427_v13 = vld [vmem:[%s5572_s16 + $0xc90] sm:$0xff]  }
 0x219   : > { %2660 = vadd.xlane.f32.xlu1 %v2211_v2  ;;  %v1705_v2 = vld [vmem:[%s5572_s16 + $0xc78] sm:$0xf]  ;;  %v683_v59 = vunpack.c.l.bf16 %v427_v13 }
 0x21a   : > { %2658 = vadd.xlane.f32.xlu0 %v2210_v45  ;;  %v1704_v45 = vld [vmem:[%s5572_s16 + $0xc68] sm:$0xf]  ;;  %v1961_v10 = vunpack.c.l.bf16 %v1705_v2  ;;  %v2218_v19 = vadd.f32 %v1962_v7, %v1450_v56  ;;  %v1707_v2 = vld [vmem:[%s5572_s16 + $0xc98] sm:$0xf] }
 0x21b   : > { %v6273_v32 = vpop.xlane.xlu2 %2578  ;;  %v1960_v63 = vunpack.c.l.bf16 %v1704_v45 }
 0x21c   : > { %8461 = vst [vmem:[#allocation115_spill] sm:$0xff] %v6273_v32  ;;  %v6275_v44 = vpop.xlane.xlu1 %2576  ;;  %v1449_v32 = vadd.f32 %v1193_v52, %v681_v54  ;;  %v1195_v54 = vunpack.c.h.bf16 %v427_v13  ;;  %v430_v13 = vld [vmem:[%s5572_s16 + $0xcc0] sm:$0xff]  }
 0x21d   : > { %8462 = vst [vmem:[#allocation116_spill] sm:$0xff] %v6275_v44  ;;  %v6277_v40 = vpop.xlane.xlu0 %2574  ;;  %v2216_v58 = vadd.f32 %v1960_v63, %v1448_v8 }
 0x21e   : > { %8463 = vst [vmem:[#allocation117_spill] sm:$0xff] %v6277_v40  ;;  %v1197_v40 = vunpack.c.h.bf16 %v429_v28  ;;  %v2217_v52 = vadd.f32 %v1961_v10, %v1449_v32  ;;  %v1964_v28 = vunpack.c.l.bf16 %v1708_v50 }
 0x220   : > { %2668 = vadd.xlane.f32.xlu2 %v2215_v16  ;;  %v1709_v16 = vld [vmem:[%s5572_s16 + $0xcb8] sm:$0xf]  ;;  %v1453_v45 = vadd.f32 %v1197_v40, %v685_v30 }
 0x221   : > { %2666 = vadd.xlane.f32.xlu1 %v2214_v0  ;;  %v684_v0 = vunpack.c.l.bf16 %v428_v3  ;;  %v1965_v56 = vunpack.c.l.bf16 %v1709_v16  ;;  %v1712_v16 = vld [vmem:[%s5572_s16 + $0xce8] sm:$0xf] }
 0x222   : > { %2664 = vadd.xlane.f32.xlu0 %v2213_v39  ;;  %v1196_v39 = vunpack.c.h.bf16 %v428_v3  ;;  %v431_v3 = vld [vmem:[%s5572_s16 + $0xcd0] sm:$0xff]  }
 0x223   : > { %v6285_v38 = vpop.xlane.xlu2 %2584  ;;  %v2221_v63 = vadd.f32 %v1965_v56, %v1453_v45 }
 0x224   : > { %8464 = vst [vmem:[#allocation118_spill] sm:$0xff] %v6285_v38  ;;  %v6287_v24 = vpop.xlane.xlu1 %2582  ;;  %v1452_v7 = vadd.f32 %v1196_v39, %v684_v0  ;;  %v1451_v38 = vadd.f32 %v1195_v54, %v683_v59  ;;  %v687_v0 = vunpack.c.l.bf16 %v431_v3  ;;  %v1199_v39 = vunpack.c.h.bf16 %v431_v3 }
 0x225   : > { %8465 = vst [vmem:[#allocation119_spill] sm:$0xff] %v6287_v24  ;;  %v6289_v20 = vpop.xlane.xlu0 %2580  ;;  %v432_v24 = vld [vmem:[%s5572_s16 + $0xce0] sm:$0xff]   ;;  %v686_v59 = vunpack.c.l.bf16 %v430_v13  ;;  %v1198_v54 = vunpack.c.h.bf16 %v430_v13 }
 0x226   : > { %8466 = vst [vmem:[#allocation120_spill] sm:$0xff] %v6289_v20  ;;  %v1963_v20 = vunpack.c.l.bf16 %v1707_v2  ;;  %v688_v32 = vunpack.c.l.bf16 %v432_v24  ;;  %v1200_v10 = vunpack.c.h.bf16 %v432_v24  ;;  %v1968_v2 = vunpack.c.l.bf16 %v1712_v16  ;;  %v435_v24 = vld [vmem:[%s5572_s16 + $0xd10] sm:$0xff]  }
 0x227   : > { %v1454_v56 = vadd.f32 %v1198_v54, %v686_v59  ;;  %v691_v13 = vunpack.c.l.bf16 %v435_v24  ;;  %v1714_v54 = vld [vmem:[%s5572_s16 + $0xd08] sm:$0xf] }
 0x228   : > { %2674 = vadd.xlane.f32.xlu2 %v2218_v19  ;;  %v2220_v19 = vadd.f32 %v1964_v28, %v1452_v7  ;;  %v2219_v30 = vadd.f32 %v1963_v20, %v1451_v38  ;;  %v1456_v50 = vadd.f32 %v1200_v10, %v688_v32  ;;  %v434_v20 = vld [vmem:[%s5572_s16 + $0xd00] sm:$0xff]   ;;  %v433_v7 = vld [vmem:[%s5572_s16 + $0xcf0] sm:$0xff]  }
 0x229   : > { %2672 = vadd.xlane.f32.xlu1 %v2217_v52  ;;  %v1711_v52 = vld [vmem:[%s5572_s16 + $0xcd8] sm:$0xf]  ;;  %v689_v16 = vunpack.c.l.bf16 %v433_v7 }
 0x22a   : > { %2670 = vadd.xlane.f32.xlu0 %v2216_v58  ;;  %v1710_v58 = vld [vmem:[%s5572_s16 + $0xcc8] sm:$0xf]  ;;  %v1967_v45 = vunpack.c.l.bf16 %v1711_v52  ;;  %v2224_v3 = vadd.f32 %v1968_v2, %v1456_v50  ;;  %v1713_v52 = vld [vmem:[%s5572_s16 + $0xcf8] sm:$0xf] }
 0x22b   : > { %v6297_v44 = vpop.xlane.xlu2 %2590  ;;  %v1966_v38 = vunpack.c.l.bf16 %v1710_v58 }
 0x22c   : > { %8467 = vst [vmem:[#allocation121_spill] sm:$0xff] %v6297_v44  ;;  %v6299_v40 = vpop.xlane.xlu1 %2588  ;;  %v1455_v44 = vadd.f32 %v1199_v39, %v687_v0  ;;  %v1201_v0 = vunpack.c.h.bf16 %v433_v7  ;;  %v436_v7 = vld [vmem:[%s5572_s16 + $0xd20] sm:$0xff]  }
 0x22d   : > { %8468 = vst [vmem:[#allocation122_spill] sm:$0xff] %v6299_v40  ;;  %v6301_v8 = vpop.xlane.xlu0 %2586  ;;  %v2222_v59 = vadd.f32 %v1966_v38, %v1454_v56 }
 0x22e   : > { %8469 = vst [vmem:[#allocation123_spill] sm:$0xff] %v6301_v8  ;;  %v1203_v8 = vunpack.c.h.bf16 %v435_v24  ;;  %v2223_v39 = vadd.f32 %v1967_v45, %v1455_v44  ;;  %v1970_v24 = vunpack.c.l.bf16 %v1714_v54 }
 0x230   : > { %2680 = vadd.xlane.f32.xlu2 %v2221_v63  ;;  %v1715_v63 = vld [vmem:[%s5572_s16 + $0xd18] sm:$0xf]  ;;  %v1459_v58 = vadd.f32 %v1203_v8, %v691_v13 }
 0x231   : > { %2678 = vadd.xlane.f32.xlu1 %v2220_v19  ;;  %v690_v19 = vunpack.c.l.bf16 %v434_v20  ;;  %v1971_v50 = vunpack.c.l.bf16 %v1715_v63  ;;  %v1718_v63 = vld [vmem:[%s5572_s16 + $0xd48] sm:$0xf] }
 0x232   : > { %2676 = vadd.xlane.f32.xlu0 %v2219_v30  ;;  %v1202_v30 = vunpack.c.h.bf16 %v434_v20  ;;  %v437_v20 = vld [vmem:[%s5572_s16 + $0xd30] sm:$0xff]  }
 0x233   : > { %v6309_v28 = vpop.xlane.xlu2 %2596  ;;  %v2227_v38 = vadd.f32 %v1971_v50, %v1459_v58 }
 0x234   : > { %8470 = vst [vmem:[#allocation124_spill] sm:$0xff] %v6309_v28  ;;  %v6311_v32 = vpop.xlane.xlu1 %2594  ;;  %v1458_v2 = vadd.f32 %v1202_v30, %v690_v19  ;;  %v1457_v28 = vadd.f32 %v1201_v0, %v689_v16  ;;  %v693_v19 = vunpack.c.l.bf16 %v437_v20  ;;  %v1205_v30 = vunpack.c.h.bf16 %v437_v20 }
 0x235   : > { %8471 = vst [vmem:[#allocation125_spill] sm:$0xff] %v6311_v32  ;;  %v6313_v10 = vpop.xlane.xlu0 %2592  ;;  %v438_v32 = vld [vmem:[%s5572_s16 + $0xd40] sm:$0xff]   ;;  %v692_v16 = vunpack.c.l.bf16 %v436_v7  ;;  %v1204_v0 = vunpack.c.h.bf16 %v436_v7 }
 0x236   : > { %8472 = vst [vmem:[#allocation126_spill] sm:$0xff] %v6313_v10  ;;  %v1969_v10 = vunpack.c.l.bf16 %v1713_v52  ;;  %v694_v44 = vunpack.c.l.bf16 %v438_v32  ;;  %v1206_v45 = vunpack.c.h.bf16 %v438_v32  ;;  %v1974_v52 = vunpack.c.l.bf16 %v1718_v63  ;;  %v441_v32 = vld [vmem:[%s5572_s16 + $0xd70] sm:$0xff]  }
 0x237   : > { %v1460_v50 = vadd.f32 %v1204_v0, %v692_v16  ;;  %v697_v7 = vunpack.c.l.bf16 %v441_v32  ;;  %v1720_v0 = vld [vmem:[%s5572_s16 + $0xd68] sm:$0xf] }
 0x238   : > { %2686 = vadd.xlane.f32.xlu2 %v2224_v3  ;;  %v2226_v3 = vadd.f32 %v1970_v24, %v1458_v2  ;;  %v2225_v13 = vadd.f32 %v1969_v10, %v1457_v28  ;;  %v1462_v54 = vadd.f32 %v1206_v45, %v694_v44  ;;  %v440_v10 = vld [vmem:[%s5572_s16 + $0xd60] sm:$0xff]   ;;  %v439_v2 = vld [vmem:[%s5572_s16 + $0xd50] sm:$0xff]  }
 0x239   : > { %2684 = vadd.xlane.f32.xlu1 %v2223_v39  ;;  %v1717_v39 = vld [vmem:[%s5572_s16 + $0xd38] sm:$0xf]  ;;  %v695_v63 = vunpack.c.l.bf16 %v439_v2 }
 0x23a   : > { %2682 = vadd.xlane.f32.xlu0 %v2222_v59  ;;  %v1716_v59 = vld [vmem:[%s5572_s16 + $0xd28] sm:$0xf]  ;;  %v1973_v58 = vunpack.c.l.bf16 %v1717_v39  ;;  %v2230_v20 = vadd.f32 %v1974_v52, %v1462_v54  ;;  %v1719_v39 = vld [vmem:[%s5572_s16 + $0xd58] sm:$0xf] }
 0x23b   : > { %v6321_v40 = vpop.xlane.xlu2 %2602  ;;  %v1972_v28 = vunpack.c.l.bf16 %v1716_v59 }
 0x23c   : > { %8473 = vst [vmem:[#allocation127_spill] sm:$0xff] %v6321_v40  ;;  %v6323_v8 = vpop.xlane.xlu1 %2600  ;;  %v1461_v40 = vadd.f32 %v1205_v30, %v693_v19  ;;  %v1207_v19 = vunpack.c.h.bf16 %v439_v2  ;;  %v442_v2 = vld [vmem:[%s5572_s16 + $0xd80] sm:$0xff]  }
 0x23d   : > { %8474 = vst [vmem:[#allocation128_spill] sm:$0xff] %v6323_v8  ;;  %v6325_v56 = vpop.xlane.xlu0 %2598  ;;  %v2228_v16 = vadd.f32 %v1972_v28, %v1460_v50 }
 0x23e   : > { %8475 = vst [vmem:[#allocation129_spill] sm:$0xff] %v6325_v56  ;;  %v1209_v56 = vunpack.c.h.bf16 %v441_v32  ;;  %v2229_v30 = vadd.f32 %v1973_v58, %v1461_v40  ;;  %v1976_v32 = vunpack.c.l.bf16 %v1720_v0 }
 0x240   : > { %2692 = vadd.xlane.f32.xlu2 %v2227_v38  ;;  %v1721_v38 = vld [vmem:[%s5572_s16 + $0xd78] sm:$0xf]  ;;  %v1465_v59 = vadd.f32 %v1209_v56, %v697_v7 }
 0x241   : > { %2690 = vadd.xlane.f32.xlu1 %v2226_v3  ;;  %v696_v3 = vunpack.c.l.bf16 %v440_v10  ;;  %v1977_v54 = vunpack.c.l.bf16 %v1721_v38  ;;  %v1724_v38 = vld [vmem:[%s5572_s16 + $0xda8] sm:$0xf] }
 0x242   : > { %2688 = vadd.xlane.f32.xlu0 %v2225_v13  ;;  %v1208_v13 = vunpack.c.h.bf16 %v440_v10  ;;  %v443_v10 = vld [vmem:[%s5572_s16 + $0xd90] sm:$0xff]  }
 0x243   : > { %v6333_v24 = vpop.xlane.xlu2 %2608  ;;  %v2233_v28 = vadd.f32 %v1977_v54, %v1465_v59 }
 0x244   : > { %8476 = vst [vmem:[#allocation130_spill] sm:$0xff] %v6333_v24  ;;  %v6335_v44 = vpop.xlane.xlu1 %2606  ;;  %v1464_v52 = vadd.f32 %v1208_v13, %v696_v3  ;;  %v1463_v24 = vadd.f32 %v1207_v19, %v695_v63  ;;  %v699_v3 = vunpack.c.l.bf16 %v443_v10  ;;  %v1211_v13 = vunpack.c.h.bf16 %v443_v10 }
 0x245   : > { %8477 = vst [vmem:[#allocation131_spill] sm:$0xff] %v6335_v44  ;;  %v6337_v45 = vpop.xlane.xlu0 %2604  ;;  %v444_v44 = vld [vmem:[%s5572_s16 + $0xda0] sm:$0xff]   ;;  %v698_v63 = vunpack.c.l.bf16 %v442_v2  ;;  %v1210_v19 = vunpack.c.h.bf16 %v442_v2 }
 0x246   : > { %8478 = vst [vmem:[#allocation132_spill] sm:$0xff] %v6337_v45  ;;  %v1975_v45 = vunpack.c.l.bf16 %v1719_v39  ;;  %v700_v40 = vunpack.c.l.bf16 %v444_v44  ;;  %v1212_v58 = vunpack.c.h.bf16 %v444_v44  ;;  %v1980_v39 = vunpack.c.l.bf16 %v1724_v38  ;;  %v447_v44 = vld [vmem:[%s5572_s16 + $0xdd0] sm:$0xff]  }
 0x247   : > { %v1466_v54 = vadd.f32 %v1210_v19, %v698_v63  ;;  %v703_v2 = vunpack.c.l.bf16 %v447_v44  ;;  %v1726_v19 = vld [vmem:[%s5572_s16 + $0xdc8] sm:$0xf] }
 0x248   : > { %2698 = vadd.xlane.f32.xlu2 %v2230_v20  ;;  %v2232_v20 = vadd.f32 %v1976_v32, %v1464_v52  ;;  %v2231_v7 = vadd.f32 %v1975_v45, %v1463_v24  ;;  %v1468_v0 = vadd.f32 %v1212_v58, %v700_v40  ;;  %v446_v45 = vld [vmem:[%s5572_s16 + $0xdc0] sm:$0xff]   ;;  %v445_v52 = vld [vmem:[%s5572_s16 + $0xdb0] sm:$0xff]  }
 0x249   : > { %2696 = vadd.xlane.f32.xlu1 %v2229_v30  ;;  %v1723_v30 = vld [vmem:[%s5572_s16 + $0xd98] sm:$0xf]  ;;  %v701_v38 = vunpack.c.l.bf16 %v445_v52 }
 0x24a   : > { %2694 = vadd.xlane.f32.xlu0 %v2228_v16  ;;  %v1722_v16 = vld [vmem:[%s5572_s16 + $0xd88] sm:$0xf]  ;;  %v1979_v59 = vunpack.c.l.bf16 %v1723_v30  ;;  %v2236_v10 = vadd.f32 %v1980_v39, %v1468_v0  ;;  %v1725_v30 = vld [vmem:[%s5572_s16 + $0xdb8] sm:$0xf] }
 0x24b   : > { %v6345_v8 = vpop.xlane.xlu2 %2614  ;;  %v1978_v24 = vunpack.c.l.bf16 %v1722_v16 }
 0x24c   : > { %8479 = vst [vmem:[#allocation133_spill] sm:$0xff] %v6345_v8  ;;  %v6347_v56 = vpop.xlane.xlu1 %2612  ;;  %v1467_v8 = vadd.f32 %v1211_v13, %v699_v3  ;;  %v1213_v3 = vunpack.c.h.bf16 %v445_v52  ;;  %v448_v52 = vld [vmem:[%s5572_s16 + $0xde0] sm:$0xff]  }
 0x24d   : > { %8480 = vst [vmem:[#allocation134_spill] sm:$0xff] %v6347_v56  ;;  %v6349_v50 = vpop.xlane.xlu0 %2610  ;;  %v2234_v63 = vadd.f32 %v1978_v24, %v1466_v54 }
 0x24e   : > { %8481 = vst [vmem:[#allocation135_spill] sm:$0xff] %v6349_v50  ;;  %v1215_v50 = vunpack.c.h.bf16 %v447_v44  ;;  %v2235_v13 = vadd.f32 %v1979_v59, %v1467_v8  ;;  %v1982_v44 = vunpack.c.l.bf16 %v1726_v19 }
 0x250   : > { %2704 = vadd.xlane.f32.xlu2 %v2233_v28  ;;  %v1727_v28 = vld [vmem:[%s5572_s16 + $0xdd8] sm:$0xf]  ;;  %v1471_v16 = vadd.f32 %v1215_v50, %v703_v2 }
 0x251   : > { %2702 = vadd.xlane.f32.xlu1 %v2232_v20  ;;  %v702_v20 = vunpack.c.l.bf16 %v446_v45  ;;  %v1983_v0 = vunpack.c.l.bf16 %v1727_v28  ;;  %v1730_v28 = vld [vmem:[%s5572_s16 + $0xe08] sm:$0xf] }
 0x252   : > { %2700 = vadd.xlane.f32.xlu0 %v2231_v7  ;;  %v1214_v7 = vunpack.c.h.bf16 %v446_v45  ;;  %v449_v45 = vld [vmem:[%s5572_s16 + $0xdf0] sm:$0xff]  }
 0x253   : > { %v6357_v32 = vpop.xlane.xlu2 %2620  ;;  %v2239_v24 = vadd.f32 %v1983_v0, %v1471_v16 }
 0x254   : > { %8482 = vst [vmem:[#allocation136_spill] sm:$0xff] %v6357_v32  ;;  %v6359_v40 = vpop.xlane.xlu1 %2618  ;;  %v1470_v39 = vadd.f32 %v1214_v7, %v702_v20  ;;  %v1469_v32 = vadd.f32 %v1213_v3, %v701_v38  ;;  %v705_v20 = vunpack.c.l.bf16 %v449_v45  ;;  %v1217_v7 = vunpack.c.h.bf16 %v449_v45 }
 0x255   : > { %8483 = vst [vmem:[#allocation137_spill] sm:$0xff] %v6359_v40  ;;  %v6361_v58 = vpop.xlane.xlu0 %2616  ;;  %v450_v40 = vld [vmem:[%s5572_s16 + $0xe00] sm:$0xff]   ;;  %v704_v38 = vunpack.c.l.bf16 %v448_v52  ;;  %v1216_v3 = vunpack.c.h.bf16 %v448_v52 }
 0x256   : > { %8484 = vst [vmem:[#allocation138_spill] sm:$0xff] %v6361_v58  ;;  %v1981_v58 = vunpack.c.l.bf16 %v1725_v30  ;;  %v706_v8 = vunpack.c.l.bf16 %v450_v40  ;;  %v1218_v59 = vunpack.c.h.bf16 %v450_v40  ;;  %v1986_v30 = vunpack.c.l.bf16 %v1730_v28  ;;  %v453_v40 = vld [vmem:[%s5572_s16 + $0xe30] sm:$0xff]  }
 0x257   : > { %v1472_v0 = vadd.f32 %v1216_v3, %v704_v38  ;;  %v709_v52 = vunpack.c.l.bf16 %v453_v40  ;;  %v1732_v3 = vld [vmem:[%s5572_s16 + $0xe28] sm:$0xf] }
 0x258   : > { %2710 = vadd.xlane.f32.xlu2 %v2236_v10  ;;  %v2238_v10 = vadd.f32 %v1982_v44, %v1470_v39  ;;  %v2237_v2 = vadd.f32 %v1981_v58, %v1469_v32  ;;  %v1474_v19 = vadd.f32 %v1218_v59, %v706_v8  ;;  %v452_v58 = vld [vmem:[%s5572_s16 + $0xe20] sm:$0xff]   ;;  %v451_v39 = vld [vmem:[%s5572_s16 + $0xe10] sm:$0xff]  }
 0x259   : > { %2708 = vadd.xlane.f32.xlu1 %v2235_v13  ;;  %v1729_v13 = vld [vmem:[%s5572_s16 + $0xdf8] sm:$0xf]  ;;  %v707_v28 = vunpack.c.l.bf16 %v451_v39 }
 0x25a   : > { %2706 = vadd.xlane.f32.xlu0 %v2234_v63  ;;  %v1728_v63 = vld [vmem:[%s5572_s16 + $0xde8] sm:$0xf]  ;;  %v1985_v16 = vunpack.c.l.bf16 %v1729_v13  ;;  %v2242_v45 = vadd.f32 %v1986_v30, %v1474_v19  ;;  %v1731_v13 = vld [vmem:[%s5572_s16 + $0xe18] sm:$0xf] }
 0x25b   : > { %v6369_v56 = vpop.xlane.xlu2 %2626  ;;  %v1984_v32 = vunpack.c.l.bf16 %v1728_v63 }
 0x25c   : > { %8485 = vst [vmem:[#allocation139_spill] sm:$0xff] %v6369_v56  ;;  %v6371_v50 = vpop.xlane.xlu1 %2624  ;;  %v1473_v56 = vadd.f32 %v1217_v7, %v705_v20  ;;  %v1219_v20 = vunpack.c.h.bf16 %v451_v39  ;;  %v454_v39 = vld [vmem:[%s5572_s16 + $0xe40] sm:$0xff]  }
 0x25d   : > { %8486 = vst [vmem:[#allocation140_spill] sm:$0xff] %v6371_v50  ;;  %v6373_v54 = vpop.xlane.xlu0 %2622  ;;  %v2240_v38 = vadd.f32 %v1984_v32, %v1472_v0 }
 0x25e   : > { %8487 = vst [vmem:[#allocation141_spill] sm:$0xff] %v6373_v54  ;;  %v1221_v54 = vunpack.c.h.bf16 %v453_v40  ;;  %v2241_v7 = vadd.f32 %v1985_v16, %v1473_v56  ;;  %v1988_v40 = vunpack.c.l.bf16 %v1732_v3 }
 0x260   : > { %2716 = vadd.xlane.f32.xlu2 %v2239_v24  ;;  %v1733_v24 = vld [vmem:[%s5572_s16 + $0xe38] sm:$0xf]  ;;  %v1477_v63 = vadd.f32 %v1221_v54, %v709_v52 }
 0x261   : > { %2714 = vadd.xlane.f32.xlu1 %v2238_v10  ;;  %v708_v10 = vunpack.c.l.bf16 %v452_v58  ;;  %v1989_v19 = vunpack.c.l.bf16 %v1733_v24  ;;  %v1736_v24 = vld [vmem:[%s5572_s16 + $0xe68] sm:$0xf] }
 0x262   : > { %2712 = vadd.xlane.f32.xlu0 %v2237_v2  ;;  %v1220_v2 = vunpack.c.h.bf16 %v452_v58  ;;  %v455_v58 = vld [vmem:[%s5572_s16 + $0xe50] sm:$0xff]  }
 0x263   : > { %v6381_v44 = vpop.xlane.xlu2 %2632  ;;  %v2245_v32 = vadd.f32 %v1989_v19, %v1477_v63 }
 0x264   : > { %8488 = vst [vmem:[#allocation142_spill] sm:$0xff] %v6381_v44  ;;  %v6383_v8 = vpop.xlane.xlu1 %2630  ;;  %v1476_v30 = vadd.f32 %v1220_v2, %v708_v10  ;;  %v1475_v44 = vadd.f32 %v1219_v20, %v707_v28  ;;  %v711_v10 = vunpack.c.l.bf16 %v455_v58  ;;  %v1223_v2 = vunpack.c.h.bf16 %v455_v58 }
 0x265   : > { %8489 = vst [vmem:[#allocation143_spill] sm:$0xff] %v6383_v8  ;;  %v6385_v59 = vpop.xlane.xlu0 %2628  ;;  %v456_v8 = vld [vmem:[%s5572_s16 + $0xe60] sm:$0xff]   ;;  %v710_v28 = vunpack.c.l.bf16 %v454_v39  ;;  %v1222_v20 = vunpack.c.h.bf16 %v454_v39 }
 0x266   : > { %8490 = vst [vmem:[#allocation144_spill] sm:$0xff] %v6385_v59  ;;  %v1987_v59 = vunpack.c.l.bf16 %v1731_v13  ;;  %v712_v56 = vunpack.c.l.bf16 %v456_v8  ;;  %v1224_v16 = vunpack.c.h.bf16 %v456_v8  ;;  %v1992_v13 = vunpack.c.l.bf16 %v1736_v24  ;;  %v459_v8 = vld [vmem:[%s5572_s16 + $0xe90] sm:$0xff]  }
 0x267   : > { %v1478_v19 = vadd.f32 %v1222_v20, %v710_v28  ;;  %v715_v39 = vunpack.c.l.bf16 %v459_v8  ;;  %v1738_v20 = vld [vmem:[%s5572_s16 + $0xe88] sm:$0xf] }
 0x268   : > { %2722 = vadd.xlane.f32.xlu2 %v2242_v45  ;;  %v2244_v45 = vadd.f32 %v1988_v40, %v1476_v30  ;;  %v2243_v52 = vadd.f32 %v1987_v59, %v1475_v44  ;;  %v1480_v3 = vadd.f32 %v1224_v16, %v712_v56  ;;  %v458_v59 = vld [vmem:[%s5572_s16 + $0xe80] sm:$0xff]   ;;  %v457_v30 = vld [vmem:[%s5572_s16 + $0xe70] sm:$0xff]  }
 0x269   : > { %2720 = vadd.xlane.f32.xlu1 %v2241_v7  ;;  %v1735_v7 = vld [vmem:[%s5572_s16 + $0xe58] sm:$0xf]  ;;  %v713_v24 = vunpack.c.l.bf16 %v457_v30 }
 0x26a   : > { %2718 = vadd.xlane.f32.xlu0 %v2240_v38  ;;  %v1734_v38 = vld [vmem:[%s5572_s16 + $0xe48] sm:$0xf]  ;;  %v1991_v63 = vunpack.c.l.bf16 %v1735_v7  ;;  %v2248_v58 = vadd.f32 %v1992_v13, %v1480_v3  ;;  %v1737_v7 = vld [vmem:[%s5572_s16 + $0xe78] sm:$0xf] }
 0x26b   : > { %v6393_v50 = vpop.xlane.xlu2 %2638  ;;  %v1990_v44 = vunpack.c.l.bf16 %v1734_v38 }
 0x26c   : > { %8491 = vst [vmem:[#allocation145_spill] sm:$0xff] %v6393_v50  ;;  %v6395_v54 = vpop.xlane.xlu1 %2636  ;;  %v1479_v50 = vadd.f32 %v1223_v2, %v711_v10  ;;  %v1225_v10 = vunpack.c.h.bf16 %v457_v30  ;;  %v460_v30 = vld [vmem:[%s5572_s16 + $0xea0] sm:$0xff]  }
 0x26d   : > { %8492 = vst [vmem:[#allocation146_spill] sm:$0xff] %v6395_v54  ;;  %v6397_v0 = vpop.xlane.xlu0 %2634  ;;  %v2246_v28 = vadd.f32 %v1990_v44, %v1478_v19 }
 0x26e   : > { %8493 = vst [vmem:[#allocation147_spill] sm:$0xff] %v6397_v0  ;;  %v1227_v0 = vunpack.c.h.bf16 %v459_v8  ;;  %v2247_v2 = vadd.f32 %v1991_v63, %v1479_v50  ;;  %v1994_v8 = vunpack.c.l.bf16 %v1738_v20 }
 0x270   : > { %2728 = vadd.xlane.f32.xlu2 %v2245_v32  ;;  %v1739_v32 = vld [vmem:[%s5572_s16 + $0xe98] sm:$0xf]  ;;  %v1483_v38 = vadd.f32 %v1227_v0, %v715_v39 }
 0x271   : > { %2726 = vadd.xlane.f32.xlu1 %v2244_v45  ;;  %v714_v45 = vunpack.c.l.bf16 %v458_v59  ;;  %v1995_v3 = vunpack.c.l.bf16 %v1739_v32  ;;  %v1742_v32 = vld [vmem:[%s5572_s16 + $0xec8] sm:$0xf] }
 0x272   : > { %2724 = vadd.xlane.f32.xlu0 %v2243_v52  ;;  %v1226_v52 = vunpack.c.h.bf16 %v458_v59  ;;  %v461_v59 = vld [vmem:[%s5572_s16 + $0xeb0] sm:$0xff]  }
 0x273   : > { %v6405_v40 = vpop.xlane.xlu2 %2644  ;;  %v2251_v44 = vadd.f32 %v1995_v3, %v1483_v38 }
 0x274   : > { %8494 = vst [vmem:[#allocation148_spill] sm:$0xff] %v6405_v40  ;;  %v6407_v56 = vpop.xlane.xlu1 %2642  ;;  %v1482_v13 = vadd.f32 %v1226_v52, %v714_v45  ;;  %v1481_v40 = vadd.f32 %v1225_v10, %v713_v24  ;;  %v717_v45 = vunpack.c.l.bf16 %v461_v59  ;;  %v1229_v52 = vunpack.c.h.bf16 %v461_v59 }
 0x275   : > { %8495 = vst [vmem:[#allocation149_spill] sm:$0xff] %v6407_v56  ;;  %v6409_v16 = vpop.xlane.xlu0 %2640  ;;  %v462_v56 = vld [vmem:[%s5572_s16 + $0xec0] sm:$0xff]   ;;  %v716_v24 = vunpack.c.l.bf16 %v460_v30  ;;  %v1228_v10 = vunpack.c.h.bf16 %v460_v30 }
 0x276   : > { %8496 = vst [vmem:[#allocation150_spill] sm:$0xff] %v6409_v16  ;;  %v1993_v16 = vunpack.c.l.bf16 %v1737_v7  ;;  %v718_v50 = vunpack.c.l.bf16 %v462_v56  ;;  %v1230_v63 = vunpack.c.h.bf16 %v462_v56  ;;  %v1998_v7 = vunpack.c.l.bf16 %v1742_v32  ;;  %v465_v56 = vld [vmem:[%s5572_s16 + $0xef0] sm:$0xff]  }
 0x277   : > { %v1484_v3 = vadd.f32 %v1228_v10, %v716_v24  ;;  %v721_v30 = vunpack.c.l.bf16 %v465_v56  ;;  %v1744_v10 = vld [vmem:[%s5572_s16 + $0xee8] sm:$0xf] }
 0x278   : > { %2734 = vadd.xlane.f32.xlu2 %v2248_v58  ;;  %v2250_v58 = vadd.f32 %v1994_v8, %v1482_v13  ;;  %v2249_v39 = vadd.f32 %v1993_v16, %v1481_v40  ;;  %v1486_v20 = vadd.f32 %v1230_v63, %v718_v50  ;;  %v464_v16 = vld [vmem:[%s5572_s16 + $0xee0] sm:$0xff]   ;;  %v463_v13 = vld [vmem:[%s5572_s16 + $0xed0] sm:$0xff]  }
 0x279   : > { %2732 = vadd.xlane.f32.xlu1 %v2247_v2  ;;  %v1741_v2 = vld [vmem:[%s5572_s16 + $0xeb8] sm:$0xf]  ;;  %v719_v32 = vunpack.c.l.bf16 %v463_v13 }
 0x27a   : > { %2730 = vadd.xlane.f32.xlu0 %v2246_v28  ;;  %v1740_v28 = vld [vmem:[%s5572_s16 + $0xea8] sm:$0xf]  ;;  %v1997_v38 = vunpack.c.l.bf16 %v1741_v2  ;;  %v2254_v59 = vadd.f32 %v1998_v7, %v1486_v20  ;;  %v1743_v2 = vld [vmem:[%s5572_s16 + $0xed8] sm:$0xf] }
 0x27b   : > { %v6417_v54 = vpop.xlane.xlu2 %2650  ;;  %v1996_v40 = vunpack.c.l.bf16 %v1740_v28 }
 0x27c   : > { %8497 = vst [vmem:[#allocation151_spill] sm:$0xff] %v6417_v54  ;;  %v6419_v0 = vpop.xlane.xlu1 %2648  ;;  %v1485_v54 = vadd.f32 %v1229_v52, %v717_v45  ;;  %v1231_v45 = vunpack.c.h.bf16 %v463_v13  ;;  %v466_v13 = vld [vmem:[%s5572_s16 + $0xf00] sm:$0xff]  }
 0x27d   : > { %8498 = vst [vmem:[#allocation152_spill] sm:$0xff] %v6419_v0  ;;  %v6421_v19 = vpop.xlane.xlu0 %2646  ;;  %v2252_v24 = vadd.f32 %v1996_v40, %v1484_v3 }
 0x27e   : > { %8499 = vst [vmem:[#allocation153_spill] sm:$0xff] %v6421_v19  ;;  %v1233_v19 = vunpack.c.h.bf16 %v465_v56  ;;  %v2253_v52 = vadd.f32 %v1997_v38, %v1485_v54  ;;  %v2000_v56 = vunpack.c.l.bf16 %v1744_v10 }
 0x280   : > { %2740 = vadd.xlane.f32.xlu2 %v2251_v44  ;;  %v1745_v44 = vld [vmem:[%s5572_s16 + $0xef8] sm:$0xf]  ;;  %v1489_v28 = vadd.f32 %v1233_v19, %v721_v30 }
 0x281   : > { %2738 = vadd.xlane.f32.xlu1 %v2250_v58  ;;  %v720_v58 = vunpack.c.l.bf16 %v464_v16  ;;  %v2001_v20 = vunpack.c.l.bf16 %v1745_v44  ;;  %v1748_v44 = vld [vmem:[%s5572_s16 + $0xf28] sm:$0xf] }
 0x282   : > { %2736 = vadd.xlane.f32.xlu0 %v2249_v39  ;;  %v1232_v39 = vunpack.c.h.bf16 %v464_v16  ;;  %v467_v16 = vld [vmem:[%s5572_s16 + $0xf10] sm:$0xff]  }
 0x283   : > { %v6429_v8 = vpop.xlane.xlu2 %2656  ;;  %v2257_v40 = vadd.f32 %v2001_v20, %v1489_v28 }
 0x284   : > { %8500 = vst [vmem:[#allocation154_spill] sm:$0xff] %v6429_v8  ;;  %v6431_v50 = vpop.xlane.xlu1 %2654  ;;  %v1488_v7 = vadd.f32 %v1232_v39, %v720_v58  ;;  %v1487_v8 = vadd.f32 %v1231_v45, %v719_v32  ;;  %v723_v58 = vunpack.c.l.bf16 %v467_v16  ;;  %v1235_v39 = vunpack.c.h.bf16 %v467_v16 }
 0x285   : > { %8501 = vst [vmem:[#allocation155_spill] sm:$0xff] %v6431_v50  ;;  %v6433_v63 = vpop.xlane.xlu0 %2652  ;;  %v468_v50 = vld [vmem:[%s5572_s16 + $0xf20] sm:$0xff]   ;;  %v722_v32 = vunpack.c.l.bf16 %v466_v13  ;;  %v1234_v45 = vunpack.c.h.bf16 %v466_v13 }
 0x286   : > { %8502 = vst [vmem:[#allocation156_spill] sm:$0xff] %v6433_v63  ;;  %v1999_v63 = vunpack.c.l.bf16 %v1743_v2  ;;  %v724_v54 = vunpack.c.l.bf16 %v468_v50  ;;  %v1236_v38 = vunpack.c.h.bf16 %v468_v50  ;;  %v2004_v2 = vunpack.c.l.bf16 %v1748_v44  ;;  %v471_v50 = vld [vmem:[%s5572_s16 + $0xf50] sm:$0xff]  }
 0x287   : > { %v1490_v20 = vadd.f32 %v1234_v45, %v722_v32  ;;  %v727_v13 = vunpack.c.l.bf16 %v471_v50  ;;  %v1750_v45 = vld [vmem:[%s5572_s16 + $0xf48] sm:$0xf] }
 0x288   : > { %2746 = vadd.xlane.f32.xlu2 %v2254_v59  ;;  %v2256_v59 = vadd.f32 %v2000_v56, %v1488_v7  ;;  %v2255_v30 = vadd.f32 %v1999_v63, %v1487_v8  ;;  %v1492_v10 = vadd.f32 %v1236_v38, %v724_v54  ;;  %v470_v63 = vld [vmem:[%s5572_s16 + $0xf40] sm:$0xff]   ;;  %v469_v7 = vld [vmem:[%s5572_s16 + $0xf30] sm:$0xff]  }
 0x289   : > { %2744 = vadd.xlane.f32.xlu1 %v2253_v52  ;;  %v1747_v52 = vld [vmem:[%s5572_s16 + $0xf18] sm:$0xf]  ;;  %v725_v44 = vunpack.c.l.bf16 %v469_v7 }
 0x28a   : > { %2742 = vadd.xlane.f32.xlu0 %v2252_v24  ;;  %v1746_v24 = vld [vmem:[%s5572_s16 + $0xf08] sm:$0xf]  ;;  %v2003_v28 = vunpack.c.l.bf16 %v1747_v52  ;;  %v2260_v16 = vadd.f32 %v2004_v2, %v1492_v10  ;;  %v1749_v52 = vld [vmem:[%s5572_s16 + $0xf38] sm:$0xf] }
 0x28b   : > { %v6441_v0 = vpop.xlane.xlu2 %2662  ;;  %v2002_v8 = vunpack.c.l.bf16 %v1746_v24 }
 0x28c   : > { %8503 = vst [vmem:[#allocation157_spill] sm:$0xff] %v6441_v0  ;;  %v6443_v19 = vpop.xlane.xlu1 %2660  ;;  %v1491_v0 = vadd.f32 %v1235_v39, %v723_v58  ;;  %v1237_v58 = vunpack.c.h.bf16 %v469_v7  ;;  %v472_v7 = vld [vmem:[%s5572_s16 + $0xf60] sm:$0xff]  }
 0x28d   : > { %8504 = vst [vmem:[#allocation158_spill] sm:$0xff] %v6443_v19  ;;  %v6445_v3 = vpop.xlane.xlu0 %2658  ;;  %v2258_v32 = vadd.f32 %v2002_v8, %v1490_v20 }
 0x28e   : > { %8505 = vst [vmem:[#allocation159_spill] sm:$0xff] %v6445_v3  ;;  %v1239_v3 = vunpack.c.h.bf16 %v471_v50  ;;  %v2259_v39 = vadd.f32 %v2003_v28, %v1491_v0  ;;  %v2006_v50 = vunpack.c.l.bf16 %v1750_v45 }
 0x290   : > { %2752 = vadd.xlane.f32.xlu2 %v2257_v40  ;;  %v1751_v40 = vld [vmem:[%s5572_s16 + $0xf58] sm:$0xf]  ;;  %v1495_v24 = vadd.f32 %v1239_v3, %v727_v13 }
 0x291   : > { %2750 = vadd.xlane.f32.xlu1 %v2256_v59  ;;  %v726_v59 = vunpack.c.l.bf16 %v470_v63  ;;  %v2007_v10 = vunpack.c.l.bf16 %v1751_v40  ;;  %v1754_v40 = vld [vmem:[%s5572_s16 + $0xf88] sm:$0xf] }
 0x292   : > { %2748 = vadd.xlane.f32.xlu0 %v2255_v30  ;;  %v1238_v30 = vunpack.c.h.bf16 %v470_v63  ;;  %v473_v63 = vld [vmem:[%s5572_s16 + $0xf70] sm:$0xff]  }
 0x293   : > { %v6453_v56 = vpop.xlane.xlu2 %2668  ;;  %v2263_v8 = vadd.f32 %v2007_v10, %v1495_v24 }
 0x294   : > { %8506 = vst [vmem:[#allocation160_spill] sm:$0xff] %v6453_v56  ;;  %v6455_v54 = vpop.xlane.xlu1 %2666  ;;  %v1494_v2 = vadd.f32 %v1238_v30, %v726_v59  ;;  %v1493_v56 = vadd.f32 %v1237_v58, %v725_v44  ;;  %v729_v59 = vunpack.c.l.bf16 %v473_v63  ;;  %v1241_v30 = vunpack.c.h.bf16 %v473_v63 }
 0x295   : > { %8507 = vst [vmem:[#allocation161_spill] sm:$0xff] %v6455_v54  ;;  %v6457_v38 = vpop.xlane.xlu0 %2664  ;;  %v2005_v54 = vunpack.c.l.bf16 %v1749_v52  ;;  %v728_v44 = vunpack.c.l.bf16 %v472_v7  ;;  %v1240_v58 = vunpack.c.h.bf16 %v472_v7  ;;  %v2010_v52 = vunpack.c.l.bf16 %v1754_v40 }
 0x296   : > { %8508 = vst [vmem:[#allocation162_spill] sm:$0xff] %v6457_v38  ;;  %v474_v38 = vld [vmem:[%s5572_s16 + $0xf80] sm:$0xff]  }
 0x297   : > { %v730_v0 = vunpack.c.l.bf16 %v474_v38  ;;  %v1242_v28 = vunpack.c.h.bf16 %v474_v38  ;;  %v2261_v13 = vadd.f32 %v2005_v54, %v1493_v56  ;;  %v477_v38 = vld [vmem:[%s5572_s16 + $0xfb0] sm:$0xff]   ;;  %v1496_v10 = vadd.f32 %v1240_v58, %v728_v44  ;;  %v476_v54 = vld [vmem:[%s5572_s16 + $0xfa0] sm:$0xff]   ;;  %v1756_v58 = vld [vmem:[%s5572_s16 + $0xfa8] sm:$0xf] }
 0x298   : > { %2758 = vadd.xlane.f32.xlu2 %v2260_v16  ;;  %v2262_v16 = vadd.f32 %v2006_v50, %v1494_v2  ;;  %v475_v2 = vld [vmem:[%s5572_s16 + $0xf90] sm:$0xff]   ;;  %v733_v7 = vunpack.c.l.bf16 %v477_v38 }
 0x299   : > { %2756 = vadd.xlane.f32.xlu1 %v2259_v39  ;;  %v1753_v39 = vld [vmem:[%s5572_s16 + $0xf78] sm:$0xf]  ;;  %v1498_v45 = vadd.f32 %v1242_v28, %v730_v0  ;;  %v731_v40 = vunpack.c.l.bf16 %v475_v2 }
 0x29a   : > { %2754 = vadd.xlane.f32.xlu0 %v2258_v32  ;;  %v1752_v32 = vld [vmem:[%s5572_s16 + $0xf68] sm:$0xf]  ;;  %v2009_v24 = vunpack.c.l.bf16 %v1753_v39  ;;  %v1755_v39 = vld [vmem:[%s5572_s16 + $0xf98] sm:$0xf] }
 0x29b   : > { %v6465_v19 = vpop.xlane.xlu2 %2674  ;;  %v2008_v56 = vunpack.c.l.bf16 %v1752_v32  ;;  %v2266_v63 = vadd.f32 %v2010_v52, %v1498_v45 }
 0x29c   : > { %8509 = vst [vmem:[#allocation163_spill] sm:$0xff] %v6465_v19  ;;  %v6467_v3 = vpop.xlane.xlu1 %2672  ;;  %v1497_v19 = vadd.f32 %v1241_v30, %v729_v59  ;;  %v1243_v59 = vunpack.c.h.bf16 %v475_v2  ;;  %v478_v2 = vld [vmem:[%s5572_s16 + $0xfc0] sm:$0xff]  }
 0x29d   : > { %8510 = vst [vmem:[#allocation164_spill] sm:$0xff] %v6467_v3  ;;  %v6469_v20 = vpop.xlane.xlu0 %2670  ;;  %v1245_v3 = vunpack.c.h.bf16 %v477_v38  ;;  %v2264_v44 = vadd.f32 %v2008_v56, %v1496_v10  ;;  %v2012_v38 = vunpack.c.l.bf16 %v1756_v58 }
 0x29e   : > { %8511 = vst [vmem:[#allocation165_spill] sm:$0xff] %v6469_v20  ;;  %v2265_v30 = vadd.f32 %v2009_v24, %v1497_v19 }
 0x29f   : > { %v1501_v32 = vadd.f32 %v1245_v3, %v733_v7 }
 0x2a0   : > { %2764 = vadd.xlane.f32.xlu2 %v2263_v8  ;;  %v1757_v8 = vld [vmem:[%s5572_s16 + $0xfb8] sm:$0xf] }
 0x2a1   : > { %2762 = vadd.xlane.f32.xlu1 %v2262_v16  ;;  %v732_v16 = vunpack.c.l.bf16 %v476_v54  ;;  %v2013_v45 = vunpack.c.l.bf16 %v1757_v8  ;;  %v1760_v8 = vld [vmem:[%s5572_s16 + $0xfe8] sm:$0xf] }
 0x2a2   : > { %2760 = vadd.xlane.f32.xlu0 %v2261_v13  ;;  %v1244_v13 = vunpack.c.h.bf16 %v476_v54  ;;  %v480_v54 = vld [vmem:[%s5572_s16 + $0xfe0] sm:$0xff]  }
 0x2a3   : > { %v6477_v50 = vpop.xlane.xlu2 %2680  ;;  %v2269_v19 = vadd.f32 %v2013_v45, %v1501_v32  ;;  %v1248_v7 = vunpack.c.h.bf16 %v480_v54 }
 0x2a4   : > { %8512 = vst [vmem:[#allocation166_spill] sm:$0xff] %v6477_v50  ;;  %v6479_v0 = vpop.xlane.xlu1 %2678  ;;  %v1500_v52 = vadd.f32 %v1244_v13, %v732_v16  ;;  %v1499_v50 = vadd.f32 %v1243_v59, %v731_v40  ;;  %v734_v40 = vunpack.c.l.bf16 %v478_v2  ;;  %v1246_v59 = vunpack.c.h.bf16 %v478_v2 }
 0x2a5   : > { %8513 = vst [vmem:[#allocation167_spill] sm:$0xff] %v6479_v0  ;;  %v6481_v28 = vpop.xlane.xlu0 %2676  ;;  %v2011_v0 = vunpack.c.l.bf16 %v1755_v39  ;;  %v2016_v39 = vunpack.c.l.bf16 %v1760_v8 }
 0x2a6   : > { %8514 = vst [vmem:[#allocation168_spill] sm:$0xff] %v6481_v28  ;;  %v479_v28 = vld [vmem:[%s5572_s16 + $0xfd0] sm:$0xff]   ;;  %v2268_v10 = vadd.f32 %v2012_v38, %v1500_v52 }
 0x2a7   : > { %v2267_v56 = vadd.f32 %v2011_v0, %v1499_v50  ;;  %v735_v16 = vunpack.c.l.bf16 %v479_v28  ;;  %v1247_v13 = vunpack.c.h.bf16 %v479_v28  ;;  %v1502_v0 = vadd.f32 %v1246_v59, %v734_v40  ;;  %v481_v52 = vld [vmem:[%s5572_s16 + $0xff0] sm:$0xff]  }
 0x2a8   : > { %2770 = vadd.xlane.f32.xlu2 %v2266_v63  ;;  %v736_v63 = vunpack.c.l.bf16 %v480_v54  ;;  %v1249_v8 = vunpack.c.h.bf16 %v481_v52 }
 0x2a9   : > { %2768 = vadd.xlane.f32.xlu1 %v2265_v30  ;;  %v1759_v30 = vld [vmem:[%s5572_s16 + $0xfd8] sm:$0xf]  ;;  %v1503_v32 = vadd.f32 %v1247_v13, %v735_v16 }
 0x2aa   : > { %2766 = vadd.xlane.f32.xlu0 %v2264_v44  ;;  %v1758_v44 = vld [vmem:[%s5572_s16 + $0xfc8] sm:$0xf]  ;;  %v1504_v58 = vadd.f32 %v1248_v7, %v736_v63  ;;  %v2015_v50 = vunpack.c.l.bf16 %v1759_v30  ;;  %v737_v7 = vunpack.c.l.bf16 %v481_v52  ;;  %v2788_v52 = vld [vmem:[%s5572_s16 + $0x2c] sm:$0xf] }
 0x2ab   : > { %v6489_v20 = vpop.xlane.xlu2 %2686  ;;  %v2014_v45 = vunpack.c.l.bf16 %v1758_v44 }
 0x2ac   : > { %8515 = vst [vmem:[#allocation169_spill] sm:$0xff] %v6489_v20  ;;  %v6491_v24 = vpop.xlane.xlu1 %2684  ;;  %v2272_v2 = vadd.f32 %v2016_v39, %v1504_v58  ;;  %v1761_v20 = vld [vmem:[%s5572_s16 + $0xff8] sm:$0xf]  ;;  %v1505_v13 = vadd.f32 %v1249_v8, %v737_v7 }
 0x2ad   : > { %8516 = vst [vmem:[#allocation170_spill] sm:$0xff] %v6491_v24  ;;  %v6493_v3 = vpop.xlane.xlu0 %2682  ;;  %v2270_v63 = vadd.f32 %v2014_v45, %v1502_v0  ;;  %v2017_v40 = vunpack.c.l.bf16 %v1761_v20  ;;  %v2790_v0 = vld [vmem:[%s5572_s16 + $0x4c] sm:$0xf]  ;;  %v2789_v45 = vld [vmem:[%s5572_s16 + $0x3c] sm:$0xf] }
 0x2ae   : > { %8517 = vst [vmem:[#allocation171_spill] sm:$0xff] %v6493_v3  ;;  %v3046_v20 = vunpack.c.l.bf16 %v2790_v0 }
 0x2b0   : > { %2776 = vadd.xlane.f32.xlu2 %v2269_v19  ;;  %v2271_v19 = vadd.f32 %v2015_v50, %v1503_v32  ;;  %v2273_v32 = vadd.f32 %v2017_v40, %v1505_v13  ;;  %v2793_v13 = vld [vmem:[%s5572_s16 + $0x7c] sm:$0xf]  ;;  %v2792_v40 = vld [vmem:[%s5572_s16 + $0x6c] sm:$0xf] }
 0x2b1   : > { %2774 = vadd.xlane.f32.xlu1 %v2268_v10  ;;  %v2787_v10 = vld [vmem:[%s5572_s16 + $0x1c] sm:$0xf] }
 0x2b2   : > { %2772 = vadd.xlane.f32.xlu0 %v2267_v56  ;;  %v2786_v56 = vld [vmem:[%s5572_s16 + $0xc] sm:$0xf]  ;;  %v3043_v16 = vunpack.c.l.bf16 %v2787_v10  ;;  %v3311_v10 = vsel %vm3298_vm0, %v3046_v20, 0.0 }
 0x2b3   : > { %v6499_v38 = vpop.xlane.xlu2 %2692  ;;  %v3042_v59 = vunpack.c.l.bf16 %v2786_v56 }
 0x2b4   : > { %8518 = vst [vmem:[#allocation172_spill] sm:$0xff] %v6499_v38  ;;  %v6501_v28 = vpop.xlane.xlu1 %2690  ;;  %v3302_v39 = vsel %vm3298_vm0, %v3043_v16, 0.0  ;;  %v2841_v38 = vld [vmem:[%s5572_s16 + $0x37c] sm:$0xf] }
 0x2b5   : > { %8519 = vst [vmem:[#allocation173_spill] sm:$0xff] %v6501_v28  ;;  %v6503_v54 = vpop.xlane.xlu0 %2688  ;;  %v3299_v50 = vsel %vm3298_vm0, %v3042_v59, 0.0  ;;  %v2791_v59 = vld [vmem:[%s5572_s16 + $0x5c] sm:$0xf] }
 0x2b6   : > { %8520 = vst [vmem:[#allocation174_spill] sm:$0xff] %v6503_v54  ;;  %v2844_v54 = vld [vmem:[%s5572_s16 + $0x3ac] sm:$0xf] }
 0x2b8   : > { %2782 = vadd.xlane.f32.xlu2 %v2272_v2  ;;  %v3045_v2 = vunpack.c.l.bf16 %v2789_v45 }
 0x2b9   : > { %2780 = vadd.xlane.f32.xlu1 %v2271_v19  ;;  %v3044_v19 = vunpack.c.l.bf16 %v2788_v52 }
 0x2ba   : > { %2778 = vadd.xlane.f32.xlu0 %v2270_v63  ;;  %v3308_v56 = vsel %vm3298_vm0, %v3045_v2, 0.0 }
 0x2bb   : > { %v6508_v30 = vpop.xlane.xlu2 %2698  ;;  %v3305_v16 = vsel %vm3298_vm0, %v3044_v19, 0.0 }
 0x2bc   : > { %8521 = vst [vmem:[#allocation175_spill] sm:$0xff] %v6508_v30  ;;  %v6510_v44 = vpop.xlane.xlu1 %2696  ;;  %v2838_v30 = vld [vmem:[%s5572_s16 + $0x34c] sm:$0xf] }
 0x2bd   : > { %8522 = vst [vmem:[#allocation176_spill] sm:$0xff] %v6510_v44  ;;  %v6512_v58 = vpop.xlane.xlu0 %2694 }
 0x2be   : > { %8523 = vst [vmem:[#allocation177_spill] sm:$0xff] %v6512_v58 }
 0x2c0   : > { %3303 = vadd.xlane.f32.xlu2 %v3302_v39  ;;  %v3049_v39 = vunpack.c.l.bf16 %v2793_v13 }
 0x2c1   : > { %3300 = vadd.xlane.f32.xlu1 %v3299_v50  ;;  %v3047_v50 = vunpack.c.l.bf16 %v2791_v59 }
 0x2c2   : > { %2784 = vadd.xlane.f32.xlu0 %v2273_v32  ;;  %v3048_v32 = vunpack.c.l.bf16 %v2792_v40  ;;  %v3320_v20 = vsel %vm3298_vm0, %v3049_v39, 0.0 }
 0x2c3   : > { %v6519_v63 = vpop.xlane.xlu2 %2704  ;;  %v3314_v19 = vsel %vm3298_vm0, %v3047_v50, 0.0 }
 0x2c4   : > { %8524 = vst [vmem:[#allocation178_spill] sm:$0xff] %v6519_v63  ;;  %v6521_v7 = vpop.xlane.xlu1 %2702  ;;  %v3317_v2 = vsel %vm3298_vm0, %v3048_v32, 0.0  ;;  %v2796_v63 = vld [vmem:[%s5572_s16 + $0xac] sm:$0xf] }
 0x2c5   : > { %8525 = vst [vmem:[#allocation179_spill] sm:$0xff] %v6521_v7  ;;  %v6523_v8 = vpop.xlane.xlu0 %2700 }
 0x2c6   : > { %8526 = vst [vmem:[#allocation180_spill] sm:$0xff] %v6523_v8 }
 0x2c8   : > { %3312 = vadd.xlane.f32.xlu2 %v3311_v10  ;;  %v2795_v10 = vld [vmem:[%s5572_s16 + $0x9c] sm:$0xf] }
 0x2c9   : > { %3309 = vadd.xlane.f32.xlu1 %v3308_v56  ;;  %v2794_v56 = vld [vmem:[%s5572_s16 + $0x8c] sm:$0xf]  ;;  %v3051_v13 = vunpack.c.l.bf16 %v2795_v10 }
 0x2ca   : > { %3306 = vadd.xlane.f32.xlu0 %v3305_v16  ;;  %v3052_v16 = vunpack.c.l.bf16 %v2796_v63  ;;  %v3050_v40 = vunpack.c.l.bf16 %v2794_v56  ;;  %v2797_v63 = vld [vmem:[%s5572_s16 + $0xbc] sm:$0xf] }
 0x2cb   : > { %v6531_v0 = vpop.xlane.xlu2 %2710  ;;  %v3326_v50 = vsel %vm3298_vm0, %v3051_v13, 0.0  ;;  %v3053_v10 = vunpack.c.l.bf16 %v2797_v63 }
 0x2cc   : > { %8527 = vst [vmem:[#allocation181_spill] sm:$0xff] %v6531_v0  ;;  %v6533_v45 = vpop.xlane.xlu1 %2708  ;;  %v3329_v32 = vsel %vm3298_vm0, %v3052_v16, 0.0 }
 0x2cd   : > { %8528 = vst [vmem:[#allocation182_spill] sm:$0xff] %v6533_v45  ;;  %v6535_v52 = vpop.xlane.xlu0 %2706  ;;  %v3323_v45 = vsel %vm3298_vm0, %v3050_v40, 0.0 }
 0x2ce   : > { %8529 = vst [vmem:[#allocation183_spill] sm:$0xff] %v6535_v52  ;;  %v2799_v52 = vld [vmem:[%s5572_s16 + $0xdc] sm:$0xf] }
 0x2d0   : > { %3321 = vadd.xlane.f32.xlu2 %v3320_v20  ;;  %v2798_v20 = vld [vmem:[%s5572_s16 + $0xcc] sm:$0xf] }
 0x2d1   : > { %3318 = vadd.xlane.f32.xlu1 %v3317_v2  ;;  %v3055_v2 = vunpack.c.l.bf16 %v2799_v52 }
 0x2d2   : > { %3315 = vadd.xlane.f32.xlu0 %v3314_v19  ;;  %v3054_v19 = vunpack.c.l.bf16 %v2798_v20 }
 0x2d3   : > { %v6543_v59 = vpop.xlane.xlu2 %2716  ;;  %v3338_v13 = vsel %vm3298_vm0, %v3055_v2, 0.0 }
 0x2d4   : > { %8530 = vst [vmem:[#allocation184_spill] sm:$0xff] %v6543_v59  ;;  %v6545_v0 = vpop.xlane.xlu1 %2714  ;;  %v3335_v40 = vsel %vm3298_vm0, %v3054_v19, 0.0 }
 0x2d5   : > { %8531 = vst [vmem:[#allocation185_spill] sm:$0xff] %v6545_v0  ;;  %v6547_v39 = vpop.xlane.xlu0 %2712  ;;  %v3332_v0 = vsel %vm3298_vm0, %v3053_v10, 0.0 }
 0x2d6   : > { %8532 = vst [vmem:[#allocation186_spill] sm:$0xff] %v6547_v39  ;;  %v2802_v39 = vld [vmem:[%s5572_s16 + $0x10c] sm:$0xf] }
 0x2d7   : > { %v3058_v52 = vunpack.c.l.bf16 %v2802_v39 }
 0x2d8   : > { %3330 = vadd.xlane.f32.xlu2 %v3329_v32  ;;  %v2801_v32 = vld [vmem:[%s5572_s16 + $0xfc] sm:$0xf] }
 0x2d9   : > { %3327 = vadd.xlane.f32.xlu1 %v3326_v50  ;;  %v3057_v50 = vunpack.c.l.bf16 %v2801_v32  ;;  %v3347_v19 = vsel %vm3298_vm0, %v3058_v52, 0.0 }
 0x2da   : > { %3324 = vadd.xlane.f32.xlu0 %v3323_v45  ;;  %v2800_v45 = vld [vmem:[%s5572_s16 + $0xec] sm:$0xf] }
 0x2db   : > { %v6555_v56 = vpop.xlane.xlu2 %2722  ;;  %v3056_v20 = vunpack.c.l.bf16 %v2800_v45  ;;  %v3344_v10 = vsel %vm3298_vm0, %v3057_v50, 0.0 }
 0x2dc   : > { %8533 = vst [vmem:[#allocation187_spill] sm:$0xff] %v6555_v56  ;;  %v6557_v59 = vpop.xlane.xlu1 %2720 }
 0x2dd   : > { %8534 = vst [vmem:[#allocation188_spill] sm:$0xff] %v6557_v59  ;;  %v6559_v16 = vpop.xlane.xlu0 %2718  ;;  %v3341_v59 = vsel %vm3298_vm0, %v3056_v20, 0.0 }
 0x2de   : > { %8535 = vst [vmem:[#allocation189_spill] sm:$0xff] %v6559_v16  ;;  %v2805_v16 = vld [vmem:[%s5572_s16 + $0x13c] sm:$0xf] }
 0x2df   : > { %v3061_v39 = vunpack.c.l.bf16 %v2805_v16 }
 0x2e0   : > { %3339 = vadd.xlane.f32.xlu2 %v3338_v13  ;;  %v2804_v13 = vld [vmem:[%s5572_s16 + $0x12c] sm:$0xf] }
 0x2e1   : > { %3336 = vadd.xlane.f32.xlu1 %v3335_v40  ;;  %v3060_v40 = vunpack.c.l.bf16 %v2804_v13  ;;  %v3356_v50 = vsel %vm3298_vm0, %v3061_v39, 0.0 }
 0x2e2   : > { %3333 = vadd.xlane.f32.xlu0 %v3332_v0  ;;  %v2803_v0 = vld [vmem:[%s5572_s16 + $0x11c] sm:$0xf] }
 0x2e3   : > { %v6567_v63 = vpop.xlane.xlu2 %2728  ;;  %v3059_v32 = vunpack.c.l.bf16 %v2803_v0  ;;  %v3353_v20 = vsel %vm3298_vm0, %v3060_v40, 0.0 }
 0x2e4   : > { %8536 = vst [vmem:[#allocation190_spill] sm:$0xff] %v6567_v63  ;;  %v6569_v56 = vpop.xlane.xlu1 %2726 }
 0x2e5   : > { %8537 = vst [vmem:[#allocation191_spill] sm:$0xff] %v6569_v56  ;;  %v6571_v2 = vpop.xlane.xlu0 %2724  ;;  %v3350_v56 = vsel %vm3298_vm0, %v3059_v32, 0.0 }
 0x2e6   : > { %8538 = vst [vmem:[#allocation192_spill] sm:$0xff] %v6571_v2  ;;  %v2808_v2 = vld [vmem:[%s5572_s16 + $0x16c] sm:$0xf] }
 0x2e7   : > { %v3064_v16 = vunpack.c.l.bf16 %v2808_v2 }
 0x2e8   : > { %3348 = vadd.xlane.f32.xlu2 %v3347_v19  ;;  %v2807_v19 = vld [vmem:[%s5572_s16 + $0x15c] sm:$0xf] }
 0x2e9   : > { %3345 = vadd.xlane.f32.xlu1 %v3344_v10  ;;  %v3063_v10 = vunpack.c.l.bf16 %v2807_v19  ;;  %v3365_v40 = vsel %vm3298_vm0, %v3064_v16, 0.0 }
 0x2ea   : > { %3342 = vadd.xlane.f32.xlu0 %v3341_v59  ;;  %v2806_v59 = vld [vmem:[%s5572_s16 + $0x14c] sm:$0xf] }
 0x2eb   : > { %v6579_v45 = vpop.xlane.xlu2 %2734  ;;  %v3062_v13 = vunpack.c.l.bf16 %v2806_v59  ;;  %v3362_v32 = vsel %vm3298_vm0, %v3063_v10, 0.0 }
 0x2ec   : > { %8539 = vst [vmem:[#allocation193_spill] sm:$0xff] %v6579_v45  ;;  %v6581_v63 = vpop.xlane.xlu1 %2732 }
 0x2ed   : > { %8540 = vst [vmem:[#allocation194_spill] sm:$0xff] %v6581_v63  ;;  %v6583_v52 = vpop.xlane.xlu0 %2730  ;;  %v3359_v63 = vsel %vm3298_vm0, %v3062_v13, 0.0 }
 0x2ee   : > { %8541 = vst [vmem:[#allocation195_spill] sm:$0xff] %v6583_v52  ;;  %v2811_v52 = vld [vmem:[%s5572_s16 + $0x19c] sm:$0xf] }
 0x2ef   : > { %v3067_v2 = vunpack.c.l.bf16 %v2811_v52 }
 0x2f0   : > { %3357 = vadd.xlane.f32.xlu2 %v3356_v50  ;;  %v2810_v50 = vld [vmem:[%s5572_s16 + $0x18c] sm:$0xf] }
 0x2f1   : > { %3354 = vadd.xlane.f32.xlu1 %v3353_v20  ;;  %v3066_v20 = vunpack.c.l.bf16 %v2810_v50  ;;  %v3374_v10 = vsel %vm3298_vm0, %v3067_v2, 0.0 }
 0x2f2   : > { %3351 = vadd.xlane.f32.xlu0 %v3350_v56  ;;  %v2809_v56 = vld [vmem:[%s5572_s16 + $0x17c] sm:$0xf] }
 0x2f3   : > { %v6591_v0 = vpop.xlane.xlu2 %2740  ;;  %v3065_v19 = vunpack.c.l.bf16 %v2809_v56  ;;  %v3371_v13 = vsel %vm3298_vm0, %v3066_v20, 0.0 }
 0x2f4   : > { %8542 = vst [vmem:[#allocation196_spill] sm:$0xff] %v6591_v0  ;;  %v6593_v45 = vpop.xlane.xlu1 %2738 }
 0x2f5   : > { %8543 = vst [vmem:[#allocation197_spill] sm:$0xff] %v6593_v45  ;;  %v6595_v39 = vpop.xlane.xlu0 %2736  ;;  %v3368_v45 = vsel %vm3298_vm0, %v3065_v19, 0.0 }
 0x2f6   : > { %8544 = vst [vmem:[#allocation198_spill] sm:$0xff] %v6595_v39  ;;  %v2814_v39 = vld [vmem:[%s5572_s16 + $0x1cc] sm:$0xf] }
 0x2f7   : > { %v3070_v52 = vunpack.c.l.bf16 %v2814_v39 }
 0x2f8   : > { %3366 = vadd.xlane.f32.xlu2 %v3365_v40  ;;  %v2813_v40 = vld [vmem:[%s5572_s16 + $0x1bc] sm:$0xf] }
 0x2f9   : > { %3363 = vadd.xlane.f32.xlu1 %v3362_v32  ;;  %v3069_v32 = vunpack.c.l.bf16 %v2813_v40  ;;  %v3383_v20 = vsel %vm3298_vm0, %v3070_v52, 0.0 }
 0x2fa   : > { %3360 = vadd.xlane.f32.xlu0 %v3359_v63  ;;  %v2812_v63 = vld [vmem:[%s5572_s16 + $0x1ac] sm:$0xf] }
 0x2fb   : > { %v6603_v59 = vpop.xlane.xlu2 %2746  ;;  %v3068_v50 = vunpack.c.l.bf16 %v2812_v63  ;;  %v3380_v19 = vsel %vm3298_vm0, %v3069_v32, 0.0 }
 0x2fc   : > { %8545 = vst [vmem:[#allocation199_spill] sm:$0xff] %v6603_v59  ;;  %v6605_v0 = vpop.xlane.xlu1 %2744 }
 0x2fd   : > { %8546 = vst [vmem:[#allocation200_spill] sm:$0xff] %v6605_v0  ;;  %v6607_v16 = vpop.xlane.xlu0 %2742  ;;  %v3377_v0 = vsel %vm3298_vm0, %v3068_v50, 0.0 }
 0x2fe   : > { %8547 = vst [vmem:[#allocation201_spill] sm:$0xff] %v6607_v16  ;;  %v2817_v16 = vld [vmem:[%s5572_s16 + $0x1fc] sm:$0xf] }
 0x2ff   : > { %v3073_v39 = vunpack.c.l.bf16 %v2817_v16 }
 0x300   : > { %3375 = vadd.xlane.f32.xlu2 %v3374_v10  ;;  %v2816_v10 = vld [vmem:[%s5572_s16 + $0x1ec] sm:$0xf] }
 0x301   : > { %3372 = vadd.xlane.f32.xlu1 %v3371_v13  ;;  %v3072_v13 = vunpack.c.l.bf16 %v2816_v10  ;;  %v3392_v32 = vsel %vm3298_vm0, %v3073_v39, 0.0 }
 0x302   : > { %3369 = vadd.xlane.f32.xlu0 %v3368_v45  ;;  %v2815_v45 = vld [vmem:[%s5572_s16 + $0x1dc] sm:$0xf] }
 0x303   : > { %v6615_v56 = vpop.xlane.xlu2 %2752  ;;  %v3071_v40 = vunpack.c.l.bf16 %v2815_v45  ;;  %v3389_v50 = vsel %vm3298_vm0, %v3072_v13, 0.0 }
 0x304   : > { %8548 = vst [vmem:[#allocation202_spill] sm:$0xff] %v6615_v56  ;;  %v6617_v59 = vpop.xlane.xlu1 %2750 }
 0x305   : > { %8549 = vst [vmem:[#allocation203_spill] sm:$0xff] %v6617_v59  ;;  %v6619_v2 = vpop.xlane.xlu0 %2748  ;;  %v3386_v59 = vsel %vm3298_vm0, %v3071_v40, 0.0 }
 0x306   : > { %8550 = vst [vmem:[#allocation204_spill] sm:$0xff] %v6619_v2  ;;  %v2820_v2 = vld [vmem:[%s5572_s16 + $0x22c] sm:$0xf] }
 0x307   : > { %v3076_v16 = vunpack.c.l.bf16 %v2820_v2 }
 0x308   : > { %3384 = vadd.xlane.f32.xlu2 %v3383_v20  ;;  %v2819_v20 = vld [vmem:[%s5572_s16 + $0x21c] sm:$0xf] }
 0x309   : > { %3381 = vadd.xlane.f32.xlu1 %v3380_v19  ;;  %v3075_v19 = vunpack.c.l.bf16 %v2819_v20  ;;  %v3401_v13 = vsel %vm3298_vm0, %v3076_v16, 0.0 }
 0x30a   : > { %3378 = vadd.xlane.f32.xlu0 %v3377_v0  ;;  %v2818_v0 = vld [vmem:[%s5572_s16 + $0x20c] sm:$0xf] }
 0x30b   : > { %v6627_v63 = vpop.xlane.xlu2 %2758  ;;  %v3074_v10 = vunpack.c.l.bf16 %v2818_v0  ;;  %v3398_v40 = vsel %vm3298_vm0, %v3075_v19, 0.0 }
 0x30c   : > { %8551 = vst [vmem:[#allocation205_spill] sm:$0xff] %v6627_v63  ;;  %v6629_v56 = vpop.xlane.xlu1 %2756 }
 0x30d   : > { %8552 = vst [vmem:[#allocation206_spill] sm:$0xff] %v6629_v56  ;;  %v6631_v52 = vpop.xlane.xlu0 %2754  ;;  %v3395_v56 = vsel %vm3298_vm0, %v3074_v10, 0.0 }
 0x30e   : > { %8553 = vst [vmem:[#allocation207_spill] sm:$0xff] %v6631_v52  ;;  %v2823_v52 = vld [vmem:[%s5572_s16 + $0x25c] sm:$0xf] }
 0x30f   : > { %v3079_v2 = vunpack.c.l.bf16 %v2823_v52 }
 0x310   : > { %3393 = vadd.xlane.f32.xlu2 %v3392_v32  ;;  %v2822_v32 = vld [vmem:[%s5572_s16 + $0x24c] sm:$0xf] }
 0x311   : > { %3390 = vadd.xlane.f32.xlu1 %v3389_v50  ;;  %v3078_v50 = vunpack.c.l.bf16 %v2822_v32  ;;  %v3410_v19 = vsel %vm3298_vm0, %v3079_v2, 0.0 }
 0x312   : > { %3387 = vadd.xlane.f32.xlu0 %v3386_v59  ;;  %v2821_v59 = vld [vmem:[%s5572_s16 + $0x23c] sm:$0xf] }
 0x313   : > { %v6639_v45 = vpop.xlane.xlu2 %2764  ;;  %v3077_v20 = vunpack.c.l.bf16 %v2821_v59  ;;  %v3407_v10 = vsel %vm3298_vm0, %v3078_v50, 0.0 }
 0x314   : > { %8554 = vst [vmem:[#allocation208_spill] sm:$0xff] %v6639_v45  ;;  %v6641_v63 = vpop.xlane.xlu1 %2762 }
 0x315   : > { %8555 = vst [vmem:[#allocation209_spill] sm:$0xff] %v6641_v63  ;;  %v6643_v39 = vpop.xlane.xlu0 %2760  ;;  %v3404_v63 = vsel %vm3298_vm0, %v3077_v20, 0.0 }
 0x316   : > { %8556 = vst [vmem:[#allocation210_spill] sm:$0xff] %v6643_v39  ;;  %v2826_v39 = vld [vmem:[%s5572_s16 + $0x28c] sm:$0xf] }
 0x317   : > { %v3082_v52 = vunpack.c.l.bf16 %v2826_v39 }
 0x318   : > { %3402 = vadd.xlane.f32.xlu2 %v3401_v13  ;;  %v2825_v13 = vld [vmem:[%s5572_s16 + $0x27c] sm:$0xf] }
 0x319   : > { %3399 = vadd.xlane.f32.xlu1 %v3398_v40  ;;  %v3081_v40 = vunpack.c.l.bf16 %v2825_v13  ;;  %v3419_v50 = vsel %vm3298_vm0, %v3082_v52, 0.0 }
 0x31a   : > { %3396 = vadd.xlane.f32.xlu0 %v3395_v56  ;;  %v2824_v56 = vld [vmem:[%s5572_s16 + $0x26c] sm:$0xf] }
 0x31b   : > { %v6651_v0 = vpop.xlane.xlu2 %2770  ;;  %v3080_v32 = vunpack.c.l.bf16 %v2824_v56  ;;  %v3416_v20 = vsel %vm3298_vm0, %v3081_v40, 0.0 }
 0x31c   : > { %8557 = vst [vmem:[#allocation211_spill] sm:$0xff] %v6651_v0  ;;  %v6653_v45 = vpop.xlane.xlu1 %2768 }
 0x31d   : > { %8558 = vst [vmem:[#allocation212_spill] sm:$0xff] %v6653_v45  ;;  %v6655_v16 = vpop.xlane.xlu0 %2766  ;;  %v3413_v45 = vsel %vm3298_vm0, %v3080_v32, 0.0 }
 0x31e   : > { %8559 = vst [vmem:[#allocation213_spill] sm:$0xff] %v6655_v16  ;;  %v2829_v16 = vld [vmem:[%s5572_s16 + $0x2bc] sm:$0xf] }
 0x31f   : > { %v3085_v39 = vunpack.c.l.bf16 %v2829_v16 }
 0x320   : > { %3411 = vadd.xlane.f32.xlu2 %v3410_v19  ;;  %v2828_v19 = vld [vmem:[%s5572_s16 + $0x2ac] sm:$0xf] }
 0x321   : > { %3408 = vadd.xlane.f32.xlu1 %v3407_v10  ;;  %v3084_v10 = vunpack.c.l.bf16 %v2828_v19  ;;  %v3428_v40 = vsel %vm3298_vm0, %v3085_v39, 0.0 }
 0x322   : > { %3405 = vadd.xlane.f32.xlu0 %v3404_v63  ;;  %v2827_v63 = vld [vmem:[%s5572_s16 + $0x29c] sm:$0xf] }
 0x323   : > { %v6663_v59 = vpop.xlane.xlu2 %2776  ;;  %v3083_v13 = vunpack.c.l.bf16 %v2827_v63  ;;  %v3425_v32 = vsel %vm3298_vm0, %v3084_v10, 0.0 }
 0x324   : > { %8560 = vst [vmem:[#allocation214_spill] sm:$0xff] %v6663_v59  ;;  %v6665_v0 = vpop.xlane.xlu1 %2774 }
 0x325   : > { %8561 = vst [vmem:[#allocation215_spill] sm:$0xff] %v6665_v0  ;;  %v6667_v2 = vpop.xlane.xlu0 %2772  ;;  %v3422_v0 = vsel %vm3298_vm0, %v3083_v13, 0.0 }
 0x326   : > { %8562 = vst [vmem:[#allocation216_spill] sm:$0xff] %v6667_v2  ;;  %v2832_v2 = vld [vmem:[%s5572_s16 + $0x2ec] sm:$0xf] }
 0x327   : > { %v3088_v16 = vunpack.c.l.bf16 %v2832_v2 }
 0x328   : > { %3420 = vadd.xlane.f32.xlu2 %v3419_v50  ;;  %v2831_v50 = vld [vmem:[%s5572_s16 + $0x2dc] sm:$0xf] }
 0x329   : > { %3417 = vadd.xlane.f32.xlu1 %v3416_v20  ;;  %v3087_v20 = vunpack.c.l.bf16 %v2831_v50  ;;  %v3437_v10 = vsel %vm3298_vm0, %v3088_v16, 0.0 }
 0x32a   : > { %3414 = vadd.xlane.f32.xlu0 %v3413_v45  ;;  %v2830_v45 = vld [vmem:[%s5572_s16 + $0x2cc] sm:$0xf] }
 0x32b   : > { %v6675_v56 = vpop.xlane.xlu2 %2782  ;;  %v3086_v19 = vunpack.c.l.bf16 %v2830_v45  ;;  %v3434_v13 = vsel %vm3298_vm0, %v3087_v20, 0.0 }
 0x32c   : > { %8563 = vst [vmem:[#allocation217_spill] sm:$0xff] %v6675_v56  ;;  %v6677_v59 = vpop.xlane.xlu1 %2780 }
 0x32d   : > { %8564 = vst [vmem:[#allocation218_spill] sm:$0xff] %v6677_v59  ;;  %v6679_v52 = vpop.xlane.xlu0 %2778  ;;  %v3431_v59 = vsel %vm3298_vm0, %v3086_v19, 0.0 }
 0x32e   : > { %8565 = vst [vmem:[#allocation219_spill] sm:$0xff] %v6679_v52  ;;  %v2835_v52 = vld [vmem:[%s5572_s16 + $0x31c] sm:$0xf] }
 0x32f   : > { %v3091_v2 = vunpack.c.l.bf16 %v2835_v52  ;;  %v3094_v52 = vunpack.c.l.bf16 %v2838_v30  ;;  %v2839_v30 = vld [vmem:[%s5572_s16 + $0x35c] sm:$0xf] }
 0x330   : > { %3429 = vadd.xlane.f32.xlu2 %v3428_v40  ;;  %v2834_v40 = vld [vmem:[%s5572_s16 + $0x30c] sm:$0xf] }
 0x331   : > { %3426 = vadd.xlane.f32.xlu1 %v3425_v32  ;;  %v3090_v32 = vunpack.c.l.bf16 %v2834_v40  ;;  %v3446_v20 = vsel %vm3298_vm0, %v3091_v2, 0.0 }
 0x332   : > { %3423 = vadd.xlane.f32.xlu0 %v3422_v0  ;;  %v2833_v0 = vld [vmem:[%s5572_s16 + $0x2fc] sm:$0xf] }
 0x333   : > { %v6687_v63 = vpop.xlane.xlu2 %3303  ;;  %v3089_v50 = vunpack.c.l.bf16 %v2833_v0  ;;  %v3443_v19 = vsel %vm3298_vm0, %v3090_v32, 0.0  ;;  %v3455_v32 = vsel %vm3298_vm0, %v3094_v52, 0.0 }
 0x334   : > { %v6689_v56 = vpop.xlane.xlu1 %3300 }
 0x335   : > { %v6691_v39 = vpop.xlane.xlu0 %2784  ;;  %v3440_v7 = vsel %vm3298_vm0, %v3089_v50, 0.0 }
 0x336   : > { %8566 = vst [vmem:[#allocation220_spill] sm:$0xff] %v6691_v39 }
 0x338   : > { %3438 = vadd.xlane.f32.xlu2 %v3437_v10  ;;  %v2837_v10 = vld [vmem:[%s5572_s16 + $0x33c] sm:$0xf] }
 0x339   : > { %3435 = vadd.xlane.f32.xlu1 %v3434_v13  ;;  %v3093_v13 = vunpack.c.l.bf16 %v2837_v10  ;;  %v3095_v10 = vunpack.c.l.bf16 %v2839_v30 }
 0x33a   : > { %3432 = vadd.xlane.f32.xlu0 %v3431_v59  ;;  %v2836_v59 = vld [vmem:[%s5572_s16 + $0x32c] sm:$0xf] }
 0x33b   : > { %v6699_v45 = vpop.xlane.xlu2 %3312  ;;  %v3092_v40 = vunpack.c.l.bf16 %v2836_v59  ;;  %v3452_v50 = vsel %vm3298_vm0, %v3093_v13, 0.0  ;;  %v3458_v28 = vsel %vm3298_vm0, %v3095_v10, 0.0 }
 0x33c   : > { %v6701_v39 = vpop.xlane.xlu1 %3309 }
 0x33d   : > { %v6703_v16 = vpop.xlane.xlu0 %3306  ;;  %v3449_v44 = vsel %vm3298_vm0, %v3092_v40, 0.0 }
 0x340   : > { %3447 = vadd.xlane.f32.xlu2 %v3446_v20  ;;  %v2840_v20 = vld [vmem:[%s5572_s16 + $0x36c] sm:$0xf] }
 0x341   : > { %3444 = vadd.xlane.f32.xlu1 %v3443_v19  ;;  %v3096_v19 = vunpack.c.l.bf16 %v2840_v20 }
 0x342   : > { %3441 = vadd.xlane.f32.xlu0 %v3440_v7  ;;  %v3097_v7 = vunpack.c.l.bf16 %v2841_v38  ;;  %v2842_v38 = vld [vmem:[%s5572_s16 + $0x38c] sm:$0xf] }
 0x343   : > { %v6711_v0 = vpop.xlane.xlu2 %3321  ;;  %v3461_v40 = vsel %vm3298_vm0, %v3096_v19, 0.0  ;;  %v3098_v20 = vunpack.c.l.bf16 %v2842_v38 }
 0x344   : > { %8567 = vst [vmem:[#allocation221_spill] sm:$0xff] %v6711_v0  ;;  %v6713_v8 = vpop.xlane.xlu1 %3318  ;;  %v3464_v13 = vsel %vm3298_vm0, %v3097_v7, 0.0  ;;  %v2899_v0 = vld [vmem:[%s5572_s16 + $0x71c] sm:$0xf] }
 0x345   : > { %8568 = vst [vmem:[#allocation222_spill] sm:$0xff] %v6713_v8  ;;  %v6715_v2 = vpop.xlane.xlu0 %3315  ;;  %v3467_v3 = vsel %vm3298_vm0, %v3098_v20, 0.0 }
 0x348   : > { %3456 = vadd.xlane.f32.xlu2 %v3455_v32  ;;  %v2843_v32 = vld [vmem:[%s5572_s16 + $0x39c] sm:$0xf] }
 0x349   : > { %3453 = vadd.xlane.f32.xlu1 %v3452_v50  ;;  %v3099_v50 = vunpack.c.l.bf16 %v2843_v32 }
 0x34a   : > { %3450 = vadd.xlane.f32.xlu0 %v3449_v44  ;;  %v3100_v44 = vunpack.c.l.bf16 %v2844_v54 }
 0x34b   : > { %v6723_v59 = vpop.xlane.xlu2 %3330  ;;  %v3470_v10 = vsel %vm3298_vm0, %v3099_v50, 0.0 }
 0x34c   : > { %8569 = vst [vmem:[#allocation223_spill] sm:$0xff] %v6723_v59  ;;  %v6725_v58 = vpop.xlane.xlu1 %3327  ;;  %v3473_v19 = vsel %vm3298_vm0, %v3100_v44, 0.0  ;;  %v2847_v59 = vld [vmem:[%s5572_s16 + $0x3dc] sm:$0xf] }
 0x34d   : > { %8570 = vst [vmem:[#allocation224_spill] sm:$0xff] %v6725_v58  ;;  %v6727_v52 = vpop.xlane.xlu0 %3324  ;;  %v3103_v54 = vunpack.c.l.bf16 %v2847_v59  ;;  %v2897_v58 = vld [vmem:[%s5572_s16 + $0x6fc] sm:$0xf] }
 0x34e   : > { %8571 = vst [vmem:[#allocation225_spill] sm:$0xff] %v6727_v52  ;;  %v2896_v52 = vld [vmem:[%s5572_s16 + $0x6ec] sm:$0xf] }
 0x34f   : > { %v3482_v50 = vsel %vm3298_vm0, %v3103_v54, 0.0 }
 0x350   : > { %3465 = vadd.xlane.f32.xlu2 %v3464_v13  ;;  %v2846_v13 = vld [vmem:[%s5572_s16 + $0x3cc] sm:$0xf] }
 0x351   : > { %3462 = vadd.xlane.f32.xlu1 %v3461_v40  ;;  %v3102_v40 = vunpack.c.l.bf16 %v2846_v13 }
 0x352   : > { %3459 = vadd.xlane.f32.xlu0 %v3458_v28  ;;  %v2845_v28 = vld [vmem:[%s5572_s16 + $0x3bc] sm:$0xf] }
 0x353   : > { %v6735_v30 = vpop.xlane.xlu2 %3339  ;;  %v3101_v32 = vunpack.c.l.bf16 %v2845_v28  ;;  %v3479_v20 = vsel %vm3298_vm0, %v3102_v40, 0.0 }
 0x354   : > { %8572 = vst [vmem:[#allocation226_spill] sm:$0xff] %v6735_v30  ;;  %v6737_v24 = vpop.xlane.xlu1 %3336 }
 0x355   : > { %8573 = vst [vmem:[#allocation227_spill] sm:$0xff] %v6737_v24  ;;  %v6739_v7 = vpop.xlane.xlu0 %3333  ;;  %v3476_v30 = vsel %vm3298_vm0, %v3101_v32, 0.0 }
 0x356   : > { %8574 = vst [vmem:[#allocation228_spill] sm:$0xff] %v6739_v7  ;;  %v2850_v7 = vld [vmem:[%s5572_s16 + $0x40c] sm:$0xf] }
 0x357   : > { %v3106_v59 = vunpack.c.l.bf16 %v2850_v7 }
 0x358   : > { %3474 = vadd.xlane.f32.xlu2 %v3473_v19  ;;  %v2849_v19 = vld [vmem:[%s5572_s16 + $0x3fc] sm:$0xf] }
 0x359   : > { %3471 = vadd.xlane.f32.xlu1 %v3470_v10  ;;  %v3105_v10 = vunpack.c.l.bf16 %v2849_v19  ;;  %v3491_v40 = vsel %vm3298_vm0, %v3106_v59, 0.0 }
 0x35a   : > { %3468 = vadd.xlane.f32.xlu0 %v3467_v3  ;;  %v2848_v3 = vld [vmem:[%s5572_s16 + $0x3ec] sm:$0xf] }
 0x35b   : > { %v6747_v38 = vpop.xlane.xlu2 %3348  ;;  %v3104_v13 = vunpack.c.l.bf16 %v2848_v3  ;;  %v3488_v32 = vsel %vm3298_vm0, %v3105_v10, 0.0 }
 0x35c   : > { %8575 = vst [vmem:[#allocation229_spill] sm:$0xff] %v6747_v38  ;;  %v6749_v24 = vpop.xlane.xlu1 %3345 }
 0x35d   : > { %8576 = vst [vmem:[#allocation230_spill] sm:$0xff] %v6749_v24  ;;  %v6751_v44 = vpop.xlane.xlu0 %3342  ;;  %v3485_v38 = vsel %vm3298_vm0, %v3104_v13, 0.0 }
 0x35e   : > { %8577 = vst [vmem:[#allocation231_spill] sm:$0xff] %v6751_v44  ;;  %v2853_v44 = vld [vmem:[%s5572_s16 + $0x43c] sm:$0xf] }
 0x35f   : > { %v3109_v7 = vunpack.c.l.bf16 %v2853_v44 }
 0x360   : > { %3483 = vadd.xlane.f32.xlu2 %v3482_v50  ;;  %v2852_v50 = vld [vmem:[%s5572_s16 + $0x42c] sm:$0xf] }
 0x361   : > { %3480 = vadd.xlane.f32.xlu1 %v3479_v20  ;;  %v3108_v20 = vunpack.c.l.bf16 %v2852_v50  ;;  %v3500_v10 = vsel %vm3298_vm0, %v3109_v7, 0.0 }
 0x362   : > { %3477 = vadd.xlane.f32.xlu0 %v3476_v30  ;;  %v2851_v30 = vld [vmem:[%s5572_s16 + $0x41c] sm:$0xf] }
 0x363   : > { %v6759_v28 = vpop.xlane.xlu2 %3357  ;;  %v3107_v19 = vunpack.c.l.bf16 %v2851_v30  ;;  %v3497_v13 = vsel %vm3298_vm0, %v3108_v20, 0.0 }
 0x364   : > { %8578 = vst [vmem:[#allocation232_spill] sm:$0xff] %v6759_v28  ;;  %v6761_v24 = vpop.xlane.xlu1 %3354 }
 0x365   : > { %8579 = vst [vmem:[#allocation233_spill] sm:$0xff] %v6761_v24  ;;  %v6763_v54 = vpop.xlane.xlu0 %3351  ;;  %v3494_v28 = vsel %vm3298_vm0, %v3107_v19, 0.0 }
 0x366   : > { %8580 = vst [vmem:[#allocation234_spill] sm:$0xff] %v6763_v54  ;;  %v2856_v54 = vld [vmem:[%s5572_s16 + $0x46c] sm:$0xf] }
 0x367   : > { %v3112_v44 = vunpack.c.l.bf16 %v2856_v54 }
 0x368   : > { %3492 = vadd.xlane.f32.xlu2 %v3491_v40  ;;  %v2855_v40 = vld [vmem:[%s5572_s16 + $0x45c] sm:$0xf] }
 0x369   : > { %3489 = vadd.xlane.f32.xlu1 %v3488_v32  ;;  %v3111_v32 = vunpack.c.l.bf16 %v2855_v40  ;;  %v3509_v20 = vsel %vm3298_vm0, %v3112_v44, 0.0 }
 0x36a   : > { %3486 = vadd.xlane.f32.xlu0 %v3485_v38  ;;  %v2854_v38 = vld [vmem:[%s5572_s16 + $0x44c] sm:$0xf] }
 0x36b   : > { %v6771_v3 = vpop.xlane.xlu2 %3366  ;;  %v3110_v50 = vunpack.c.l.bf16 %v2854_v38  ;;  %v3506_v19 = vsel %vm3298_vm0, %v3111_v32, 0.0 }
 0x36c   : > { %8581 = vst [vmem:[#allocation235_spill] sm:$0xff] %v6771_v3  ;;  %v6773_v24 = vpop.xlane.xlu1 %3363 }
 0x36d   : > { %8582 = vst [vmem:[#allocation236_spill] sm:$0xff] %v6773_v24  ;;  %v6775_v59 = vpop.xlane.xlu0 %3360  ;;  %v3503_v24 = vsel %vm3298_vm0, %v3110_v50, 0.0 }
 0x36e   : > { %8583 = vst [vmem:[#allocation237_spill] sm:$0xff] %v6775_v59  ;;  %v2859_v59 = vld [vmem:[%s5572_s16 + $0x49c] sm:$0xf] }
 0x36f   : > { %v3115_v54 = vunpack.c.l.bf16 %v2859_v59 }
 0x370   : > { %3501 = vadd.xlane.f32.xlu2 %v3500_v10  ;;  %v2858_v10 = vld [vmem:[%s5572_s16 + $0x48c] sm:$0xf] }
 0x371   : > { %3498 = vadd.xlane.f32.xlu1 %v3497_v13  ;;  %v3114_v13 = vunpack.c.l.bf16 %v2858_v10  ;;  %v3518_v32 = vsel %vm3298_vm0, %v3115_v54, 0.0 }
 0x372   : > { %3495 = vadd.xlane.f32.xlu0 %v3494_v28  ;;  %v2857_v28 = vld [vmem:[%s5572_s16 + $0x47c] sm:$0xf] }
 0x373   : > { %v6783_v30 = vpop.xlane.xlu2 %3375  ;;  %v3113_v40 = vunpack.c.l.bf16 %v2857_v28  ;;  %v3515_v50 = vsel %vm3298_vm0, %v3114_v13, 0.0 }
 0x374   : > { %8584 = vst [vmem:[#allocation238_spill] sm:$0xff] %v6783_v30  ;;  %v6785_v3 = vpop.xlane.xlu1 %3372 }
 0x375   : > { %8585 = vst [vmem:[#allocation239_spill] sm:$0xff] %v6785_v3  ;;  %v6787_v7 = vpop.xlane.xlu0 %3369  ;;  %v3512_v30 = vsel %vm3298_vm0, %v3113_v40, 0.0 }
 0x376   : > { %8586 = vst [vmem:[#allocation240_spill] sm:$0xff] %v6787_v7  ;;  %v2862_v7 = vld [vmem:[%s5572_s16 + $0x4cc] sm:$0xf] }
 0x377   : > { %v3118_v59 = vunpack.c.l.bf16 %v2862_v7 }
 0x378   : > { %3510 = vadd.xlane.f32.xlu2 %v3509_v20  ;;  %v2861_v20 = vld [vmem:[%s5572_s16 + $0x4bc] sm:$0xf] }
 0x379   : > { %3507 = vadd.xlane.f32.xlu1 %v3506_v19  ;;  %v3117_v19 = vunpack.c.l.bf16 %v2861_v20  ;;  %v3527_v13 = vsel %vm3298_vm0, %v3118_v59, 0.0 }
 0x37a   : > { %3504 = vadd.xlane.f32.xlu0 %v3503_v24  ;;  %v2860_v24 = vld [vmem:[%s5572_s16 + $0x4ac] sm:$0xf] }
 0x37b   : > { %v6795_v38 = vpop.xlane.xlu2 %3384  ;;  %v3116_v10 = vunpack.c.l.bf16 %v2860_v24  ;;  %v3524_v40 = vsel %vm3298_vm0, %v3117_v19, 0.0 }
 0x37c   : > { %8587 = vst [vmem:[#allocation241_spill] sm:$0xff] %v6795_v38  ;;  %v6797_v3 = vpop.xlane.xlu1 %3381 }
 0x37d   : > { %8588 = vst [vmem:[#allocation242_spill] sm:$0xff] %v6797_v3  ;;  %v6799_v44 = vpop.xlane.xlu0 %3378  ;;  %v3521_v3 = vsel %vm3298_vm0, %v3116_v10, 0.0 }
 0x37e   : > { %8589 = vst [vmem:[#allocation243_spill] sm:$0xff] %v6799_v44  ;;  %v2865_v44 = vld [vmem:[%s5572_s16 + $0x4fc] sm:$0xf] }
 0x37f   : > { %v3121_v7 = vunpack.c.l.bf16 %v2865_v44 }
 0x380   : > { %3519 = vadd.xlane.f32.xlu2 %v3518_v32  ;;  %v2864_v32 = vld [vmem:[%s5572_s16 + $0x4ec] sm:$0xf] }
 0x381   : > { %3516 = vadd.xlane.f32.xlu1 %v3515_v50  ;;  %v3120_v50 = vunpack.c.l.bf16 %v2864_v32  ;;  %v3536_v19 = vsel %vm3298_vm0, %v3121_v7, 0.0 }
 0x382   : > { %3513 = vadd.xlane.f32.xlu0 %v3512_v30  ;;  %v2863_v30 = vld [vmem:[%s5572_s16 + $0x4dc] sm:$0xf] }
 0x383   : > { %v6807_v28 = vpop.xlane.xlu2 %3393  ;;  %v3119_v20 = vunpack.c.l.bf16 %v2863_v30  ;;  %v3533_v10 = vsel %vm3298_vm0, %v3120_v50, 0.0 }
 0x384   : > { %8590 = vst [vmem:[#allocation244_spill] sm:$0xff] %v6807_v28  ;;  %v6809_v38 = vpop.xlane.xlu1 %3390 }
 0x385   : > { %8591 = vst [vmem:[#allocation245_spill] sm:$0xff] %v6809_v38  ;;  %v6811_v54 = vpop.xlane.xlu0 %3387  ;;  %v3530_v38 = vsel %vm3298_vm0, %v3119_v20, 0.0 }
 0x386   : > { %8592 = vst [vmem:[#allocation246_spill] sm:$0xff] %v6811_v54  ;;  %v2868_v54 = vld [vmem:[%s5572_s16 + $0x52c] sm:$0xf] }
 0x387   : > { %v3124_v44 = vunpack.c.l.bf16 %v2868_v54 }
 0x388   : > { %3528 = vadd.xlane.f32.xlu2 %v3527_v13  ;;  %v2867_v13 = vld [vmem:[%s5572_s16 + $0x51c] sm:$0xf] }
 0x389   : > { %3525 = vadd.xlane.f32.xlu1 %v3524_v40  ;;  %v3123_v40 = vunpack.c.l.bf16 %v2867_v13  ;;  %v3545_v50 = vsel %vm3298_vm0, %v3124_v44, 0.0 }
 0x38a   : > { %3522 = vadd.xlane.f32.xlu0 %v3521_v3  ;;  %v2866_v3 = vld [vmem:[%s5572_s16 + $0x50c] sm:$0xf] }
 0x38b   : > { %v6819_v24 = vpop.xlane.xlu2 %3402  ;;  %v3122_v32 = vunpack.c.l.bf16 %v2866_v3  ;;  %v3542_v20 = vsel %vm3298_vm0, %v3123_v40, 0.0 }
 0x38c   : > { %8593 = vst [vmem:[#allocation247_spill] sm:$0xff] %v6819_v24  ;;  %v6821_v28 = vpop.xlane.xlu1 %3399 }
 0x38d   : > { %8594 = vst [vmem:[#allocation248_spill] sm:$0xff] %v6821_v28  ;;  %v6823_v59 = vpop.xlane.xlu0 %3396  ;;  %v3539_v24 = vsel %vm3298_vm0, %v3122_v32, 0.0 }
 0x38e   : > { %8595 = vst [vmem:[#allocation249_spill] sm:$0xff] %v6823_v59  ;;  %v2871_v59 = vld [vmem:[%s5572_s16 + $0x55c] sm:$0xf] }
 0x38f   : > { %v3127_v54 = vunpack.c.l.bf16 %v2871_v59 }
 0x390   : > { %3537 = vadd.xlane.f32.xlu2 %v3536_v19  ;;  %v2870_v19 = vld [vmem:[%s5572_s16 + $0x54c] sm:$0xf] }
 0x391   : > { %3534 = vadd.xlane.f32.xlu1 %v3533_v10  ;;  %v3126_v10 = vunpack.c.l.bf16 %v2870_v19  ;;  %v3554_v40 = vsel %vm3298_vm0, %v3127_v54, 0.0 }
 0x392   : > { %3531 = vadd.xlane.f32.xlu0 %v3530_v38  ;;  %v2869_v38 = vld [vmem:[%s5572_s16 + $0x53c] sm:$0xf] }
 0x393   : > { %v6831_v30 = vpop.xlane.xlu2 %3411  ;;  %v3125_v13 = vunpack.c.l.bf16 %v2869_v38  ;;  %v3551_v32 = vsel %vm3298_vm0, %v3126_v10, 0.0 }
 0x394   : > { %8596 = vst [vmem:[#allocation250_spill] sm:$0xff] %v6831_v30  ;;  %v6833_v28 = vpop.xlane.xlu1 %3408 }
 0x395   : > { %8597 = vst [vmem:[#allocation251_spill] sm:$0xff] %v6833_v28  ;;  %v6835_v7 = vpop.xlane.xlu0 %3405  ;;  %v3548_v28 = vsel %vm3298_vm0, %v3125_v13, 0.0 }
 0x396   : > { %8598 = vst [vmem:[#allocation252_spill] sm:$0xff] %v6835_v7  ;;  %v2874_v7 = vld [vmem:[%s5572_s16 + $0x58c] sm:$0xf] }
 0x397   : > { %v3130_v59 = vunpack.c.l.bf16 %v2874_v7 }
 0x398   : > { %3546 = vadd.xlane.f32.xlu2 %v3545_v50  ;;  %v2873_v50 = vld [vmem:[%s5572_s16 + $0x57c] sm:$0xf] }
 0x399   : > { %3543 = vadd.xlane.f32.xlu1 %v3542_v20  ;;  %v3129_v20 = vunpack.c.l.bf16 %v2873_v50  ;;  %v3563_v10 = vsel %vm3298_vm0, %v3130_v59, 0.0 }
 0x39a   : > { %3540 = vadd.xlane.f32.xlu0 %v3539_v24  ;;  %v2872_v24 = vld [vmem:[%s5572_s16 + $0x56c] sm:$0xf] }
 0x39b   : > { %v6843_v3 = vpop.xlane.xlu2 %3420  ;;  %v3128_v19 = vunpack.c.l.bf16 %v2872_v24  ;;  %v3560_v13 = vsel %vm3298_vm0, %v3129_v20, 0.0 }
 0x39c   : > { %8599 = vst [vmem:[#allocation253_spill] sm:$0xff] %v6843_v3  ;;  %v6845_v30 = vpop.xlane.xlu1 %3417 }
 0x39d   : > { %8600 = vst [vmem:[#allocation254_spill] sm:$0xff] %v6845_v30  ;;  %v6847_v44 = vpop.xlane.xlu0 %3414  ;;  %v3557_v30 = vsel %vm3298_vm0, %v3128_v19, 0.0 }
 0x39e   : > { %8601 = vst [vmem:[#allocation255_spill] sm:$0xff] %v6847_v44  ;;  %v2877_v44 = vld [vmem:[%s5572_s16 + $0x5bc] sm:$0xf] }
 0x39f   : > { %v3133_v7 = vunpack.c.l.bf16 %v2877_v44 }
 0x3a0   : > { %3555 = vadd.xlane.f32.xlu2 %v3554_v40  ;;  %v2876_v40 = vld [vmem:[%s5572_s16 + $0x5ac] sm:$0xf] }
 0x3a1   : > { %3552 = vadd.xlane.f32.xlu1 %v3551_v32  ;;  %v3132_v32 = vunpack.c.l.bf16 %v2876_v40  ;;  %v3572_v20 = vsel %vm3298_vm0, %v3133_v7, 0.0 }
 0x3a2   : > { %3549 = vadd.xlane.f32.xlu0 %v3548_v28  ;;  %v2875_v28 = vld [vmem:[%s5572_s16 + $0x59c] sm:$0xf] }
 0x3a3   : > { %v6855_v38 = vpop.xlane.xlu2 %3429  ;;  %v3131_v50 = vunpack.c.l.bf16 %v2875_v28  ;;  %v3569_v19 = vsel %vm3298_vm0, %v3132_v32, 0.0 }
 0x3a4   : > { %8602 = vst [vmem:[#allocation256_spill] sm:$0xff] %v6855_v38  ;;  %v6857_v3 = vpop.xlane.xlu1 %3426 }
 0x3a5   : > { %8603 = vst [vmem:[#allocation257_spill] sm:$0xff] %v6857_v3  ;;  %v6859_v54 = vpop.xlane.xlu0 %3423  ;;  %v3566_v38 = vsel %vm3298_vm0, %v3131_v50, 0.0 }
 0x3a6   : > { %8604 = vst [vmem:[#allocation258_spill] sm:$0xff] %v6859_v54  ;;  %v2880_v54 = vld [vmem:[%s5572_s16 + $0x5ec] sm:$0xf] }
 0x3a7   : > { %v3136_v44 = vunpack.c.l.bf16 %v2880_v54 }
 0x3a8   : > { %3564 = vadd.xlane.f32.xlu2 %v3563_v10  ;;  %v2879_v10 = vld [vmem:[%s5572_s16 + $0x5dc] sm:$0xf] }
 0x3a9   : > { %3561 = vadd.xlane.f32.xlu1 %v3560_v13  ;;  %v3135_v13 = vunpack.c.l.bf16 %v2879_v10  ;;  %v3581_v32 = vsel %vm3298_vm0, %v3136_v44, 0.0 }
 0x3aa   : > { %3558 = vadd.xlane.f32.xlu0 %v3557_v30  ;;  %v2878_v30 = vld [vmem:[%s5572_s16 + $0x5cc] sm:$0xf] }
 0x3ab   : > { %v6867_v24 = vpop.xlane.xlu2 %3438  ;;  %v3134_v40 = vunpack.c.l.bf16 %v2878_v30  ;;  %v3578_v50 = vsel %vm3298_vm0, %v3135_v13, 0.0 }
 0x3ac   : > { %8605 = vst [vmem:[#allocation259_spill] sm:$0xff] %v6867_v24  ;;  %v6869_v3 = vpop.xlane.xlu1 %3435 }
 0x3ad   : > { %8606 = vst [vmem:[#allocation260_spill] sm:$0xff] %v6869_v3  ;;  %v6871_v59 = vpop.xlane.xlu0 %3432  ;;  %v3575_v3 = vsel %vm3298_vm0, %v3134_v40, 0.0 }
 0x3ae   : > { %8607 = vst [vmem:[#allocation261_spill] sm:$0xff] %v6871_v59  ;;  %v2883_v59 = vld [vmem:[%s5572_s16 + $0x61c] sm:$0xf] }
 0x3af   : > { %v3139_v54 = vunpack.c.l.bf16 %v2883_v59 }
 0x3b0   : > { %3573 = vadd.xlane.f32.xlu2 %v3572_v20  ;;  %v2882_v20 = vld [vmem:[%s5572_s16 + $0x60c] sm:$0xf] }
 0x3b1   : > { %3570 = vadd.xlane.f32.xlu1 %v3569_v19  ;;  %v3138_v19 = vunpack.c.l.bf16 %v2882_v20  ;;  %v3590_v13 = vsel %vm3298_vm0, %v3139_v54, 0.0 }
 0x3b2   : > { %3567 = vadd.xlane.f32.xlu0 %v3566_v38  ;;  %v2881_v38 = vld [vmem:[%s5572_s16 + $0x5fc] sm:$0xf] }
 0x3b3   : > { %v6879_v28 = vpop.xlane.xlu2 %3447  ;;  %v3137_v10 = vunpack.c.l.bf16 %v2881_v38  ;;  %v3587_v40 = vsel %vm3298_vm0, %v3138_v19, 0.0 }
 0x3b4   : > { %8608 = vst [vmem:[#allocation262_spill] sm:$0xff] %v6879_v28  ;;  %v6881_v24 = vpop.xlane.xlu1 %3444 }
 0x3b5   : > { %8609 = vst [vmem:[#allocation263_spill] sm:$0xff] %v6881_v24  ;;  %v6883_v7 = vpop.xlane.xlu0 %3441  ;;  %v3584_v28 = vsel %vm3298_vm0, %v3137_v10, 0.0 }
 0x3b6   : > { %8610 = vst [vmem:[#allocation264_spill] sm:$0xff] %v6883_v7  ;;  %v2886_v7 = vld [vmem:[%s5572_s16 + $0x64c] sm:$0xf] }
 0x3b7   : > { %v3142_v59 = vunpack.c.l.bf16 %v2886_v7 }
 0x3b8   : > { %3582 = vadd.xlane.f32.xlu2 %v3581_v32  ;;  %v2885_v32 = vld [vmem:[%s5572_s16 + $0x63c] sm:$0xf] }
 0x3b9   : > { %3579 = vadd.xlane.f32.xlu1 %v3578_v50  ;;  %v3141_v50 = vunpack.c.l.bf16 %v2885_v32  ;;  %v3599_v19 = vsel %vm3298_vm0, %v3142_v59, 0.0 }
 0x3ba   : > { %3576 = vadd.xlane.f32.xlu0 %v3575_v3  ;;  %v2884_v3 = vld [vmem:[%s5572_s16 + $0x62c] sm:$0xf] }
 0x3bb   : > { %v6891_v30 = vpop.xlane.xlu2 %3456  ;;  %v3140_v20 = vunpack.c.l.bf16 %v2884_v3  ;;  %v3596_v10 = vsel %vm3298_vm0, %v3141_v50, 0.0 }
 0x3bc   : > { %8611 = vst [vmem:[#allocation265_spill] sm:$0xff] %v6891_v30  ;;  %v6893_v24 = vpop.xlane.xlu1 %3453 }
 0x3bd   : > { %8612 = vst [vmem:[#allocation266_spill] sm:$0xff] %v6893_v24  ;;  %v6895_v44 = vpop.xlane.xlu0 %3450  ;;  %v3593_v24 = vsel %vm3298_vm0, %v3140_v20, 0.0 }
 0x3be   : > { %8613 = vst [vmem:[#allocation267_spill] sm:$0xff] %v6895_v44  ;;  %v2889_v44 = vld [vmem:[%s5572_s16 + $0x67c] sm:$0xf] }
 0x3bf   : > { %v3145_v7 = vunpack.c.l.bf16 %v2889_v44 }
 0x3c0   : > { %3591 = vadd.xlane.f32.xlu2 %v3590_v13  ;;  %v2888_v13 = vld [vmem:[%s5572_s16 + $0x66c] sm:$0xf] }
 0x3c1   : > { %3588 = vadd.xlane.f32.xlu1 %v3587_v40  ;;  %v3144_v40 = vunpack.c.l.bf16 %v2888_v13  ;;  %v3608_v50 = vsel %vm3298_vm0, %v3145_v7, 0.0 }
 0x3c2   : > { %3585 = vadd.xlane.f32.xlu0 %v3584_v28  ;;  %v2887_v28 = vld [vmem:[%s5572_s16 + $0x65c] sm:$0xf] }
 0x3c3   : > { %v6903_v38 = vpop.xlane.xlu2 %3465  ;;  %v3143_v32 = vunpack.c.l.bf16 %v2887_v28  ;;  %v3605_v20 = vsel %vm3298_vm0, %v3144_v40, 0.0 }
 0x3c4   : > { %8614 = vst [vmem:[#allocation268_spill] sm:$0xff] %v6903_v38  ;;  %v6905_v30 = vpop.xlane.xlu1 %3462 }
 0x3c5   : > { %8615 = vst [vmem:[#allocation269_spill] sm:$0xff] %v6905_v30  ;;  %v6907_v54 = vpop.xlane.xlu0 %3459  ;;  %v3602_v30 = vsel %vm3298_vm0, %v3143_v32, 0.0 }
 0x3c6   : > { %8616 = vst [vmem:[#allocation270_spill] sm:$0xff] %v6907_v54  ;;  %v2892_v54 = vld [vmem:[%s5572_s16 + $0x6ac] sm:$0xf] }
 0x3c7   : > { %v3148_v44 = vunpack.c.l.bf16 %v2892_v54 }
 0x3c8   : > { %3600 = vadd.xlane.f32.xlu2 %v3599_v19  ;;  %v2891_v19 = vld [vmem:[%s5572_s16 + $0x69c] sm:$0xf] }
 0x3c9   : > { %3597 = vadd.xlane.f32.xlu1 %v3596_v10  ;;  %v3147_v10 = vunpack.c.l.bf16 %v2891_v19  ;;  %v3617_v40 = vsel %vm3298_vm0, %v3148_v44, 0.0 }
 0x3ca   : > { %3594 = vadd.xlane.f32.xlu0 %v3593_v24  ;;  %v2890_v24 = vld [vmem:[%s5572_s16 + $0x68c] sm:$0xf] }
 0x3cb   : > { %v6915_v3 = vpop.xlane.xlu2 %3474  ;;  %v3146_v13 = vunpack.c.l.bf16 %v2890_v24  ;;  %v3614_v32 = vsel %vm3298_vm0, %v3147_v10, 0.0 }
 0x3cc   : > { %8617 = vst [vmem:[#allocation271_spill] sm:$0xff] %v6915_v3  ;;  %v6917_v38 = vpop.xlane.xlu1 %3471 }
 0x3cd   : > { %8618 = vst [vmem:[#allocation272_spill] sm:$0xff] %v6917_v38  ;;  %v6919_v59 = vpop.xlane.xlu0 %3468  ;;  %v3611_v38 = vsel %vm3298_vm0, %v3146_v13, 0.0 }
 0x3ce   : > { %8619 = vst [vmem:[#allocation273_spill] sm:$0xff] %v6919_v59  ;;  %v2895_v59 = vld [vmem:[%s5572_s16 + $0x6dc] sm:$0xf] }
 0x3cf   : > { %v3151_v54 = vunpack.c.l.bf16 %v2895_v59 }
 0x3d0   : > { %3609 = vadd.xlane.f32.xlu2 %v3608_v50  ;;  %v2894_v50 = vld [vmem:[%s5572_s16 + $0x6cc] sm:$0xf] }
 0x3d1   : > { %3606 = vadd.xlane.f32.xlu1 %v3605_v20  ;;  %v3150_v20 = vunpack.c.l.bf16 %v2894_v50  ;;  %v3626_v10 = vsel %vm3298_vm0, %v3151_v54, 0.0 }
 0x3d2   : > { %3603 = vadd.xlane.f32.xlu0 %v3602_v30  ;;  %v2893_v30 = vld [vmem:[%s5572_s16 + $0x6bc] sm:$0xf] }
 0x3d3   : > { %v6927_v28 = vpop.xlane.xlu2 %3483  ;;  %v3149_v19 = vunpack.c.l.bf16 %v2893_v30  ;;  %v3623_v13 = vsel %vm3298_vm0, %v3150_v20, 0.0  ;;  %v4776_v20 = vld [vmem:[%s8347_s1 + $0x200] sm:$0xff] }
 0x3d4   : > { %8620 = vst [vmem:[#allocation274_spill] sm:$0xff] %v6927_v28  ;;  %v6929_v3 = vpop.xlane.xlu1 %3480 }
 0x3d5   : > { %8621 = vst [vmem:[#allocation275_spill] sm:$0xff] %v6929_v3  ;;  %v6931_v7 = vpop.xlane.xlu0 %3477  ;;  %v3620_v28 = vsel %vm3298_vm0, %v3149_v19, 0.0 }
 0x3d6   : > { %8622 = vst [vmem:[#allocation276_spill] sm:$0xff] %v6931_v7  ;;  %v2898_v7 = vld [vmem:[%s5572_s16 + $0x70c] sm:$0xf] }
 0x3d7   : > { %v3154_v59 = vunpack.c.l.bf16 %v2898_v7 }
 0x3d8   : > { %3618 = vadd.xlane.f32.xlu2 %v3617_v40  ;;  %v3153_v40 = vunpack.c.l.bf16 %v2897_v58 }
 0x3d9   : > { %3615 = vadd.xlane.f32.xlu1 %v3614_v32  ;;  %v3152_v32 = vunpack.c.l.bf16 %v2896_v52  ;;  %v3635_v58 = vsel %vm3298_vm0, %v3154_v59, 0.0 }
 0x3da   : > { %3612 = vadd.xlane.f32.xlu0 %v3611_v38  ;;  %v3632_v52 = vsel %vm3298_vm0, %v3153_v40, 0.0 }
 0x3db   : > { %v3493_v24 = vpop.xlane.xlu2 %3492  ;;  %v3629_v7 = vsel %vm3298_vm0, %v3152_v32, 0.0  ;;  %v3155_v32 = vunpack.c.l.bf16 %v2899_v0 }
 0x3dc   : > { %v6939_v3 = vpop.xlane.xlu1 %3489  ;;  %v4131_v38 = vadd.f32 %v3493_v24, %v5927_v23  ;;  %v4777_v23 = vld [vmem:[%s8347_s1 + $0x208] sm:$0xff]  ;;  %v2901_v24 = vld [vmem:[%s5572_s16 + $0x73c] sm:$0xf] }
 0x3dd   : > { %8623 = vst [vmem:[#allocation277_spill] sm:$0xff] %v6939_v3  ;;  %v6941_v44 = vpop.xlane.xlu0 %3486  ;;  %v3157_v59 = vunpack.c.l.bf16 %v2901_v24  ;;  %v2903_v24 = vld [vmem:[%s5572_s16 + $0x75c] sm:$0xf] }
 0x3de   : > { %8624 = vst [vmem:[#allocation278_spill] sm:$0xff] %v6941_v44  ;;  %v4387_v19 = vmul.f32 0.0025510204, %v4131_v38 }
 0x3e0   : > { %3627 = vadd.xlane.f32.xlu2 %v3626_v10 }
 0x3e1   : > { %3624 = vadd.xlane.f32.xlu1 %v3623_v13  ;;  %v2900_v13 = vld [vmem:[%s5572_s16 + $0x72c] sm:$0xf] }
 0x3e2   : > { %3621 = vadd.xlane.f32.xlu0 %v3620_v28  ;;  %v3156_v40 = vunpack.c.l.bf16 %v2900_v13 }
 0x3e3   : > { %v3502_v50 = vpop.xlane.xlu2 %3501 }
 0x3e4   : > { %v3499_v30 = vpop.xlane.xlu1 %3498  ;;  %v4134_v3 = vadd.f32 %v3502_v50, %v5939_v60 }
 0x3e5   : > { %v3496_v54 = vpop.xlane.xlu0 %3495  ;;  %v4133_v10 = vadd.f32 %v3499_v30, %v5941_v49  ;;  %v4778_v49 = vld [vmem:[%s8347_s1 + $0x210] sm:$0xff]  ;;  %v4840_v30 = vmul.f32 %v4776_v20, %v4387_v19 }
 0x3e6   : > { %v4132_v28 = vadd.f32 %v3496_v54, %v5925_v9  ;;  %v4390_v54 = vmul.f32 0.0025510204, %v4134_v3  ;;  %v3644_v3 = vsel %vm3298_vm0, %v3157_v59, 0.0 }
 0x3e7   : > { %v4389_v44 = vmul.f32 0.0025510204, %v4133_v10  ;;  %v4779_v10 = vld [vmem:[%s8347_s1 + $0x218] sm:$0xff] }
 0x3e8   : > { %v4388_v38 = vmul.f32 0.0025510204, %v4132_v28  ;;  %3636 = vadd.xlane.f32.xlu2 %v3635_v58  ;;  %v4843_v13 = vmul.f32 %v4779_v10, %v4390_v54  ;;  %v4782_v10 = vld [vmem:[%s8347_s1 + $0x230] sm:$0xff] }
 0x3e9   : > { %3633 = vadd.xlane.f32.xlu1 %v3632_v52  ;;  %v4842_v8 = vmul.f32 %v4778_v49, %v4389_v44  ;;  %v3641_v44 = vsel %vm3298_vm0, %v3156_v40, 0.0  ;;  %v3638_v52 = vsel %vm3298_vm0, %v3155_v32, 0.0  ;;  %v3159_v40 = vunpack.c.l.bf16 %v2903_v24  ;;  %v2906_v24 = vld [vmem:[%s5572_s16 + $0x78c] sm:$0xf] }
 0x3ea   : > { %v4841_v9 = vmul.f32 %v4777_v23, %v4388_v38  ;;  %3630 = vadd.xlane.f32.xlu0 %v3629_v7  ;;  %v4780_v23 = vld [vmem:[%s8347_s1 + $0x220] sm:$0xff]  ;;  %v2904_v7 = vld [vmem:[%s5572_s16 + $0x76c] sm:$0xf] }
 0x3eb   : > { %v3511_v50 = vpop.xlane.xlu2 %3510  ;;  %v3160_v59 = vunpack.c.l.bf16 %v2904_v7  ;;  %v2907_v7 = vld [vmem:[%s5572_s16 + $0x79c] sm:$0xf] }
 0x3ec   : > { %v4904_v60 = vadd.f32 %v4841_v9, %v4840_v30  ;;  %v3508_v28 = vpop.xlane.xlu1 %3507  ;;  %v4137_v38 = vadd.f32 %v3511_v50, %v5951_v6  ;;  %v4781_v30 = vld [vmem:[%s8347_s1 + $0x228] sm:$0xff] }
 0x3ed   : > { %v3505_v58 = vpop.xlane.xlu0 %3504  ;;  %v4136_v19 = vadd.f32 %v3508_v28, %v5953_v48  ;;  %v2902_v48 = vld [vmem:[%s5572_s16 + $0x74c] sm:$0xf] }
 0x3ee   : > { %v4905_v20 = vadd.f32 %v4904_v60, %v4842_v8  ;;  %v4135_v0 = vadd.f32 %v3505_v58, %v5937_v47  ;;  %v3158_v32 = vunpack.c.l.bf16 %v2902_v48  ;;  %v4393_v54 = vmul.f32 0.0025510204, %v4137_v38  ;;  %v4784_v48 = vld [vmem:[%s8347_s1 + $0x240] sm:$0xff] }
 0x3ef   : > { %v4392_v8 = vmul.f32 0.0025510204, %v4136_v19 }
 0x3f0   : > { %v4391_v49 = vmul.f32 0.0025510204, %v4135_v0  ;;  %3645 = vadd.xlane.f32.xlu2 %v3644_v3  ;;  %v4906_v47 = vadd.f32 %v4905_v20, %v4843_v13  ;;  %v3653_v3 = vsel %vm3298_vm0, %v3160_v59, 0.0  ;;  %v4846_v13 = vmul.f32 %v4782_v10, %v4393_v54 }
 0x3f1   : > { %3642 = vadd.xlane.f32.xlu1 %v3641_v44  ;;  %v4845_v60 = vmul.f32 %v4781_v30, %v4392_v8  ;;  %v3650_v44 = vsel %vm3298_vm0, %v3159_v40, 0.0 }
 0x3f2   : > { %v4844_v9 = vmul.f32 %v4780_v23, %v4391_v49  ;;  %3639 = vadd.xlane.f32.xlu0 %v3638_v52  ;;  %v4783_v23 = vld [vmem:[%s8347_s1 + $0x238] sm:$0xff]  ;;  %v3647_v52 = vsel %vm3298_vm0, %v3158_v32, 0.0 }
 0x3f3   : > { %v3520_v50 = vpop.xlane.xlu2 %3519 }
 0x3f4   : > { %v4907_v6 = vadd.f32 %v4906_v47, %v4844_v9  ;;  %v3517_v28 = vpop.xlane.xlu1 %3516  ;;  %v4140_v38 = vadd.f32 %v3520_v50, %v5963_v1  ;;  %v3163_v47 = vunpack.c.l.bf16 %v2907_v7  ;;  %v3162_v9 = vunpack.c.l.bf16 %v2906_v24 }
 0x3f5   : > { %v3514_v58 = vpop.xlane.xlu0 %3513  ;;  %v4139_v19 = vadd.f32 %v3517_v28, %v5965_v36  ;;  %v2905_v36 = vld [vmem:[%s5572_s16 + $0x77c] sm:$0xf] }
 0x3f6   : > { %v4908_v20 = vadd.f32 %v4907_v6, %v4845_v60  ;;  %v4138_v0 = vadd.f32 %v3514_v58, %v5949_v5  ;;  %v3161_v59 = vunpack.c.l.bf16 %v2905_v36  ;;  %v4396_v40 = vmul.f32 0.0025510204, %v4140_v38  ;;  %v4785_v60 = vld [vmem:[%s8347_s1 + $0x248] sm:$0xff]  ;;  %v4786_v58 = vld [vmem:[%s8347_s1 + $0x250] sm:$0xff]  ;;  %v4787_v38 = vld [vmem:[%s8347_s1 + $0x258] sm:$0xff] }
 0x3f7   : > { %v4395_v8 = vmul.f32 0.0025510204, %v4139_v19  ;;  %v3662_v19 = vsel %vm3298_vm0, %v3163_v47, 0.0 }
 0x3f8   : > { %v4394_v49 = vmul.f32 0.0025510204, %v4138_v0  ;;  %3654 = vadd.xlane.f32.xlu2 %v3653_v3  ;;  %v4909_v5 = vadd.f32 %v4908_v20, %v4846_v13  ;;  %v3656_v0 = vsel %vm3298_vm0, %v3161_v59, 0.0  ;;  %v2910_v3 = vld [vmem:[%s5572_s16 + $0x7cc] sm:$0xf] }
 0x3f9   : > { %3651 = vadd.xlane.f32.xlu1 %v3650_v44  ;;  %v4848_v32 = vmul.f32 %v4784_v48, %v4395_v8  ;;  %v2909_v44 = vld [vmem:[%s5572_s16 + $0x7bc] sm:$0xf] }
 0x3fa   : > { %v4847_v30 = vmul.f32 %v4783_v23, %v4394_v49  ;;  %3648 = vadd.xlane.f32.xlu0 %v3647_v52  ;;  %v3659_v23 = vsel %vm3298_vm0, %v3162_v9, 0.0  ;;  %v4849_v52 = vmul.f32 %v4785_v60, %v4396_v40  ;;  %v3166_v49 = vunpack.c.l.bf16 %v2910_v3  ;;  %v4788_v9 = vld [vmem:[%s8347_s1 + $0x260] sm:$0xff]  ;;  %v4790_v3 = vld [vmem:[%s8347_s1 + $0x270] sm:$0xff] }
 0x3fb   : > { %v3529_v54 = vpop.xlane.xlu2 %3528  ;;  %v3165_v36 = vunpack.c.l.bf16 %v2909_v44 }
 0x3fc   : > { %v4910_v1 = vadd.f32 %v4909_v5, %v4847_v30  ;;  %v3526_v6 = vpop.xlane.xlu1 %3525  ;;  %v4143_v7 = vadd.f32 %v3529_v54, %v5975_v51  ;;  %v4789_v54 = vld [vmem:[%s8347_s1 + $0x268] sm:$0xff] }
 0x3fd   : > { %v3523_v50 = vpop.xlane.xlu0 %3522  ;;  %v4142_v28 = vadd.f32 %v3526_v6, %v5977_v35  ;;  %v2908_v35 = vld [vmem:[%s5572_s16 + $0x7ac] sm:$0xf]  ;;  %v3671_v6 = vsel %vm3298_vm0, %v3166_v49, 0.0 }
 0x3fe   : > { %v4911_v10 = vadd.f32 %v4910_v1, %v4848_v32  ;;  %v4141_v20 = vadd.f32 %v3523_v50, %v5961_v12  ;;  %v3164_v48 = vunpack.c.l.bf16 %v2908_v35  ;;  %v4399_v5 = vmul.f32 0.0025510204, %v4143_v7 }
 0x3ff   : > { %v4398_v24 = vmul.f32 0.0025510204, %v4142_v28  ;;  %v3668_v50 = vsel %vm3298_vm0, %v3165_v36, 0.0  ;;  %v2913_v28 = vld [vmem:[%s5572_s16 + $0x7fc] sm:$0xf] }
 0x400   : > { %v4397_v13 = vmul.f32 0.0025510204, %v4141_v20  ;;  %3663 = vadd.xlane.f32.xlu2 %v3662_v19  ;;  %v4912_v12 = vadd.f32 %v4911_v10, %v4849_v52  ;;  %v3665_v10 = vsel %vm3298_vm0, %v3164_v48, 0.0  ;;  %v4852_v20 = vmul.f32 %v4788_v9, %v4399_v5  ;;  %v4792_v5 = vld [vmem:[%s8347_s1 + $0x280] sm:$0xff] }
 0x401   : > { %3660 = vadd.xlane.f32.xlu1 %v3659_v23  ;;  %v4851_v30 = vmul.f32 %v4787_v38, %v4398_v24  ;;  %v3169_v52 = vunpack.c.l.bf16 %v2913_v28 }
 0x402   : > { %v4850_v8 = vmul.f32 %v4786_v58, %v4397_v13  ;;  %3657 = vadd.xlane.f32.xlu0 %v3656_v0  ;;  %v2912_v58 = vld [vmem:[%s5572_s16 + $0x7ec] sm:$0xf] }
 0x403   : > { %v3538_v47 = vpop.xlane.xlu2 %3537  ;;  %v3168_v7 = vunpack.c.l.bf16 %v2912_v58 }
 0x404   : > { %v4913_v51 = vadd.f32 %v4912_v12, %v4850_v8  ;;  %v3535_v59 = vpop.xlane.xlu1 %3534  ;;  %v4146_v19 = vadd.f32 %v3538_v47, %v5987_v37  ;;  %v4791_v12 = vld [vmem:[%s8347_s1 + $0x278] sm:$0xff] }
 0x405   : > { %v3532_v40 = vpop.xlane.xlu0 %3531  ;;  %v4145_v1 = vadd.f32 %v3535_v59, %v5989_v29  ;;  %v2911_v29 = vld [vmem:[%s5572_s16 + $0x7dc] sm:$0xf]  ;;  %v3677_v47 = vsel %vm3298_vm0, %v3168_v7, 0.0  ;;  %v2916_v59 = vld [vmem:[%s5572_s16 + $0x82c] sm:$0xf] }
 0x406   : > { %v4914_v32 = vadd.f32 %v4913_v51, %v4851_v30  ;;  %v4144_v60 = vadd.f32 %v3532_v40, %v5973_v46  ;;  %v3167_v24 = vunpack.c.l.bf16 %v2911_v29  ;;  %v4402_v13 = vmul.f32 0.0025510204, %v4146_v19  ;;  %v2915_v40 = vld [vmem:[%s5572_s16 + $0x81c] sm:$0xf] }
 0x407   : > { %v4401_v23 = vmul.f32 0.0025510204, %v4145_v1  ;;  %v3680_v51 = vsel %vm3298_vm0, %v3169_v52, 0.0  ;;  %v3171_v28 = vunpack.c.l.bf16 %v2915_v40  ;;  %v4795_v52 = vld [vmem:[%s8347_s1 + $0x298] sm:$0xff] }
 0x408   : > { %v4400_v0 = vmul.f32 0.0025510204, %v4144_v60  ;;  %3672 = vadd.xlane.f32.xlu2 %v3671_v6  ;;  %v4915_v46 = vadd.f32 %v4914_v32, %v4852_v20  ;;  %v3674_v9 = vsel %vm3298_vm0, %v3167_v24, 0.0  ;;  %v4855_v32 = vmul.f32 %v4791_v12, %v4402_v13  ;;  %v4793_v6 = vld [vmem:[%s8347_s1 + $0x288] sm:$0xff] }
 0x409   : > { %3669 = vadd.xlane.f32.xlu1 %v3668_v50  ;;  %v4854_v35 = vmul.f32 %v4790_v3, %v4401_v23  ;;  %v3686_v13 = vsel %vm3298_vm0, %v3171_v28, 0.0 }
 0x40a   : > { %v4853_v44 = vmul.f32 %v4789_v54, %v4400_v0  ;;  %3666 = vadd.xlane.f32.xlu0 %v3665_v10  ;;  %v3172_v10 = vunpack.c.l.bf16 %v2916_v59  ;;  %v4794_v0 = vld [vmem:[%s8347_s1 + $0x290] sm:$0xff] }
 0x40b   : > { %v3547_v38 = vpop.xlane.xlu2 %3546 }
 0x40c   : > { %v4916_v37 = vadd.f32 %v4915_v46, %v4853_v44  ;;  %v3544_v8 = vpop.xlane.xlu1 %3543  ;;  %v4149_v1 = vadd.f32 %v3547_v38, %v5999_v33  ;;  %v3689_v24 = vsel %vm3298_vm0, %v3172_v10, 0.0  ;;  %v2918_v38 = vld [vmem:[%s5572_s16 + $0x84c] sm:$0xf] }
 0x40d   : > { %v3541_v49 = vpop.xlane.xlu0 %3540  ;;  %v4148_v48 = vadd.f32 %v3544_v8, %v6001_v34  ;;  %v2914_v34 = vld [vmem:[%s5572_s16 + $0x80c] sm:$0xf] }
 0x40e   : > { %v4917_v36 = vadd.f32 %v4916_v37, %v4854_v35  ;;  %v4147_v30 = vadd.f32 %v3541_v49, %v5985_v61  ;;  %v3170_v58 = vunpack.c.l.bf16 %v2914_v34  ;;  %v4405_v20 = vmul.f32 0.0025510204, %v4149_v1  ;;  %v2919_v37 = vld [vmem:[%s5572_s16 + $0x85c] sm:$0xf] }
 0x40f   : > { %v4404_v54 = vmul.f32 0.0025510204, %v4148_v48  ;;  %v4796_v48 = vld [vmem:[%s8347_s1 + $0x2a0] sm:$0xff] }
 0x410   : > { %v4403_v60 = vmul.f32 0.0025510204, %v4147_v30  ;;  %3681 = vadd.xlane.f32.xlu2 %v3680_v51  ;;  %v4918_v61 = vadd.f32 %v4917_v36, %v4855_v32  ;;  %v3683_v35 = vsel %vm3298_vm0, %v3170_v58, 0.0  ;;  %v4858_v12 = vmul.f32 %v4794_v0, %v4405_v20  ;;  %v4797_v32 = vld [vmem:[%s8347_s1 + $0x2a8] sm:$0xff]  ;;  %v2921_v20 = vld [vmem:[%s5572_s16 + $0x87c] sm:$0xf] }
 0x411   : > { %3678 = vadd.xlane.f32.xlu1 %v3677_v47  ;;  %v4857_v19 = vmul.f32 %v4793_v6, %v4404_v54  ;;  %v3175_v30 = vunpack.c.l.bf16 %v2919_v37  ;;  %v3174_v51 = vunpack.c.l.bf16 %v2918_v38  ;;  %v4798_v6 = vld [vmem:[%s8347_s1 + $0x2b0] sm:$0xff]  ;;  %v2922_v58 = vld [vmem:[%s5572_s16 + $0x88c] sm:$0xf] }
 0x412   : > { %v4856_v50 = vmul.f32 %v4792_v5, %v4403_v60  ;;  %3675 = vadd.xlane.f32.xlu0 %v3674_v9 }
 0x413   : > { %v3556_v23 = vpop.xlane.xlu2 %3555  ;;  %v3695_v10 = vsel %vm3298_vm0, %v3174_v51, 0.0 }
 0x414   : > { %v4919_v33 = vadd.f32 %v4918_v61, %v4856_v50  ;;  %v3553_v29 = vpop.xlane.xlu1 %3552  ;;  %v4152_v8 = vadd.f32 %v3556_v23, %v6011_v26  ;;  %v3698_v50 = vsel %vm3298_vm0, %v3175_v30, 0.0  ;;  %v2924_v30 = vld [vmem:[%s5572_s16 + $0x8ac] sm:$0xf] }
 0x415   : > { %v3550_v3 = vpop.xlane.xlu0 %3549  ;;  %v4151_v44 = vadd.f32 %v3553_v29, %v6013_v42  ;;  %v2917_v42 = vld [vmem:[%s5572_s16 + $0x83c] sm:$0xf] }
 0x416   : > { %v4920_v46 = vadd.f32 %v4919_v33, %v4857_v19  ;;  %v4150_v7 = vadd.f32 %v3550_v3, %v5997_v11  ;;  %v3173_v47 = vunpack.c.l.bf16 %v2917_v42  ;;  %v4408_v9 = vmul.f32 0.0025510204, %v4152_v8  ;;  %v4799_v29 = vld [vmem:[%s8347_s1 + $0x2b8] sm:$0xff] }
 0x417   : > { %v4407_v49 = vmul.f32 0.0025510204, %v4151_v44  ;;  %v3177_v44 = vunpack.c.l.bf16 %v2921_v20  ;;  %v4804_v20 = vld [vmem:[%s8347_s1 + $0x2e0] sm:$0xff] }
 0x418   : > { %v4406_v36 = vmul.f32 0.0025510204, %v4150_v7  ;;  %3690 = vadd.xlane.f32.xlu2 %v3689_v24  ;;  %v4921_v11 = vadd.f32 %v4920_v46, %v4858_v12  ;;  %v3692_v28 = vsel %vm3298_vm0, %v3173_v47, 0.0  ;;  %v4861_v19 = vmul.f32 %v4797_v32, %v4408_v9 }
 0x419   : > { %3687 = vadd.xlane.f32.xlu1 %v3686_v13  ;;  %v4860_v59 = vmul.f32 %v4796_v48, %v4407_v49  ;;  %v3178_v46 = vunpack.c.l.bf16 %v2922_v58  ;;  %v4801_v49 = vld [vmem:[%s8347_s1 + $0x2c8] sm:$0xff]  ;;  %v3704_v48 = vsel %vm3298_vm0, %v3177_v44, 0.0 }
 0x41a   : > { %v4859_v5 = vmul.f32 %v4795_v52, %v4406_v36  ;;  %3684 = vadd.xlane.f32.xlu0 %v3683_v35  ;;  %v4800_v35 = vld [vmem:[%s8347_s1 + $0x2c0] sm:$0xff] }
 0x41b   : > { %v3565_v40 = vpop.xlane.xlu2 %3564  ;;  %v3707_v42 = vsel %vm3298_vm0, %v3178_v46, 0.0 }
 0x41c   : > { %v4922_v26 = vadd.f32 %v4921_v11, %v4859_v5  ;;  %v3562_v1 = vpop.xlane.xlu1 %3561  ;;  %v4155_v33 = vadd.f32 %v3565_v40, %v6023_v17  ;;  %v2925_v5 = vld [vmem:[%s5572_s16 + $0x8bc] sm:$0xf] }
 0x41d   : > { %v3559_v54 = vpop.xlane.xlu0 %3558  ;;  %v4154_v34 = vadd.f32 %v3562_v1, %v6025_v14  ;;  %v2920_v14 = vld [vmem:[%s5572_s16 + $0x86c] sm:$0xf]  ;;  %v3181_v32 = vunpack.c.l.bf16 %v2925_v5  ;;  %v3180_v1 = vunpack.c.l.bf16 %v2924_v30 }
 0x41e   : > { %v4923_v60 = vadd.f32 %v4922_v26, %v4860_v59  ;;  %v4153_v61 = vadd.f32 %v3559_v54, %v6009_v53  ;;  %v3176_v52 = vunpack.c.l.bf16 %v2920_v14  ;;  %v4411_v7 = vmul.f32 0.0025510204, %v4155_v33  ;;  %v4802_v26 = vld [vmem:[%s8347_s1 + $0x2d0] sm:$0xff]  ;;  %v2928_v14 = vld [vmem:[%s5572_s16 + $0x8ec] sm:$0xf] }
 0x41f   : > { %v4410_v23 = vmul.f32 0.0025510204, %v4154_v34  ;;  %v3716_v33 = vsel %vm3298_vm0, %v3181_v32, 0.0 }
 0x420   : > { %v4409_v0 = vmul.f32 0.0025510204, %v4153_v61  ;;  %3699 = vadd.xlane.f32.xlu2 %v3698_v50  ;;  %v4924_v53 = vadd.f32 %v4923_v60, %v4861_v19  ;;  %v3701_v11 = vsel %vm3298_vm0, %v3176_v52, 0.0  ;;  %v4864_v51 = vmul.f32 %v4800_v35, %v4411_v7  ;;  %v4803_v61 = vld [vmem:[%s8347_s1 + $0x2d8] sm:$0xff]  ;;  %v4805_v52 = vld [vmem:[%s8347_s1 + $0x2e8] sm:$0xff] }
 0x421   : > { %3696 = vadd.xlane.f32.xlu1 %v3695_v10  ;;  %v4863_v24 = vmul.f32 %v4799_v29, %v4410_v23  ;;  %v3713_v23 = vsel %vm3298_vm0, %v3180_v1, 0.0  ;;  %v2927_v29 = vld [vmem:[%s5572_s16 + $0x8dc] sm:$0xf] }
 0x422   : > { %v4862_v3 = vmul.f32 %v4798_v6, %v4409_v0  ;;  %3693 = vadd.xlane.f32.xlu0 %v3692_v28 }
 0x423   : > { %v3574_v13 = vpop.xlane.xlu2 %3573 }
 0x424   : > { %v4925_v17 = vadd.f32 %v4924_v53, %v4862_v3  ;;  %v3571_v37 = vpop.xlane.xlu1 %3570  ;;  %v4158_v47 = vadd.f32 %v3574_v13, %v6035_v25 }
 0x425   : > { %v3568_v38 = vpop.xlane.xlu0 %3567  ;;  %v4157_v8 = vadd.f32 %v3571_v37, %v6037_v15  ;;  %v2923_v15 = vld [vmem:[%s5572_s16 + $0x89c] sm:$0xf] }
 0x426   : > { %v4926_v12 = vadd.f32 %v4925_v17, %v4863_v24  ;;  %v4156_v36 = vadd.f32 %v3568_v38, %v6021_v62  ;;  %v3179_v54 = vunpack.c.l.bf16 %v2923_v15  ;;  %v4414_v60 = vmul.f32 0.0025510204, %v4158_v47  ;;  %v2931_v47 = vld [vmem:[%s5572_s16 + $0x91c] sm:$0xf] }
 0x427   : > { %v4413_v9 = vmul.f32 0.0025510204, %v4157_v8  ;;  %v3184_v24 = vunpack.c.l.bf16 %v2928_v14  ;;  %v3183_v17 = vunpack.c.l.bf16 %v2927_v29  ;;  %v3187_v1 = vunpack.c.l.bf16 %v2931_v47  ;;  %v2934_v14 = vld [vmem:[%s5572_s16 + $0x94c] sm:$0xf]  ;;  %v2933_v29 = vld [vmem:[%s5572_s16 + $0x93c] sm:$0xf] }
 0x428   : > { %v4412_v59 = vmul.f32 0.0025510204, %v4156_v36  ;;  %3708 = vadd.xlane.f32.xlu2 %v3707_v42  ;;  %v4927_v62 = vadd.f32 %v4926_v12, %v4864_v51  ;;  %v3710_v0 = vsel %vm3298_vm0, %v3179_v54, 0.0  ;;  %v4867_v53 = vmul.f32 %v4803_v61, %v4414_v60  ;;  %v4806_v12 = vld [vmem:[%s8347_s1 + $0x2f0] sm:$0xff]  ;;  %v4809_v61 = vld [vmem:[%s8347_s1 + $0x308] sm:$0xff] }
 0x429   : > { %3705 = vadd.xlane.f32.xlu1 %v3704_v48  ;;  %v4866_v34 = vmul.f32 %v4802_v26, %v4413_v9  ;;  %v4807_v48 = vld [vmem:[%s8347_s1 + $0x2f8] sm:$0xff]  ;;  %v3725_v5 = vsel %vm3298_vm0, %v3184_v24, 0.0  ;;  %v3722_v30 = vsel %vm3298_vm0, %v3183_v17, 0.0  ;;  %v2930_v9 = vld [vmem:[%s5572_s16 + $0x90c] sm:$0xf] }
 0x42a   : > { %v4865_v40 = vmul.f32 %v4801_v49, %v4412_v59  ;;  %3702 = vadd.xlane.f32.xlu0 %v3701_v11  ;;  %v3186_v54 = vunpack.c.l.bf16 %v2930_v9  ;;  %v8626_v9 = vld [vmem:[#allocation69_spill] sm:$0xff] }
 0x42b   : > { %v3583_v6 = vpop.xlane.xlu2 %3582 }
 0x42c   : > { %v4928_v25 = vadd.f32 %v4927_v62, %v4865_v40  ;;  %v3580_v50 = vpop.xlane.xlu1 %3579  ;;  %v4161_v3 = vadd.f32 %v3583_v6, %v6047_v18  ;;  %v4808_v40 = vld [vmem:[%s8347_s1 + $0x300] sm:$0xff] }
 0x42d   : > { %v3577_v10 = vpop.xlane.xlu0 %3576  ;;  %v4160_v58 = vadd.f32 %v3580_v50, %v6049_v43  ;;  %v2926_v43 = vld [vmem:[%s5572_s16 + $0x8cc] sm:$0xf] }
 0x42e   : > { %v4929_v28 = vadd.f32 %v4928_v25, %v4866_v34  ;;  %v4159_v19 = vadd.f32 %v3577_v10, %v6033_v57  ;;  %v3182_v13 = vunpack.c.l.bf16 %v2926_v43  ;;  %v4417_v35 = vmul.f32 0.0025510204, %v4161_v3  ;;  %v4811_v43 = vld [vmem:[%s8347_s1 + $0x318] sm:$0xff] }
 0x42f   : > { %v4416_v46 = vmul.f32 0.0025510204, %v4160_v58 }
 0x430   : > { %v4415_v44 = vmul.f32 0.0025510204, %v4159_v19  ;;  %3717 = vadd.xlane.f32.xlu2 %v3716_v33  ;;  %v4930_v57 = vadd.f32 %v4929_v28, %v4867_v53  ;;  %v3719_v51 = vsel %vm3298_vm0, %v3182_v13, 0.0  ;;  %v4870_v59 = vmul.f32 %v4806_v12, %v4417_v35 }
 0x431   : > { %3714 = vadd.xlane.f32.xlu1 %v3713_v23  ;;  %v4869_v37 = vmul.f32 %v4805_v52, %v4416_v46  ;;  %v3734_v33 = vsel %vm3298_vm0, %v3187_v1, 0.0  ;;  %v3731_v23 = vsel %vm3298_vm0, %v3186_v54, 0.0 }
 0x432   : > { %v4868_v7 = vmul.f32 %v4804_v20, %v4415_v44  ;;  %3711 = vadd.xlane.f32.xlu0 %v3710_v0  ;;  %v4810_v20 = vld [vmem:[%s8347_s1 + $0x310] sm:$0xff] }
 0x433   : > { %v3592_v38 = vpop.xlane.xlu2 %3591 }
 0x434   : > { %v4931_v18 = vadd.f32 %v4930_v57, %v4868_v7  ;;  %v3589_v8 = vpop.xlane.xlu1 %3588  ;;  %v4164_v15 = vadd.f32 %v3592_v38, %v6059_v31  ;;  %v3190_v57 = vunpack.c.l.bf16 %v2934_v14  ;;  %v3189_v7 = vunpack.c.l.bf16 %v2933_v29  ;;  %v8630_v14 = vld [vmem:[#allocation72_spill] sm:$0xff] }
 0x435   : > { %v3586_v49 = vpop.xlane.xlu0 %3585  ;;  %v4163_v42 = vadd.f32 %v3589_v8, %v6061_v41  ;;  %v2929_v41 = vld [vmem:[%s5572_s16 + $0x8fc] sm:$0xf] }
 0x436   : > { %v4932_v36 = vadd.f32 %v4931_v18, %v4869_v37  ;;  %v4162_v11 = vadd.f32 %v3586_v49, %v6045_v55  ;;  %v3185_v60 = vunpack.c.l.bf16 %v2929_v41  ;;  %v4420_v34 = vmul.f32 0.0025510204, %v4164_v15  ;;  %v4812_v37 = vld [vmem:[%s8347_s1 + $0x320] sm:$0xff]  ;;  %v4813_v49 = vld [vmem:[%s8347_s1 + $0x328] sm:$0xff] }
 0x437   : > { %v4419_v26 = vmul.f32 0.0025510204, %v4163_v42 }
 0x438   : > { %v4418_v62 = vmul.f32 0.0025510204, %v4162_v11  ;;  %3726 = vadd.xlane.f32.xlu2 %v3725_v5  ;;  %v4933_v55 = vadd.f32 %v4932_v36, %v4870_v59  ;;  %v3728_v0 = vsel %vm3298_vm0, %v3185_v60, 0.0  ;;  %v4873_v53 = vmul.f32 %v4809_v61, %v4420_v34  ;;  %v8625_v36 = vld [vmem:[#allocation67_spill] sm:$0xff] }
 0x439   : > { %3723 = vadd.xlane.f32.xlu1 %v3722_v30  ;;  %v4872_v25 = vmul.f32 %v4808_v40, %v4419_v26  ;;  %v3740_v11 = vsel %vm3298_vm0, %v3189_v7, 0.0  ;;  %v2937_v30 = vld [vmem:[%s5572_s16 + $0x97c] sm:$0xf]  ;;  %v8628_v40 = vld [vmem:[#allocation5_spill] sm:$0xff] }
 0x43a   : > { %v4871_v32 = vmul.f32 %v4807_v48, %v4418_v62  ;;  %3720 = vadd.xlane.f32.xlu0 %v3719_v51  ;;  %v3743_v48 = vsel %vm3298_vm0, %v3190_v57, 0.0  ;;  %v2936_v51 = vld [vmem:[%s5572_s16 + $0x96c] sm:$0xf]  ;;  %v3193_v60 = vunpack.c.l.bf16 %v2937_v30  ;;  %v8632_v57 = vld [vmem:[#allocation71_spill] sm:$0xff] }
 0x43b   : > { %v3601_v6 = vpop.xlane.xlu2 %3600  ;;  %v8627_v62 = vld [vmem:[#allocation8_spill] sm:$0xff]  ;;  %v3192_v34 = vunpack.c.l.bf16 %v2936_v51 }
 0x43c   : > { %v4934_v31 = vadd.f32 %v4933_v55, %v4871_v32  ;;  %v3598_v50 = vpop.xlane.xlu1 %3597  ;;  %v4167_v3 = vadd.f32 %v3601_v6, %v6071_v27  ;;  %v4068_v41 = vadd.f32 %v6687_v63, %v8627_v62  ;;  %v4067_v55 = vadd.f32 %v6689_v56, %v8628_v40  ;;  %v4814_v32 = vld [vmem:[%s8347_s1 + $0x330] sm:$0xff] }
 0x43d   : > { %v3595_v10 = vpop.xlane.xlu0 %3594  ;;  %v4166_v58 = vadd.f32 %v3598_v50, %v6073_v21  ;;  %v2932_v21 = vld [vmem:[%s5572_s16 + $0x92c] sm:$0xf] }
 0x43e   : > { %v4935_v28 = vadd.f32 %v4934_v31, %v4872_v25  ;;  %v4165_v19 = vadd.f32 %v3595_v10, %v6057_v4  ;;  %v3188_v24 = vunpack.c.l.bf16 %v2932_v21  ;;  %v4423_v17 = vmul.f32 0.0025510204, %v4167_v3  ;;  %v8629_v10 = vld [vmem:[#allocation4_spill] sm:$0xff] }
 0x43f   : > { %v4422_v46 = vmul.f32 0.0025510204, %v4166_v58  ;;  %v4324_v63 = vmul.f32 0.0025510204, %v4068_v41  ;;  %v4323_v56 = vmul.f32 0.0025510204, %v4067_v55 }
 0x440   : > { %v4421_v44 = vmul.f32 0.0025510204, %v4165_v19  ;;  %3735 = vadd.xlane.f32.xlu2 %v3734_v33  ;;  %v4936_v4 = vadd.f32 %v4935_v28, %v4873_v53  ;;  %v3737_v5 = vsel %vm3298_vm0, %v3188_v24, 0.0  ;;  %v4876_v47 = vmul.f32 %v4812_v37, %v4423_v17  ;;  %v4815_v58 = vld [vmem:[%s8347_s1 + $0x338] sm:$0xff]  ;;  %v4580_v33 = vld [vmem:[%s8347_s1 + $0x8] sm:$0xff]  ;;  %v8635_v55 = vld [vmem:[#allocation75_spill] sm:$0xff] }
 0x441   : > { %3732 = vadd.xlane.f32.xlu1 %v3731_v23  ;;  %v4875_v13 = vmul.f32 %v4811_v43, %v4422_v46  ;;  %v4069_v28 = vadd.f32 %v6703_v16, %v8629_v10  ;;  %v4579_v23 = vld [vmem:[%s8347_s1] sm:$0xff]  ;;  %v8631_v53 = vld [vmem:[#allocation68_spill] sm:$0xff]  ;;  %v3752_v46 = vsel %vm3298_vm0, %v3193_v60, 0.0  ;;  %v4582_v41 = vld [vmem:[%s8347_s1 + $0x18] sm:$0xff] }
 0x442   : > { %v4874_v52 = vmul.f32 %v4810_v20, %v4421_v44  ;;  %3729 = vadd.xlane.f32.xlu0 %v3728_v0  ;;  %v4816_v16 = vld [vmem:[%s8347_s1 + $0x340] sm:$0xff]  ;;  %v3749_v44 = vsel %vm3298_vm0, %v3192_v34, 0.0  ;;  %v2940_v43 = vld [vmem:[%s5572_s16 + $0x9ac] sm:$0xf]  ;;  %v8638_v10 = vld [vmem:[#allocation74_spill] sm:$0xff] }
 0x443   : > { %v3610_v35 = vpop.xlane.xlu2 %3609  ;;  %v4325_v37 = vmul.f32 0.0025510204, %v4069_v28 }
 0x444   : > { %v4937_v27 = vadd.f32 %v4936_v4, %v4874_v52  ;;  %v3607_v18 = vpop.xlane.xlu1 %3606  ;;  %v4170_v59 = vadd.f32 %v3610_v35, %v8626_v9  ;;  %v2939_v4 = vld [vmem:[%s5572_s16 + $0x99c] sm:$0xf] }
 0x445   : > { %v3604_v38 = vpop.xlane.xlu0 %3603  ;;  %v4169_v8 = vadd.f32 %v3607_v18, %v6085_v22  ;;  %v2935_v22 = vld [vmem:[%s5572_s16 + $0x95c] sm:$0xf]  ;;  %v4817_v18 = vld [vmem:[%s8347_s1 + $0x348] sm:$0xff] }
 0x446   : > { %v4938_v12 = vadd.f32 %v4937_v27, %v4875_v13  ;;  %v4168_v42 = vadd.f32 %v3604_v38, %v8625_v36  ;;  %v3191_v25 = vunpack.c.l.bf16 %v2935_v22  ;;  %v4426_v31 = vmul.f32 0.0025510204, %v4170_v59  ;;  %v2938_v13 = vld [vmem:[%s5572_s16 + $0x98c] sm:$0xf]  ;;  %v8633_v27 = vld [vmem:[#allocation7_spill] sm:$0xff]  ;;  %v4581_v38 = vld [vmem:[%s8347_s1 + $0x10] sm:$0xff] }
 0x447   : > { %v4425_v15 = vmul.f32 0.0025510204, %v4169_v8  ;;  %v4070_v35 = vadd.f32 %v6701_v39, %v8633_v27  ;;  %v4644_v36 = vmul.f32 %v4580_v33, %v4324_v63  ;;  %v2942_v63 = vld [vmem:[%s5572_s16 + $0x9cc] sm:$0xf] }
 0x448   : > { %v4424_v26 = vmul.f32 0.0025510204, %v4168_v42  ;;  %3744 = vadd.xlane.f32.xlu2 %v3743_v48  ;;  %v4939_v1 = vadd.f32 %v4938_v12, %v4876_v47  ;;  %v3746_v21 = vsel %vm3298_vm0, %v3191_v25, 0.0  ;;  %v4879_v52 = vmul.f32 %v4815_v58, %v4426_v31  ;;  %v8634_v47 = vld [vmem:[#allocation3_spill] sm:$0xff]  ;;  %v8637_v25 = vld [vmem:[#allocation6_spill] sm:$0xff] }
 0x449   : > { %3741 = vadd.xlane.f32.xlu1 %v3740_v11  ;;  %v4878_v6 = vmul.f32 %v4814_v32, %v4425_v15  ;;  %v4643_v42 = vmul.f32 %v4579_v23, %v4323_v56  ;;  %v3195_v48 = vunpack.c.l.bf16 %v2939_v4  ;;  %v3194_v11 = vunpack.c.l.bf16 %v2938_v13  ;;  %v8639_v23 = vld [vmem:[#allocation11_spill] sm:$0xff] }
 0x44a   : > { %v4877_v54 = vmul.f32 %v4813_v49, %v4424_v26  ;;  %3738 = vadd.xlane.f32.xlu0 %v3737_v5  ;;  %v3196_v49 = vunpack.c.l.bf16 %v2940_v43  ;;  %v4071_v9 = vadd.f32 %v6699_v45, %v8634_v47  ;;  %v4326_v59 = vmul.f32 0.0025510204, %v4070_v35  ;;  %v4818_v26 = vld [vmem:[%s8347_s1 + $0x350] sm:$0xff]  ;;  %v4819_v45 = vld [vmem:[%s8347_s1 + $0x358] sm:$0xff]  ;;  %v4583_v4 = vld [vmem:[%s8347_s1 + $0x20] sm:$0xff] }
 0x44b   : > { %v3619_v50 = vpop.xlane.xlu2 %3618  ;;  %v4645_v15 = vmul.f32 %v4581_v38, %v4325_v37  ;;  %v4707_v34 = vadd.f32 %v4644_v36, %v4643_v42  ;;  %v4072_v31 = vadd.f32 %v6715_v2, %v8637_v25  ;;  %v4820_v2 = vld [vmem:[%s8347_s1 + $0x360] sm:$0xff]  ;;  %v4821_v35 = vld [vmem:[%s8347_s1 + $0x368] sm:$0xff]  ;;  %v8641_v37 = vld [vmem:[#allocation77_spill] sm:$0xff] }
 0x44c   : > { %v4940_v61 = vadd.f32 %v4939_v1, %v4877_v54  ;;  %v3616_v20 = vpop.xlane.xlu1 %3615  ;;  %v4173_v7 = vadd.f32 %v3619_v50, %v8632_v57  ;;  %v8636_v1 = vld [vmem:[#allocation70_spill] sm:$0xff]  ;;  %v3761_v60 = vsel %vm3298_vm0, %v3196_v49, 0.0  ;;  %v8643_v42 = vld [vmem:[#allocation73_spill] sm:$0xff] }
 0x44d   : > { %v3613_v19 = vpop.xlane.xlu0 %3612  ;;  %v4172_v29 = vadd.f32 %v3616_v20, %v8630_v14  ;;  %v2943_v50 = vld [vmem:[%s5572_s16 + $0x9dc] sm:$0xf]  ;;  %v4708_v33 = vadd.f32 %v4707_v34, %v4645_v15 }
 0x44e   : > { %v4941_v0 = vadd.f32 %v4940_v61, %v4878_v6  ;;  %v4171_v3 = vadd.f32 %v3613_v19, %v8631_v53  ;;  %v4429_v39 = vmul.f32 0.0025510204, %v4173_v7  ;;  %v3758_v6 = vsel %vm3298_vm0, %v3195_v48, 0.0  ;;  %v2941_v19 = vld [vmem:[%s5572_s16 + $0x9bc] sm:$0xf] }
 0x44f   : > { %v4428_v24 = vmul.f32 0.0025510204, %v4172_v29  ;;  %v3755_v61 = vsel %vm3298_vm0, %v3194_v11, 0.0  ;;  %v4327_v29 = vmul.f32 0.0025510204, %v4071_v9  ;;  %v3197_v43 = vunpack.c.l.bf16 %v2941_v19  ;;  %v8642_v49 = vld [vmem:[#allocation78_spill] sm:$0xff] }
 0x450   : > { %v4427_v17 = vmul.f32 0.0025510204, %v4171_v3  ;;  %3753 = vadd.xlane.f32.xlu2 %v3752_v46  ;;  %v4942_v12 = vadd.f32 %v4941_v0, %v4879_v52  ;;  %v4882_v56 = vmul.f32 %v4818_v26, %v4429_v39  ;;  %v8640_v0 = vld [vmem:[#allocation222_spill] sm:$0xff]  ;;  %v3199_v3 = vunpack.c.l.bf16 %v2943_v50  ;;  %v4584_v52 = vld [vmem:[%s8347_s1 + $0x28] sm:$0xff]  ;;  %v8645_v26 = vld [vmem:[#allocation221_spill] sm:$0xff] }
 0x451   : > { %3750 = vadd.xlane.f32.xlu1 %v3749_v44  ;;  %v4881_v5 = vmul.f32 %v4817_v18, %v4428_v24  ;;  %v4073_v14 = vadd.f32 %v8640_v0, %v8639_v23  ;;  %v4646_v46 = vmul.f32 %v4582_v41, %v4326_v59  ;;  %v4328_v44 = vmul.f32 0.0025510204, %v4072_v31  ;;  %v2946_v39 = vld [vmem:[%s5572_s16 + $0xa0c] sm:$0xf]  ;;  %v2945_v59 = vld [vmem:[%s5572_s16 + $0x9fc] sm:$0xf] }
 0x452   : > { %v4880_v8 = vmul.f32 %v4816_v16, %v4427_v17  ;;  %3747 = vadd.xlane.f32.xlu0 %v3746_v21  ;;  %v3198_v21 = vunpack.c.l.bf16 %v2942_v63  ;;  %v3770_v11 = vsel %vm3298_vm0, %v3199_v3, 0.0  ;;  %v3764_v9 = vsel %vm3298_vm0, %v3197_v43, 0.0  ;;  %v8644_v15 = vld [vmem:[#allocation10_spill] sm:$0xff]  ;;  %v4585_v31 = vld [vmem:[%s8347_s1 + $0x30] sm:$0xff] }
 0x453   : > { %v3628_v51 = vpop.xlane.xlu2 %3627  ;;  %v4709_v13 = vadd.f32 %v4708_v33, %v4646_v46  ;;  %v4329_v27 = vmul.f32 0.0025510204, %v4073_v14  ;;  %v4823_v34 = vld [vmem:[%s8347_s1 + $0x378] sm:$0xff]  ;;  %v3202_v25 = vunpack.c.l.bf16 %v2946_v39  ;;  %v8648_v46 = vld [vmem:[#allocation80_spill] sm:$0xff] }
 0x454   : > { %v4943_v30 = vadd.f32 %v4942_v12, %v4880_v8  ;;  %v3625_v22 = vpop.xlane.xlu1 %3624  ;;  %v4176_v28 = vadd.f32 %v3628_v51, %v8638_v10  ;;  %v4822_v51 = vld [vmem:[%s8347_s1 + $0x370] sm:$0xff]  ;;  %v3767_v47 = vsel %vm3298_vm0, %v3198_v21, 0.0 }
 0x455   : > { %v3622_v62 = vpop.xlane.xlu0 %3621  ;;  %v4175_v32 = vadd.f32 %v3625_v22, %v8635_v55  ;;  %v4074_v22 = vadd.f32 %v8645_v26, %v8644_v15  ;;  %v2944_v55 = vld [vmem:[%s5572_s16 + $0x9ec] sm:$0xf]  ;;  %v4649_v33 = vmul.f32 %v4585_v31, %v4329_v27  ;;  %v8649_v21 = vld [vmem:[#allocation81_spill] sm:$0xff] }
 0x456   : > { %v4944_v40 = vadd.f32 %v4943_v30, %v4881_v5  ;;  %v4174_v54 = vadd.f32 %v3622_v62, %v8636_v1  ;;  %v4432_v57 = vmul.f32 0.0025510204, %v4176_v28  ;;  %v4647_v5 = vmul.f32 %v4583_v4, %v4327_v29  ;;  %v8647_v1 = vld [vmem:[#allocation225_spill] sm:$0xff]  ;;  %v8650_v4 = vld [vmem:[#allocation76_spill] sm:$0xff] }
 0x457   : > { %v4431_v58 = vmul.f32 0.0025510204, %v4175_v32  ;;  %v4648_v30 = vmul.f32 %v4584_v52, %v4328_v44  ;;  %v3200_v10 = vunpack.c.l.bf16 %v2944_v55  ;;  %v4330_v28 = vmul.f32 0.0025510204, %v4074_v22  ;;  %v4825_v27 = vld [vmem:[%s8347_s1 + $0x388] sm:$0xff] }
 0x458   : > { %v4430_v20 = vmul.f32 0.0025510204, %v4174_v54  ;;  %3762 = vadd.xlane.f32.xlu2 %v3761_v60  ;;  %v4945_v16 = vadd.f32 %v4944_v40, %v4882_v56  ;;  %v4885_v62 = vmul.f32 %v4821_v35, %v4432_v57  ;;  %v4710_v32 = vadd.f32 %v4709_v13, %v4647_v5  ;;  %v2949_v57 = vld [vmem:[%s5572_s16 + $0xa3c] sm:$0xf]  ;;  %v8655_v5 = vld [vmem:[#allocation12_spill] sm:$0xff] }
 0x459   : > { %3759 = vadd.xlane.f32.xlu1 %v3758_v6  ;;  %v4884_v7 = vmul.f32 %v4820_v2, %v4431_v58  ;;  %v4824_v6 = vld [vmem:[%s8347_s1 + $0x380] sm:$0xff]  ;;  %v3201_v56 = vunpack.c.l.bf16 %v2945_v59  ;;  %v3779_v29 = vsel %vm3298_vm0, %v3202_v25, 0.0 }
 0x45a   : > { %v4883_v53 = vmul.f32 %v4819_v45, %v4430_v20  ;;  %3756 = vadd.xlane.f32.xlu0 %v3755_v61  ;;  %v8646_v45 = vld [vmem:[#allocation9_spill] sm:$0xff]  ;;  %v4711_v63 = vadd.f32 %v4710_v32, %v4648_v30  ;;  %v8656_v30 = vld [vmem:[#allocation228_spill] sm:$0xff]  ;;  %v8657_v25 = vld [vmem:[#allocation83_spill] sm:$0xff] }
 0x45b   : > { %v3637_v17 = vpop.xlane.xlu2 %3636  ;;  %v4075_v54 = vadd.f32 %v8647_v1, %v8646_v45  ;;  %v3776_v35 = vsel %vm3298_vm0, %v3201_v56, 0.0  ;;  %v4588_v32 = vld [vmem:[%s8347_s1 + $0x48] sm:$0xff] }
 0x45c   : > { %v4946_v24 = vadd.f32 %v4945_v16, %v4883_v53  ;;  %v4179_v18 = vadd.f32 %v3637_v17, %v8641_v37  ;;  %v3634_v38 = vpop.xlane.xlu1 %3633  ;;  %v4586_v16 = vld [vmem:[%s8347_s1 + $0x38] sm:$0xff]  ;;  %v4587_v53 = vld [vmem:[%s8347_s1 + $0x40] sm:$0xff]  ;;  %v8652_v17 = vld [vmem:[#allocation224_spill] sm:$0xff]  ;;  %v3773_v37 = vsel %vm3298_vm0, %v3200_v10, 0.0 }
 0x45d   : > { %v3631_v12 = vpop.xlane.xlu0 %3630  ;;  %v4178_v36 = vadd.f32 %v3634_v38, %v8642_v49  ;;  %v4331_v23 = vmul.f32 0.0025510204, %v4075_v54  ;;  %v8653_v38 = vld [vmem:[#allocation13_spill] sm:$0xff] }
 0x45e   : > { %v4947_v8 = vadd.f32 %v4946_v24, %v4884_v7  ;;  %v4177_v48 = vadd.f32 %v3631_v12, %v8643_v42  ;;  %v4435_v60 = vmul.f32 0.0025510204, %v4179_v18  ;;  %v4712_v7 = vadd.f32 %v4711_v63, %v4649_v33  ;;  %v8651_v24 = vld [vmem:[#allocation14_spill] sm:$0xff]  ;;  %v2948_v18 = vld [vmem:[%s5572_s16 + $0xa2c] sm:$0xf]  ;;  %v8654_v12 = vld [vmem:[#allocation223_spill] sm:$0xff] }
 0x45f   : > { %v4434_v41 = vmul.f32 0.0025510204, %v4178_v36  ;;  %v4076_v13 = vadd.f32 %v8652_v17, %v8651_v24  ;;  %v4651_v39 = vmul.f32 %v4587_v53, %v4331_v23  ;;  %v4589_v63 = vld [vmem:[%s8347_s1 + $0x50] sm:$0xff]  ;;  %v2952_v33 = vld [vmem:[%s5572_s16 + $0xa6c] sm:$0xf] }
 0x460   : > { %v4433_v40 = vmul.f32 0.0025510204, %v4177_v48  ;;  %3771 = vadd.xlane.f32.xlu2 %v3770_v11  ;;  %v4948_v61 = vadd.f32 %v4947_v8, %v4885_v62  ;;  %v4888_v0 = vmul.f32 %v4824_v6, %v4435_v60  ;;  %v4077_v8 = vadd.f32 %v8654_v12, %v8653_v38  ;;  %v2947_v48 = vld [vmem:[%s5572_s16 + $0xa1c] sm:$0xf] }
 0x461   : > { %3768 = vadd.xlane.f32.xlu1 %v3767_v47  ;;  %v4887_v58 = vmul.f32 %v4823_v34, %v4434_v41  ;;  %v4650_v11 = vmul.f32 %v4586_v16, %v4330_v28  ;;  %v4826_v47 = vld [vmem:[%s8347_s1 + $0x390] sm:$0xff]  ;;  %v4332_v26 = vmul.f32 0.0025510204, %v4076_v13  ;;  %v4827_v62 = vld [vmem:[%s8347_s1 + $0x398] sm:$0xff]  ;;  %v3204_v41 = vunpack.c.l.bf16 %v2948_v18  ;;  %v8658_v28 = vld [vmem:[#allocation84_spill] sm:$0xff] }
 0x462   : > { %v4886_v50 = vmul.f32 %v4822_v51, %v4433_v40  ;;  %3765 = vadd.xlane.f32.xlu0 %v3764_v9  ;;  %v4078_v51 = vadd.f32 %v8656_v30, %v8655_v5  ;;  %v3205_v9 = vunpack.c.l.bf16 %v2949_v57  ;;  %v3203_v40 = vunpack.c.l.bf16 %v2947_v48  ;;  %v4828_v16 = vld [vmem:[%s8347_s1 + $0x3a0] sm:$0xff]  ;;  %v4829_v13 = vld [vmem:[%s8347_s1 + $0x3a8] sm:$0xff] }
 0x463   : > { %v3646_v19 = vpop.xlane.xlu2 %3645  ;;  %v4713_v22 = vadd.f32 %v4712_v7, %v4650_v11  ;;  %v4333_v55 = vmul.f32 0.0025510204, %v4077_v8  ;;  %v4652_v23 = vmul.f32 %v4588_v32, %v4332_v26  ;;  %v3785_v53 = vsel %vm3298_vm0, %v3204_v41, 0.0  ;;  %v2950_v7 = vld [vmem:[%s5572_s16 + $0xa4c] sm:$0xf]  ;;  %v8664_v5 = vld [vmem:[#allocation15_spill] sm:$0xff] }
 0x464   : > { %v4949_v20 = vadd.f32 %v4948_v61, %v4886_v50  ;;  %v3643_v14 = vpop.xlane.xlu1 %3642  ;;  %v4182_v44 = vadd.f32 %v3646_v19, %v8648_v46  ;;  %v4334_v34 = vmul.f32 0.0025510204, %v4078_v51  ;;  %v3788_v50 = vsel %vm3298_vm0, %v3205_v9, 0.0  ;;  %v2951_v46 = vld [vmem:[%s5572_s16 + $0xa5c] sm:$0xf]  ;;  %v8665_v30 = vld [vmem:[#allocation231_spill] sm:$0xff] }
 0x465   : > { %v3640_v2 = vpop.xlane.xlu0 %3639  ;;  %v4181_v43 = vadd.f32 %v3643_v14, %v8649_v21  ;;  %v4714_v60 = vadd.f32 %v4713_v22, %v4651_v39  ;;  %v8661_v14 = vld [vmem:[#allocation226_spill] sm:$0xff]  ;;  %v8663_v21 = vld [vmem:[#allocation227_spill] sm:$0xff]  ;;  %v4653_v18 = vmul.f32 %v4589_v63, %v4333_v55  ;;  %v3207_v12 = vunpack.c.l.bf16 %v2951_v46  ;;  %v4833_v46 = vld [vmem:[%s8347_s1 + $0x3c8] sm:$0xff] }
 0x466   : > { %v4950_v3 = vadd.f32 %v4949_v20, %v4887_v58  ;;  %v4180_v52 = vadd.f32 %v3640_v2, %v8650_v4  ;;  %v4438_v59 = vmul.f32 0.0025510204, %v4182_v44  ;;  %v8659_v20 = vld [vmem:[#allocation79_spill] sm:$0xff]  ;;  %v8662_v44 = vld [vmem:[#allocation17_spill] sm:$0xff]  ;;  %v3206_v8 = vunpack.c.l.bf16 %v2950_v7  ;;  %v8668_v32 = vld [vmem:[#allocation82_spill] sm:$0xff] }
 0x467   : > { %v4437_v49 = vmul.f32 0.0025510204, %v4181_v43  ;;  %v4079_v43 = vadd.f32 %v8663_v21, %v8662_v44  ;;  %v4715_v24 = vadd.f32 %v4714_v60, %v4652_v23  ;;  %v4081_v51 = vadd.f32 %v8665_v30, %v8664_v5  ;;  %v4591_v26 = vld [vmem:[%s8347_s1 + $0x60] sm:$0xff]  ;;  %v4831_v60 = vld [vmem:[%s8347_s1 + $0x3b8] sm:$0xff] }
 0x468   : > { %v4951_v36 = vadd.f32 %v4950_v3, %v4888_v0  ;;  %v4436_v42 = vmul.f32 0.0025510204, %v4180_v52  ;;  %3780 = vadd.xlane.f32.xlu2 %v3779_v29  ;;  %v4891_v56 = vmul.f32 %v4827_v62, %v4438_v59  ;;  %v8660_v0 = vld [vmem:[#allocation16_spill] sm:$0xff]  ;;  %v4590_v29 = vld [vmem:[%s8347_s1 + $0x58] sm:$0xff]  ;;  %v3782_v3 = vsel %vm3298_vm0, %v3203_v40, 0.0  ;;  %v8667_v40 = vld [vmem:[#allocation87_spill] sm:$0xff] }
 0x469   : > { %3777 = vadd.xlane.f32.xlu1 %v3776_v35  ;;  %v4890_v45 = vmul.f32 %v4826_v47, %v4437_v49  ;;  %v4080_v2 = vadd.f32 %v8661_v14, %v8660_v0  ;;  %v4830_v35 = vld [vmem:[%s8347_s1 + $0x3b0] sm:$0xff]  ;;  %v4654_v38 = vmul.f32 %v4590_v29, %v4334_v34  ;;  %v4716_v39 = vadd.f32 %v4715_v24, %v4653_v18  ;;  %v8666_v62 = vld [vmem:[#allocation86_spill] sm:$0xff]  ;;  %v4832_v14 = vld [vmem:[%s8347_s1 + $0x3c0] sm:$0xff] }
 0x46a   : > { %v4889_v15 = vmul.f32 %v4825_v27, %v4436_v42  ;;  %3774 = vadd.xlane.f32.xlu0 %v3773_v37  ;;  %v3208_v27 = vunpack.c.l.bf16 %v2952_v33  ;;  %v3794_v34 = vsel %vm3298_vm0, %v3207_v12, 0.0  ;;  %v8672_v33 = vld [vmem:[#allocation230_spill] sm:$0xff]  ;;  %v4337_v0 = vmul.f32 0.0025510204, %v4081_v51  ;;  %v4593_v29 = vld [vmem:[%s8347_s1 + $0x70] sm:$0xff] }
 0x46b   : > { %v3655_v54 = vpop.xlane.xlu2 %3654  ;;  %v4336_v49 = vmul.f32 0.0025510204, %v4080_v2  ;;  %v8676_v5 = vld [vmem:[#allocation18_spill] sm:$0xff] }
 0x46c   : > { %v4952_v1 = vadd.f32 %v4951_v36, %v4889_v15  ;;  %v4185_v31 = vadd.f32 %v3655_v54, %v8657_v25  ;;  %v3652_v6 = vpop.xlane.xlu1 %3651  ;;  %v4335_v36 = vmul.f32 0.0025510204, %v4079_v43  ;;  %v3797_v15 = vsel %vm3298_vm0, %v3208_v27, 0.0  ;;  %v8677_v30 = vld [vmem:[#allocation234_spill] sm:$0xff] }
 0x46d   : > { %v3649_v61 = vpop.xlane.xlu0 %3648  ;;  %v4184_v58 = vadd.f32 %v3652_v6, %v8658_v28  ;;  %v4717_v54 = vadd.f32 %v4716_v39, %v4654_v38  ;;  %v3791_v25 = vsel %vm3298_vm0, %v3206_v8, 0.0  ;;  %v8669_v6 = vld [vmem:[#allocation19_spill] sm:$0xff]  ;;  %v2953_v28 = vld [vmem:[%s5572_s16 + $0xa7c] sm:$0xf]  ;;  %v4084_v51 = vadd.f32 %v8677_v30, %v8676_v5 }
 0x46e   : > { %v4953_v10 = vadd.f32 %v4952_v1, %v4890_v45  ;;  %v4183_v19 = vadd.f32 %v3649_v61, %v8659_v20  ;;  %v4441_v17 = vmul.f32 0.0025510204, %v4185_v31  ;;  %v2955_v1 = vld [vmem:[%s5572_s16 + $0xa9c] sm:$0xf]  ;;  %v2954_v31 = vld [vmem:[%s5572_s16 + $0xa8c] sm:$0xf]  ;;  %v4655_v20 = vmul.f32 %v4591_v26, %v4335_v36 }
 0x46f   : > { %v4440_v4 = vmul.f32 0.0025510204, %v4184_v58  ;;  %v8670_v61 = vld [vmem:[#allocation229_spill] sm:$0xff]  ;;  %v4592_v58 = vld [vmem:[%s8347_s1 + $0x68] sm:$0xff]  ;;  %v3211_v2 = vunpack.c.l.bf16 %v2955_v1  ;;  %v3210_v44 = vunpack.c.l.bf16 %v2954_v31  ;;  %v3209_v21 = vunpack.c.l.bf16 %v2953_v28  ;;  %v8674_v8 = vld [vmem:[#allocation90_spill] sm:$0xff] }
 0x470   : > { %v4954_v52 = vadd.f32 %v4953_v10, %v4891_v56  ;;  %v4439_v57 = vmul.f32 0.0025510204, %v4183_v19  ;;  %3789 = vadd.xlane.f32.xlu2 %v3788_v50  ;;  %v4894_v47 = vmul.f32 %v4830_v35, %v4441_v17  ;;  %v4083_v50 = vadd.f32 %v8670_v61, %v8669_v6  ;;  %v8671_v19 = vld [vmem:[#allocation20_spill] sm:$0xff] }
 0x471   : > { %3786 = vadd.xlane.f32.xlu1 %v3785_v53  ;;  %v4893_v42 = vmul.f32 %v4829_v13, %v4440_v4  ;;  %v4082_v23 = vadd.f32 %v8672_v33, %v8671_v19  ;;  %v4656_v43 = vmul.f32 %v4592_v58, %v4336_v49  ;;  %v4657_v17 = vmul.f32 %v4593_v29, %v4337_v0  ;;  %v8673_v13 = vld [vmem:[#allocation89_spill] sm:$0xff]  ;;  %v8678_v58 = vld [vmem:[#allocation22_spill] sm:$0xff]  ;;  %v8680_v29 = vld [vmem:[#allocation92_spill] sm:$0xff] }
 0x472   : > { %v4892_v37 = vmul.f32 %v4828_v16, %v4439_v57  ;;  %3783 = vadd.xlane.f32.xlu0 %v3782_v3  ;;  %v4718_v3 = vadd.f32 %v4717_v54, %v4655_v20  ;;  %v4339_v4 = vmul.f32 0.0025510204, %v4083_v50  ;;  %v3806_v18 = vsel %vm3298_vm0, %v3211_v2, 0.0  ;;  %v4836_v54 = vld [vmem:[%s8347_s1 + $0x3e0] sm:$0xff]  ;;  %v4596_v50 = vld [vmem:[%s8347_s1 + $0x88] sm:$0xff] }
 0x473   : > { %v3664_v11 = vpop.xlane.xlu2 %3663  ;;  %v4338_v24 = vmul.f32 0.0025510204, %v4082_v23  ;;  %v8679_v20 = vld [vmem:[#allocation232_spill] sm:$0xff] }
 0x474   : > { %v4955_v48 = vadd.f32 %v4954_v52, %v4892_v37  ;;  %v3661_v9 = vpop.xlane.xlu1 %3660  ;;  %v4188_v41 = vadd.f32 %v3664_v11, %v8666_v62  ;;  %v4594_v11 = vld [vmem:[%s8347_s1 + $0x78] sm:$0xff]  ;;  %v4719_v39 = vadd.f32 %v4718_v3, %v4656_v43  ;;  %v4086_v19 = vadd.f32 %v8679_v20, %v8678_v58  ;;  %v2960_v43 = vld [vmem:[%s5572_s16 + $0xaec] sm:$0xf] }
 0x475   : > { %v3658_v59 = vpop.xlane.xlu0 %3657  ;;  %v4187_v55 = vadd.f32 %v3661_v9, %v8667_v40  ;;  %v3803_v9 = vsel %vm3298_vm0, %v3210_v44, 0.0  ;;  %v4595_v40 = vld [vmem:[%s8347_s1 + $0x80] sm:$0xff]  ;;  %v2963_v58 = vld [vmem:[%s5572_s16 + $0xb1c] sm:$0xf]  ;;  %v2962_v20 = vld [vmem:[%s5572_s16 + $0xb0c] sm:$0xf] }
 0x476   : > { %v4956_v22 = vadd.f32 %v4955_v48, %v4893_v42  ;;  %v4186_v45 = vadd.f32 %v3658_v59, %v8668_v32  ;;  %v4444_v16 = vmul.f32 0.0025510204, %v4188_v41  ;;  %v8675_v42 = vld [vmem:[#allocation85_spill] sm:$0xff]  ;;  %v2958_v48 = vld [vmem:[%s5572_s16 + $0xacc] sm:$0xf]  ;;  %v3800_v59 = vsel %vm3298_vm0, %v3209_v21, 0.0 }
 0x477   : > { %v4443_v63 = vmul.f32 0.0025510204, %v4187_v55  ;;  %v2956_v41 = vld [vmem:[%s5572_s16 + $0xaac] sm:$0xf]  ;;  %v4720_v55 = vadd.f32 %v4719_v39, %v4657_v17  ;;  %v3214_v1 = vunpack.c.l.bf16 %v2958_v48  ;;  %v4659_v61 = vmul.f32 %v4595_v40, %v4339_v4  ;;  %v2961_v21 = vld [vmem:[%s5572_s16 + $0xafc] sm:$0xf] }
 0x478   : > { %v4957_v56 = vadd.f32 %v4956_v22, %v4894_v47  ;;  %v4442_v10 = vmul.f32 0.0025510204, %v4186_v45  ;;  %3798 = vadd.xlane.f32.xlu2 %v3797_v15  ;;  %v4897_v38 = vmul.f32 %v4833_v46, %v4444_v16  ;;  %v4834_v47 = vld [vmem:[%s8347_s1 + $0x3d0] sm:$0xff]  ;;  %v2957_v15 = vld [vmem:[%s5572_s16 + $0xabc] sm:$0xf]  ;;  %v3212_v6 = vunpack.c.l.bf16 %v2956_v41  ;;  %v8682_v46 = vld [vmem:[#allocation88_spill] sm:$0xff] }
 0x479   : > { %3795 = vadd.xlane.f32.xlu1 %v3794_v34  ;;  %v4896_v52 = vmul.f32 %v4832_v14, %v4443_v63  ;;  %v4835_v45 = vld [vmem:[%s8347_s1 + $0x3d8] sm:$0xff]  ;;  %v4658_v34 = vmul.f32 %v4594_v11, %v4338_v24  ;;  %v3213_v31 = vunpack.c.l.bf16 %v2957_v15  ;;  %v3815_v14 = vsel %vm3298_vm0, %v3214_v1, 0.0  ;;  %v4837_v17 = vld [vmem:[%s8347_s1 + $0x3e8] sm:$0xff]  ;;  %v8687_v41 = vld [vmem:[#allocation95_spill] sm:$0xff] }
 0x47a   : > { %v4895_v53 = vmul.f32 %v4831_v60, %v4442_v10  ;;  %3792 = vadd.xlane.f32.xlu0 %v3791_v25  ;;  %v4340_v25 = vmul.f32 0.0025510204, %v4084_v51  ;;  %v2959_v4 = vld [vmem:[%s5572_s16 + $0xadc] sm:$0xf]  ;;  %v4342_v30 = vmul.f32 0.0025510204, %v4086_v19 }
 0x47b   : > { %v3673_v7 = vpop.xlane.xlu2 %3672  ;;  %v4721_v28 = vadd.f32 %v4720_v55, %v4658_v34  ;;  %v3215_v48 = vunpack.c.l.bf16 %v2959_v4  ;;  %v3219_v4 = vunpack.c.l.bf16 %v2963_v58 }
 0x47c   : > { %v4958_v57 = vadd.f32 %v4957_v56, %v4895_v53  ;;  %v4191_v27 = vadd.f32 %v3673_v7, %v8673_v13  ;;  %v3670_v35 = vpop.xlane.xlu1 %3669  ;;  %v8681_v53 = vld [vmem:[#allocation93_spill] sm:$0xff]  ;;  %v4660_v24 = vmul.f32 %v4596_v50, %v4340_v25  ;;  %v3812_v13 = vsel %vm3298_vm0, %v3213_v31, 0.0  ;;  %v4975_v31 = vld [vmem:[%s8347_s1 + $0x408] sm:$0xff]  ;;  %v4974_v50 = vld [vmem:[%s8347_s1 + $0x400] sm:$0xff] }
 0x47d   : > { %v3667_v37 = vpop.xlane.xlu0 %3666  ;;  %v4190_v36 = vadd.f32 %v3670_v35, %v8674_v8  ;;  %v8685_v35 = vld [vmem:[#allocation21_spill] sm:$0xff]  ;;  %v4722_v11 = vadd.f32 %v4721_v28, %v4659_v61  ;;  %v2964_v28 = vld [vmem:[%s5572_s16 + $0xb2c] sm:$0xf] }
 0x47e   : > { %v4959_v12 = vadd.f32 %v4958_v57, %v4896_v52  ;;  %v4189_v49 = vadd.f32 %v3667_v37, %v8675_v42  ;;  %v4447_v32 = vmul.f32 0.0025510204, %v4191_v27  ;;  %v8683_v52 = vld [vmem:[#allocation23_spill] sm:$0xff]  ;;  %v8684_v57 = vld [vmem:[#allocation233_spill] sm:$0xff]  ;;  %v3809_v27 = vsel %vm3298_vm0, %v3212_v6, 0.0  ;;  %v8688_v6 = vld [vmem:[#allocation96_spill] sm:$0xff] }
 0x47f   : > { %v4446_v26 = vmul.f32 0.0025510204, %v4190_v36  ;;  %v4085_v7 = vadd.f32 %v8684_v57, %v8683_v52  ;;  %v8686_v37 = vld [vmem:[#allocation237_spill] sm:$0xff]  ;;  %v3217_v42 = vunpack.c.l.bf16 %v2961_v21  ;;  %v3220_v21 = vunpack.c.l.bf16 %v2964_v28 }
 0x480   : > { %v4960_v22 = vadd.f32 %v4959_v12, %v4897_v38  ;;  %v4445_v62 = vmul.f32 0.0025510204, %v4189_v49  ;;  %3807 = vadd.xlane.f32.xlu2 %v3806_v18  ;;  %v4900_v33 = vmul.f32 %v4836_v54, %v4447_v32  ;;  %v4087_v18 = vadd.f32 %v8686_v37, %v8685_v35  ;;  %v4838_v36 = vld [vmem:[%s8347_s1 + $0x3f0] sm:$0xff]  ;;  %v8692_v35 = vld [vmem:[#allocation98_spill] sm:$0xff] }
 0x481   : > { %3804 = vadd.xlane.f32.xlu1 %v3803_v9  ;;  %v4899_v63 = vmul.f32 %v4835_v45, %v4446_v26  ;;  %v3216_v49 = vunpack.c.l.bf16 %v2960_v43  ;;  %v4341_v51 = vmul.f32 0.0025510204, %v4085_v7  ;;  %v4597_v9 = vld [vmem:[%s8347_s1 + $0x90] sm:$0xff]  ;;  %v3824_v45 = vsel %vm3298_vm0, %v3217_v42, 0.0  ;;  %v8694_v42 = vld [vmem:[#allocation94_spill] sm:$0xff] }
 0x482   : > { %v4898_v60 = vmul.f32 %v4834_v47, %v4445_v62  ;;  %3801 = vadd.xlane.f32.xlu0 %v3800_v59  ;;  %v4839_v47 = vld [vmem:[%s8347_s1 + $0x3f8] sm:$0xff]  ;;  %v4723_v59 = vadd.f32 %v4722_v11, %v4660_v24  ;;  %v4343_v15 = vmul.f32 0.0025510204, %v4087_v18  ;;  %v3818_v54 = vsel %vm3298_vm0, %v3215_v48, 0.0  ;;  %v4601_v28 = vld [vmem:[%s8347_s1 + $0xb0] sm:$0xff] }
 0x483   : > { %v3682_v10 = vpop.xlane.xlu2 %3681  ;;  %v3821_v1 = vsel %vm3298_vm0, %v3216_v49, 0.0  ;;  %v3218_v52 = vunpack.c.l.bf16 %v2962_v20  ;;  %v3833_v48 = vsel %vm3298_vm0, %v3220_v21, 0.0  ;;  %v2967_v11 = vld [vmem:[%s5572_s16 + $0xb5c] sm:$0xf] }
 0x484   : > { %v4961_v56 = vadd.f32 %v4960_v22, %v4898_v60  ;;  %v3679_v23 = vpop.xlane.xlu1 %3678  ;;  %v4194_v16 = vadd.f32 %v3682_v10, %v8680_v29  ;;  %v4598_v60 = vld [vmem:[%s8347_s1 + $0x98] sm:$0xff]  ;;  %v4661_v10 = vmul.f32 %v4597_v9, %v4341_v51  ;;  %v8691_v29 = vld [vmem:[#allocation236_spill] sm:$0xff] }
 0x485   : > { %v3676_v0 = vpop.xlane.xlu0 %3675  ;;  %v4193_v3 = vadd.f32 %v3679_v23, %v8681_v53  ;;  %v4599_v53 = vld [vmem:[%s8347_s1 + $0xa0] sm:$0xff]  ;;  %v4662_v43 = vmul.f32 %v4598_v60, %v4342_v30  ;;  %v4600_v51 = vld [vmem:[%s8347_s1 + $0xa8] sm:$0xff]  ;;  %v4602_v20 = vld [vmem:[%s8347_s1 + $0xb8] sm:$0xff] }
 0x486   : > { %v4962_v2 = vadd.f32 %v4961_v56, %v4899_v63  ;;  %v4192_v44 = vadd.f32 %v3676_v0, %v8682_v46  ;;  %v4450_v39 = vmul.f32 0.0025510204, %v4194_v16  ;;  %v8689_v63 = vld [vmem:[#allocation91_spill] sm:$0xff]  ;;  %v4663_v57 = vmul.f32 %v4599_v53, %v4343_v15  ;;  %v8698_v9 = vld [vmem:[#allocation240_spill] sm:$0xff]  ;;  %v4977_v15 = vld [vmem:[%s8347_s1 + $0x418] sm:$0xff] }
 0x487   : > { %v4449_v38 = vmul.f32 0.0025510204, %v4193_v3  ;;  %v4976_v3 = vld [vmem:[%s8347_s1 + $0x410] sm:$0xff] }
 0x488   : > { %v4963_v12 = vadd.f32 %v4962_v2, %v4900_v33  ;;  %v4448_v8 = vmul.f32 0.0025510204, %v4192_v44  ;;  %3816 = vadd.xlane.f32.xlu2 %v3815_v14  ;;  %v4903_v34 = vmul.f32 %v4839_v47, %v4450_v39  ;;  %v4724_v14 = vadd.f32 %v4723_v59, %v4661_v10  ;;  %v8690_v2 = vld [vmem:[#allocation26_spill] sm:$0xff]  ;;  %v8695_v39 = vld [vmem:[#allocation25_spill] sm:$0xff]  ;;  %v8697_v47 = vld [vmem:[#allocation24_spill] sm:$0xff] }
 0x489   : > { %3813 = vadd.xlane.f32.xlu1 %v3812_v13  ;;  %v4902_v26 = vmul.f32 %v4838_v36, %v4449_v38  ;;  %v4088_v16 = vadd.f32 %v8691_v29, %v8690_v2  ;;  %v4090_v59 = vadd.f32 %v8698_v9, %v8697_v47  ;;  %v8701_v2 = vld [vmem:[#allocation29_spill] sm:$0xff]  ;;  %v8702_v29 = vld [vmem:[#allocation239_spill] sm:$0xff] }
 0x48a   : > { %v4901_v5 = vmul.f32 %v4837_v17, %v4448_v8  ;;  %3810 = vadd.xlane.f32.xlu0 %v3809_v27  ;;  %v4725_v27 = vadd.f32 %v4724_v14, %v4662_v43  ;;  %v8703_v43 = vld [vmem:[#allocation101_spill] sm:$0xff]  ;;  %v4603_v9 = vld [vmem:[%s8347_s1 + $0xc0] sm:$0xff] }
 0x48b   : > { %v3691_v62 = vpop.xlane.xlu2 %3690  ;;  %v4344_v13 = vmul.f32 0.0025510204, %v4088_v16  ;;  %v4091_v16 = vadd.f32 %v8702_v29, %v8701_v2  ;;  %v4983_v2 = vld [vmem:[%s8347_s1 + $0x448] sm:$0xff] }
 0x48c   : > { %v4964_v22 = vadd.f32 %v4963_v12, %v4901_v5  ;;  %v4197_v40 = vadd.f32 %v3691_v62, %v8687_v41  ;;  %v3688_v55 = vpop.xlane.xlu1 %3687  ;;  %v8693_v12 = vld [vmem:[#allocation99_spill] sm:$0xff]  ;;  %v2966_v62 = vld [vmem:[%s5572_s16 + $0xb4c] sm:$0xf]  ;;  %v4726_v41 = vadd.f32 %v4725_v27, %v4663_v57 }
 0x48d   : > { %v3685_v32 = vpop.xlane.xlu0 %3684  ;;  %v4196_v61 = vadd.f32 %v3688_v55, %v8688_v6  ;;  %v8696_v5 = vld [vmem:[#allocation235_spill] sm:$0xff]  ;;  %v4979_v6 = vld [vmem:[%s8347_s1 + $0x428] sm:$0xff] }
 0x48e   : > { %v4965_v25 = vadd.f32 %v4964_v22, %v4902_v26  ;;  %v4195_v56 = vadd.f32 %v3685_v32, %v8689_v63  ;;  %v4453_v33 = vmul.f32 0.0025510204, %v4197_v40  ;;  %v4089_v30 = vadd.f32 %v8696_v5, %v8695_v39  ;;  %v2965_v32 = vld [vmem:[%s5572_s16 + $0xb3c] sm:$0xf]  ;;  %v8706_v39 = vld [vmem:[#allocation27_spill] sm:$0xff] }
 0x48f   : > { %v4452_v23 = vmul.f32 0.0025510204, %v4196_v61  ;;  %v3830_v26 = vsel %vm3298_vm0, %v3219_v4, 0.0  ;;  %v3827_v22 = vsel %vm3298_vm0, %v3218_v52, 0.0  ;;  %v4346_v63 = vmul.f32 0.0025510204, %v4090_v59 }
 0x490   : > { %v7448_v19 = vadd.f32 %v4965_v25, %v4903_v34  ;;  %v4451_v0 = vmul.f32 0.0025510204, %v4195_v56  ;;  %3825 = vadd.xlane.f32.xlu2 %v3824_v45  ;;  %v5040_v7 = vmul.f32 %v4976_v3, %v4453_v33  ;;  %v8699_v45 = vld [vmem:[#allocation28_spill] sm:$0xff]  ;;  %v4978_v34 = vld [vmem:[%s8347_s1 + $0x420] sm:$0xff]  ;;  %v3223_v25 = vunpack.c.l.bf16 %v2967_v11  ;;  %v8704_v52 = vld [vmem:[#allocation102_spill] sm:$0xff] }
 0x491   : > { %v5039_v46 = vmul.f32 %v4975_v31, %v4452_v23  ;;  %3822 = vadd.xlane.f32.xlu1 %v3821_v1  ;;  %v8700_v1 = vld [vmem:[#allocation238_spill] sm:$0xff]  ;;  %v4664_v31 = vmul.f32 %v4600_v51, %v4344_v13  ;;  %v3222_v56 = vunpack.c.l.bf16 %v2966_v62  ;;  %v3221_v10 = vunpack.c.l.bf16 %v2965_v32  ;;  %v8707_v5 = vld [vmem:[#allocation243_spill] sm:$0xff] }
 0x492   : > { %v5038_v44 = vmul.f32 %v4974_v50, %v4451_v0  ;;  %3819 = vadd.xlane.f32.xlu0 %v3818_v54  ;;  %v4092_v54 = vadd.f32 %v8700_v1, %v8699_v45  ;;  %v4345_v50 = vmul.f32 0.0025510204, %v4089_v30  ;;  %v4666_v27 = vmul.f32 %v4602_v20, %v4346_v63  ;;  %v4981_v51 = vld [vmem:[%s8347_s1 + $0x438] sm:$0xff] }
 0x493   : > { %v3700_v17 = vpop.xlane.xlu2 %3699  ;;  %v4727_v58 = vadd.f32 %v4726_v41, %v4664_v31  ;;  %v4093_v30 = vadd.f32 %v8707_v5, %v8706_v39  ;;  %v2973_v20 = vld [vmem:[%s5572_s16 + $0xbbc] sm:$0xf] }
 0x494   : > { %v5102_v24 = vadd.f32 %v5039_v46, %v5038_v44  ;;  %v4200_v37 = vadd.f32 %v3700_v17, %v8692_v35  ;;  %v3697_v18 = vpop.xlane.xlu1 %3696  ;;  %v4348_v14 = vmul.f32 0.0025510204, %v4092_v54  ;;  %v3842_v44 = vsel %vm3298_vm0, %v3223_v25, 0.0  ;;  %v2970_v17 = vld [vmem:[%s5572_s16 + $0xb8c] sm:$0xf]  ;;  %v4980_v35 = vld [vmem:[%s8347_s1 + $0x430] sm:$0xff] }
 0x495   : > { %v3694_v38 = vpop.xlane.xlu0 %3693  ;;  %v4199_v8 = vadd.f32 %v3697_v18, %v8693_v12  ;;  %v4665_v13 = vmul.f32 %v4601_v28, %v4345_v50  ;;  %v3836_v18 = vsel %vm3298_vm0, %v3221_v10, 0.0  ;;  %v3226_v47 = vunpack.c.l.bf16 %v2970_v17  ;;  %v8710_v28 = vld [vmem:[#allocation100_spill] sm:$0xff] }
 0x496   : > { %v5103_v36 = vadd.f32 %v5102_v24, %v5040_v7  ;;  %v4198_v49 = vadd.f32 %v3694_v38, %v8694_v42  ;;  %v4456_v60 = vmul.f32 0.0025510204, %v4200_v37  ;;  %v8705_v7 = vld [vmem:[#allocation97_spill] sm:$0xff]  ;;  %v3839_v37 = vsel %vm3298_vm0, %v3222_v56, 0.0  ;;  %v2969_v38 = vld [vmem:[%s5572_s16 + $0xb7c] sm:$0xf] }
 0x497   : > { %v4455_v40 = vmul.f32 0.0025510204, %v4199_v8  ;;  %v2968_v42 = vld [vmem:[%s5572_s16 + $0xb6c] sm:$0xf]  ;;  %v4728_v11 = vadd.f32 %v4727_v58, %v4665_v13  ;;  %v3225_v62 = vunpack.c.l.bf16 %v2969_v38  ;;  %v4349_v54 = vmul.f32 0.0025510204, %v4093_v30 }
 0x498   : > { %v4454_v55 = vmul.f32 0.0025510204, %v4198_v49  ;;  %3834 = vadd.xlane.f32.xlu2 %v3833_v48  ;;  %v5043_v53 = vmul.f32 %v4979_v6, %v4456_v60  ;;  %v4604_v49 = vld [vmem:[%s8347_s1 + $0xc8] sm:$0xff]  ;;  %v4347_v48 = vmul.f32 0.0025510204, %v4091_v16  ;;  %v3224_v41 = vunpack.c.l.bf16 %v2968_v42  ;;  %v8709_v56 = vld [vmem:[#allocation105_spill] sm:$0xff] }
 0x499   : > { %3831 = vadd.xlane.f32.xlu1 %v3830_v26  ;;  %v5042_v33 = vmul.f32 %v4978_v34, %v4455_v40  ;;  %v4729_v26 = vadd.f32 %v4728_v11, %v4666_v27  ;;  %v4668_v40 = vmul.f32 %v4604_v49, %v4348_v14  ;;  %v8708_v60 = vld [vmem:[#allocation104_spill] sm:$0xff]  ;;  %v3851_v6 = vsel %vm3298_vm0, %v3226_v47, 0.0  ;;  %v4984_v27 = vld [vmem:[%s8347_s1 + $0x450] sm:$0xff]  ;;  %v4606_v49 = vld [vmem:[%s8347_s1 + $0xd8] sm:$0xff] }
 0x49a   : > { %v5041_v61 = vmul.f32 %v4977_v15, %v4454_v55  ;;  %3828 = vadd.xlane.f32.xlu0 %v3827_v22  ;;  %v4982_v22 = vld [vmem:[%s8347_s1 + $0x440] sm:$0xff]  ;;  %v4667_v1 = vmul.f32 %v4603_v9, %v4347_v48  ;;  %v3848_v29 = vsel %vm3298_vm0, %v3225_v62, 0.0  ;;  %v3845_v16 = vsel %vm3298_vm0, %v3224_v41, 0.0  ;;  %v8718_v62 = vld [vmem:[#allocation108_spill] sm:$0xff] }
 0x49b   : > { %v3709_v0 = vpop.xlane.xlu2 %3708 }
 0x49c   : > { %v5104_v23 = vadd.f32 %v5103_v36, %v5041_v61  ;;  %v3706_v3 = vpop.xlane.xlu1 %3705  ;;  %v4203_v4 = vadd.f32 %v3709_v0, %v8703_v43  ;;  %v4605_v61 = vld [vmem:[%s8347_s1 + $0xd0] sm:$0xff]  ;;  %v8712_v0 = vld [vmem:[#allocation242_spill] sm:$0xff] }
 0x49d   : > { %v3703_v46 = vpop.xlane.xlu0 %3702  ;;  %v4202_v57 = vadd.f32 %v3706_v3, %v8704_v52  ;;  %v8713_v3 = vld [vmem:[#allocation31_spill] sm:$0xff]  ;;  %v2971_v52 = vld [vmem:[%s5572_s16 + $0xb9c] sm:$0xf] }
 0x49e   : > { %v5105_v21 = vadd.f32 %v5104_v23, %v5042_v33  ;;  %v4201_v24 = vadd.f32 %v3703_v46, %v8705_v7  ;;  %v4459_v59 = vmul.f32 0.0025510204, %v4203_v4  ;;  %v4730_v33 = vadd.f32 %v4729_v26, %v4667_v1  ;;  %v8711_v23 = vld [vmem:[#allocation32_spill] sm:$0xff]  ;;  %v8714_v46 = vld [vmem:[#allocation241_spill] sm:$0xff]  ;;  %v8715_v7 = vld [vmem:[#allocation30_spill] sm:$0xff] }
 0x49f   : > { %v4458_v12 = vmul.f32 0.0025510204, %v4202_v57  ;;  %v4094_v14 = vadd.f32 %v8712_v0, %v8711_v23  ;;  %v4669_v57 = vmul.f32 %v4605_v61, %v4349_v54  ;;  %v8717_v26 = vld [vmem:[#allocation107_spill] sm:$0xff] }
 0x4a0   : > { %v5106_v8 = vadd.f32 %v5105_v21, %v5043_v53  ;;  %v4457_v36 = vmul.f32 0.0025510204, %v4201_v24  ;;  %3843 = vadd.xlane.f32.xlu2 %v3842_v44  ;;  %v5046_v50 = vmul.f32 %v4982_v22, %v4459_v59  ;;  %v2972_v53 = vld [vmem:[%s5572_s16 + $0xbac] sm:$0xf]  ;;  %v4095_v44 = vadd.f32 %v8714_v46, %v8713_v3  ;;  %v8716_v24 = vld [vmem:[#allocation246_spill] sm:$0xff]  ;;  %v4986_v54 = vld [vmem:[%s8347_s1 + $0x460] sm:$0xff] }
 0x4a1   : > { %3840 = vadd.xlane.f32.xlu1 %v3839_v37  ;;  %v5045_v55 = vmul.f32 %v4981_v51, %v4458_v12  ;;  %v4096_v17 = vadd.f32 %v8716_v24, %v8715_v7  ;;  %v4985_v37 = vld [vmem:[%s8347_s1 + $0x458] sm:$0xff]  ;;  %v4350_v38 = vmul.f32 0.0025510204, %v4094_v14  ;;  %v4731_v12 = vadd.f32 %v4730_v33, %v4668_v40  ;;  %v8719_v40 = vld [vmem:[#allocation103_spill] sm:$0xff] }
 0x4a2   : > { %v5044_v15 = vmul.f32 %v4980_v35, %v4457_v36  ;;  %3837 = vadd.xlane.f32.xlu0 %v3836_v18  ;;  %v3229_v35 = vunpack.c.l.bf16 %v2973_v20  ;;  %v3227_v36 = vunpack.c.l.bf16 %v2971_v52  ;;  %v4351_v42 = vmul.f32 0.0025510204, %v4095_v44  ;;  %v4987_v20 = vld [vmem:[%s8347_s1 + $0x468] sm:$0xff] }
 0x4a3   : > { %v3718_v45 = vpop.xlane.xlu2 %3717  ;;  %v4732_v5 = vadd.f32 %v4731_v12, %v4669_v57  ;;  %v4352_v30 = vmul.f32 0.0025510204, %v4096_v17  ;;  %v4670_v1 = vmul.f32 %v4606_v49, %v4350_v38  ;;  %v2979_v38 = vld [vmem:[%s5572_s16 + $0xc1c] sm:$0xf]  ;;  %v8727_v49 = vld [vmem:[#allocation33_spill] sm:$0xff] }
 0x4a4   : > { %v5107_v32 = vadd.f32 %v5106_v8, %v5044_v15  ;;  %v4206_v34 = vadd.f32 %v3718_v45, %v8708_v60  ;;  %v3715_v25 = vpop.xlane.xlu1 %3714  ;;  %v3228_v8 = vunpack.c.l.bf16 %v2972_v53  ;;  %v3860_v59 = vsel %vm3298_vm0, %v3229_v35, 0.0  ;;  %v4607_v45 = vld [vmem:[%s8347_s1 + $0xe0] sm:$0xff]  ;;  %v8725_v12 = vld [vmem:[#allocation34_spill] sm:$0xff] }
 0x4a5   : > { %v3712_v31 = vpop.xlane.xlu0 %3711  ;;  %v4205_v10 = vadd.f32 %v3715_v25, %v8709_v56  ;;  %v2975_v25 = vld [vmem:[%s5572_s16 + $0xbdc] sm:$0xf]  ;;  %v8720_v56 = vld [vmem:[#allocation35_spill] sm:$0xff]  ;;  %v4671_v14 = vmul.f32 %v4607_v45, %v4351_v42  ;;  %v4609_v42 = vld [vmem:[%s8347_s1 + $0xf0] sm:$0xff] }
 0x4a6   : > { %v5108_v63 = vadd.f32 %v5107_v32, %v5045_v55  ;;  %v4204_v58 = vadd.f32 %v3712_v31, %v8710_v28  ;;  %v4462_v13 = vmul.f32 0.0025510204, %v4206_v34  ;;  %v2976_v32 = vld [vmem:[%s5572_s16 + $0xbec] sm:$0xf]  ;;  %v3857_v60 = vsel %vm3298_vm0, %v3228_v8, 0.0 }
 0x4a7   : > { %v4461_v21 = vmul.f32 0.0025510204, %v4205_v10  ;;  %v3854_v34 = vsel %vm3298_vm0, %v3227_v36, 0.0  ;;  %v8721_v10 = vld [vmem:[#allocation245_spill] sm:$0xff]  ;;  %v3232_v33 = vunpack.c.l.bf16 %v2976_v32  ;;  %v8726_v8 = vld [vmem:[#allocation244_spill] sm:$0xff]  ;;  %v3235_v32 = vunpack.c.l.bf16 %v2979_v38 }
 0x4a8   : > { %v5109_v43 = vadd.f32 %v5108_v63, %v5046_v50  ;;  %v4460_v4 = vmul.f32 0.0025510204, %v4204_v58  ;;  %3852 = vadd.xlane.f32.xlu2 %v3851_v6  ;;  %v5049_v51 = vmul.f32 %v4985_v37, %v4462_v13  ;;  %v2974_v50 = vld [vmem:[%s5572_s16 + $0xbcc] sm:$0xf]  ;;  %v4733_v63 = vadd.f32 %v4732_v5, %v4670_v1  ;;  %v8724_v37 = vld [vmem:[#allocation106_spill] sm:$0xff] }
 0x4a9   : > { %3849 = vadd.xlane.f32.xlu1 %v3848_v29  ;;  %v5048_v48 = vmul.f32 %v4984_v27, %v4461_v21  ;;  %v4097_v28 = vadd.f32 %v8721_v10, %v8720_v56  ;;  %v4608_v58 = vld [vmem:[%s8347_s1 + $0xe8] sm:$0xff]  ;;  %v3231_v29 = vunpack.c.l.bf16 %v2975_v25  ;;  %v3869_v24 = vsel %vm3298_vm0, %v3232_v33, 0.0  ;;  %v8723_v27 = vld [vmem:[#allocation111_spill] sm:$0xff] }
 0x4aa   : > { %v5047_v18 = vmul.f32 %v4983_v2, %v4460_v4  ;;  %3846 = vadd.xlane.f32.xlu0 %v3845_v16  ;;  %v4988_v2 = vld [vmem:[%s8347_s1 + $0x470] sm:$0xff]  ;;  %v3230_v16 = vunpack.c.l.bf16 %v2974_v50  ;;  %v4672_v53 = vmul.f32 %v4608_v58, %v4352_v30  ;;  %v8722_v4 = vld [vmem:[#allocation110_spill] sm:$0xff]  ;;  %v4098_v36 = vadd.f32 %v8726_v8, %v8725_v12  ;;  %v4991_v1 = vld [vmem:[%s8347_s1 + $0x488] sm:$0xff] }
 0x4ab   : > { %v3727_v39 = vpop.xlane.xlu2 %3726  ;;  %v4353_v21 = vmul.f32 0.0025510204, %v4097_v28  ;;  %v3866_v5 = vsel %vm3298_vm0, %v3231_v29, 0.0  ;;  %v4611_v50 = vld [vmem:[%s8347_s1 + $0x100] sm:$0xff]  ;;  %v8731_v58 = vld [vmem:[#allocation38_spill] sm:$0xff]  ;;  %v8736_v8 = vld [vmem:[#allocation36_spill] sm:$0xff] }
 0x4ac   : > { %v5110_v11 = vadd.f32 %v5109_v43, %v5047_v18  ;;  %v3724_v47 = vpop.xlane.xlu1 %3723  ;;  %v4209_v22 = vadd.f32 %v3727_v39, %v8717_v26  ;;  %v4734_v43 = vadd.f32 %v4733_v63, %v4671_v14  ;;  %v4989_v39 = vld [vmem:[%s8347_s1 + $0x478] sm:$0xff]  ;;  %v3863_v30 = vsel %vm3298_vm0, %v3230_v16, 0.0  ;;  %v8733_v16 = vld [vmem:[#allocation113_spill] sm:$0xff] }
 0x4ad   : > { %v3721_v9 = vpop.xlane.xlu0 %3720  ;;  %v4208_v41 = vadd.f32 %v3724_v47, %v8718_v62  ;;  %v2977_v26 = vld [vmem:[%s5572_s16 + $0xbfc] sm:$0xf]  ;;  %v8730_v62 = vld [vmem:[#allocation247_spill] sm:$0xff]  ;;  %v4673_v45 = vmul.f32 %v4609_v42, %v4353_v21 }
 0x4ae   : > { %v5111_v15 = vadd.f32 %v5110_v11, %v5048_v48  ;;  %v4207_v55 = vadd.f32 %v3721_v9, %v8719_v40  ;;  %v4465_v23 = vmul.f32 0.0025510204, %v4209_v22  ;;  %v8728_v48 = vld [vmem:[#allocation249_spill] sm:$0xff]  ;;  %v4735_v47 = vadd.f32 %v4734_v43, %v4672_v53  ;;  %v2982_v43 = vld [vmem:[%s5572_s16 + $0xc4c] sm:$0xf] }
 0x4af   : > { %v4464_v31 = vmul.f32 0.0025510204, %v4208_v41  ;;  %v4099_v11 = vadd.f32 %v8728_v48, %v8727_v49  ;;  %v8729_v22 = vld [vmem:[#allocation37_spill] sm:$0xff]  ;;  %v4993_v49 = vld [vmem:[%s8347_s1 + $0x498] sm:$0xff]  ;;  %v3238_v48 = vunpack.c.l.bf16 %v2982_v43 }
 0x4b0   : > { %v5112_v6 = vadd.f32 %v5111_v15, %v5049_v51  ;;  %v4463_v61 = vmul.f32 0.0025510204, %v4207_v55  ;;  %3861 = vadd.xlane.f32.xlu2 %v3860_v59  ;;  %v5052_v17 = vmul.f32 %v4988_v2, %v4465_v23  ;;  %v2978_v51 = vld [vmem:[%s5572_s16 + $0xc0c] sm:$0xf]  ;;  %v4101_v41 = vadd.f32 %v8730_v62, %v8729_v22  ;;  %v4990_v55 = vld [vmem:[%s8347_s1 + $0x480] sm:$0xff] }
 0x4b1   : > { %3858 = vadd.xlane.f32.xlu1 %v3857_v60  ;;  %v5051_v3 = vmul.f32 %v4987_v20, %v4464_v31  ;;  %v4354_v60 = vmul.f32 0.0025510204, %v4098_v36  ;;  %v3234_v25 = vunpack.c.l.bf16 %v2978_v51  ;;  %v3233_v31 = vunpack.c.l.bf16 %v2977_v26  ;;  %v8732_v20 = vld [vmem:[#allocation248_spill] sm:$0xff]  ;;  %v4994_v51 = vld [vmem:[%s8347_s1 + $0x4a0] sm:$0xff] }
 0x4b2   : > { %v5050_v0 = vmul.f32 %v4986_v54, %v4463_v61  ;;  %3855 = vadd.xlane.f32.xlu0 %v3854_v34  ;;  %v4355_v34 = vmul.f32 0.0025510204, %v4099_v11  ;;  %v4736_v61 = vadd.f32 %v4735_v47, %v4673_v45  ;;  %v4357_v28 = vmul.f32 0.0025510204, %v4101_v41  ;;  %v8737_v36 = vld [vmem:[#allocation252_spill] sm:$0xff] }
 0x4b3   : > { %v3736_v44 = vpop.xlane.xlu2 %3735  ;;  %v4100_v33 = vadd.f32 %v8732_v20, %v8731_v58  ;;  %v3878_v2 = vsel %vm3298_vm0, %v3235_v32, 0.0  ;;  %v4102_v42 = vadd.f32 %v8737_v36, %v8736_v8  ;;  %v4612_v11 = vld [vmem:[%s8347_s1 + $0x108] sm:$0xff] }
 0x4b4   : > { %v5113_v46 = vadd.f32 %v5112_v6, %v5050_v0  ;;  %v4212_v52 = vadd.f32 %v3736_v44, %v8722_v4  ;;  %v3733_v57 = vpop.xlane.xlu1 %3732  ;;  %v4610_v6 = vld [vmem:[%s8347_s1 + $0xf8] sm:$0xff]  ;;  %v8735_v44 = vld [vmem:[#allocation109_spill] sm:$0xff]  ;;  %v4995_v58 = vld [vmem:[%s8347_s1 + $0x4a8] sm:$0xff] }
 0x4b5   : > { %v3730_v7 = vpop.xlane.xlu0 %3729  ;;  %v4211_v35 = vadd.f32 %v3733_v57, %v8723_v27  ;;  %v4674_v4 = vmul.f32 %v4610_v6, %v4354_v60  ;;  %v4992_v57 = vld [vmem:[%s8347_s1 + $0x490] sm:$0xff]  ;;  %v4356_v38 = vmul.f32 0.0025510204, %v4100_v33  ;;  %v4358_v41 = vmul.f32 0.0025510204, %v4102_v42  ;;  %v8740_v6 = vld [vmem:[#allocation112_spill] sm:$0xff] }
 0x4b6   : > { %v5114_v13 = vadd.f32 %v5113_v46, %v5051_v3  ;;  %v4210_v18 = vadd.f32 %v3730_v7, %v8724_v37  ;;  %v4468_v40 = vmul.f32 0.0025510204, %v4212_v52  ;;  %v8734_v3 = vld [vmem:[#allocation114_spill] sm:$0xff]  ;;  %v4675_v52 = vmul.f32 %v4611_v50, %v4355_v34  ;;  %v2980_v37 = vld [vmem:[%s5572_s16 + $0xc2c] sm:$0xf] }
 0x4b7   : > { %v4467_v9 = vmul.f32 0.0025510204, %v4211_v35  ;;  %v3875_v7 = vsel %vm3298_vm0, %v3234_v25, 0.0  ;;  %v4737_v12 = vadd.f32 %v4736_v61, %v4674_v4  ;;  %v4676_v62 = vmul.f32 %v4612_v11, %v4356_v38  ;;  %v8739_v25 = vld [vmem:[#allocation117_spill] sm:$0xff]  ;;  %v2985_v50 = vld [vmem:[%s5572_s16 + $0xc7c] sm:$0xf] }
 0x4b8   : > { %v5115_v59 = vadd.f32 %v5114_v13, %v5052_v17  ;;  %v4466_v15 = vmul.f32 0.0025510204, %v4210_v18  ;;  %3870 = vadd.xlane.f32.xlu2 %v3869_v24  ;;  %v5055_v23 = vmul.f32 %v4991_v1, %v4468_v40  ;;  %v3872_v24 = vsel %vm3298_vm0, %v3233_v31, 0.0  ;;  %v2981_v17 = vld [vmem:[%s5572_s16 + $0xc3c] sm:$0xf]  ;;  %v4613_v18 = vld [vmem:[%s8347_s1 + $0x110] sm:$0xff] }
 0x4b9   : > { %3867 = vadd.xlane.f32.xlu1 %v3866_v5  ;;  %v5054_v63 = vmul.f32 %v4990_v55, %v4467_v9  ;;  %v3237_v47 = vunpack.c.l.bf16 %v2981_v17  ;;  %v3236_v9 = vunpack.c.l.bf16 %v2980_v37  ;;  %v8738_v40 = vld [vmem:[#allocation116_spill] sm:$0xff]  ;;  %v3887_v1 = vsel %vm3298_vm0, %v3238_v48, 0.0 }
 0x4ba   : > { %v5053_v54 = vmul.f32 %v4989_v39, %v4466_v15  ;;  %3864 = vadd.xlane.f32.xlu0 %v3863_v30  ;;  %v4738_v30 = vadd.f32 %v4737_v12, %v4675_v52  ;;  %v4996_v52 = vld [vmem:[%s8347_s1 + $0x4b0] sm:$0xff] }
 0x4bb   : > { %v3745_v10 = vpop.xlane.xlu2 %3744  ;;  %v3884_v20 = vsel %vm3298_vm0, %v3237_v47, 0.0  ;;  %v3881_v33 = vsel %vm3298_vm0, %v3236_v9, 0.0  ;;  %v8748_v47 = vld [vmem:[#allocation120_spill] sm:$0xff] }
 0x4bc   : > { %v5116_v56 = vadd.f32 %v5115_v59, %v5053_v54  ;;  %v3742_v0 = vpop.xlane.xlu1 %3741  ;;  %v4215_v53 = vadd.f32 %v3745_v10, %v8733_v16  ;;  %v4677_v59 = vmul.f32 %v4613_v18, %v4357_v28  ;;  %v4614_v54 = vld [vmem:[%s8347_s1 + $0x118] sm:$0xff]  ;;  %v8742_v10 = vld [vmem:[#allocation251_spill] sm:$0xff] }
 0x4bd   : > { %v3739_v14 = vpop.xlane.xlu0 %3738  ;;  %v4214_v46 = vadd.f32 %v3742_v0, %v8734_v3  ;;  %v8743_v0 = vld [vmem:[#allocation40_spill] sm:$0xff]  ;;  %v2983_v3 = vld [vmem:[%s5572_s16 + $0xc5c] sm:$0xf]  ;;  %v4615_v18 = vld [vmem:[%s8347_s1 + $0x120] sm:$0xff] }
 0x4be   : > { %v5117_v29 = vadd.f32 %v5116_v56, %v5054_v63  ;;  %v4213_v21 = vadd.f32 %v3739_v14, %v8735_v44  ;;  %v4471_v39 = vmul.f32 0.0025510204, %v4215_v53  ;;  %v4739_v63 = vadd.f32 %v4738_v30, %v4676_v62  ;;  %v8741_v56 = vld [vmem:[#allocation41_spill] sm:$0xff]  ;;  %v8744_v14 = vld [vmem:[#allocation250_spill] sm:$0xff]  ;;  %v8745_v44 = vld [vmem:[#allocation39_spill] sm:$0xff] }
 0x4bf   : > { %v4470_v13 = vmul.f32 0.0025510204, %v4214_v46  ;;  %v4103_v28 = vadd.f32 %v8742_v10, %v8741_v56  ;;  %v4678_v46 = vmul.f32 %v4614_v54, %v4358_v41  ;;  %v8747_v30 = vld [vmem:[#allocation119_spill] sm:$0xff] }
 0x4c0   : > { %v5118_v27 = vadd.f32 %v5117_v29, %v5055_v23  ;;  %v4469_v35 = vmul.f32 0.0025510204, %v4213_v21  ;;  %3879 = vadd.xlane.f32.xlu2 %v3878_v2  ;;  %v5058_v60 = vmul.f32 %v4994_v51, %v4471_v39  ;;  %v2984_v23 = vld [vmem:[%s5572_s16 + $0xc6c] sm:$0xf]  ;;  %v4104_v2 = vadd.f32 %v8744_v14, %v8743_v0  ;;  %v8746_v21 = vld [vmem:[#allocation255_spill] sm:$0xff] }
 0x4c1   : > { %3876 = vadd.xlane.f32.xlu1 %v3875_v7  ;;  %v5057_v15 = vmul.f32 %v4993_v49, %v4470_v13  ;;  %v4105_v43 = vadd.f32 %v8746_v21, %v8745_v44  ;;  %v4997_v7 = vld [vmem:[%s8347_s1 + $0x4b8] sm:$0xff]  ;;  %v4359_v17 = vmul.f32 0.0025510204, %v4103_v28  ;;  %v4740_v13 = vadd.f32 %v4739_v63, %v4677_v59  ;;  %v8749_v59 = vld [vmem:[#allocation115_spill] sm:$0xff] }
 0x4c2   : > { %v5056_v5 = vmul.f32 %v4992_v57, %v4469_v35  ;;  %3873 = vadd.xlane.f32.xlu0 %v3872_v24  ;;  %v3241_v57 = vunpack.c.l.bf16 %v2985_v50  ;;  %v3239_v35 = vunpack.c.l.bf16 %v2983_v3  ;;  %v4360_v37 = vmul.f32 0.0025510204, %v4104_v2  ;;  %v4998_v41 = vld [vmem:[%s8347_s1 + $0x4c0] sm:$0xff]  ;;  %v4999_v50 = vld [vmem:[%s8347_s1 + $0x4c8] sm:$0xff] }
 0x4c3   : > { %v3754_v22 = vpop.xlane.xlu2 %3753  ;;  %v4741_v36 = vadd.f32 %v4740_v13, %v4678_v46  ;;  %v4361_v42 = vmul.f32 0.0025510204, %v4105_v43  ;;  %v4679_v62 = vmul.f32 %v4615_v18, %v4359_v17  ;;  %v2991_v17 = vld [vmem:[%s5572_s16 + $0xcdc] sm:$0xf]  ;;  %v8755_v13 = vld [vmem:[#allocation43_spill] sm:$0xff] }
 0x4c4   : > { %v5119_v26 = vadd.f32 %v5118_v27, %v5056_v5  ;;  %v4218_v55 = vadd.f32 %v3754_v22, %v8738_v40  ;;  %v3751_v32 = vpop.xlane.xlu1 %3750  ;;  %v3240_v27 = vunpack.c.l.bf16 %v2984_v23  ;;  %v3896_v39 = vsel %vm3298_vm0, %v3241_v57, 0.0  ;;  %v4616_v22 = vld [vmem:[%s8347_s1 + $0x128] sm:$0xff]  ;;  %v8757_v18 = vld [vmem:[#allocation42_spill] sm:$0xff] }
 0x4c5   : > { %v3748_v45 = vpop.xlane.xlu0 %3747  ;;  %v4217_v31 = vadd.f32 %v3751_v32, %v8739_v25  ;;  %v2987_v32 = vld [vmem:[%s5572_s16 + $0xc9c] sm:$0xf]  ;;  %v8750_v25 = vld [vmem:[#allocation44_spill] sm:$0xff]  ;;  %v4680_v28 = vmul.f32 %v4616_v22, %v4360_v37 }
 0x4c6   : > { %v5120_v34 = vadd.f32 %v5119_v26, %v5057_v15  ;;  %v4216_v61 = vadd.f32 %v3748_v45, %v8740_v6  ;;  %v4474_v4 = vmul.f32 0.0025510204, %v4218_v55  ;;  %v2988_v26 = vld [vmem:[%s5572_s16 + $0xcac] sm:$0xf]  ;;  %v3893_v40 = vsel %vm3298_vm0, %v3240_v27, 0.0  ;;  %v8756_v27 = vld [vmem:[#allocation253_spill] sm:$0xff] }
 0x4c7   : > { %v4473_v29 = vmul.f32 0.0025510204, %v4217_v31  ;;  %v3890_v55 = vsel %vm3298_vm0, %v3239_v35, 0.0  ;;  %v8751_v31 = vld [vmem:[#allocation254_spill] sm:$0xff]  ;;  %v3244_v63 = vunpack.c.l.bf16 %v2988_v26  ;;  %v4107_v35 = vadd.f32 %v8756_v27, %v8755_v13  ;;  %v8766_v27 = vld [vmem:[#allocation45_spill] sm:$0xff] }
 0x4c8   : > { %v5121_v16 = vadd.f32 %v5120_v34, %v5058_v60  ;;  %v4472_v53 = vmul.f32 0.0025510204, %v4216_v61  ;;  %3888 = vadd.xlane.f32.xlu2 %v3887_v1  ;;  %v5061_v49 = vmul.f32 %v4997_v7, %v4474_v4  ;;  %v2986_v60 = vld [vmem:[%s5572_s16 + $0xc8c] sm:$0xf]  ;;  %v4742_v34 = vadd.f32 %v4741_v36, %v4679_v62  ;;  %v4617_v61 = vld [vmem:[%s8347_s1 + $0x130] sm:$0xff]  ;;  %v8754_v7 = vld [vmem:[#allocation118_spill] sm:$0xff] }
 0x4c9   : > { %3885 = vadd.xlane.f32.xlu1 %v3884_v20  ;;  %v5060_v38 = vmul.f32 %v4996_v52, %v4473_v29  ;;  %v4106_v6 = vadd.f32 %v8751_v31, %v8750_v25  ;;  %v3243_v20 = vunpack.c.l.bf16 %v2987_v32  ;;  %v4681_v23 = vmul.f32 %v4617_v61, %v4361_v42  ;;  %v8753_v52 = vld [vmem:[#allocation123_spill] sm:$0xff]  ;;  %v4618_v37 = vld [vmem:[%s8347_s1 + $0x138] sm:$0xff]  ;;  %v5003_v62 = vld [vmem:[%s8347_s1 + $0x4e8] sm:$0xff] }
 0x4ca   : > { %v5059_v24 = vmul.f32 %v4995_v58, %v4472_v53  ;;  %3882 = vadd.xlane.f32.xlu0 %v3881_v33  ;;  %v5000_v58 = vld [vmem:[%s8347_s1 + $0x4d0] sm:$0xff]  ;;  %v3242_v33 = vunpack.c.l.bf16 %v2986_v60  ;;  %v8752_v53 = vld [vmem:[#allocation122_spill] sm:$0xff]  ;;  %v3905_v21 = vsel %vm3298_vm0, %v3244_v63, 0.0  ;;  %v3247_v26 = vunpack.c.l.bf16 %v2991_v17  ;;  %v4620_v60 = vld [vmem:[%s8347_s1 + $0x148] sm:$0xff] }
 0x4cb   : > { %v3763_v8 = vpop.xlane.xlu2 %3762  ;;  %v4362_v29 = vmul.f32 0.0025510204, %v4106_v6  ;;  %v3902_v36 = vsel %vm3298_vm0, %v3243_v20, 0.0  ;;  %v8761_v61 = vld [vmem:[#allocation47_spill] sm:$0xff] }
 0x4cc   : > { %v5122_v12 = vadd.f32 %v5121_v16, %v5059_v24  ;;  %v3760_v48 = vpop.xlane.xlu1 %3759  ;;  %v4221_v51 = vadd.f32 %v3763_v8, %v8747_v30  ;;  %v4743_v16 = vadd.f32 %v4742_v34, %v4680_v28  ;;  %v5001_v8 = vld [vmem:[%s8347_s1 + $0x4d8] sm:$0xff]  ;;  %v3899_v42 = vsel %vm3298_vm0, %v3242_v33, 0.0  ;;  %v8763_v33 = vld [vmem:[#allocation125_spill] sm:$0xff] }
 0x4cd   : > { %v3757_v11 = vpop.xlane.xlu0 %3756  ;;  %v4220_v9 = vadd.f32 %v3760_v48, %v8748_v47  ;;  %v2989_v30 = vld [vmem:[%s5572_s16 + $0xcbc] sm:$0xf]  ;;  %v8760_v47 = vld [vmem:[#allocation256_spill] sm:$0xff]  ;;  %v4682_v22 = vmul.f32 %v4618_v37, %v4362_v29 }
 0x4ce   : > { %v5123_v5 = vadd.f32 %v5122_v12, %v5060_v38  ;;  %v4219_v15 = vadd.f32 %v3757_v11, %v8749_v59  ;;  %v4477_v56 = vmul.f32 0.0025510204, %v4221_v51  ;;  %v8758_v38 = vld [vmem:[#allocation258_spill] sm:$0xff]  ;;  %v4744_v48 = vadd.f32 %v4743_v16, %v4681_v23  ;;  %v2994_v16 = vld [vmem:[%s5572_s16 + $0xd0c] sm:$0xf] }
 0x4cf   : > { %v4476_v45 = vmul.f32 0.0025510204, %v4220_v9  ;;  %v4108_v12 = vadd.f32 %v8758_v38, %v8757_v18  ;;  %v8759_v51 = vld [vmem:[#allocation46_spill] sm:$0xff]  ;;  %v3250_v38 = vunpack.c.l.bf16 %v2994_v16 }
 0x4d0   : > { %v5124_v1 = vadd.f32 %v5123_v5, %v5061_v49  ;;  %v4475_v54 = vmul.f32 0.0025510204, %v4219_v15  ;;  %3897 = vadd.xlane.f32.xlu2 %v3896_v39  ;;  %v5064_v43 = vmul.f32 %v5000_v58, %v4477_v56  ;;  %v2990_v49 = vld [vmem:[%s5572_s16 + $0xccc] sm:$0xf]  ;;  %v4110_v9 = vadd.f32 %v8760_v47, %v8759_v51  ;;  %v5002_v15 = vld [vmem:[%s8347_s1 + $0x4e0] sm:$0xff]  ;;  %v5005_v18 = vld [vmem:[%s8347_s1 + $0x4f8] sm:$0xff] }
 0x4d1   : > { %3894 = vadd.xlane.f32.xlu1 %v3893_v40  ;;  %v5063_v0 = vmul.f32 %v4999_v50, %v4476_v45  ;;  %v4363_v40 = vmul.f32 0.0025510204, %v4107_v35  ;;  %v3246_v32 = vunpack.c.l.bf16 %v2990_v49  ;;  %v3245_v45 = vunpack.c.l.bf16 %v2989_v30  ;;  %v8762_v50 = vld [vmem:[#allocation257_spill] sm:$0xff]  ;;  %v5006_v49 = vld [vmem:[%s8347_s1 + $0x500] sm:$0xff] }
 0x4d2   : > { %v5062_v10 = vmul.f32 %v4998_v41, %v4475_v54  ;;  %3891 = vadd.xlane.f32.xlu0 %v3890_v55  ;;  %v4364_v55 = vmul.f32 0.0025510204, %v4108_v12  ;;  %v4745_v54 = vadd.f32 %v4744_v48, %v4682_v22  ;;  %v4366_v6 = vmul.f32 0.0025510204, %v4110_v9  ;;  %v8767_v35 = vld [vmem:[#allocation261_spill] sm:$0xff] }
 0x4d3   : > { %v3772_v2 = vpop.xlane.xlu2 %3771  ;;  %v4109_v63 = vadd.f32 %v8762_v50, %v8761_v61  ;;  %v3914_v58 = vsel %vm3298_vm0, %v3247_v26, 0.0  ;;  %v4111_v37 = vadd.f32 %v8767_v35, %v8766_v27  ;;  %v4621_v12 = vld [vmem:[%s8347_s1 + $0x150] sm:$0xff]  ;;  %v5007_v61 = vld [vmem:[%s8347_s1 + $0x508] sm:$0xff] }
 0x4d4   : > { %v5125_v14 = vadd.f32 %v5124_v1, %v5062_v10  ;;  %v4224_v3 = vadd.f32 %v3772_v2, %v8752_v53  ;;  %v3769_v46 = vpop.xlane.xlu1 %3768  ;;  %v4619_v1 = vld [vmem:[%s8347_s1 + $0x140] sm:$0xff]  ;;  %v8765_v2 = vld [vmem:[#allocation121_spill] sm:$0xff] }
 0x4d5   : > { %v3766_v44 = vpop.xlane.xlu0 %3765  ;;  %v4223_v57 = vadd.f32 %v3769_v46, %v8753_v52  ;;  %v4683_v53 = vmul.f32 %v4619_v1, %v4363_v40  ;;  %v5004_v46 = vld [vmem:[%s8347_s1 + $0x4f0] sm:$0xff]  ;;  %v4365_v17 = vmul.f32 0.0025510204, %v4109_v63  ;;  %v4367_v9 = vmul.f32 0.0025510204, %v4111_v37  ;;  %v8770_v1 = vld [vmem:[#allocation124_spill] sm:$0xff] }
 0x4d6   : > { %v5126_v4 = vadd.f32 %v5125_v14, %v5063_v0  ;;  %v4222_v24 = vadd.f32 %v3766_v44, %v8754_v7  ;;  %v4480_v59 = vmul.f32 0.0025510204, %v4224_v3  ;;  %v8764_v0 = vld [vmem:[#allocation126_spill] sm:$0xff]  ;;  %v4684_v3 = vmul.f32 %v4620_v60, %v4364_v55  ;;  %v2992_v7 = vld [vmem:[%s5572_s16 + $0xcec] sm:$0xf] }
 0x4d7   : > { %v4479_v11 = vmul.f32 0.0025510204, %v4223_v57  ;;  %v3911_v44 = vsel %vm3298_vm0, %v3246_v32, 0.0  ;;  %v4746_v13 = vadd.f32 %v4745_v54, %v4683_v53  ;;  %v4685_v47 = vmul.f32 %v4621_v12, %v4365_v17  ;;  %v8769_v32 = vld [vmem:[#allocation129_spill] sm:$0xff]  ;;  %v2997_v60 = vld [vmem:[%s5572_s16 + $0xd3c] sm:$0xf] }
 0x4d8   : > { %v5127_v39 = vadd.f32 %v5126_v4, %v5064_v43  ;;  %v4478_v5 = vmul.f32 0.0025510204, %v4222_v24  ;;  %3906 = vadd.xlane.f32.xlu2 %v3905_v21  ;;  %v5067_v56 = vmul.f32 %v5003_v62, %v4480_v59  ;;  %v3908_v21 = vsel %vm3298_vm0, %v3245_v45, 0.0  ;;  %v2993_v43 = vld [vmem:[%s5572_s16 + $0xcfc] sm:$0xf]  ;;  %v8768_v59 = vld [vmem:[#allocation128_spill] sm:$0xff] }
 0x4d9   : > { %3903 = vadd.xlane.f32.xlu1 %v3902_v36  ;;  %v5066_v34 = vmul.f32 %v5002_v15, %v4479_v11  ;;  %v4622_v24 = vld [vmem:[%s8347_s1 + $0x158] sm:$0xff]  ;;  %v3249_v48 = vunpack.c.l.bf16 %v2993_v43  ;;  %v3248_v11 = vunpack.c.l.bf16 %v2992_v7  ;;  %v3923_v62 = vsel %vm3298_vm0, %v3250_v38, 0.0 }
 0x4da   : > { %v5065_v41 = vmul.f32 %v5001_v8, %v4478_v5  ;;  %3900 = vadd.xlane.f32.xlu0 %v3899_v42  ;;  %v4747_v42 = vadd.f32 %v4746_v13, %v4684_v3  ;;  %v5008_v3 = vld [vmem:[%s8347_s1 + $0x510] sm:$0xff] }
 0x4db   : > { %v3781_v31 = vpop.xlane.xlu2 %3780  ;;  %v3920_v50 = vsel %vm3298_vm0, %v3249_v48, 0.0  ;;  %v3917_v63 = vsel %vm3298_vm0, %v3248_v11, 0.0  ;;  %v8778_v11 = vld [vmem:[#allocation132_spill] sm:$0xff] }
 0x4dc   : > { %v5128_v25 = vadd.f32 %v5127_v39, %v5065_v41  ;;  %v3778_v10 = vpop.xlane.xlu1 %3777  ;;  %v4227_v23 = vadd.f32 %v3781_v31, %v8763_v33  ;;  %v4686_v39 = vmul.f32 %v4622_v24, %v4366_v6  ;;  %v4623_v41 = vld [vmem:[%s8347_s1 + $0x160] sm:$0xff]  ;;  %v8772_v31 = vld [vmem:[#allocation260_spill] sm:$0xff] }
 0x4dd   : > { %v3775_v28 = vpop.xlane.xlu0 %3774  ;;  %v4226_v14 = vadd.f32 %v3778_v10, %v8764_v0  ;;  %v8773_v10 = vld [vmem:[#allocation49_spill] sm:$0xff]  ;;  %v2995_v0 = vld [vmem:[%s5572_s16 + $0xd1c] sm:$0xf]  ;;  %v4624_v24 = vld [vmem:[%s8347_s1 + $0x168] sm:$0xff] }
 0x4de   : > { %v5129_v20 = vadd.f32 %v5128_v25, %v5066_v34  ;;  %v4225_v29 = vadd.f32 %v3775_v28, %v8765_v2  ;;  %v4483_v8 = vmul.f32 0.0025510204, %v4227_v23  ;;  %v4748_v34 = vadd.f32 %v4747_v42, %v4685_v47  ;;  %v8771_v25 = vld [vmem:[#allocation50_spill] sm:$0xff]  ;;  %v8774_v28 = vld [vmem:[#allocation259_spill] sm:$0xff]  ;;  %v8775_v2 = vld [vmem:[#allocation48_spill] sm:$0xff] }
 0x4df   : > { %v4482_v4 = vmul.f32 0.0025510204, %v4226_v14  ;;  %v4112_v6 = vadd.f32 %v8772_v31, %v8771_v25  ;;  %v4687_v14 = vmul.f32 %v4623_v41, %v4367_v9  ;;  %v8780_v9 = vld [vmem:[#allocation52_spill] sm:$0xff] }
 0x4e0   : > { %v5130_v52 = vadd.f32 %v5129_v20, %v5067_v56  ;;  %v4481_v57 = vmul.f32 0.0025510204, %v4225_v29  ;;  %3915 = vadd.xlane.f32.xlu2 %v3914_v58  ;;  %v5070_v40 = vmul.f32 %v5006_v49, %v4483_v8  ;;  %v2996_v56 = vld [vmem:[%s5572_s16 + $0xd2c] sm:$0xf]  ;;  %v4113_v58 = vadd.f32 %v8774_v28, %v8773_v10  ;;  %v8777_v49 = vld [vmem:[#allocation131_spill] sm:$0xff]  ;;  %v5012_v10 = vld [vmem:[%s8347_s1 + $0x530] sm:$0xff] }
 0x4e1   : > { %3912 = vadd.xlane.f32.xlu1 %v3911_v44  ;;  %v5069_v5 = vmul.f32 %v5005_v18, %v4482_v4  ;;  %v8776_v29 = vld [vmem:[#allocation264_spill] sm:$0xff]  ;;  %v5009_v44 = vld [vmem:[%s8347_s1 + $0x518] sm:$0xff]  ;;  %v4368_v43 = vmul.f32 0.0025510204, %v4112_v6  ;;  %v4749_v4 = vadd.f32 %v4748_v34, %v4686_v39 }
 0x4e2   : > { %v5068_v36 = vmul.f32 %v5004_v46, %v4481_v57  ;;  %3909 = vadd.xlane.f32.xlu0 %v3908_v21  ;;  %v4114_v16 = vadd.f32 %v8776_v29, %v8775_v2  ;;  %v3253_v46 = vunpack.c.l.bf16 %v2997_v60  ;;  %v3251_v57 = vunpack.c.l.bf16 %v2995_v0  ;;  %v2998_v34 = vld [vmem:[%s5572_s16 + $0xd4c] sm:$0xf]  ;;  %v4627_v2 = vld [vmem:[%s8347_s1 + $0x180] sm:$0xff] }
 0x4e3   : > { %v3790_v51 = vpop.xlane.xlu2 %3789  ;;  %v4369_v7 = vmul.f32 0.0025510204, %v4113_v58  ;;  %v4750_v35 = vadd.f32 %v4749_v4, %v4687_v14  ;;  %v4688_v47 = vmul.f32 %v4624_v24, %v4368_v43  ;;  %v5011_v31 = vld [vmem:[%s8347_s1 + $0x528] sm:$0xff]  ;;  %v3254_v58 = vunpack.c.l.bf16 %v2998_v34 }
 0x4e4   : > { %v5131_v30 = vadd.f32 %v5130_v52, %v5068_v36  ;;  %v4230_v15 = vadd.f32 %v3790_v51, %v8768_v59  ;;  %v3787_v26 = vpop.xlane.xlu1 %3786  ;;  %v3252_v52 = vunpack.c.l.bf16 %v2996_v56  ;;  %v4370_v37 = vmul.f32 0.0025510204, %v4114_v16  ;;  %v4625_v36 = vld [vmem:[%s8347_s1 + $0x170] sm:$0xff]  ;;  %v3000_v51 = vld [vmem:[%s5572_s16 + $0xd6c] sm:$0xf]  ;;  %v8781_v59 = vld [vmem:[#allocation262_spill] sm:$0xff] }
 0x4e5   : > { %v3784_v22 = vpop.xlane.xlu0 %3783  ;;  %v4229_v45 = vadd.f32 %v3787_v26, %v8769_v32  ;;  %v3932_v8 = vsel %vm3298_vm0, %v3253_v46, 0.0  ;;  %v4626_v26 = vld [vmem:[%s8347_s1 + $0x178] sm:$0xff]  ;;  %v3926_v41 = vsel %vm3298_vm0, %v3251_v57, 0.0  ;;  %v8783_v32 = vld [vmem:[#allocation263_spill] sm:$0xff]  ;;  %v4751_v25 = vadd.f32 %v4750_v35, %v4688_v47 }
 0x4e6   : > { %v5132_v55 = vadd.f32 %v5131_v30, %v5069_v5  ;;  %v4228_v54 = vadd.f32 %v3784_v22, %v8770_v1  ;;  %v4486_v53 = vmul.f32 0.0025510204, %v4230_v15  ;;  %v8779_v5 = vld [vmem:[#allocation127_spill] sm:$0xff]  ;;  %v4116_v15 = vadd.f32 %v8781_v59, %v8780_v9  ;;  %v8786_v46 = vld [vmem:[#allocation134_spill] sm:$0xff] }
 0x4e7   : > { %v4485_v20 = vmul.f32 0.0025510204, %v4229_v45  ;;  %v5010_v22 = vld [vmem:[%s8347_s1 + $0x520] sm:$0xff]  ;;  %v3256_v6 = vunpack.c.l.bf16 %v3000_v51  ;;  %v4690_v56 = vmul.f32 %v4626_v26, %v4370_v37  ;;  %v5013_v37 = vld [vmem:[%s8347_s1 + $0x538] sm:$0xff]  ;;  %v5015_v26 = vld [vmem:[%s8347_s1 + $0x548] sm:$0xff] }
 0x4e8   : > { %v5133_v33 = vadd.f32 %v5132_v55, %v5070_v40  ;;  %v4484_v23 = vmul.f32 0.0025510204, %v4228_v54  ;;  %3924 = vadd.xlane.f32.xlu2 %v3923_v62  ;;  %v5073_v18 = vmul.f32 %v5009_v44, %v4486_v53  ;;  %v3929_v62 = vsel %vm3298_vm0, %v3252_v52, 0.0  ;;  %v2999_v40 = vld [vmem:[%s5572_s16 + $0xd5c] sm:$0xf]  ;;  %v8782_v55 = vld [vmem:[#allocation53_spill] sm:$0xff] }
 0x4e9   : > { %3921 = vadd.xlane.f32.xlu1 %v3920_v50  ;;  %v5072_v17 = vmul.f32 %v5008_v3, %v4485_v20  ;;  %v4115_v45 = vadd.f32 %v8783_v32, %v8782_v55  ;;  %v3255_v28 = vunpack.c.l.bf16 %v2999_v40  ;;  %v4372_v20 = vmul.f32 0.0025510204, %v4116_v15  ;;  %v8784_v16 = vld [vmem:[#allocation51_spill] sm:$0xff]  ;;  %v4629_v15 = vld [vmem:[%s8347_s1 + $0x190] sm:$0xff] }
 0x4ea   : > { %v5071_v21 = vmul.f32 %v5007_v61, %v4484_v23  ;;  %3918 = vadd.xlane.f32.xlu0 %v3917_v63  ;;  %v4689_v63 = vmul.f32 %v4625_v36, %v4369_v7  ;;  %v8785_v53 = vld [vmem:[#allocation267_spill] sm:$0xff]  ;;  %v3941_v4 = vsel %vm3298_vm0, %v3256_v6, 0.0 }
 0x4eb   : > { %v3799_v27 = vpop.xlane.xlu2 %3798  ;;  %v4117_v3 = vadd.f32 %v8785_v53, %v8784_v16  ;;  %v8787_v7 = vld [vmem:[#allocation135_spill] sm:$0xff]  ;;  %v8797_v16 = vld [vmem:[#allocation270_spill] sm:$0xff] }
 0x4ec   : > { %v5134_v13 = vadd.f32 %v5133_v33, %v5071_v21  ;;  %v3796_v38 = vpop.xlane.xlu1 %3795  ;;  %v4233_v48 = vadd.f32 %v3799_v27, %v8777_v49  ;;  %v4371_v33 = vmul.f32 0.0025510204, %v4115_v45  ;;  %v4752_v29 = vadd.f32 %v4751_v25, %v4689_v63  ;;  %v3003_v27 = vld [vmem:[%s5572_s16 + $0xd9c] sm:$0xf]  ;;  %v5014_v9 = vld [vmem:[%s8347_s1 + $0x540] sm:$0xff]  ;;  %v8792_v45 = vld [vmem:[#allocation265_spill] sm:$0xff] }
 0x4ed   : > { %v3793_v12 = vpop.xlane.xlu0 %3792  ;;  %v4232_v39 = vadd.f32 %v3796_v38, %v8778_v11  ;;  %v3935_v38 = vsel %vm3298_vm0, %v3254_v58, 0.0  ;;  %v4628_v11 = vld [vmem:[%s8347_s1 + $0x188] sm:$0xff]  ;;  %v4373_v51 = vmul.f32 0.0025510204, %v4117_v3  ;;  %v3259_v59 = vunpack.c.l.bf16 %v3003_v27  ;;  %v8791_v32 = vld [vmem:[#allocation55_spill] sm:$0xff]  ;;  %v8794_v58 = vld [vmem:[#allocation138_spill] sm:$0xff] }
 0x4ee   : > { %v5135_v42 = vadd.f32 %v5134_v13, %v5072_v17  ;;  %v4231_v30 = vadd.f32 %v3793_v12, %v8779_v5  ;;  %v4489_v61 = vmul.f32 0.0025510204, %v4233_v48  ;;  %v8788_v17 = vld [vmem:[#allocation130_spill] sm:$0xff]  ;;  %v4753_v35 = vadd.f32 %v4752_v29, %v4690_v56  ;;  %v3002_v12 = vld [vmem:[%s5572_s16 + $0xd8c] sm:$0xf]  ;;  %v5016_v3 = vld [vmem:[%s8347_s1 + $0x550] sm:$0xff] }
 0x4ef   : > { %v4488_v1 = vmul.f32 0.0025510204, %v4232_v39  ;;  %v3001_v48 = vld [vmem:[%s5572_s16 + $0xd7c] sm:$0xf]  ;;  %v8789_v39 = vld [vmem:[#allocation56_spill] sm:$0xff]  ;;  %v4692_v55 = vmul.f32 %v4628_v11, %v4372_v20  ;;  %v3950_v63 = vsel %vm3298_vm0, %v3259_v59, 0.0 }
 0x4f0   : > { %v5136_v54 = vadd.f32 %v5135_v42, %v5073_v18  ;;  %v4487_v60 = vmul.f32 0.0025510204, %v4231_v30  ;;  %3933 = vadd.xlane.f32.xlu2 %v3932_v8  ;;  %v5076_v52 = vmul.f32 %v5012_v10, %v4489_v61  ;;  %v3938_v18 = vsel %vm3298_vm0, %v3255_v28, 0.0  ;;  %v8790_v5 = vld [vmem:[#allocation266_spill] sm:$0xff]  ;;  %v8793_v10 = vld [vmem:[#allocation137_spill] sm:$0xff]  ;;  %v4632_v11 = vld [vmem:[%s8347_s1 + $0x1a8] sm:$0xff] }
 0x4f1   : > { %3930 = vadd.xlane.f32.xlu1 %v3929_v62  ;;  %v5075_v23 = vmul.f32 %v5011_v31, %v4488_v1  ;;  %v4691_v8 = vmul.f32 %v4627_v2, %v4371_v33  ;;  %v4118_v30 = vadd.f32 %v8790_v5, %v8789_v39  ;;  %v3257_v40 = vunpack.c.l.bf16 %v3001_v48  ;;  %v8795_v33 = vld [vmem:[#allocation133_spill] sm:$0xff]  ;;  %v8796_v29 = vld [vmem:[#allocation54_spill] sm:$0xff]  ;;  %v4631_v48 = vld [vmem:[%s8347_s1 + $0x1a0] sm:$0xff] }
 0x4f2   : > { %v5074_v50 = vmul.f32 %v5010_v22, %v4487_v60  ;;  %3927 = vadd.xlane.f32.xlu0 %v3926_v41  ;;  %v3258_v41 = vunpack.c.l.bf16 %v3002_v12  ;;  %v4119_v1 = vadd.f32 %v8792_v45, %v8791_v32  ;;  %v4693_v31 = vmul.f32 %v4629_v15, %v4373_v51  ;;  %v5017_v27 = vld [vmem:[%s8347_s1 + $0x558] sm:$0xff]  ;;  %v8802_v32 = vld [vmem:[#allocation136_spill] sm:$0xff] }
 0x4f3   : > { %v3808_v14 = vpop.xlane.xlu2 %3807  ;;  %v4754_v62 = vadd.f32 %v4753_v35, %v4691_v8  ;;  %v4374_v25 = vmul.f32 0.0025510204, %v4118_v30  ;;  %v4120_v53 = vadd.f32 %v8797_v16, %v8796_v29  ;;  %v4633_v16 = vld [vmem:[%s8347_s1 + $0x1b0] sm:$0xff] }
 0x4f4   : > { %v5137_v0 = vadd.f32 %v5136_v54, %v5074_v50  ;;  %v4236_v44 = vadd.f32 %v3808_v14, %v8786_v46  ;;  %v3805_v21 = vpop.xlane.xlu1 %3804  ;;  %v4630_v14 = vld [vmem:[%s8347_s1 + $0x198] sm:$0xff]  ;;  %v3947_v46 = vsel %vm3298_vm0, %v3258_v41, 0.0 }
 0x4f5   : > { %v3802_v43 = vpop.xlane.xlu0 %3801  ;;  %v4235_v24 = vadd.f32 %v3805_v21, %v8787_v7  ;;  %v4755_v2 = vadd.f32 %v4754_v62, %v4692_v55  ;;  %v3005_v21 = vld [vmem:[%s5572_s16 + $0xdbc] sm:$0xf]  ;;  %v4694_v12 = vmul.f32 %v4630_v14, %v4374_v25  ;;  %v4376_v8 = vmul.f32 0.0025510204, %v4120_v53 }
 0x4f6   : > { %v5138_v57 = vadd.f32 %v5137_v0, %v5075_v23  ;;  %v4234_v13 = vadd.f32 %v3802_v43, %v8788_v17  ;;  %v4492_v47 = vmul.f32 0.0025510204, %v4236_v44  ;;  %v3006_v0 = vld [vmem:[%s5572_s16 + $0xdcc] sm:$0xf]  ;;  %v3944_v44 = vsel %vm3298_vm0, %v3257_v40, 0.0  ;;  %v8799_v17 = vld [vmem:[#allocation269_spill] sm:$0xff] }
 0x4f7   : > { %v4491_v36 = vmul.f32 0.0025510204, %v4235_v24  ;;  %v4756_v7 = vadd.f32 %v4755_v2, %v4693_v31  ;;  %v8798_v24 = vld [vmem:[#allocation59_spill] sm:$0xff]  ;;  %v3262_v35 = vunpack.c.l.bf16 %v3006_v0  ;;  %v8801_v40 = vld [vmem:[#allocation141_spill] sm:$0xff]  ;;  %v5021_v53 = vld [vmem:[%s8347_s1 + $0x578] sm:$0xff] }
 0x4f8   : > { %v5139_v42 = vadd.f32 %v5138_v57, %v5076_v52  ;;  %v4490_v49 = vmul.f32 0.0025510204, %v4234_v13  ;;  %3942 = vadd.xlane.f32.xlu2 %v3941_v4  ;;  %v5079_v6 = vmul.f32 %v5015_v26, %v4492_v47  ;;  %v3004_v57 = vld [vmem:[%s5572_s16 + $0xdac] sm:$0xf]  ;;  %v4121_v13 = vadd.f32 %v8799_v17, %v8798_v24  ;;  %v5020_v2 = vld [vmem:[%s8347_s1 + $0x570] sm:$0xff] }
 0x4f9   : > { %3939 = vadd.xlane.f32.xlu1 %v3938_v18  ;;  %v5078_v54 = vmul.f32 %v5014_v9, %v4491_v36  ;;  %v5018_v36 = vld [vmem:[%s8347_s1 + $0x560] sm:$0xff]  ;;  %v4757_v51 = vadd.f32 %v4756_v7, %v4694_v12  ;;  %v8800_v9 = vld [vmem:[#allocation140_spill] sm:$0xff] }
 0x4fa   : > { %v5077_v22 = vmul.f32 %v5013_v37, %v4490_v49  ;;  %3936 = vadd.xlane.f32.xlu0 %v3935_v38  ;;  %v4375_v37 = vmul.f32 0.0025510204, %v4119_v1  ;;  %v3260_v49 = vunpack.c.l.bf16 %v3004_v57  ;;  %v4377_v47 = vmul.f32 0.0025510204, %v4121_v13  ;;  %v3009_v1 = vld [vmem:[%s5572_s16 + $0xdfc] sm:$0xf] }
 0x4fb   : > { %v3817_v34 = vpop.xlane.xlu2 %3816  ;;  %v3265_v29 = vunpack.c.l.bf16 %v3009_v1  ;;  %v8807_v12 = vld [vmem:[#allocation143_spill] sm:$0xff] }
 0x4fc   : > { %v5140_v60 = vadd.f32 %v5139_v42, %v5077_v22  ;;  %v3814_v61 = vpop.xlane.xlu1 %3813  ;;  %v4239_v28 = vadd.f32 %v3817_v34, %v8793_v10  ;;  %v3261_v42 = vunpack.c.l.bf16 %v3005_v21  ;;  %v3959_v22 = vsel %vm3298_vm0, %v3262_v35, 0.0  ;;  %v5019_v34 = vld [vmem:[%s8347_s1 + $0x568] sm:$0xff] }
 0x4fd   : > { %v3811_v50 = vpop.xlane.xlu0 %3810  ;;  %v4238_v20 = vadd.f32 %v3814_v61, %v8794_v58  ;;  %v3953_v31 = vsel %vm3298_vm0, %v3260_v49, 0.0  ;;  %v8803_v61 = vld [vmem:[#allocation58_spill] sm:$0xff]  ;;  %v4697_v7 = vmul.f32 %v4633_v16, %v4377_v47  ;;  %v3968_v35 = vsel %vm3298_vm0, %v3265_v29, 0.0  ;;  %v8809_v49 = vld [vmem:[#allocation139_spill] sm:$0xff] }
 0x4fe   : > { %v5141_v56 = vadd.f32 %v5140_v60, %v5078_v54  ;;  %v4237_v23 = vadd.f32 %v3811_v50, %v8795_v33  ;;  %v4495_v18 = vmul.f32 0.0025510204, %v4239_v28  ;;  %v4695_v54 = vmul.f32 %v4631_v48, %v4375_v37  ;;  %v8804_v50 = vld [vmem:[#allocation268_spill] sm:$0xff]  ;;  %v3007_v58 = vld [vmem:[%s5572_s16 + $0xddc] sm:$0xf]  ;;  %v8805_v33 = vld [vmem:[#allocation57_spill] sm:$0xff] }
 0x4ff   : > { %v4494_v43 = vmul.f32 0.0025510204, %v4238_v20  ;;  %v4696_v60 = vmul.f32 %v4632_v11, %v4376_v8  ;;  %v3956_v25 = vsel %vm3298_vm0, %v3261_v42, 0.0  ;;  %v3263_v21 = vunpack.c.l.bf16 %v3007_v58  ;;  %v4634_v37 = vld [vmem:[%s8347_s1 + $0x1b8] sm:$0xff]  ;;  %v3012_v11 = vld [vmem:[%s5572_s16 + $0xe2c] sm:$0xf] }
 0x500   : > { %v5142_v4 = vadd.f32 %v5141_v56, %v5079_v6  ;;  %v4493_v52 = vmul.f32 0.0025510204, %v4237_v23  ;;  %3951 = vadd.xlane.f32.xlu2 %v3950_v63  ;;  %v5082_v62 = vmul.f32 %v5018_v36, %v4495_v18  ;;  %v3008_v6 = vld [vmem:[%s5572_s16 + $0xdec] sm:$0xf]  ;;  %v4122_v63 = vadd.f32 %v8804_v50, %v8803_v61  ;;  %v8806_v23 = vld [vmem:[#allocation273_spill] sm:$0xff]  ;;  %v4635_v18 = vld [vmem:[%s8347_s1 + $0x1c0] sm:$0xff] }
 0x501   : > { %3948 = vadd.xlane.f32.xlu1 %v3947_v46  ;;  %v5081_v39 = vmul.f32 %v5017_v27, %v4494_v43  ;;  %v4758_v20 = vadd.f32 %v4757_v51, %v4695_v54  ;;  %v4123_v0 = vadd.f32 %v8806_v23, %v8805_v33  ;;  %v8808_v36 = vld [vmem:[#allocation144_spill] sm:$0xff]  ;;  %v5022_v47 = vld [vmem:[%s8347_s1 + $0x580] sm:$0xff]  ;;  %v8816_v29 = vld [vmem:[#allocation146_spill] sm:$0xff] }
 0x502   : > { %v5080_v38 = vmul.f32 %v5016_v3, %v4493_v52  ;;  %3945 = vadd.xlane.f32.xlu0 %v3944_v44  ;;  %v3264_v44 = vunpack.c.l.bf16 %v3008_v6  ;;  %v4378_v43 = vmul.f32 0.0025510204, %v4122_v63  ;;  %v8814_v54 = vld [vmem:[#allocation60_spill] sm:$0xff] }
 0x503   : > { %v3826_v30 = vpop.xlane.xlu2 %3825  ;;  %v4759_v46 = vadd.f32 %v4758_v20, %v4696_v60  ;;  %v4379_v24 = vmul.f32 0.0025510204, %v4123_v0  ;;  %v8815_v60 = vld [vmem:[#allocation276_spill] sm:$0xff] }
 0x504   : > { %v5143_v5 = vadd.f32 %v5142_v4, %v5080_v38  ;;  %v4242_v59 = vadd.f32 %v3826_v30, %v8800_v9  ;;  %v3823_v15 = vpop.xlane.xlu1 %3822  ;;  %v8811_v30 = vld [vmem:[#allocation272_spill] sm:$0xff]  ;;  %v3965_v9 = vsel %vm3298_vm0, %v3264_v44, 0.0  ;;  %v4637_v44 = vld [vmem:[%s8347_s1 + $0x1d0] sm:$0xff] }
 0x505   : > { %v3820_v26 = vpop.xlane.xlu0 %3819  ;;  %v4241_v55 = vadd.f32 %v3823_v15, %v8801_v40  ;;  %v3011_v15 = vld [vmem:[%s5572_s16 + $0xe1c] sm:$0xf]  ;;  %v4699_v1 = vmul.f32 %v4635_v18, %v4379_v24  ;;  %v4636_v20 = vld [vmem:[%s8347_s1 + $0x1c8] sm:$0xff] }
 0x506   : > { %v5144_v41 = vadd.f32 %v5143_v5, %v5081_v39  ;;  %v4240_v45 = vadd.f32 %v3820_v26, %v8802_v32  ;;  %v4498_v14 = vmul.f32 0.0025510204, %v4242_v59  ;;  %v4760_v39 = vadd.f32 %v4759_v46, %v4697_v7  ;;  %v8810_v5 = vld [vmem:[#allocation62_spill] sm:$0xff]  ;;  %v8812_v26 = vld [vmem:[#allocation61_spill] sm:$0xff]  ;;  %v3010_v32 = vld [vmem:[%s5572_s16 + $0xe0c] sm:$0xf] }
 0x507   : > { %v4497_v56 = vmul.f32 0.0025510204, %v4241_v55  ;;  %v4124_v51 = vadd.f32 %v8811_v30, %v8810_v5  ;;  %v3962_v59 = vsel %vm3298_vm0, %v3263_v21, 0.0  ;;  %v3015_v24 = vld [vmem:[%s5572_s16 + $0xe5c] sm:$0xf] }
 0x508   : > { %v5145_v10 = vadd.f32 %v5144_v41, %v5082_v62  ;;  %v4496_v28 = vmul.f32 0.0025510204, %v4240_v45  ;;  %3960 = vadd.xlane.f32.xlu2 %v3959_v22  ;;  %v5085_v17 = vmul.f32 %v5021_v53, %v4498_v14  ;;  %v8813_v22 = vld [vmem:[#allocation271_spill] sm:$0xff]  ;;  %v4698_v45 = vmul.f32 %v4634_v37, %v4378_v43  ;;  %v4638_v37 = vld [vmem:[%s8347_s1 + $0x1d8] sm:$0xff] }
 0x509   : > { %3957 = vadd.xlane.f32.xlu1 %v3956_v25  ;;  %v5084_v4 = vmul.f32 %v5020_v2, %v4497_v56  ;;  %v4125_v62 = vadd.f32 %v8813_v22, %v8812_v26  ;;  %v5023_v25 = vld [vmem:[%s8347_s1 + $0x588] sm:$0xff]  ;;  %v4380_v50 = vmul.f32 0.0025510204, %v4124_v51  ;;  %v5024_v56 = vld [vmem:[%s8347_s1 + $0x590] sm:$0xff]  ;;  %v5025_v18 = vld [vmem:[%s8347_s1 + $0x598] sm:$0xff] }
 0x50a   : > { %v5083_v3 = vmul.f32 %v5019_v34, %v4496_v28  ;;  %3954 = vadd.xlane.f32.xlu0 %v3953_v31  ;;  %v4126_v34 = vadd.f32 %v8815_v60, %v8814_v54  ;;  %v3268_v31 = vunpack.c.l.bf16 %v3012_v11  ;;  %v4761_v63 = vadd.f32 %v4760_v39, %v4698_v45  ;;  %v3013_v5 = vld [vmem:[%s5572_s16 + $0xe3c] sm:$0xf]  ;;  %v8823_v60 = vld [vmem:[#allocation63_spill] sm:$0xff] }
 0x50b   : > { %v3835_v57 = vpop.xlane.xlu2 %3834  ;;  %v3266_v28 = vunpack.c.l.bf16 %v3010_v32  ;;  %v4381_v58 = vmul.f32 0.0025510204, %v4125_v62 }
 0x50c   : > { %v5146_v52 = vadd.f32 %v5145_v10, %v5083_v3  ;;  %v3832_v13 = vpop.xlane.xlu1 %3831  ;;  %v4245_v8 = vadd.f32 %v3835_v57, %v8807_v12  ;;  %v3267_v10 = vunpack.c.l.bf16 %v3011_v15  ;;  %v4762_v14 = vadd.f32 %v4761_v63, %v4699_v1  ;;  %v8818_v57 = vld [vmem:[#allocation142_spill] sm:$0xff]  ;;  %v4639_v63 = vld [vmem:[%s8347_s1 + $0x1e0] sm:$0xff] }
 0x50d   : > { %v3829_v27 = vpop.xlane.xlu0 %3828  ;;  %v4244_v42 = vadd.f32 %v3832_v13, %v8808_v36  ;;  %v4382_v2 = vmul.f32 0.0025510204, %v4126_v34  ;;  %v3977_v46 = vsel %vm3298_vm0, %v3268_v31, 0.0  ;;  %v8819_v13 = vld [vmem:[#allocation64_spill] sm:$0xff]  ;;  %v3971_v12 = vsel %vm3298_vm0, %v3266_v28, 0.0  ;;  %v8821_v36 = vld [vmem:[#allocation65_spill] sm:$0xff] }
 0x50e   : > { %v5147_v38 = vadd.f32 %v5146_v52, %v5084_v4  ;;  %v4243_v48 = vadd.f32 %v3829_v27, %v8809_v49  ;;  %v4501_v6 = vmul.f32 0.0025510204, %v4245_v8  ;;  %v8817_v4 = vld [vmem:[#allocation147_spill] sm:$0xff]  ;;  %v8820_v27 = vld [vmem:[#allocation274_spill] sm:$0xff]  ;;  %v3014_v8 = vld [vmem:[%s5572_s16 + $0xe4c] sm:$0xf]  ;;  %v4701_v26 = vmul.f32 %v4637_v44, %v4381_v58 }
 0x50f   : > { %v4500_v41 = vmul.f32 0.0025510204, %v4244_v42  ;;  %v8822_v42 = vld [vmem:[#allocation275_spill] sm:$0xff]  ;;  %v4702_v22 = vmul.f32 %v4638_v37, %v4382_v2  ;;  %v3270_v62 = vunpack.c.l.bf16 %v3014_v8  ;;  %v8824_v34 = vld [vmem:[#allocation278_spill] sm:$0xff]  ;;  %v5028_v2 = vld [vmem:[%s8347_s1 + $0x5b0] sm:$0xff] }
 0x510   : > { %v5148_v40 = vadd.f32 %v5147_v38, %v5085_v17  ;;  %v4499_v55 = vmul.f32 0.0025510204, %v4243_v48  ;;  %3969 = vadd.xlane.f32.xlu2 %v3968_v35  ;;  %v5088_v21 = vmul.f32 %v5024_v56, %v4501_v6  ;;  %v4700_v17 = vmul.f32 %v4636_v20, %v4380_v50  ;;  %v8826_v58 = vld [vmem:[#allocation150_spill] sm:$0xff] }
 0x511   : > { %3966 = vadd.xlane.f32.xlu1 %v3965_v9  ;;  %v5087_v33 = vmul.f32 %v5023_v25, %v4500_v41  ;;  %v4128_v35 = vadd.f32 %v8820_v27, %v8819_v13  ;;  %v3974_v38 = vsel %vm3298_vm0, %v3267_v10, 0.0  ;;  %v4127_v49 = vadd.f32 %v8822_v42, %v8821_v36  ;;  %v8825_v10 = vld [vmem:[#allocation149_spill] sm:$0xff] }
 0x512   : > { %v5086_v61 = vmul.f32 %v5022_v47, %v4499_v55  ;;  %3963 = vadd.xlane.f32.xlu0 %v3962_v59  ;;  %v4763_v30 = vadd.f32 %v4762_v14, %v4700_v17  ;;  %v5026_v47 = vld [vmem:[%s8347_s1 + $0x5a0] sm:$0xff]  ;;  %v3271_v9 = vunpack.c.l.bf16 %v3015_v24  ;;  %v5027_v59 = vld [vmem:[%s8347_s1 + $0x5a8] sm:$0xff]  ;;  %v3269_v41 = vunpack.c.l.bf16 %v3013_v5  ;;  %v5029_v17 = vld [vmem:[%s8347_s1 + $0x5b8] sm:$0xff] }
 0x513   : > { %v3844_v0 = vpop.xlane.xlu2 %3843  ;;  %v4383_v55 = vmul.f32 0.0025510204, %v4127_v49  ;;  %v4129_v25 = vadd.f32 %v8824_v34, %v8823_v60  ;;  %v4641_v27 = vld [vmem:[%s8347_s1 + $0x1f0] sm:$0xff]  ;;  %v8830_v5 = vld [vmem:[#allocation152_spill] sm:$0xff] }
 0x514   : > { %v5149_v23 = vadd.f32 %v5148_v40, %v5086_v61  ;;  %v4248_v16 = vadd.f32 %v3844_v0, %v8816_v29  ;;  %v3841_v53 = vpop.xlane.xlu1 %3840  ;;  %v4384_v40 = vmul.f32 0.0025510204, %v4128_v35  ;;  %v4764_v54 = vadd.f32 %v4763_v30, %v4701_v26  ;;  %v3018_v0 = vld [vmem:[%s5572_s16 + $0xe8c] sm:$0xf]  ;;  %v8831_v26 = vld [vmem:[#allocation153_spill] sm:$0xff] }
 0x515   : > { %v3838_v3 = vpop.xlane.xlu0 %3837  ;;  %v4247_v52 = vadd.f32 %v3841_v53, %v8817_v4  ;;  %v3986_v50 = vsel %vm3298_vm0, %v3271_v9, 0.0  ;;  %v3983_v29 = vsel %vm3298_vm0, %v3270_v62, 0.0  ;;  %v3017_v53 = vld [vmem:[%s5572_s16 + $0xe7c] sm:$0xf]  ;;  %v4703_v4 = vmul.f32 %v4639_v63, %v4383_v55  ;;  %v8832_v62 = vld [vmem:[#allocation148_spill] sm:$0xff]  ;;  %v5032_v63 = vld [vmem:[%s8347_s1 + $0x5d0] sm:$0xff] }
 0x516   : > { %v5150_v43 = vadd.f32 %v5149_v23, %v5087_v33  ;;  %v4246_v7 = vadd.f32 %v3838_v3, %v8818_v57  ;;  %v4504_v51 = vmul.f32 0.0025510204, %v4248_v16  ;;  %v8827_v33 = vld [vmem:[#allocation145_spill] sm:$0xff]  ;;  %v4765_v14 = vadd.f32 %v4764_v54, %v4702_v22  ;;  %v4642_v55 = vld [vmem:[%s8347_s1 + $0x1f8] sm:$0xff]  ;;  %v3020_v60 = vld [vmem:[%s5572_s16 + $0xeac] sm:$0xf] }
 0x517   : > { %v4503_v48 = vmul.f32 0.0025510204, %v4247_v52  ;;  %v3980_v16 = vsel %vm3298_vm0, %v3269_v41, 0.0  ;;  %v8828_v52 = vld [vmem:[#allocation66_spill] sm:$0xff]  ;;  %v8829_v57 = vld [vmem:[#allocation277_spill] sm:$0xff]  ;;  %v3274_v13 = vunpack.c.l.bf16 %v3018_v0 }
 0x518   : > { %v5151_v11 = vadd.f32 %v5150_v43, %v5088_v21  ;;  %v4502_v39 = vmul.f32 0.0025510204, %v4246_v7  ;;  %3978 = vadd.xlane.f32.xlu2 %v3977_v46  ;;  %v5091_v31 = vmul.f32 %v5027_v59, %v4504_v51  ;;  %v3016_v21 = vld [vmem:[%s5572_s16 + $0xe6c] sm:$0xf]  ;;  %v4130_v7 = vadd.f32 %v8829_v57, %v8828_v52  ;;  %v8835_v52 = vld [vmem:[#allocation151_spill] sm:$0xff] }
 0x519   : > { %3975 = vadd.xlane.f32.xlu1 %v3974_v38  ;;  %v5090_v32 = vmul.f32 %v5026_v47, %v4503_v48  ;;  %v4640_v43 = vld [vmem:[%s8347_s1 + $0x1e8] sm:$0xff]  ;;  %v4385_v24 = vmul.f32 0.0025510204, %v4129_v25  ;;  %v5030_v38 = vld [vmem:[%s8347_s1 + $0x5c0] sm:$0xff]  ;;  %v3272_v8 = vunpack.c.l.bf16 %v3016_v21  ;;  %v3995_v9 = vsel %vm3298_vm0, %v3274_v13, 0.0 }
 0x51a   : > { %v5089_v15 = vmul.f32 %v5025_v18, %v4502_v39  ;;  %3972 = vadd.xlane.f32.xlu0 %v3971_v12  ;;  %v4766_v18 = vadd.f32 %v4765_v14, %v4703_v4  ;;  %v3273_v12 = vunpack.c.l.bf16 %v3017_v53  ;;  %v4704_v36 = vmul.f32 %v4640_v43, %v4384_v40  ;;  %v3021_v40 = vld [vmem:[%s5572_s16 + $0xebc] sm:$0xf]  ;;  %v8834_v43 = vld [vmem:[#allocation156_spill] sm:$0xff] }
 0x51b   : > { %v3853_v1 = vpop.xlane.xlu2 %3852  ;;  %v4705_v39 = vmul.f32 %v4641_v27, %v4385_v24  ;;  %v3989_v54 = vsel %vm3298_vm0, %v3272_v8, 0.0  ;;  %v4967_v24 = vrot.slane %v7448_v19, 4 }
 0x51c   : > { %v5152_v45 = vadd.f32 %v5151_v11, %v5089_v15  ;;  %v3850_v6 = vpop.xlane.xlu1 %3849  ;;  %v4251_v28 = vadd.f32 %v3853_v1, %v8825_v10  ;;  %v4386_v11 = vmul.f32 0.0025510204, %v4130_v7  ;;  %v3992_v1 = vsel %vm3298_vm0, %v3273_v12, 0.0  ;;  %v5033_v10 = vld [vmem:[%s8347_s1 + $0x5d8] sm:$0xff]  ;;  %v3024_v7 = vld [vmem:[%s5572_s16 + $0xeec] sm:$0xf] }
 0x51d   : > { %v3847_v61 = vpop.xlane.xlu0 %3846  ;;  %v4250_v20 = vadd.f32 %v3850_v6, %v8826_v58  ;;  %v3019_v6 = vld [vmem:[%s5572_s16 + $0xe9c] sm:$0xf]  ;;  %v3022_v12 = vld [vmem:[%s5572_s16 + $0xecc] sm:$0xf] }
 0x51e   : > { %v5153_v56 = vadd.f32 %v5152_v45, %v5090_v32  ;;  %v4249_v23 = vadd.f32 %v3847_v61, %v8827_v33  ;;  %v4507_v35 = vmul.f32 0.0025510204, %v4251_v28  ;;  %v4767_v32 = vadd.f32 %v4766_v18, %v4704_v36  ;;  %v5031_v45 = vld [vmem:[%s8347_s1 + $0x5c8] sm:$0xff] }
 0x51f   : > { %v4506_v3 = vmul.f32 0.0025510204, %v4250_v20  ;;  %v4706_v58 = vmul.f32 %v4642_v55, %v4386_v11  ;;  %v3276_v20 = vunpack.c.l.bf16 %v3020_v60  ;;  %v3275_v33 = vunpack.c.l.bf16 %v3019_v6  ;;  %v5035_v36 = vld [vmem:[%s8347_s1 + $0x5e8] sm:$0xff]  ;;  %v8837_v55 = vld [vmem:[#allocation159_spill] sm:$0xff] }
 0x520   : > { %v5154_v46 = vadd.f32 %v5153_v56, %v5091_v31  ;;  %v4505_v44 = vmul.f32 0.0025510204, %v4249_v23  ;;  %3987 = vadd.xlane.f32.xlu2 %v3986_v50  ;;  %v5094_v59 = vmul.f32 %v5030_v38, %v4507_v35  ;;  %v4768_v61 = vadd.f32 %v4767_v32, %v4705_v39  ;;  %v3023_v35 = vld [vmem:[%s5572_s16 + $0xedc] sm:$0xf]  ;;  %v5036_v39 = vld [vmem:[%s8347_s1 + $0x5f0] sm:$0xff] }
 0x521   : > { %3984 = vadd.xlane.f32.xlu1 %v3983_v29  ;;  %v5093_v42 = vmul.f32 %v5029_v17, %v4506_v3  ;;  %v3277_v56 = vunpack.c.l.bf16 %v3021_v40  ;;  %v5034_v17 = vld [vmem:[%s8347_s1 + $0x5e0] sm:$0xff]  ;;  %v4001_v13 = vsel %vm3298_vm0, %v3276_v20, 0.0  ;;  %v3998_v27 = vsel %vm3298_vm0, %v3275_v33, 0.0 }
 0x522   : > { %v5092_v37 = vmul.f32 %v5028_v2, %v4505_v44  ;;  %3981 = vadd.xlane.f32.xlu0 %v3980_v16  ;;  %v4769_v2 = vadd.f32 %v4768_v61, %v4706_v58  ;;  %v8833_v44 = vld [vmem:[#allocation155_spill] sm:$0xff]  ;;  %v4968_v11 = vadd.f32 %v4967_v24, %v7448_v19  ;;  %v5173_v58 = vld [vmem:[%s8347_s1 + $0x608] sm:$0xff] }
 0x523   : > { %v3862_v48 = vpop.xlane.xlu2 %3861  ;;  %v4004_v3 = vsel %vm3298_vm0, %v3277_v56, 0.0 }
 0x524   : > { %v5155_v49 = vadd.f32 %v5154_v46, %v5092_v37  ;;  %v4254_v30 = vadd.f32 %v3862_v48, %v8830_v5  ;;  %v3859_v51 = vpop.xlane.xlu1 %3858  ;;  %v4770_v8 = vrot.slane %v4769_v2, 4  ;;  %v3279_v5 = vunpack.c.l.bf16 %v3023_v35 }
 0x525   : > { %v3856_v47 = vpop.xlane.xlu0 %3855  ;;  %v4253_v22 = vadd.f32 %v3859_v51, %v8831_v26  ;;  %v4969_v60 = vrot.slane %v4968_v11, 2 }
 0x526   : > { %v5156_v15 = vadd.f32 %v5155_v49, %v5093_v42  ;;  %v4252_v41 = vadd.f32 %v3856_v47, %v8832_v62  ;;  %v4510_v50 = vmul.f32 0.0025510204, %v4254_v30  ;;  %v3280_v42 = vunpack.c.l.bf16 %v3024_v7  ;;  %v8840_v7 = vld [vmem:[#allocation157_spill] sm:$0xff] }
 0x527   : > { %v4509_v34 = vmul.f32 0.0025510204, %v4253_v22  ;;  %v3278_v30 = vunpack.c.l.bf16 %v3022_v12  ;;  %v3029_v12 = vld [vmem:[%s5572_s16 + $0xf3c] sm:$0xf] }
 0x528   : > { %v5157_v25 = vadd.f32 %v5156_v15, %v5094_v59  ;;  %v4508_v31 = vmul.f32 0.0025510204, %v4252_v41  ;;  %3996 = vadd.xlane.f32.xlu2 %v3995_v9  ;;  %v5097_v29 = vmul.f32 %v5033_v10, %v4510_v50  ;;  %v4771_v59 = vadd.f32 %v4770_v8, %v4769_v2  ;;  %v8836_v15 = vld [vmem:[#allocation158_spill] sm:$0xff]  ;;  %v3026_v50 = vld [vmem:[%s5572_s16 + $0xf0c] sm:$0xf] }
 0x529   : > { %3993 = vadd.xlane.f32.xlu1 %v3992_v1  ;;  %v5096_v23 = vmul.f32 %v5032_v63, %v4509_v34  ;;  %v4013_v41 = vsel %vm3298_vm0, %v3280_v42, 0.0  ;;  %v5037_v34 = vld [vmem:[%s8347_s1 + $0x5f8] sm:$0xff] }
 0x52a   : > { %v5095_v28 = vmul.f32 %v5031_v45, %v4508_v31  ;;  %3990 = vadd.xlane.f32.xlu0 %v3989_v54  ;;  %v8838_v45 = vld [vmem:[#allocation154_spill] sm:$0xff]  ;;  %v4007_v31 = vsel %vm3298_vm0, %v3278_v30, 0.0  ;;  %v4772_v56 = vrot.slane %v4771_v59, 2 }
 0x52b   : > { %v3871_v14 = vpop.xlane.xlu2 %3870  ;;  %v3027_v54 = vld [vmem:[%s5572_s16 + $0xf1c] sm:$0xf] }
 0x52c   : > { %v5158_v0 = vadd.f32 %v5157_v25, %v5095_v28  ;;  %v3868_v16 = vpop.xlane.xlu1 %3867  ;;  %v4257_v21 = vadd.f32 %v3871_v14, %v8833_v44  ;;  %v4010_v25 = vsel %vm3298_vm0, %v3279_v5, 0.0  ;;  %v3025_v63 = vld [vmem:[%s5572_s16 + $0xefc] sm:$0xf]  ;;  %v3283_v28 = vunpack.c.l.bf16 %v3027_v54 }
 0x52d   : > { %v3865_v53 = vpop.xlane.xlu0 %3864  ;;  %v4256_v4 = vadd.f32 %v3868_v16, %v8834_v43  ;;  %v3282_v14 = vunpack.c.l.bf16 %v3026_v50  ;;  %v3281_v2 = vunpack.c.l.bf16 %v3025_v63 }
 0x52e   : > { %v5159_v46 = vadd.f32 %v5158_v0, %v5096_v23  ;;  %v4255_v57 = vadd.f32 %v3865_v53, %v8835_v52  ;;  %v4513_v49 = vmul.f32 0.0025510204, %v4257_v21  ;;  %v4970_v23 = vadd.f32 %v4969_v60, %v4968_v11  ;;  %v5172_v0 = vld [vmem:[%s8347_s1 + $0x600] sm:$0xff]  ;;  %v8839_v52 = vld [vmem:[#allocation162_spill] sm:$0xff]  ;;  %v8842_v60 = vld [vmem:[#allocation165_spill] sm:$0xff] }
 0x52f   : > { %v4512_v37 = vmul.f32 0.0025510204, %v4256_v4  ;;  %v4773_v53 = vadd.f32 %v4772_v56, %v4771_v59  ;;  %v4022_v21 = vsel %vm3298_vm0, %v3283_v28, 0.0  ;;  %v5175_v11 = vld [vmem:[%s8347_s1 + $0x618] sm:$0xff]  ;;  %v3285_v59 = vunpack.c.l.bf16 %v3029_v12  ;;  %v3032_v28 = vld [vmem:[%s5572_s16 + $0xf6c] sm:$0xf] }
 0x530   : > { %v5160_v18 = vadd.f32 %v5159_v46, %v5097_v29  ;;  %v4511_v38 = vmul.f32 0.0025510204, %v4255_v57  ;;  %4005 = vadd.xlane.f32.xlu2 %v4004_v3  ;;  %v5100_v19 = vmul.f32 %v5036_v39, %v4513_v49  ;;  %v3028_v49 = vld [vmem:[%s5572_s16 + $0xf2c] sm:$0xf] }
 0x531   : > { %4002 = vadd.xlane.f32.xlu1 %v4001_v13  ;;  %v5099_v51 = vmul.f32 %v5035_v36, %v4512_v37  ;;  %v4971_v13 = vrot.slane %v4970_v23, 1  ;;  %v5174_v37 = vld [vmem:[%s8347_s1 + $0x610] sm:$0xff]  ;;  %v4028_v63 = vsel %vm3298_vm0, %v3285_v59, 0.0 }
 0x532   : > { %v5098_v48 = vmul.f32 %v5034_v17, %v4511_v38  ;;  %3999 = vadd.xlane.f32.xlu0 %v3998_v27  ;;  %v3030_v17 = vld [vmem:[%s5572_s16 + $0xf4c] sm:$0xf]  ;;  %v8841_v27 = vld [vmem:[#allocation161_spill] sm:$0xff]  ;;  %v4016_v38 = vsel %vm3298_vm0, %v3281_v2, 0.0 }
 0x533   : > { %v3880_v9 = vpop.xlane.xlu2 %3879  ;;  %v3286_v39 = vunpack.c.l.bf16 %v3030_v17  ;;  %v5178_v2 = vld [vmem:[%s8347_s1 + $0x630] sm:$0xff] }
 0x534   : > { %v5161_v47 = vadd.f32 %v5160_v18, %v5098_v48  ;;  %v4260_v26 = vadd.f32 %v3880_v9, %v8836_v15  ;;  %v3877_v22 = vpop.xlane.xlu1 %3876  ;;  %v4019_v18 = vsel %vm3298_vm0, %v3282_v14, 0.0  ;;  %v4774_v48 = vrot.slane %v4773_v53, 1  ;;  %v3031_v14 = vld [vmem:[%s5572_s16 + $0xf5c] sm:$0xf] }
 0x535   : > { %v3874_v62 = vpop.xlane.xlu0 %3873  ;;  %v4259_v32 = vadd.f32 %v3877_v22, %v8837_v55  ;;  %v3284_v15 = vunpack.c.l.bf16 %v3028_v49  ;;  %v5176_v22 = vld [vmem:[%s8347_s1 + $0x620] sm:$0xff] }
 0x536   : > { %v5162_v40 = vadd.f32 %v5161_v47, %v5099_v51  ;;  %v4258_v1 = vadd.f32 %v3874_v62, %v8838_v45  ;;  %v4516_v10 = vmul.f32 0.0025510204, %v4260_v26  ;;  %v4972_v47 = vadd.f32 %v4971_v13, %v4970_v23  ;;  %v8845_v13 = vld [vmem:[#allocation168_spill] sm:$0xff] }
 0x537   : > { %v4515_v20 = vmul.f32 0.0025510204, %v4259_v32  ;;  %v4031_v45 = vsel %vm3298_vm0, %v3286_v39, 0.0  ;;  %v4025_v56 = vsel %vm3298_vm0, %v3284_v15, 0.0 }
 0x538   : > { %v5163_v6 = vadd.f32 %v5162_v40, %v5100_v19  ;;  %v4514_v61 = vmul.f32 0.0025510204, %v4258_v1  ;;  %4014 = vadd.xlane.f32.xlu2 %v4013_v41  ;;  %v5237_v3 = vmul.f32 %v5173_v58, %v4516_v10  ;;  %v4775_v40 = vadd.f32 %v4774_v48, %v4773_v53  ;;  %v3033_v10 = vld [vmem:[%s5572_s16 + $0xf7c] sm:$0xf]  ;;  %v8847_v48 = vld [vmem:[#allocation167_spill] sm:$0xff] }
 0x539   : > { %4011 = vadd.xlane.f32.xlu1 %v4010_v25  ;;  %v5236_v43 = vmul.f32 %v5172_v0, %v4515_v20  ;;  %v5177_v25 = vld [vmem:[%s8347_s1 + $0x628] sm:$0xff] }
 0x53a   : > { %v5101_v33 = vmul.f32 %v5037_v34, %v4514_v61  ;;  %4008 = vadd.xlane.f32.xlu0 %v4007_v31  ;;  %v8843_v31 = vld [vmem:[#allocation160_spill] sm:$0xff]  ;;  %v4973_v61 = vadd.f32 %v4972_v47, %v4775_v40  ;;  %v5182_v40 = vld [vmem:[%s8347_s1 + $0x650] sm:$0xff] }
 0x53b   : > { %v3889_v16 = vpop.xlane.xlu2 %3888  ;;  %v5300_v5 = vadd.f32 %v5237_v3, %v5236_v43  ;;  %v8844_v20 = vld [vmem:[#allocation164_spill] sm:$0xff]  ;;  %v3289_v3 = vunpack.c.l.bf16 %v3033_v10  ;;  %v8850_v10 = vld [vmem:[#allocation170_spill] sm:$0xff] }
 0x53c   : > { %v5164_v29 = vadd.f32 %v5163_v6, %v5101_v33  ;;  %v3886_v46 = vpop.xlane.xlu1 %3885  ;;  %v4263_v35 = vadd.f32 %v3889_v16, %v8841_v27 }
 0x53d   : > { %v3883_v44 = vpop.xlane.xlu0 %3882  ;;  %v4262_v57 = vadd.f32 %v3886_v46, %v8839_v52  ;;  %v3288_v46 = vunpack.c.l.bf16 %v3032_v28 }
 0x53e   : > { %v5165_v4 = vrot.slane %v5164_v29, 4  ;;  %v4261_v24 = vadd.f32 %v3883_v44, %v8840_v7  ;;  %v4519_v9 = vmul.f32 0.0025510204, %v4263_v35  ;;  %v3287_v44 = vunpack.c.l.bf16 %v3031_v14  ;;  %v5180_v35 = vld [vmem:[%s8347_s1 + $0x640] sm:$0xff] }
 0x53f   : > { %v4518_v36 = vmul.f32 0.0025510204, %v4262_v57  ;;  %v5179_v57 = vld [vmem:[%s8347_s1 + $0x638] sm:$0xff]  ;;  %v4037_v12 = vsel %vm3298_vm0, %v3288_v46, 0.0 }
 0x540   : > { %v5166_v8 = vadd.f32 %v5165_v4, %v5164_v29  ;;  %v4517_v42 = vmul.f32 0.0025510204, %v4261_v24  ;;  %4023 = vadd.xlane.f32.xlu2 %v4022_v21  ;;  %v5240_v50 = vmul.f32 %v5176_v22, %v4519_v9 }
 0x541   : > { %4020 = vadd.xlane.f32.xlu1 %v4019_v18  ;;  %v5239_v62 = vmul.f32 %v5175_v11, %v4518_v36  ;;  %v3036_v36 = vld [vmem:[%s5572_s16 + $0xfac] sm:$0xf] }
 0x542   : > { %v5167_v30 = vrot.slane %v5166_v8, 2  ;;  %v5238_v51 = vmul.f32 %v5174_v37, %v4517_v42  ;;  %4017 = vadd.xlane.f32.xlu0 %v4016_v38  ;;  %v8846_v37 = vld [vmem:[#allocation163_spill] sm:$0xff]  ;;  %v4040_v38 = vsel %vm3298_vm0, %v3289_v3, 0.0  ;;  %v3035_v42 = vld [vmem:[%s5572_s16 + $0xf9c] sm:$0xf]  ;;  %v3292_v59 = vunpack.c.l.bf16 %v3036_v36 }
 0x543   : > { %v3898_v19 = vpop.xlane.xlu2 %3897  ;;  %v3291_v15 = vunpack.c.l.bf16 %v3035_v42 }
 0x544   : > { %v5168_v26 = vadd.f32 %v5167_v30, %v5166_v8  ;;  %v5301_v41 = vadd.f32 %v5300_v5, %v5238_v51  ;;  %v3895_v55 = vpop.xlane.xlu1 %3894  ;;  %v4266_v33 = vadd.f32 %v3898_v19, %v8844_v20  ;;  %v4034_v8 = vsel %vm3298_vm0, %v3287_v44, 0.0  ;;  %v3034_v30 = vld [vmem:[%s5572_s16 + $0xf8c] sm:$0xf] }
 0x545   : > { %v3892_v32 = vpop.xlane.xlu0 %3891  ;;  %v4265_v34 = vadd.f32 %v3895_v55, %v8842_v60  ;;  %v5181_v51 = vld [vmem:[%s8347_s1 + $0x648] sm:$0xff]  ;;  %v5183_v60 = vld [vmem:[%s8347_s1 + $0x658] sm:$0xff] }
 0x546   : > { %v5169_v1 = vrot.slane %v5168_v26, 1  ;;  %v5302_v54 = vadd.f32 %v5301_v41, %v5239_v62  ;;  %v4264_v6 = vadd.f32 %v3892_v32, %v8843_v31  ;;  %v4522_v21 = vmul.f32 0.0025510204, %v4266_v33  ;;  %v3037_v33 = vld [vmem:[%s5572_s16 + $0xfbc] sm:$0xf] }
 0x547   : > { %v4521_v23 = vmul.f32 0.0025510204, %v4265_v34  ;;  %v8849_v34 = vld [vmem:[#allocation166_spill] sm:$0xff]  ;;  %v4049_v31 = vsel %vm3298_vm0, %v3292_v59, 0.0 }
 0x548   : > { %v5170_v58 = vadd.f32 %v5169_v1, %v5168_v26  ;;  %v4520_v0 = vmul.f32 0.0025510204, %v4264_v6  ;;  %4032 = vadd.xlane.f32.xlu2 %v4031_v45  ;;  %v5303_v16 = vadd.f32 %v5302_v54, %v5240_v50  ;;  %v5243_v49 = vmul.f32 %v5179_v57, %v4522_v21  ;;  %v8848_v1 = vld [vmem:[#allocation171_spill] sm:$0xff]  ;;  %v3039_v50 = vld [vmem:[%s5572_s16 + $0xfdc] sm:$0xf] }
 0x549   : > { %4029 = vadd.xlane.f32.xlu1 %v4028_v63  ;;  %v5242_v43 = vmul.f32 %v5178_v2, %v4521_v23  ;;  %v3290_v26 = vunpack.c.l.bf16 %v3034_v30  ;;  %v4046_v6 = vsel %vm3298_vm0, %v3291_v15, 0.0  ;;  %v3038_v63 = vld [vmem:[%s5572_s16 + $0xfcc] sm:$0xf]  ;;  %v5184_v23 = vld [vmem:[%s8347_s1 + $0x660] sm:$0xff]  ;;  %v3295_v2 = vunpack.c.l.bf16 %v3039_v50 }
 0x54a   : > { %v8084_v29 = vadd.f32 %v5170_v58, %v4973_v61  ;;  %v5241_v53 = vmul.f32 %v5177_v25, %v4520_v0  ;;  %4026 = vadd.xlane.f32.xlu0 %v4025_v56 }
 0x54b   : > { %v3907_v52 = vpop.xlane.xlu2 %3906  ;;  %v4043_v61 = vsel %vm3298_vm0, %v3290_v26, 0.0  ;;  %v5188_v26 = vld [vmem:[%s8347_s1 + $0x680] sm:$0xff] }
 0x54c   : > { %v5304_v4 = vadd.f32 %v5303_v16, %v5241_v53  ;;  %v3904_v7 = vpop.xlane.xlu1 %3903  ;;  %v4269_v11 = vadd.f32 %v3907_v52, %v8847_v48  ;;  %v3294_v16 = vunpack.c.l.bf16 %v3038_v63  ;;  %v3293_v53 = vunpack.c.l.bf16 %v3037_v33  ;;  %v3040_v48 = vld [vmem:[%s5572_s16 + $0xfec] sm:$0xf] }
 0x54d   : > { %v3901_v24 = vpop.xlane.xlu0 %3900  ;;  %v4268_v27 = vadd.f32 %v3904_v7, %v8845_v13  ;;  %v8851_v7 = vld [vmem:[#allocation174_spill] sm:$0xff] }
 0x54e   : > { %v5305_v17 = vadd.f32 %v5304_v4, %v5242_v43  ;;  %v4267_v18 = vadd.f32 %v3901_v24, %v8846_v37  ;;  %v4525_v22 = vmul.f32 0.0025510204, %v4269_v11  ;;  %v5185_v43 = vld [vmem:[%s8347_s1 + $0x668] sm:$0xff]  ;;  %v4055_v37 = vsel %vm3298_vm0, %v3294_v16, 0.0  ;;  %v5187_v11 = vld [vmem:[%s8347_s1 + $0x678] sm:$0xff]  ;;  %v8858_v16 = vld [vmem:[#allocation175_spill] sm:$0xff] }
 0x54f   : > { %v4524_v39 = vmul.f32 0.0025510204, %v4268_v27  ;;  %v4058_v27 = vsel %vm3298_vm0, %v3295_v2, 0.0 }
 0x550   : > { %v4523_v5 = vmul.f32 0.0025510204, %v4267_v18  ;;  %4041 = vadd.xlane.f32.xlu2 %v4040_v38  ;;  %v5306_v47 = vadd.f32 %v5305_v17, %v5243_v49  ;;  %v5246_v56 = vmul.f32 %v5182_v40, %v4525_v22  ;;  %v8852_v17 = vld [vmem:[#allocation169_spill] sm:$0xff]  ;;  %v4052_v18 = vsel %vm3298_vm0, %v3293_v53, 0.0  ;;  %v3041_v38 = vld [vmem:[%s5572_s16 + $0xffc] sm:$0xf] }
 0x551   : > { %4038 = vadd.xlane.f32.xlu1 %v4037_v12  ;;  %v5245_v62 = vmul.f32 %v5181_v51, %v4524_v39  ;;  %v3297_v30 = vunpack.c.l.bf16 %v3041_v38  ;;  %v3296_v51 = vunpack.c.l.bf16 %v3040_v48 }
 0x552   : > { %v5244_v9 = vmul.f32 %v5180_v35, %v4523_v5  ;;  %4035 = vadd.xlane.f32.xlu0 %v4034_v8  ;;  %v5186_v35 = vld [vmem:[%s8347_s1 + $0x670] sm:$0xff] }
 0x553   : > { %v3916_v19 = vpop.xlane.xlu2 %3915  ;;  %v8853_v8 = vld [vmem:[#allocation173_spill] sm:$0xff] }
 0x554   : > { %v5307_v41 = vadd.f32 %v5306_v47, %v5244_v9  ;;  %v3913_v55 = vpop.xlane.xlu1 %3912  ;;  %v4272_v28 = vadd.f32 %v3916_v19, %v8850_v10  ;;  %v8854_v19 = vld [vmem:[#allocation177_spill] sm:$0xff] }
 0x555   : > { %v3910_v32 = vpop.xlane.xlu0 %3909  ;;  %v4271_v54 = vadd.f32 %v3913_v55, %v8848_v1  ;;  %v8855_v55 = vld [vmem:[#allocation172_spill] sm:$0xff]  ;;  %v4064_v1 = vsel %vm3298_vm0, %v3297_v30, 0.0 }
 0x556   : > { %v5308_v45 = vadd.f32 %v5307_v41, %v5245_v62  ;;  %v4270_v25 = vadd.f32 %v3910_v32, %v8849_v34  ;;  %v4528_v3 = vmul.f32 0.0025510204, %v4272_v28  ;;  %v8856_v34 = vld [vmem:[#allocation176_spill] sm:$0xff] }
 0x557   : > { %v4527_v58 = vmul.f32 0.0025510204, %v4271_v54  ;;  %v4061_v54 = vsel %vm3298_vm0, %v3296_v51, 0.0  ;;  %v5196_v51 = vld [vmem:[%s8347_s1 + $0x6c0] sm:$0xff] }
 0x558   : > { %v4526_v20 = vmul.f32 0.0025510204, %v4270_v25  ;;  %4050 = vadd.xlane.f32.xlu2 %v4049_v31  ;;  %v5309_v0 = vadd.f32 %v5308_v45, %v5246_v56  ;;  %v5249_v12 = vmul.f32 %v5185_v43, %v4528_v3  ;;  %v5189_v45 = vld [vmem:[%s8347_s1 + $0x688] sm:$0xff]  ;;  %v5192_v3 = vld [vmem:[%s8347_s1 + $0x6a0] sm:$0xff] }
 0x559   : > { %4047 = vadd.xlane.f32.xlu1 %v4046_v6  ;;  %v5248_v46 = vmul.f32 %v5184_v23, %v4527_v58 }
 0x55a   : > { %v5247_v14 = vmul.f32 %v5183_v60, %v4526_v20  ;;  %4044 = vadd.xlane.f32.xlu0 %v4043_v61  ;;  %v5190_v61 = vld [vmem:[%s8347_s1 + $0x690] sm:$0xff]  ;;  %v5191_v20 = vld [vmem:[%s8347_s1 + $0x698] sm:$0xff] }
 0x55b   : > { %v3925_v21 = vpop.xlane.xlu2 %3924 }
 0x55c   : > { %v5310_v44 = vadd.f32 %v5309_v0, %v5247_v14  ;;  %v3922_v4 = vpop.xlane.xlu1 %3921  ;;  %v4275_v36 = vadd.f32 %v3925_v21, %v8853_v8  ;;  %v8857_v14 = vld [vmem:[#allocation180_spill] sm:$0xff] }
 0x55d   : > { %v3919_v52 = vpop.xlane.xlu0 %3918  ;;  %v4274_v24 = vadd.f32 %v3922_v4, %v8851_v7 }
 0x55e   : > { %v5311_v57 = vadd.f32 %v5310_v44, %v5248_v46  ;;  %v4273_v13 = vadd.f32 %v3919_v52, %v8852_v17  ;;  %v4531_v47 = vmul.f32 0.0025510204, %v4275_v36  ;;  %v8859_v44 = vld [vmem:[#allocation179_spill] sm:$0xff]  ;;  %v5193_v52 = vld [vmem:[%s8347_s1 + $0x6a8] sm:$0xff]  ;;  %v8861_v36 = vld [vmem:[#allocation178_spill] sm:$0xff] }
 0x55f   : > { %v4530_v42 = vmul.f32 0.0025510204, %v4274_v24 }
 0x560   : > { %v4529_v49 = vmul.f32 0.0025510204, %v4273_v13  ;;  %4059 = vadd.xlane.f32.xlu2 %v4058_v27  ;;  %v5312_v39 = vadd.f32 %v5311_v57, %v5249_v12  ;;  %v5252_v60 = vmul.f32 %v5188_v26, %v4531_v47  ;;  %v8860_v12 = vld [vmem:[#allocation183_spill] sm:$0xff] }
 0x561   : > { %4056 = vadd.xlane.f32.xlu1 %v4055_v37  ;;  %v5251_v9 = vmul.f32 %v5187_v11, %v4530_v42  ;;  %v8862_v11 = vld [vmem:[#allocation182_spill] sm:$0xff] }
 0x562   : > { %v5250_v5 = vmul.f32 %v5186_v35, %v4529_v49  ;;  %4053 = vadd.xlane.f32.xlu0 %v4052_v18  ;;  %v5194_v35 = vld [vmem:[%s8347_s1 + $0x6b0] sm:$0xff]  ;;  %v5195_v49 = vld [vmem:[%s8347_s1 + $0x6b8] sm:$0xff] }
 0x563   : > { %v3934_v15 = vpop.xlane.xlu2 %3933 }
 0x564   : > { %v5313_v59 = vadd.f32 %v5312_v39, %v5250_v5  ;;  %v3931_v22 = vpop.xlane.xlu1 %3930  ;;  %v4278_v25 = vadd.f32 %v3934_v15, %v8856_v34  ;;  %v8865_v34 = vld [vmem:[#allocation185_spill] sm:$0xff] }
 0x565   : > { %v3928_v62 = vpop.xlane.xlu0 %3927  ;;  %v4277_v40 = vadd.f32 %v3931_v22, %v8854_v19 }
 0x566   : > { %v5314_v41 = vadd.f32 %v5313_v59, %v5251_v9  ;;  %v4276_v32 = vadd.f32 %v3928_v62, %v8855_v55  ;;  %v4534_v56 = vmul.f32 0.0025510204, %v4278_v25  ;;  %v5197_v62 = vld [vmem:[%s8347_s1 + $0x6c8] sm:$0xff]  ;;  %v8863_v55 = vld [vmem:[#allocation186_spill] sm:$0xff] }
 0x567   : > { %v4533_v31 = vmul.f32 0.0025510204, %v4277_v40 }
 0x568   : > { %v4532_v6 = vmul.f32 0.0025510204, %v4276_v32  ;;  %v5315_v50 = vadd.f32 %v5314_v41, %v5252_v60  ;;  %v5255_v46 = vmul.f32 %v5191_v20, %v4534_v56  ;;  %v5200_v20 = vld [vmem:[%s8347_s1 + $0x6e0] sm:$0xff] }
 0x569   : > { %4065 = vadd.xlane.f32.xlu1 %v4064_v1  ;;  %v5254_v10 = vmul.f32 %v5190_v61, %v4533_v31  ;;  %v5199_v61 = vld [vmem:[%s8347_s1 + $0x6d8] sm:$0xff] }
 0x56a   : > { %v5253_v63 = vmul.f32 %v5189_v45, %v4532_v6  ;;  %4062 = vadd.xlane.f32.xlu0 %v4061_v54  ;;  %v8864_v45 = vld [vmem:[#allocation181_spill] sm:$0xff] }
 0x56b   : > { %v3943_v58 = vpop.xlane.xlu2 %3942  ;;  %v5198_v54 = vld [vmem:[%s8347_s1 + $0x6d0] sm:$0xff] }
 0x56c   : > { %v5316_v28 = vadd.f32 %v5315_v50, %v5253_v63  ;;  %v3940_v33 = vpop.xlane.xlu1 %3939  ;;  %v4281_v21 = vadd.f32 %v3943_v58, %v8859_v44  ;;  %v8868_v44 = vld [vmem:[#allocation188_spill] sm:$0xff] }
 0x56d   : > { %v3937_v23 = vpop.xlane.xlu0 %3936  ;;  %v4280_v2 = vadd.f32 %v3940_v33, %v8857_v14  ;;  %v8866_v14 = vld [vmem:[#allocation189_spill] sm:$0xff] }
 0x56e   : > { %v5317_v0 = vadd.f32 %v5316_v28, %v5254_v10  ;;  %v4279_v53 = vadd.f32 %v3937_v23, %v8858_v16  ;;  %v4537_v24 = vmul.f32 0.0025510204, %v4281_v21  ;;  %v8867_v16 = vld [vmem:[#allocation184_spill] sm:$0xff] }
 0x56f   : > { %v4536_v43 = vmul.f32 0.0025510204, %v4280_v2 }
 0x570   : > { %v4535_v4 = vmul.f32 0.0025510204, %v4279_v53  ;;  %v5318_v57 = vadd.f32 %v5317_v0, %v5255_v46  ;;  %v5258_v48 = vmul.f32 %v5194_v35, %v4537_v24  ;;  %v5203_v35 = vld [vmem:[%s8347_s1 + $0x6f8] sm:$0xff] }
 0x571   : > { %v5257_v17 = vmul.f32 %v5193_v52, %v4536_v43  ;;  %v5202_v52 = vld [vmem:[%s8347_s1 + $0x6f0] sm:$0xff] }
 0x572   : > { %v5256_v7 = vmul.f32 %v5192_v3, %v4535_v4  ;;  %v5201_v3 = vld [vmem:[%s8347_s1 + $0x6e8] sm:$0xff] }
 0x573   : > { %v3952_v27 = vpop.xlane.xlu2 %3951 }
 0x574   : > { %v5319_v13 = vadd.f32 %v5318_v57, %v5256_v7  ;;  %v3949_v37 = vpop.xlane.xlu1 %3948  ;;  %v4284_v39 = vadd.f32 %v3952_v27, %v8862_v11  ;;  %v8871_v11 = vld [vmem:[#allocation191_spill] sm:$0xff] }
 0x575   : > { %v3946_v18 = vpop.xlane.xlu0 %3945  ;;  %v4283_v8 = vadd.f32 %v3949_v37, %v8860_v12  ;;  %v8869_v12 = vld [vmem:[#allocation192_spill] sm:$0xff] }
 0x576   : > { %v5320_v38 = vadd.f32 %v5319_v13, %v5257_v17  ;;  %v4282_v42 = vadd.f32 %v3946_v18, %v8861_v36  ;;  %v4540_v59 = vmul.f32 0.0025510204, %v4284_v39  ;;  %v8870_v36 = vld [vmem:[#allocation187_spill] sm:$0xff] }
 0x577   : > { %v4539_v5 = vmul.f32 0.0025510204, %v4283_v8 }
 0x578   : > { %v4538_v30 = vmul.f32 0.0025510204, %v4282_v42  ;;  %v5321_v47 = vadd.f32 %v5320_v38, %v5258_v48  ;;  %v5261_v60 = vmul.f32 %v5197_v62, %v4540_v59  ;;  %v5206_v62 = vld [vmem:[%s8347_s1 + $0x710] sm:$0xff] }
 0x579   : > { %v5260_v15 = vmul.f32 %v5196_v51, %v4539_v5  ;;  %v5205_v51 = vld [vmem:[%s8347_s1 + $0x708] sm:$0xff] }
 0x57a   : > { %v5259_v9 = vmul.f32 %v5195_v49, %v4538_v30  ;;  %v5204_v49 = vld [vmem:[%s8347_s1 + $0x700] sm:$0xff] }
 0x57b   : > { %v3961_v22 = vpop.xlane.xlu2 %3960 }
 0x57c   : > { %v5322_v26 = vadd.f32 %v5321_v47, %v5259_v9  ;;  %v3958_v41 = vpop.xlane.xlu1 %3957  ;;  %v4287_v25 = vadd.f32 %v3961_v22, %v8865_v34  ;;  %v8874_v34 = vld [vmem:[#allocation194_spill] sm:$0xff] }
 0x57d   : > { %v3955_v19 = vpop.xlane.xlu0 %3954  ;;  %v4286_v32 = vadd.f32 %v3958_v41, %v8863_v55  ;;  %v8872_v55 = vld [vmem:[#allocation195_spill] sm:$0xff] }
 0x57e   : > { %v5323_v40 = vadd.f32 %v5322_v26, %v5260_v15  ;;  %v4285_v1 = vadd.f32 %v3955_v19, %v8864_v45  ;;  %v4543_v56 = vmul.f32 0.0025510204, %v4287_v25  ;;  %v8873_v45 = vld [vmem:[#allocation190_spill] sm:$0xff] }
 0x57f   : > { %v4542_v31 = vmul.f32 0.0025510204, %v4286_v32 }
 0x580   : > { %v4541_v6 = vmul.f32 0.0025510204, %v4285_v1  ;;  %v5324_v50 = vadd.f32 %v5323_v40, %v5261_v60  ;;  %v5264_v46 = vmul.f32 %v5200_v20, %v4543_v56  ;;  %v5209_v20 = vld [vmem:[%s8347_s1 + $0x728] sm:$0xff] }
 0x581   : > { %v5263_v10 = vmul.f32 %v5199_v61, %v4542_v31  ;;  %v5208_v61 = vld [vmem:[%s8347_s1 + $0x720] sm:$0xff] }
 0x582   : > { %v5262_v63 = vmul.f32 %v5198_v54, %v4541_v6  ;;  %v5207_v54 = vld [vmem:[%s8347_s1 + $0x718] sm:$0xff] }
 0x583   : > { %v3970_v58 = vpop.xlane.xlu2 %3969 }
 0x584   : > { %v5325_v28 = vadd.f32 %v5324_v50, %v5262_v63  ;;  %v3967_v33 = vpop.xlane.xlu1 %3966  ;;  %v4290_v21 = vadd.f32 %v3970_v58, %v8868_v44  ;;  %v8877_v44 = vld [vmem:[#allocation197_spill] sm:$0xff] }
 0x585   : > { %v3964_v23 = vpop.xlane.xlu0 %3963  ;;  %v4289_v2 = vadd.f32 %v3967_v33, %v8866_v14  ;;  %v8875_v14 = vld [vmem:[#allocation198_spill] sm:$0xff] }
 0x586   : > { %v5326_v0 = vadd.f32 %v5325_v28, %v5263_v10  ;;  %v4288_v53 = vadd.f32 %v3964_v23, %v8867_v16  ;;  %v4546_v24 = vmul.f32 0.0025510204, %v4290_v21  ;;  %v8876_v16 = vld [vmem:[#allocation193_spill] sm:$0xff] }
 0x587   : > { %v4545_v43 = vmul.f32 0.0025510204, %v4289_v2 }
 0x588   : > { %v4544_v4 = vmul.f32 0.0025510204, %v4288_v53  ;;  %v5327_v57 = vadd.f32 %v5326_v0, %v5264_v46  ;;  %v5267_v48 = vmul.f32 %v5203_v35, %v4546_v24  ;;  %v5212_v35 = vld [vmem:[%s8347_s1 + $0x740] sm:$0xff] }
 0x589   : > { %v5266_v17 = vmul.f32 %v5202_v52, %v4545_v43  ;;  %v5211_v52 = vld [vmem:[%s8347_s1 + $0x738] sm:$0xff] }
 0x58a   : > { %v5265_v7 = vmul.f32 %v5201_v3, %v4544_v4  ;;  %v5210_v3 = vld [vmem:[%s8347_s1 + $0x730] sm:$0xff] }
 0x58b   : > { %v3979_v27 = vpop.xlane.xlu2 %3978 }
 0x58c   : > { %v5328_v13 = vadd.f32 %v5327_v57, %v5265_v7  ;;  %v3976_v37 = vpop.xlane.xlu1 %3975  ;;  %v4293_v39 = vadd.f32 %v3979_v27, %v8871_v11  ;;  %v8880_v11 = vld [vmem:[#allocation200_spill] sm:$0xff] }
 0x58d   : > { %v3973_v18 = vpop.xlane.xlu0 %3972  ;;  %v4292_v8 = vadd.f32 %v3976_v37, %v8869_v12  ;;  %v8878_v12 = vld [vmem:[#allocation201_spill] sm:$0xff] }
 0x58e   : > { %v5329_v38 = vadd.f32 %v5328_v13, %v5266_v17  ;;  %v4291_v42 = vadd.f32 %v3973_v18, %v8870_v36  ;;  %v4549_v59 = vmul.f32 0.0025510204, %v4293_v39  ;;  %v8879_v36 = vld [vmem:[#allocation196_spill] sm:$0xff] }
 0x58f   : > { %v4548_v5 = vmul.f32 0.0025510204, %v4292_v8 }
 0x590   : > { %v4547_v30 = vmul.f32 0.0025510204, %v4291_v42  ;;  %v5330_v47 = vadd.f32 %v5329_v38, %v5267_v48  ;;  %v5270_v60 = vmul.f32 %v5206_v62, %v4549_v59  ;;  %v5215_v62 = vld [vmem:[%s8347_s1 + $0x758] sm:$0xff] }
 0x591   : > { %v5269_v15 = vmul.f32 %v5205_v51, %v4548_v5  ;;  %v5214_v51 = vld [vmem:[%s8347_s1 + $0x750] sm:$0xff] }
 0x592   : > { %v5268_v9 = vmul.f32 %v5204_v49, %v4547_v30  ;;  %v5213_v49 = vld [vmem:[%s8347_s1 + $0x748] sm:$0xff] }
 0x593   : > { %v3988_v22 = vpop.xlane.xlu2 %3987 }
 0x594   : > { %v5331_v26 = vadd.f32 %v5330_v47, %v5268_v9  ;;  %v3985_v41 = vpop.xlane.xlu1 %3984  ;;  %v4296_v25 = vadd.f32 %v3988_v22, %v8874_v34  ;;  %v8883_v34 = vld [vmem:[#allocation203_spill] sm:$0xff] }
 0x595   : > { %v3982_v19 = vpop.xlane.xlu0 %3981  ;;  %v4295_v32 = vadd.f32 %v3985_v41, %v8872_v55  ;;  %v8881_v55 = vld [vmem:[#allocation204_spill] sm:$0xff] }
 0x596   : > { %v5332_v40 = vadd.f32 %v5331_v26, %v5269_v15  ;;  %v4294_v1 = vadd.f32 %v3982_v19, %v8873_v45  ;;  %v4552_v56 = vmul.f32 0.0025510204, %v4296_v25  ;;  %v8882_v45 = vld [vmem:[#allocation199_spill] sm:$0xff] }
 0x597   : > { %v4551_v31 = vmul.f32 0.0025510204, %v4295_v32 }
 0x598   : > { %v4550_v6 = vmul.f32 0.0025510204, %v4294_v1  ;;  %v5333_v50 = vadd.f32 %v5332_v40, %v5270_v60  ;;  %v5273_v46 = vmul.f32 %v5209_v20, %v4552_v56  ;;  %v5218_v20 = vld [vmem:[%s8347_s1 + $0x770] sm:$0xff] }
 0x599   : > { %v5272_v10 = vmul.f32 %v5208_v61, %v4551_v31  ;;  %v5217_v61 = vld [vmem:[%s8347_s1 + $0x768] sm:$0xff] }
 0x59a   : > { %v5271_v63 = vmul.f32 %v5207_v54, %v4550_v6  ;;  %v5216_v54 = vld [vmem:[%s8347_s1 + $0x760] sm:$0xff] }
 0x59b   : > { %v3997_v58 = vpop.xlane.xlu2 %3996 }
 0x59c   : > { %v5334_v28 = vadd.f32 %v5333_v50, %v5271_v63  ;;  %v3994_v33 = vpop.xlane.xlu1 %3993  ;;  %v4299_v21 = vadd.f32 %v3997_v58, %v8877_v44  ;;  %v8886_v44 = vld [vmem:[#allocation206_spill] sm:$0xff] }
 0x59d   : > { %v3991_v23 = vpop.xlane.xlu0 %3990  ;;  %v4298_v2 = vadd.f32 %v3994_v33, %v8875_v14  ;;  %v8884_v14 = vld [vmem:[#allocation207_spill] sm:$0xff] }
 0x59e   : > { %v5335_v0 = vadd.f32 %v5334_v28, %v5272_v10  ;;  %v4297_v53 = vadd.f32 %v3991_v23, %v8876_v16  ;;  %v4555_v24 = vmul.f32 0.0025510204, %v4299_v21  ;;  %v8885_v16 = vld [vmem:[#allocation202_spill] sm:$0xff] }
 0x59f   : > { %v4554_v43 = vmul.f32 0.0025510204, %v4298_v2 }
 0x5a0   : > { %v4553_v4 = vmul.f32 0.0025510204, %v4297_v53  ;;  %v5336_v57 = vadd.f32 %v5335_v0, %v5273_v46  ;;  %v5276_v48 = vmul.f32 %v5212_v35, %v4555_v24  ;;  %v5221_v35 = vld [vmem:[%s8347_s1 + $0x788] sm:$0xff] }
 0x5a1   : > { %v5275_v17 = vmul.f32 %v5211_v52, %v4554_v43  ;;  %v5220_v52 = vld [vmem:[%s8347_s1 + $0x780] sm:$0xff] }
 0x5a2   : > { %v5274_v7 = vmul.f32 %v5210_v3, %v4553_v4  ;;  %v5219_v3 = vld [vmem:[%s8347_s1 + $0x778] sm:$0xff] }
 0x5a3   : > { %v4006_v27 = vpop.xlane.xlu2 %4005 }
 0x5a4   : > { %v5337_v13 = vadd.f32 %v5336_v57, %v5274_v7  ;;  %v4003_v37 = vpop.xlane.xlu1 %4002  ;;  %v4302_v39 = vadd.f32 %v4006_v27, %v8880_v11  ;;  %v8889_v11 = vld [vmem:[#allocation209_spill] sm:$0xff] }
 0x5a5   : > { %v4000_v18 = vpop.xlane.xlu0 %3999  ;;  %v4301_v8 = vadd.f32 %v4003_v37, %v8878_v12  ;;  %v8887_v12 = vld [vmem:[#allocation210_spill] sm:$0xff] }
 0x5a6   : > { %v5338_v38 = vadd.f32 %v5337_v13, %v5275_v17  ;;  %v4300_v42 = vadd.f32 %v4000_v18, %v8879_v36  ;;  %v4558_v59 = vmul.f32 0.0025510204, %v4302_v39  ;;  %v8888_v36 = vld [vmem:[#allocation205_spill] sm:$0xff] }
 0x5a7   : > { %v4557_v5 = vmul.f32 0.0025510204, %v4301_v8 }
 0x5a8   : > { %v4556_v30 = vmul.f32 0.0025510204, %v4300_v42  ;;  %v5339_v47 = vadd.f32 %v5338_v38, %v5276_v48  ;;  %v5279_v60 = vmul.f32 %v5215_v62, %v4558_v59  ;;  %v5224_v62 = vld [vmem:[%s8347_s1 + $0x7a0] sm:$0xff] }
 0x5a9   : > { %v5278_v15 = vmul.f32 %v5214_v51, %v4557_v5  ;;  %v5223_v51 = vld [vmem:[%s8347_s1 + $0x798] sm:$0xff] }
 0x5aa   : > { %v5277_v9 = vmul.f32 %v5213_v49, %v4556_v30  ;;  %v5222_v49 = vld [vmem:[%s8347_s1 + $0x790] sm:$0xff] }
 0x5ab   : > { %v4015_v22 = vpop.xlane.xlu2 %4014 }
 0x5ac   : > { %v5340_v26 = vadd.f32 %v5339_v47, %v5277_v9  ;;  %v4012_v41 = vpop.xlane.xlu1 %4011  ;;  %v4305_v25 = vadd.f32 %v4015_v22, %v8883_v34  ;;  %v8892_v34 = vld [vmem:[#allocation212_spill] sm:$0xff] }
 0x5ad   : > { %v4009_v19 = vpop.xlane.xlu0 %4008  ;;  %v4304_v32 = vadd.f32 %v4012_v41, %v8881_v55  ;;  %v8890_v55 = vld [vmem:[#allocation213_spill] sm:$0xff] }
 0x5ae   : > { %v5341_v40 = vadd.f32 %v5340_v26, %v5278_v15  ;;  %v4303_v1 = vadd.f32 %v4009_v19, %v8882_v45  ;;  %v4561_v56 = vmul.f32 0.0025510204, %v4305_v25  ;;  %v8891_v45 = vld [vmem:[#allocation208_spill] sm:$0xff] }
 0x5af   : > { %v4560_v31 = vmul.f32 0.0025510204, %v4304_v32 }
 0x5b0   : > { %v4559_v6 = vmul.f32 0.0025510204, %v4303_v1  ;;  %v5342_v50 = vadd.f32 %v5341_v40, %v5279_v60  ;;  %v5282_v46 = vmul.f32 %v5218_v20, %v4561_v56  ;;  %v5227_v20 = vld [vmem:[%s8347_s1 + $0x7b8] sm:$0xff] }
 0x5b1   : > { %v5281_v10 = vmul.f32 %v5217_v61, %v4560_v31  ;;  %v5226_v61 = vld [vmem:[%s8347_s1 + $0x7b0] sm:$0xff] }
 0x5b2   : > { %v5280_v63 = vmul.f32 %v5216_v54, %v4559_v6  ;;  %v5225_v54 = vld [vmem:[%s8347_s1 + $0x7a8] sm:$0xff] }
 0x5b3   : > { %v4024_v58 = vpop.xlane.xlu2 %4023 }
 0x5b4   : > { %v5343_v28 = vadd.f32 %v5342_v50, %v5280_v63  ;;  %v4021_v33 = vpop.xlane.xlu1 %4020  ;;  %v4308_v21 = vadd.f32 %v4024_v58, %v8886_v44  ;;  %v8895_v44 = vld [vmem:[#allocation215_spill] sm:$0xff] }
 0x5b5   : > { %v4018_v23 = vpop.xlane.xlu0 %4017  ;;  %v4307_v2 = vadd.f32 %v4021_v33, %v8884_v14  ;;  %v8893_v14 = vld [vmem:[#allocation216_spill] sm:$0xff] }
 0x5b6   : > { %v5344_v0 = vadd.f32 %v5343_v28, %v5281_v10  ;;  %v4306_v53 = vadd.f32 %v4018_v23, %v8885_v16  ;;  %v4564_v24 = vmul.f32 0.0025510204, %v4308_v21  ;;  %v8894_v16 = vld [vmem:[#allocation211_spill] sm:$0xff] }
 0x5b7   : > { %v4563_v43 = vmul.f32 0.0025510204, %v4307_v2 }
 0x5b8   : > { %v4562_v4 = vmul.f32 0.0025510204, %v4306_v53  ;;  %v5345_v57 = vadd.f32 %v5344_v0, %v5282_v46  ;;  %v5285_v48 = vmul.f32 %v5221_v35, %v4564_v24  ;;  %v5230_v35 = vld [vmem:[%s8347_s1 + $0x7d0] sm:$0xff] }
 0x5b9   : > { %v5284_v17 = vmul.f32 %v5220_v52, %v4563_v43  ;;  %v5229_v52 = vld [vmem:[%s8347_s1 + $0x7c8] sm:$0xff] }
 0x5ba   : > { %v5283_v7 = vmul.f32 %v5219_v3, %v4562_v4  ;;  %v5228_v3 = vld [vmem:[%s8347_s1 + $0x7c0] sm:$0xff] }
 0x5bb   : > { %v4033_v27 = vpop.xlane.xlu2 %4032 }
 0x5bc   : > { %v5346_v13 = vadd.f32 %v5345_v57, %v5283_v7  ;;  %v4030_v37 = vpop.xlane.xlu1 %4029  ;;  %v4311_v39 = vadd.f32 %v4033_v27, %v8889_v11  ;;  %v8898_v11 = vld [vmem:[#allocation218_spill] sm:$0xff] }
 0x5bd   : > { %v4027_v18 = vpop.xlane.xlu0 %4026  ;;  %v4310_v8 = vadd.f32 %v4030_v37, %v8887_v12  ;;  %v8896_v12 = vld [vmem:[#allocation219_spill] sm:$0xff] }
 0x5be   : > { %v5347_v38 = vadd.f32 %v5346_v13, %v5284_v17  ;;  %v4309_v42 = vadd.f32 %v4027_v18, %v8888_v36  ;;  %v4567_v59 = vmul.f32 0.0025510204, %v4311_v39  ;;  %v8897_v36 = vld [vmem:[#allocation214_spill] sm:$0xff] }
 0x5bf   : > { %v4566_v5 = vmul.f32 0.0025510204, %v4310_v8 }
 0x5c0   : > { %v4565_v30 = vmul.f32 0.0025510204, %v4309_v42  ;;  %v5348_v47 = vadd.f32 %v5347_v38, %v5285_v48  ;;  %v5288_v60 = vmul.f32 %v5224_v62, %v4567_v59 }
 0x5c1   : > { %v5287_v15 = vmul.f32 %v5223_v51, %v4566_v5  ;;  %v5232_v51 = vld [vmem:[%s8347_s1 + $0x7e0] sm:$0xff] }
 0x5c2   : > { %v5286_v9 = vmul.f32 %v5222_v49, %v4565_v30  ;;  %v5231_v49 = vld [vmem:[%s8347_s1 + $0x7d8] sm:$0xff] }
 0x5c3   : > { %v4042_v22 = vpop.xlane.xlu2 %4041 }
 0x5c4   : > { %v5349_v26 = vadd.f32 %v5348_v47, %v5286_v9  ;;  %v4039_v41 = vpop.xlane.xlu1 %4038  ;;  %v4314_v25 = vadd.f32 %v4042_v22, %v8892_v34  ;;  %v5233_v22 = vld [vmem:[%s8347_s1 + $0x7e8] sm:$0xff] }
 0x5c5   : > { %v4036_v19 = vpop.xlane.xlu0 %4035  ;;  %v4313_v32 = vadd.f32 %v4039_v41, %v8890_v55 }
 0x5c6   : > { %v5350_v40 = vadd.f32 %v5349_v26, %v5287_v15  ;;  %v4312_v1 = vadd.f32 %v4036_v19, %v8891_v45  ;;  %v4570_v56 = vmul.f32 0.0025510204, %v4314_v25  ;;  %v5235_v25 = vld [vmem:[%s8347_s1 + $0x7f8] sm:$0xff] }
 0x5c7   : > { %v4569_v31 = vmul.f32 0.0025510204, %v4313_v32  ;;  %v8900_v32 = vld [vmem:[#allocation217_spill] sm:$0xff] }
 0x5c8   : > { %v4568_v6 = vmul.f32 0.0025510204, %v4312_v1  ;;  %v5351_v50 = vadd.f32 %v5350_v40, %v5288_v60  ;;  %v5291_v46 = vmul.f32 %v5227_v20, %v4570_v56  ;;  %v8899_v40 = vld [vmem:[#allocation220_spill] sm:$0xff]  ;;  %v5234_v1 = vld [vmem:[%s8347_s1 + $0x7f0] sm:$0xff] }
 0x5c9   : > { %v5290_v10 = vmul.f32 %v5226_v61, %v4569_v31 }
 0x5ca   : > { %v5289_v63 = vmul.f32 %v5225_v54, %v4568_v6 }
 0x5cb   : > { %v4051_v58 = vpop.xlane.xlu2 %4050 }
 0x5cc   : > { %v5352_v28 = vadd.f32 %v5351_v50, %v5289_v63  ;;  %v4048_v33 = vpop.xlane.xlu1 %4047  ;;  %v4317_v21 = vadd.f32 %v4051_v58, %v8895_v44 }
 0x5cd   : > { %v4045_v23 = vpop.xlane.xlu0 %4044  ;;  %v4316_v2 = vadd.f32 %v4048_v33, %v8893_v14 }
 0x5ce   : > { %v5353_v0 = vadd.f32 %v5352_v28, %v5290_v10  ;;  %v4315_v53 = vadd.f32 %v4045_v23, %v8894_v16  ;;  %v4573_v24 = vmul.f32 0.0025510204, %v4317_v21 }
 0x5cf   : > { %v4572_v43 = vmul.f32 0.0025510204, %v4316_v2 }
 0x5d0   : > { %v4571_v4 = vmul.f32 0.0025510204, %v4315_v53  ;;  %v5354_v57 = vadd.f32 %v5353_v0, %v5291_v46  ;;  %v5294_v48 = vmul.f32 %v5230_v35, %v4573_v24 }
 0x5d1   : > { %v5293_v17 = vmul.f32 %v5229_v52, %v4572_v43 }
 0x5d2   : > { %v5292_v7 = vmul.f32 %v5228_v3, %v4571_v4 }
 0x5d3   : > { %v4060_v27 = vpop.xlane.xlu2 %4059 }
 0x5d4   : > { %v5355_v13 = vadd.f32 %v5354_v57, %v5292_v7  ;;  %v4057_v37 = vpop.xlane.xlu1 %4056  ;;  %v4320_v39 = vadd.f32 %v4060_v27, %v8898_v11 }
 0x5d5   : > { %v4054_v18 = vpop.xlane.xlu0 %4053  ;;  %v4319_v8 = vadd.f32 %v4057_v37, %v8896_v12 }
 0x5d6   : > { %v5356_v38 = vadd.f32 %v5355_v13, %v5293_v17  ;;  %v4318_v42 = vadd.f32 %v4054_v18, %v8897_v36  ;;  %v4576_v59 = vmul.f32 0.0025510204, %v4320_v39 }
 0x5d7   : > { %v4575_v5 = vmul.f32 0.0025510204, %v4319_v8 }
 0x5d8   : > { %v4574_v30 = vmul.f32 0.0025510204, %v4318_v42  ;;  %v5357_v47 = vadd.f32 %v5356_v38, %v5294_v48  ;;  %v5297_v54 = vmul.f32 %v5233_v22, %v4576_v59 }
 0x5d9   : > { %v5296_v15 = vmul.f32 %v5232_v51, %v4575_v5 }
 0x5da   : > { %v5295_v9 = vmul.f32 %v5231_v49, %v4574_v30 }
 0x5dc   : > { %v5358_v26 = vadd.f32 %v5357_v47, %v5295_v9  ;;  %v4066_v62 = vpop.xlane.xlu1 %4065 }
 0x5dd   : > { %v4063_v41 = vpop.xlane.xlu0 %4062  ;;  %v4322_v55 = vadd.f32 %v4066_v62, %v8899_v40 }
 0x5de   : > { %v5359_v19 = vadd.f32 %v5358_v26, %v5296_v15  ;;  %v4321_v45 = vadd.f32 %v4063_v41, %v8900_v32 }
 0x5df   : > { %v4578_v60 = vmul.f32 0.0025510204, %v4322_v55 }
 0x5e0   : > { %v4577_v34 = vmul.f32 0.0025510204, %v4321_v45  ;;  %v5360_v31 = vadd.f32 %v5359_v19, %v5297_v54 }
 0x5e1   : > { %v5299_v61 = vmul.f32 %v5235_v25, %v4578_v60 }
 0x5e2   : > { %v5298_v6 = vmul.f32 %v5234_v1, %v4577_v34 }
 0x5e4   : > { %v5361_v50 = vadd.f32 %v5360_v31, %v5298_v6 }
 0x5e6   : > { %v5362_v63 = vadd.f32 %v5361_v50, %v5299_v61 }
 0x5e8   : > { %v5363_v56 = vrot.slane %v5362_v63, 4 }
 0x5ea   : > { %v5364_v10 = vadd.f32 %v5363_v56, %v5362_v63 }
 0x5ec   : > { %v5365_v28 = vrot.slane %v5364_v10, 2 }
 0x5ee   : > { %v5366_v58 = vadd.f32 %v5365_v28, %v5364_v10 }
 0x5f0   : > { %v5367_v20 = vrot.slane %v5366_v58, 1 }
 0x5f2   : > { %v5368_v33 = vadd.f32 %v5367_v20, %v5366_v58 }
 0x5f4   : > { %v5369_v23 = vadd.f32 %v5368_v33, %v8084_v29 }
 0x5f6   : > { %5370 = vst [vmem:[%s225_s21] sm:$0xff] %v5369_v23 }
 0x5f7 PF: > { %s12_s11 = sadd.s32 1, %s5531_s11   ;;  %s8901_s9 = smov %s5527_s10 }
 0x5f8   : > { %p9_p5 = scmp.ge.s32.totalorder %s12_s11, 4   ;;  %s8902_s10 = smov %s8904_s12 }
 0x5fa   :  { %11 = sbr.rel (!%p9_p5) target bundleno = 2 (0x2), region = 61 }

</bundles_post_ra>
